<compile_context>
chip_gen: v5e
topology: v5e:2x2
jax: 0.10.0
libtpu: 0.0.40
codegen_flags: <defaults>
</compile_context>

<pallas_src>
import math
import numpy as np
import jax
import jax.numpy as jnp
from jax.experimental import pallas as pl
from jax.experimental.pallas import tpu as pltpu

IN_CH = 4
OUT_CH = 8            # d_model, divisible by num_heads=4
NUM_HEADS = 4
NUM_LAYERS = 6
DIM_FF = 2048         # nn.TransformerEncoderLayer default dim_feedforward
LN_EPS = 1e-5
BN_EPS = 1e-5


# ----------------------------- helpers -----------------------------

def _const_spec(shape):
    """Whole-array block, resident for the (single) grid step."""
    n = len(shape)
    return pl.BlockSpec(shape, lambda *_: (0,) * n)


def _layer_norm(v, g, b):
    m = jnp.mean(v, axis=-1, keepdims=True)
    c = v - m
    var = jnp.mean(c * c, axis=-1, keepdims=True)
    return c * jax.lax.rsqrt(var + LN_EPS) * g + b


def _conv2_tap_mask(B, Ho, Wo, C1):
    """(R, 9*C1) validity mask for the rolled 3x3 taps (zero-padding + batch edges)."""
    R = B * Ho * Wo
    m = np.zeros((R, 9 * C1), np.float32)
    for t in range(9):
        dy, dx = t // 3 - 1, t % 3 - 1
        for b in range(B):
            for i in range(Ho):
                for j in range(Wo):
                    if 0 <= i + dy < Ho and 0 <= j + dx < Wo:
                        m[b * Ho * Wo + i * Wo + j, t * C1:(t + 1) * C1] = 1.0
    return jnp.asarray(m)


def _head_selectors(S, E, NH):
    """Block-diagonal head-indicator matrices stacked over the S shifts."""
    Dh = E // NH
    hsel = np.zeros((E, NH), np.float32)
    for h in range(NH):
        hsel[h * Dh:(h + 1) * Dh, h] = 1.0
    big = np.zeros((S * E, S * NH), np.float32)
    bigT = np.zeros((S * NH, S * E), np.float32)
    for d in range(S):
        big[d * E:(d + 1) * E, d * NH:(d + 1) * NH] = hsel
        bigT[d * NH:(d + 1) * NH, d * E:(d + 1) * E] = hsel.T
    return jnp.asarray(big), jnp.asarray(bigT)


# ----------------------------- fused kernel -----------------------------

def _make_fused_kernel(*, B, Ho, Wo, E, num_heads, num_layers):
    R = B * Ho * Wo
    S, N = B, Ho * Wo           # batch_first=False: seq axis = B, batch axis = HW
    SN = S * N                  # == R
    NH = num_heads
    Dh = E // NH
    scale = 1.0 / math.sqrt(Dh)
    L = num_layers

    def kernel(p_ref, cw1_ref, cs1_ref, ct1_ref, m2_ref, cw2_ref, cs2_ref,
               ct2_ref, hsel_ref, hselT_ref, win_ref, bin_ref, wout_ref,
               bout_ref, ln1g_ref, ln1b_ref, wf1_ref, bf1_ref, wf2_ref,
               bf2_ref, ln2g_ref, ln2b_ref, o_ref):
        # ---- conv1 (im2col GEMM) + folded BN1 + ReLU ----
        o1 = jnp.dot(p_ref[...], cw1_ref[...], preferred_element_type=jnp.float32)
        o1 = jnp.maximum(o1 * cs1_ref[...] + ct1_ref[...], 0.0)           # (R, C1)

        # ---- conv2 (3x3, s1, p1): rolled taps + boundary mask, one GEMM ----
        taps = []
        for t in range(9):
            off = (t // 3 - 1) * Wo + (t % 3 - 1)
            taps.append(o1 if off == 0
                        else pltpu.roll(o1, shift=(-off) % R, axis=0))
        tapmat = jnp.concatenate(taps, axis=1) * m2_ref[...]               # (R, 9*C1)
        x = jnp.dot(tapmat, cw2_ref[...], preferred_element_type=jnp.float32)
        x = x * cs2_ref[...] + ct2_ref[...]                                # (R, E), BN2

        hsel = hsel_ref[...]        # (S*E, S*NH) block-diag head indicator
        hselT = hselT_ref[...]      # (S*NH, S*E)

        # ---- 6 post-norm TransformerEncoderLayer's, fully unrolled ----
        for l in range(L):
            qkv = jnp.dot(x, win_ref[l], preferred_element_type=jnp.float32) + bin_ref[l]
            q = qkv[:, :E]
            k = qkv[:, E:2 * E]
            v = qkv[:, 2 * E:]

            # row (s, n) pairs with ((s+d) mod S, n) == circular sublane roll by d*N
            qk_parts = [q * k]
            v_parts = [v]
            for d in range(1, S):
                sh = SN - d * N
                qk_parts.append(q * pltpu.roll(k, shift=sh, axis=0))
                v_parts.append(pltpu.roll(v, shift=sh, axis=0))
            qk_all = jnp.concatenate(qk_parts, axis=1)                     # (SN, S*E)
            v_all = jnp.concatenate(v_parts, axis=1)                       # (SN, S*E)

            # lane-stacked scores: column d*NH + h
            scores = jnp.dot(qk_all, hsel, preferred_element_type=jnp.float32) * scale
            m = scores[:, :NH]
            for d in range(1, S):
                m = jnp.maximum(m, scores[:, d * NH:(d + 1) * NH])
            e = jnp.exp(scores - jnp.concatenate([m] * S, axis=1))
            den = e[:, :NH]
            for d in range(1, S):
                den = den + e[:, d * NH:(d + 1) * NH]
            p = e * jnp.concatenate([1.0 / den] * S, axis=1)               # exact softmax
            ctx_all = jnp.dot(p, hselT, preferred_element_type=jnp.float32) * v_all
            ctx = ctx_all[:, :E]
            for d in range(1, S):
                ctx = ctx + ctx_all[:, d * E:(d + 1) * E]

            attn = jnp.dot(ctx, wout_ref[l], preferred_element_type=jnp.float32) + bout_ref[l]
            # TODO(synk): dropout (p=0.1) of nn.TransformerEncoderLayer is identity (inference).
            y = _layer_norm(x + attn, ln1g_ref[l], ln1b_ref[l])

            h1 = jnp.maximum(
                jnp.dot(y, wf1_ref[l], preferred_element_type=jnp.float32) + bf1_ref[l], 0.0)
            # linear2 weight kept lane-dense as (E, F); contract on its last axis.
            h2 = jax.lax.dot_general(h1, wf2_ref[l], (((1,), (1,)), ((), ())),
                                     preferred_element_type=jnp.float32) + bf2_ref[l]
            x = _layer_norm(y + h2, ln2g_ref[l], ln2b_ref[l])

        # module-level final ReLU fused in
        o_ref[...] = jnp.maximum(x, 0.0).astype(o_ref.dtype)

    return kernel


# ----------------------- full Down_T_Sampling forward -----------------------

def down_t_sampling_forward(x_nchw, params):
    B, Cin, H, W = x_nchw.shape
    Ho = (H + 2 - 3) // 2 + 1
    Wo = (W + 2 - 3) // 2 + 1
    R = B * Ho * Wo
    C1 = params['conv1_w'].shape[0]
    C2 = params['conv2_w'].shape[0]
    E = C2

    # TODO(synk): conv1 im2col patch extraction stays as tiny XLA glue; at real
    # MAFF-HRNet resolutions it should move in-kernel (pl.ANY input + in-kernel taps).
    x_nhwc = jnp.transpose(x_nchw, (0, 2, 3, 1))
    xp = jnp.pad(x_nhwc, ((0, 0), (1, 1), (1, 1), (0, 0)))
    taps = []
    for ky in range(3):
        for kx in range(3):
            taps.append(xp[:, ky:ky + 2 * (Ho - 1) + 1:2,
                           kx:kx + 2 * (Wo - 1) + 1:2, :])
    patches = jnp.stack(taps, axis=3).reshape(R, 9 * Cin)

    cw1 = jnp.transpose(params['conv1_w'], (2, 3, 1, 0)).reshape(9 * Cin, C1)
    cw2 = jnp.transpose(params['conv2_w'], (2, 3, 1, 0)).reshape(9 * C1, C2)

    # fold BatchNorm (inference running stats) + conv bias into scale/shift
    scale1 = params['bn1_g'] / jnp.sqrt(params['bn1_v'] + BN_EPS)
    shift1 = params['bn1_b'] + (params['conv1_b'] - params['bn1_m']) * scale1
    scale2 = params['bn2_g'] / jnp.sqrt(params['bn2_v'] + BN_EPS)
    shift2 = params['bn2_b'] + (params['conv2_b'] - params['bn2_m']) * scale2

    mask2 = _conv2_tap_mask(B, Ho, Wo, C1)
    S, N = B, Ho * Wo
    hsel_big, hselT_big = _head_selectors(S, E, NUM_HEADS)

    layers = params['layers']
    L = len(layers)
    win = jnp.stack([lp['w_in'].T for lp in layers])                     # (L, E, 3E)
    binp = jnp.stack([lp['b_in'].reshape(1, -1) for lp in layers])       # (L, 1, 3E)
    wout = jnp.stack([lp['w_out'].T for lp in layers])                   # (L, E, E)
    bout = jnp.stack([lp['b_out'].reshape(1, -1) for lp in layers])      # (L, 1, E)
    ln1g = jnp.stack([lp['ln1_g'].reshape(1, -1) for lp in layers])
    ln1b = jnp.stack([lp['ln1_b'].reshape(1, -1) for lp in layers])
    wf1 = jnp.stack([lp['w1'].T for lp in layers])                       # (L, E, F) lane-dense
    bf1 = jnp.stack([lp['b1'].reshape(1, -1) for lp in layers])          # (L, 1, F)
    wf2 = jnp.stack([lp['w2'] for lp in layers])                         # (L, E, F) native layout
    bf2 = jnp.stack([lp['b2'].reshape(1, -1) for lp in layers])
    ln2g = jnp.stack([lp['ln2_g'].reshape(1, -1) for lp in layers])
    ln2b = jnp.stack([lp['ln2_b'].reshape(1, -1) for lp in layers])

    ins = (patches, cw1, scale1.reshape(1, C1), shift1.reshape(1, C1),
           mask2, cw2, scale2.reshape(1, C2), shift2.reshape(1, C2),
           hsel_big, hselT_big,
           win, binp, wout, bout, ln1g, ln1b, wf1, bf1, wf2, bf2, ln2g, ln2b)

    out_flat = pl.pallas_call(
        _make_fused_kernel(B=B, Ho=Ho, Wo=Wo, E=E,
                           num_heads=NUM_HEADS, num_layers=L),
        out_shape=jax.ShapeDtypeStruct((R, E), jnp.float32),
        grid=(1,),
        in_specs=[_const_spec(a.shape) for a in ins],
        out_specs=_const_spec((R, E)),
        compiler_params=pltpu.CompilerParams(dimension_semantics=("arbitrary",)),
    )(*ins)

    # PyTorch: x.transpose(1,2).view(B, C, h, w); final ReLU already fused in-kernel.
    out = out_flat.reshape(B, Ho * Wo, E).transpose(0, 2, 1).reshape(B, E, Ho, Wo)
    return out


# ----------------------- deterministic parameter init -----------------------

def init_params(seed=0):
    key = jax.random.PRNGKey(seed)

    def take(shape, std=0.1):
        nonlocal key
        key, sub = jax.random.split(key)
        return (std * jax.random.normal(sub, shape)).astype(jnp.float32)

    params = dict(
        conv1_w=take((OUT_CH, IN_CH, 3, 3), 0.15), conv1_b=take((OUT_CH,), 0.05),
        bn1_g=1.0 + take((OUT_CH,), 0.05), bn1_b=take((OUT_CH,), 0.05),
        bn1_m=take((OUT_CH,), 0.05), bn1_v=1.0 + jnp.abs(take((OUT_CH,), 0.1)),
        conv2_w=take((OUT_CH, OUT_CH, 3, 3), 0.1), conv2_b=take((OUT_CH,), 0.05),
        bn2_g=1.0 + take((OUT_CH,), 0.05), bn2_b=take((OUT_CH,), 0.05),
        bn2_m=take((OUT_CH,), 0.05), bn2_v=1.0 + jnp.abs(take((OUT_CH,), 0.1)),
    )
    layers = []
    for _ in range(NUM_LAYERS):
        layers.append(dict(
            w_in=take((3 * OUT_CH, OUT_CH), 0.2), b_in=take((3 * OUT_CH,), 0.02),
            w_out=take((OUT_CH, OUT_CH), 0.2), b_out=take((OUT_CH,), 0.02),
            ln1_g=1.0 + take((OUT_CH,), 0.05), ln1_b=take((OUT_CH,), 0.02),
            w1=take((DIM_FF, OUT_CH), 0.2), b1=take((DIM_FF,), 0.02),
            w2=take((OUT_CH, DIM_FF), 0.02), b2=take((OUT_CH,), 0.02),
            ln2_g=1.0 + take((OUT_CH,), 0.05), ln2_b=take((OUT_CH,), 0.02),
        ))
    params['layers'] = layers
    return params


if __name__ == "__main__":
    params = init_params(0)
    # input 8x8 -> stride-2 conv -> 4x4 -> HW = 16 == num_patches of the module
    x = jax.random.normal(jax.random.PRNGKey(0), (2, IN_CH, 8, 8), dtype=jnp.float32)
    fwd = jax.jit(down_t_sampling_forward)
    out = jax.block_until_ready(fwd(x, params))
    assert out.shape == (2, OUT_CH, 4, 4), out.shape
    assert bool(jnp.all(jnp.isfinite(out)))
    assert bool(jnp.all(out >= 0.0))  # final ReLU
    print("KERNEL_OK")
</pallas_src>

<mosaic_0001>
module attributes {stable_mosaic.version = 11 : i64} {
  func.func @kernel(%arg0: i32, %arg1: memref<32x36xf32, #tpu.memory_space<vmem>>, %arg2: memref<36x8xf32, #tpu.memory_space<vmem>>, %arg3: memref<1x8xf32, #tpu.memory_space<vmem>>, %arg4: memref<1x8xf32, #tpu.memory_space<vmem>>, %arg5: memref<32x72xf32, #tpu.memory_space<vmem>>, %arg6: memref<72x8xf32, #tpu.memory_space<vmem>>, %arg7: memref<1x8xf32, #tpu.memory_space<vmem>>, %arg8: memref<1x8xf32, #tpu.memory_space<vmem>>, %arg9: memref<16x8xf32, #tpu.memory_space<vmem>>, %arg10: memref<8x16xf32, #tpu.memory_space<vmem>>, %arg11: memref<6x8x24xf32, #tpu.memory_space<vmem>>, %arg12: memref<6x1x24xf32, #tpu.memory_space<vmem>>, %arg13: memref<6x8x8xf32, #tpu.memory_space<vmem>>, %arg14: memref<6x1x8xf32, #tpu.memory_space<vmem>>, %arg15: memref<6x1x8xf32, #tpu.memory_space<vmem>>, %arg16: memref<6x1x8xf32, #tpu.memory_space<vmem>>, %arg17: memref<6x8x2048xf32, #tpu.memory_space<vmem>>, %arg18: memref<6x1x2048xf32, #tpu.memory_space<vmem>>, %arg19: memref<6x8x2048xf32, #tpu.memory_space<vmem>>, %arg20: memref<6x1x8xf32, #tpu.memory_space<vmem>>, %arg21: memref<6x1x8xf32, #tpu.memory_space<vmem>>, %arg22: memref<6x1x8xf32, #tpu.memory_space<vmem>>, %arg23: memref<32x8xf32, #tpu.memory_space<vmem>>) attributes {dimension_semantics = [#tpu.dimension_semantics<arbitrary>], iteration_bounds = array<i64: 1>, scalar_prefetch = 0 : i64, scratch_operands = 0 : i64, tpu.core_type = #tpu.core_type<tc>, window_params = [{pipeline_mode = #tpu.pipeline_mode<synchronous>, transform_indices = @transform_0, window_bounds = array<i64: 32, 36>}, {pipeline_mode = #tpu.pipeline_mode<synchronous>, transform_indices = @transform_1, window_bounds = array<i64: 36, 8>}, {pipeline_mode = #tpu.pipeline_mode<synchronous>, transform_indices = @transform_2, window_bounds = array<i64: 1, 8>}, {pipeline_mode = #tpu.pipeline_mode<synchronous>, transform_indices = @transform_3, window_bounds = array<i64: 1, 8>}, {pipeline_mode = #tpu.pipeline_mode<synchronous>, transform_indices = @transform_4, window_bounds = array<i64: 32, 72>}, {pipeline_mode = #tpu.pipeline_mode<synchronous>, transform_indices = @transform_5, window_bounds = array<i64: 72, 8>}, {pipeline_mode = #tpu.pipeline_mode<synchronous>, transform_indices = @transform_6, window_bounds = array<i64: 1, 8>}, {pipeline_mode = #tpu.pipeline_mode<synchronous>, transform_indices = @transform_7, window_bounds = array<i64: 1, 8>}, {pipeline_mode = #tpu.pipeline_mode<synchronous>, transform_indices = @transform_8, window_bounds = array<i64: 16, 8>}, {pipeline_mode = #tpu.pipeline_mode<synchronous>, transform_indices = @transform_9, window_bounds = array<i64: 8, 16>}, {pipeline_mode = #tpu.pipeline_mode<synchronous>, transform_indices = @transform_10, window_bounds = array<i64: 6, 8, 24>}, {pipeline_mode = #tpu.pipeline_mode<synchronous>, transform_indices = @transform_11, window_bounds = array<i64: 6, 1, 24>}, {pipeline_mode = #tpu.pipeline_mode<synchronous>, transform_indices = @transform_12, window_bounds = array<i64: 6, 8, 8>}, {pipeline_mode = #tpu.pipeline_mode<synchronous>, transform_indices = @transform_13, window_bounds = array<i64: 6, 1, 8>}, {pipeline_mode = #tpu.pipeline_mode<synchronous>, transform_indices = @transform_14, window_bounds = array<i64: 6, 1, 8>}, {pipeline_mode = #tpu.pipeline_mode<synchronous>, transform_indices = @transform_15, window_bounds = array<i64: 6, 1, 8>}, {pipeline_mode = #tpu.pipeline_mode<synchronous>, transform_indices = @transform_16, window_bounds = array<i64: 6, 8, 2048>}, {pipeline_mode = #tpu.pipeline_mode<synchronous>, transform_indices = @transform_17, window_bounds = array<i64: 6, 1, 2048>}, {pipeline_mode = #tpu.pipeline_mode<synchronous>, transform_indices = @transform_18, window_bounds = array<i64: 6, 8, 2048>}, {pipeline_mode = #tpu.pipeline_mode<synchronous>, transform_indices = @transform_19, window_bounds = array<i64: 6, 1, 8>}, {pipeline_mode = #tpu.pipeline_mode<synchronous>, transform_indices = @transform_20, window_bounds = array<i64: 6, 1, 8>}, {pipeline_mode = #tpu.pipeline_mode<synchronous>, transform_indices = @transform_21, window_bounds = array<i64: 6, 1, 8>}, {pipeline_mode = #tpu.pipeline_mode<synchronous>, transform_indices = @transform_22, window_bounds = array<i64: 32, 8>}]} {
    %c0 = arith.constant 0 : index
    %c0_0 = arith.constant 0 : index
    %0 = vector.load %arg1[%c0, %c0_0] : memref<32x36xf32, #tpu.memory_space<vmem>>, vector<32x36xf32>
    %c0_1 = arith.constant 0 : index
    %c0_2 = arith.constant 0 : index
    %1 = vector.load %arg2[%c0_1, %c0_2] : memref<36x8xf32, #tpu.memory_space<vmem>>, vector<36x8xf32>
    %cst = arith.constant dense<0.000000e+00> : vector<32x8xf32>
    %2 = tpu.matmul %0, %1, %cst {dimension_numbers = #tpu.dot_dimension_numbers<[1], [0], [0], [1], [0, 0, 1, 1], [], []>} : vector<32x36xf32>, vector<36x8xf32>, vector<32x8xf32> -> vector<32x8xf32>
    %c0_3 = arith.constant 0 : index
    %c0_4 = arith.constant 0 : index
    %3 = vector.load %arg3[%c0_3, %c0_4] : memref<1x8xf32, #tpu.memory_space<vmem>>, vector<1x8xf32>
    %4 = vector.broadcast %3 : vector<1x8xf32> to vector<32x8xf32>
    %5 = arith.mulf %2, %4 : vector<32x8xf32>
    %c0_5 = arith.constant 0 : index
    %c0_6 = arith.constant 0 : index
    %6 = vector.load %arg4[%c0_5, %c0_6] : memref<1x8xf32, #tpu.memory_space<vmem>>, vector<1x8xf32>
    %7 = vector.broadcast %6 : vector<1x8xf32> to vector<32x8xf32>
    %8 = arith.addf %5, %7 : vector<32x8xf32>
    %cst_7 = arith.constant 0.000000e+00 : f32
    %9 = vector.broadcast %cst_7 : f32 to vector<32x8xf32>
    %10 = arith.maximumf %8, %9 : vector<32x8xf32>
    %c5_i32 = arith.constant 5 : i32
    %11 = tpu.dynamic_rotate %10 by %c5_i32 dim 0 : vector<32x8xf32>, i32 -> vector<32x8xf32>
    %c4_i32 = arith.constant 4 : i32
    %12 = tpu.dynamic_rotate %10 by %c4_i32 dim 0 : vector<32x8xf32>, i32 -> vector<32x8xf32>
    %c3_i32 = arith.constant 3 : i32
    %13 = tpu.dynamic_rotate %10 by %c3_i32 dim 0 : vector<32x8xf32>, i32 -> vector<32x8xf32>
    %c1_i32 = arith.constant 1 : i32
    %14 = tpu.dynamic_rotate %10 by %c1_i32 dim 0 : vector<32x8xf32>, i32 -> vector<32x8xf32>
    %c31_i32 = arith.constant 31 : i32
    %15 = tpu.dynamic_rotate %10 by %c31_i32 dim 0 : vector<32x8xf32>, i32 -> vector<32x8xf32>
    %c29_i32 = arith.constant 29 : i32
    %16 = tpu.dynamic_rotate %10 by %c29_i32 dim 0 : vector<32x8xf32>, i32 -> vector<32x8xf32>
    %c28_i32 = arith.constant 28 : i32
    %17 = tpu.dynamic_rotate %10 by %c28_i32 dim 0 : vector<32x8xf32>, i32 -> vector<32x8xf32>
    %c27_i32 = arith.constant 27 : i32
    %18 = tpu.dynamic_rotate %10 by %c27_i32 dim 0 : vector<32x8xf32>, i32 -> vector<32x8xf32>
    %19 = tpu.concatenate %11, %12, %13, %14, %10, %15, %16, %17, %18 in 1 : vector<32x8xf32>, vector<32x8xf32>, vector<32x8xf32>, vector<32x8xf32>, vector<32x8xf32>, vector<32x8xf32>, vector<32x8xf32>, vector<32x8xf32>, vector<32x8xf32> -> vector<32x72xf32>
    %c0_8 = arith.constant 0 : index
    %c0_9 = arith.constant 0 : index
    %20 = vector.load %arg5[%c0_8, %c0_9] : memref<32x72xf32, #tpu.memory_space<vmem>>, vector<32x72xf32>
    %21 = arith.mulf %19, %20 : vector<32x72xf32>
    %c0_10 = arith.constant 0 : index
    %c0_11 = arith.constant 0 : index
    %22 = vector.load %arg6[%c0_10, %c0_11] : memref<72x8xf32, #tpu.memory_space<vmem>>, vector<72x8xf32>
    %cst_12 = arith.constant dense<0.000000e+00> : vector<32x8xf32>
    %23 = tpu.matmul %21, %22, %cst_12 {dimension_numbers = #tpu.dot_dimension_numbers<[1], [0], [0], [1], [0, 0, 1, 1], [], []>} : vector<32x72xf32>, vector<72x8xf32>, vector<32x8xf32> -> vector<32x8xf32>
    %c0_13 = arith.constant 0 : index
    %c0_14 = arith.constant 0 : index
    %24 = vector.load %arg7[%c0_13, %c0_14] : memref<1x8xf32, #tpu.memory_space<vmem>>, vector<1x8xf32>
    %25 = vector.broadcast %24 : vector<1x8xf32> to vector<32x8xf32>
    %26 = arith.mulf %23, %25 : vector<32x8xf32>
    %c0_15 = arith.constant 0 : index
    %c0_16 = arith.constant 0 : index
    %27 = vector.load %arg8[%c0_15, %c0_16] : memref<1x8xf32, #tpu.memory_space<vmem>>, vector<1x8xf32>
    %28 = vector.broadcast %27 : vector<1x8xf32> to vector<32x8xf32>
    %29 = arith.addf %26, %28 : vector<32x8xf32>
    %c0_17 = arith.constant 0 : index
    %c0_18 = arith.constant 0 : index
    %30 = vector.load %arg9[%c0_17, %c0_18] : memref<16x8xf32, #tpu.memory_space<vmem>>, vector<16x8xf32>
    %c0_19 = arith.constant 0 : index
    %c0_20 = arith.constant 0 : index
    %31 = vector.load %arg10[%c0_19, %c0_20] : memref<8x16xf32, #tpu.memory_space<vmem>>, vector<8x16xf32>
    %c0_21 = arith.constant 0 : index
    %c0_22 = arith.constant 0 : index
    %c0_23 = arith.constant 0 : index
    %32 = vector.load %arg11[%c0_21, %c0_22, %c0_23] : memref<6x8x24xf32, #tpu.memory_space<vmem>>, vector<1x8x24xf32>
    %33 = vector.shape_cast %32 : vector<1x8x24xf32> to vector<8x24xf32>
    %cst_24 = arith.constant dense<0.000000e+00> : vector<32x24xf32>
    %34 = tpu.matmul %29, %33, %cst_24 {dimension_numbers = #tpu.dot_dimension_numbers<[1], [0], [0], [1], [0, 0, 1, 1], [], []>} : vector<32x8xf32>, vector<8x24xf32>, vector<32x24xf32> -> vector<32x24xf32>
    %c0_25 = arith.constant 0 : index
    %c0_26 = arith.constant 0 : index
    %c0_27 = arith.constant 0 : index
    %35 = vector.load %arg12[%c0_25, %c0_26, %c0_27] : memref<6x1x24xf32, #tpu.memory_space<vmem>>, vector<1x1x24xf32>
    %36 = vector.shape_cast %35 : vector<1x1x24xf32> to vector<1x24xf32>
    %37 = vector.broadcast %36 : vector<1x24xf32> to vector<32x24xf32>
    %38 = arith.addf %34, %37 : vector<32x24xf32>
    %39 = vector.extract_strided_slice %38 {offsets = [0, 0], sizes = [32, 8], strides = [1, 1]} : vector<32x24xf32> to vector<32x8xf32>
    %40 = vector.extract_strided_slice %38 {offsets = [0, 8], sizes = [32, 8], strides = [1, 1]} : vector<32x24xf32> to vector<32x8xf32>
    %41 = vector.extract_strided_slice %38 {offsets = [0, 16], sizes = [32, 8], strides = [1, 1]} : vector<32x24xf32> to vector<32x8xf32>
    %42 = arith.mulf %39, %40 : vector<32x8xf32>
    %c16_i32 = arith.constant 16 : i32
    %43 = tpu.dynamic_rotate %40 by %c16_i32 dim 0 : vector<32x8xf32>, i32 -> vector<32x8xf32>
    %44 = arith.mulf %39, %43 : vector<32x8xf32>
    %c16_i32_28 = arith.constant 16 : i32
    %45 = tpu.dynamic_rotate %41 by %c16_i32_28 dim 0 : vector<32x8xf32>, i32 -> vector<32x8xf32>
    %46 = tpu.concatenate %42, %44 in 1 : vector<32x8xf32>, vector<32x8xf32> -> vector<32x16xf32>
    %47 = tpu.concatenate %41, %45 in 1 : vector<32x8xf32>, vector<32x8xf32> -> vector<32x16xf32>
    %cst_29 = arith.constant dense<0.000000e+00> : vector<32x8xf32>
    %48 = tpu.matmul %46, %30, %cst_29 {dimension_numbers = #tpu.dot_dimension_numbers<[1], [0], [0], [1], [0, 0, 1, 1], [], []>} : vector<32x16xf32>, vector<16x8xf32>, vector<32x8xf32> -> vector<32x8xf32>
    %cst_30 = arith.constant 0.707106769 : f32
    %49 = vector.broadcast %cst_30 : f32 to vector<32x8xf32>
    %50 = arith.mulf %48, %49 : vector<32x8xf32>
    %51 = vector.extract_strided_slice %50 {offsets = [0, 0], sizes = [32, 4], strides = [1, 1]} : vector<32x8xf32> to vector<32x4xf32>
    %52 = vector.extract_strided_slice %50 {offsets = [0, 4], sizes = [32, 4], strides = [1, 1]} : vector<32x8xf32> to vector<32x4xf32>
    %53 = arith.maximumf %51, %52 : vector<32x4xf32>
    %54 = tpu.concatenate %53, %53 in 1 : vector<32x4xf32>, vector<32x4xf32> -> vector<32x8xf32>
    %55 = arith.subf %50, %54 : vector<32x8xf32>
    %56 = math.exp %55 : vector<32x8xf32>
    %57 = vector.extract_strided_slice %56 {offsets = [0, 0], sizes = [32, 4], strides = [1, 1]} : vector<32x8xf32> to vector<32x4xf32>
    %58 = vector.extract_strided_slice %56 {offsets = [0, 4], sizes = [32, 4], strides = [1, 1]} : vector<32x8xf32> to vector<32x4xf32>
    %59 = arith.addf %57, %58 : vector<32x4xf32>
    %cst_31 = arith.constant 1.000000e+00 : f32
    %60 = vector.broadcast %cst_31 : f32 to vector<32x4xf32>
    %61 = arith.divf %60, %59 : vector<32x4xf32>
    %62 = tpu.concatenate %61, %61 in 1 : vector<32x4xf32>, vector<32x4xf32> -> vector<32x8xf32>
    %63 = arith.mulf %56, %62 : vector<32x8xf32>
    %cst_32 = arith.constant dense<0.000000e+00> : vector<32x16xf32>
    %64 = tpu.matmul %63, %31, %cst_32 {dimension_numbers = #tpu.dot_dimension_numbers<[1], [0], [0], [1], [0, 0, 1, 1], [], []>} : vector<32x8xf32>, vector<8x16xf32>, vector<32x16xf32> -> vector<32x16xf32>
    %65 = arith.mulf %64, %47 : vector<32x16xf32>
    %66 = vector.extract_strided_slice %65 {offsets = [0, 0], sizes = [32, 8], strides = [1, 1]} : vector<32x16xf32> to vector<32x8xf32>
    %67 = vector.extract_strided_slice %65 {offsets = [0, 8], sizes = [32, 8], strides = [1, 1]} : vector<32x16xf32> to vector<32x8xf32>
    %68 = arith.addf %66, %67 : vector<32x8xf32>
    %c0_33 = arith.constant 0 : index
    %c0_34 = arith.constant 0 : index
    %c0_35 = arith.constant 0 : index
    %69 = vector.load %arg13[%c0_33, %c0_34, %c0_35] : memref<6x8x8xf32, #tpu.memory_space<vmem>>, vector<1x8x8xf32>
    %70 = vector.shape_cast %69 : vector<1x8x8xf32> to vector<8x8xf32>
    %cst_36 = arith.constant dense<0.000000e+00> : vector<32x8xf32>
    %71 = tpu.matmul %68, %70, %cst_36 {dimension_numbers = #tpu.dot_dimension_numbers<[1], [0], [0], [1], [0, 0, 1, 1], [], []>} : vector<32x8xf32>, vector<8x8xf32>, vector<32x8xf32> -> vector<32x8xf32>
    %c0_37 = arith.constant 0 : index
    %c0_38 = arith.constant 0 : index
    %c0_39 = arith.constant 0 : index
    %72 = vector.load %arg14[%c0_37, %c0_38, %c0_39] : memref<6x1x8xf32, #tpu.memory_space<vmem>>, vector<1x1x8xf32>
    %73 = vector.shape_cast %72 : vector<1x1x8xf32> to vector<1x8xf32>
    %74 = vector.broadcast %73 : vector<1x8xf32> to vector<32x8xf32>
    %75 = arith.addf %71, %74 : vector<32x8xf32>
    %76 = arith.addf %29, %75 : vector<32x8xf32>
    %c0_40 = arith.constant 0 : index
    %c0_41 = arith.constant 0 : index
    %c0_42 = arith.constant 0 : index
    %77 = vector.load %arg15[%c0_40, %c0_41, %c0_42] : memref<6x1x8xf32, #tpu.memory_space<vmem>>, vector<1x1x8xf32>
    %78 = vector.shape_cast %77 : vector<1x1x8xf32> to vector<1x8xf32>
    %c0_43 = arith.constant 0 : index
    %c0_44 = arith.constant 0 : index
    %c0_45 = arith.constant 0 : index
    %79 = vector.load %arg16[%c0_43, %c0_44, %c0_45] : memref<6x1x8xf32, #tpu.memory_space<vmem>>, vector<1x1x8xf32>
    %80 = vector.shape_cast %79 : vector<1x1x8xf32> to vector<1x8xf32>
    %cst_46 = arith.constant dense<0.000000e+00> : vector<32xf32>
    %81 = vector.multi_reduction <add>, %76, %cst_46 [1] : vector<32x8xf32> to vector<32xf32>
    %82 = vector.shape_cast %81 : vector<32xf32> to vector<32x1xf32>
    %cst_47 = arith.constant 8.000000e+00 : f32
    %83 = vector.broadcast %cst_47 : f32 to vector<32x1xf32>
    %84 = arith.divf %82, %83 : vector<32x1xf32>
    %85 = vector.broadcast %84 : vector<32x1xf32> to vector<32x8xf32>
    %86 = arith.subf %76, %85 : vector<32x8xf32>
    %87 = arith.mulf %86, %86 : vector<32x8xf32>
    %cst_48 = arith.constant dense<0.000000e+00> : vector<32xf32>
    %88 = vector.multi_reduction <add>, %87, %cst_48 [1] : vector<32x8xf32> to vector<32xf32>
    %89 = vector.shape_cast %88 : vector<32xf32> to vector<32x1xf32>
    %cst_49 = arith.constant 8.000000e+00 : f32
    %90 = vector.broadcast %cst_49 : f32 to vector<32x1xf32>
    %91 = arith.divf %89, %90 : vector<32x1xf32>
    %cst_50 = arith.constant 9.99999974E-6 : f32
    %92 = vector.broadcast %cst_50 : f32 to vector<32x1xf32>
    %93 = arith.addf %91, %92 : vector<32x1xf32>
    %94 = math.rsqrt %93 : vector<32x1xf32>
    %95 = vector.broadcast %94 : vector<32x1xf32> to vector<32x8xf32>
    %96 = arith.mulf %86, %95 : vector<32x8xf32>
    %97 = vector.broadcast %78 : vector<1x8xf32> to vector<32x8xf32>
    %98 = arith.mulf %96, %97 : vector<32x8xf32>
    %99 = vector.broadcast %80 : vector<1x8xf32> to vector<32x8xf32>
    %100 = arith.addf %98, %99 : vector<32x8xf32>
    %c0_51 = arith.constant 0 : index
    %c0_52 = arith.constant 0 : index
    %c0_53 = arith.constant 0 : index
    %101 = vector.load %arg17[%c0_51, %c0_52, %c0_53] : memref<6x8x2048xf32, #tpu.memory_space<vmem>>, vector<1x8x2048xf32>
    %102 = vector.shape_cast %101 : vector<1x8x2048xf32> to vector<8x2048xf32>
    %cst_54 = arith.constant dense<0.000000e+00> : vector<32x2048xf32>
    %103 = tpu.matmul %100, %102, %cst_54 {dimension_numbers = #tpu.dot_dimension_numbers<[1], [0], [0], [1], [0, 0, 1, 1], [], []>} : vector<32x8xf32>, vector<8x2048xf32>, vector<32x2048xf32> -> vector<32x2048xf32>
    %c0_55 = arith.constant 0 : index
    %c0_56 = arith.constant 0 : index
    %c0_57 = arith.constant 0 : index
    %104 = vector.load %arg18[%c0_55, %c0_56, %c0_57] : memref<6x1x2048xf32, #tpu.memory_space<vmem>>, vector<1x1x2048xf32>
    %105 = vector.shape_cast %104 : vector<1x1x2048xf32> to vector<1x2048xf32>
    %106 = vector.broadcast %105 : vector<1x2048xf32> to vector<32x2048xf32>
    %107 = arith.addf %103, %106 : vector<32x2048xf32>
    %cst_58 = arith.constant 0.000000e+00 : f32
    %108 = vector.broadcast %cst_58 : f32 to vector<32x2048xf32>
    %109 = arith.maximumf %107, %108 : vector<32x2048xf32>
    %c0_59 = arith.constant 0 : index
    %c0_60 = arith.constant 0 : index
    %c0_61 = arith.constant 0 : index
    %110 = vector.load %arg19[%c0_59, %c0_60, %c0_61] : memref<6x8x2048xf32, #tpu.memory_space<vmem>>, vector<1x8x2048xf32>
    %111 = vector.shape_cast %110 : vector<1x8x2048xf32> to vector<8x2048xf32>
    %cst_62 = arith.constant dense<0.000000e+00> : vector<32x8xf32>
    %112 = tpu.matmul %109, %111, %cst_62 {dimension_numbers = #tpu.dot_dimension_numbers<[1], [1], [0], [0], [0, 0, 1, 0], [], []>} : vector<32x2048xf32>, vector<8x2048xf32>, vector<32x8xf32> -> vector<32x8xf32>
    %c0_63 = arith.constant 0 : index
    %c0_64 = arith.constant 0 : index
    %c0_65 = arith.constant 0 : index
    %113 = vector.load %arg20[%c0_63, %c0_64, %c0_65] : memref<6x1x8xf32, #tpu.memory_space<vmem>>, vector<1x1x8xf32>
    %114 = vector.shape_cast %113 : vector<1x1x8xf32> to vector<1x8xf32>
    %115 = vector.broadcast %114 : vector<1x8xf32> to vector<32x8xf32>
    %116 = arith.addf %112, %115 : vector<32x8xf32>
    %117 = arith.addf %100, %116 : vector<32x8xf32>
    %c0_66 = arith.constant 0 : index
    %c0_67 = arith.constant 0 : index
    %c0_68 = arith.constant 0 : index
    %118 = vector.load %arg21[%c0_66, %c0_67, %c0_68] : memref<6x1x8xf32, #tpu.memory_space<vmem>>, vector<1x1x8xf32>
    %119 = vector.shape_cast %118 : vector<1x1x8xf32> to vector<1x8xf32>
    %c0_69 = arith.constant 0 : index
    %c0_70 = arith.constant 0 : index
    %c0_71 = arith.constant 0 : index
    %120 = vector.load %arg22[%c0_69, %c0_70, %c0_71] : memref<6x1x8xf32, #tpu.memory_space<vmem>>, vector<1x1x8xf32>
    %121 = vector.shape_cast %120 : vector<1x1x8xf32> to vector<1x8xf32>
    %cst_72 = arith.constant dense<0.000000e+00> : vector<32xf32>
    %122 = vector.multi_reduction <add>, %117, %cst_72 [1] : vector<32x8xf32> to vector<32xf32>
    %123 = vector.shape_cast %122 : vector<32xf32> to vector<32x1xf32>
    %cst_73 = arith.constant 8.000000e+00 : f32
    %124 = vector.broadcast %cst_73 : f32 to vector<32x1xf32>
    %125 = arith.divf %123, %124 : vector<32x1xf32>
    %126 = vector.broadcast %125 : vector<32x1xf32> to vector<32x8xf32>
    %127 = arith.subf %117, %126 : vector<32x8xf32>
    %128 = arith.mulf %127, %127 : vector<32x8xf32>
    %cst_74 = arith.constant dense<0.000000e+00> : vector<32xf32>
    %129 = vector.multi_reduction <add>, %128, %cst_74 [1] : vector<32x8xf32> to vector<32xf32>
    %130 = vector.shape_cast %129 : vector<32xf32> to vector<32x1xf32>
    %cst_75 = arith.constant 8.000000e+00 : f32
    %131 = vector.broadcast %cst_75 : f32 to vector<32x1xf32>
    %132 = arith.divf %130, %131 : vector<32x1xf32>
    %cst_76 = arith.constant 9.99999974E-6 : f32
    %133 = vector.broadcast %cst_76 : f32 to vector<32x1xf32>
    %134 = arith.addf %132, %133 : vector<32x1xf32>
    %135 = math.rsqrt %134 : vector<32x1xf32>
    %136 = vector.broadcast %135 : vector<32x1xf32> to vector<32x8xf32>
    %137 = arith.mulf %127, %136 : vector<32x8xf32>
    %138 = vector.broadcast %119 : vector<1x8xf32> to vector<32x8xf32>
    %139 = arith.mulf %137, %138 : vector<32x8xf32>
    %140 = vector.broadcast %121 : vector<1x8xf32> to vector<32x8xf32>
    %141 = arith.addf %139, %140 : vector<32x8xf32>
    %c1 = arith.constant 1 : index
    %c0_77 = arith.constant 0 : index
    %c0_78 = arith.constant 0 : index
    %142 = vector.load %arg11[%c1, %c0_77, %c0_78] : memref<6x8x24xf32, #tpu.memory_space<vmem>>, vector<1x8x24xf32>
    %143 = vector.shape_cast %142 : vector<1x8x24xf32> to vector<8x24xf32>
    %cst_79 = arith.constant dense<0.000000e+00> : vector<32x24xf32>
    %144 = tpu.matmul %141, %143, %cst_79 {dimension_numbers = #tpu.dot_dimension_numbers<[1], [0], [0], [1], [0, 0, 1, 1], [], []>} : vector<32x8xf32>, vector<8x24xf32>, vector<32x24xf32> -> vector<32x24xf32>
    %c1_80 = arith.constant 1 : index
    %c0_81 = arith.constant 0 : index
    %c0_82 = arith.constant 0 : index
    %145 = vector.load %arg12[%c1_80, %c0_81, %c0_82] : memref<6x1x24xf32, #tpu.memory_space<vmem>>, vector<1x1x24xf32>
    %146 = vector.shape_cast %145 : vector<1x1x24xf32> to vector<1x24xf32>
    %147 = vector.broadcast %146 : vector<1x24xf32> to vector<32x24xf32>
    %148 = arith.addf %144, %147 : vector<32x24xf32>
    %149 = vector.extract_strided_slice %148 {offsets = [0, 0], sizes = [32, 8], strides = [1, 1]} : vector<32x24xf32> to vector<32x8xf32>
    %150 = vector.extract_strided_slice %148 {offsets = [0, 8], sizes = [32, 8], strides = [1, 1]} : vector<32x24xf32> to vector<32x8xf32>
    %151 = vector.extract_strided_slice %148 {offsets = [0, 16], sizes = [32, 8], strides = [1, 1]} : vector<32x24xf32> to vector<32x8xf32>
    %152 = arith.mulf %149, %150 : vector<32x8xf32>
    %c16_i32_83 = arith.constant 16 : i32
    %153 = tpu.dynamic_rotate %150 by %c16_i32_83 dim 0 : vector<32x8xf32>, i32 -> vector<32x8xf32>
    %154 = arith.mulf %149, %153 : vector<32x8xf32>
    %c16_i32_84 = arith.constant 16 : i32
    %155 = tpu.dynamic_rotate %151 by %c16_i32_84 dim 0 : vector<32x8xf32>, i32 -> vector<32x8xf32>
    %156 = tpu.concatenate %152, %154 in 1 : vector<32x8xf32>, vector<32x8xf32> -> vector<32x16xf32>
    %157 = tpu.concatenate %151, %155 in 1 : vector<32x8xf32>, vector<32x8xf32> -> vector<32x16xf32>
    %cst_85 = arith.constant dense<0.000000e+00> : vector<32x8xf32>
    %158 = tpu.matmul %156, %30, %cst_85 {dimension_numbers = #tpu.dot_dimension_numbers<[1], [0], [0], [1], [0, 0, 1, 1], [], []>} : vector<32x16xf32>, vector<16x8xf32>, vector<32x8xf32> -> vector<32x8xf32>
    %cst_86 = arith.constant 0.707106769 : f32
    %159 = vector.broadcast %cst_86 : f32 to vector<32x8xf32>
    %160 = arith.mulf %158, %159 : vector<32x8xf32>
    %161 = vector.extract_strided_slice %160 {offsets = [0, 0], sizes = [32, 4], strides = [1, 1]} : vector<32x8xf32> to vector<32x4xf32>
    %162 = vector.extract_strided_slice %160 {offsets = [0, 4], sizes = [32, 4], strides = [1, 1]} : vector<32x8xf32> to vector<32x4xf32>
    %163 = arith.maximumf %161, %162 : vector<32x4xf32>
    %164 = tpu.concatenate %163, %163 in 1 : vector<32x4xf32>, vector<32x4xf32> -> vector<32x8xf32>
    %165 = arith.subf %160, %164 : vector<32x8xf32>
    %166 = math.exp %165 : vector<32x8xf32>
    %167 = vector.extract_strided_slice %166 {offsets = [0, 0], sizes = [32, 4], strides = [1, 1]} : vector<32x8xf32> to vector<32x4xf32>
    %168 = vector.extract_strided_slice %166 {offsets = [0, 4], sizes = [32, 4], strides = [1, 1]} : vector<32x8xf32> to vector<32x4xf32>
    %169 = arith.addf %167, %168 : vector<32x4xf32>
    %cst_87 = arith.constant 1.000000e+00 : f32
    %170 = vector.broadcast %cst_87 : f32 to vector<32x4xf32>
    %171 = arith.divf %170, %169 : vector<32x4xf32>
    %172 = tpu.concatenate %171, %171 in 1 : vector<32x4xf32>, vector<32x4xf32> -> vector<32x8xf32>
    %173 = arith.mulf %166, %172 : vector<32x8xf32>
    %cst_88 = arith.constant dense<0.000000e+00> : vector<32x16xf32>
    %174 = tpu.matmul %173, %31, %cst_88 {dimension_numbers = #tpu.dot_dimension_numbers<[1], [0], [0], [1], [0, 0, 1, 1], [], []>} : vector<32x8xf32>, vector<8x16xf32>, vector<32x16xf32> -> vector<32x16xf32>
    %175 = arith.mulf %174, %157 : vector<32x16xf32>
    %176 = vector.extract_strided_slice %175 {offsets = [0, 0], sizes = [32, 8], strides = [1, 1]} : vector<32x16xf32> to vector<32x8xf32>
    %177 = vector.extract_strided_slice %175 {offsets = [0, 8], sizes = [32, 8], strides = [1, 1]} : vector<32x16xf32> to vector<32x8xf32>
    %178 = arith.addf %176, %177 : vector<32x8xf32>
    %c1_89 = arith.constant 1 : index
    %c0_90 = arith.constant 0 : index
    %c0_91 = arith.constant 0 : index
    %179 = vector.load %arg13[%c1_89, %c0_90, %c0_91] : memref<6x8x8xf32, #tpu.memory_space<vmem>>, vector<1x8x8xf32>
    %180 = vector.shape_cast %179 : vector<1x8x8xf32> to vector<8x8xf32>
    %cst_92 = arith.constant dense<0.000000e+00> : vector<32x8xf32>
    %181 = tpu.matmul %178, %180, %cst_92 {dimension_numbers = #tpu.dot_dimension_numbers<[1], [0], [0], [1], [0, 0, 1, 1], [], []>} : vector<32x8xf32>, vector<8x8xf32>, vector<32x8xf32> -> vector<32x8xf32>
    %c1_93 = arith.constant 1 : index
    %c0_94 = arith.constant 0 : index
    %c0_95 = arith.constant 0 : index
    %182 = vector.load %arg14[%c1_93, %c0_94, %c0_95] : memref<6x1x8xf32, #tpu.memory_space<vmem>>, vector<1x1x8xf32>
    %183 = vector.shape_cast %182 : vector<1x1x8xf32> to vector<1x8xf32>
    %184 = vector.broadcast %183 : vector<1x8xf32> to vector<32x8xf32>
    %185 = arith.addf %181, %184 : vector<32x8xf32>
    %186 = arith.addf %141, %185 : vector<32x8xf32>
    %c1_96 = arith.constant 1 : index
    %c0_97 = arith.constant 0 : index
    %c0_98 = arith.constant 0 : index
    %187 = vector.load %arg15[%c1_96, %c0_97, %c0_98] : memref<6x1x8xf32, #tpu.memory_space<vmem>>, vector<1x1x8xf32>
    %188 = vector.shape_cast %187 : vector<1x1x8xf32> to vector<1x8xf32>
    %c1_99 = arith.constant 1 : index
    %c0_100 = arith.constant 0 : index
    %c0_101 = arith.constant 0 : index
    %189 = vector.load %arg16[%c1_99, %c0_100, %c0_101] : memref<6x1x8xf32, #tpu.memory_space<vmem>>, vector<1x1x8xf32>
    %190 = vector.shape_cast %189 : vector<1x1x8xf32> to vector<1x8xf32>
    %cst_102 = arith.constant dense<0.000000e+00> : vector<32xf32>
    %191 = vector.multi_reduction <add>, %186, %cst_102 [1] : vector<32x8xf32> to vector<32xf32>
    %192 = vector.shape_cast %191 : vector<32xf32> to vector<32x1xf32>
    %cst_103 = arith.constant 8.000000e+00 : f32
    %193 = vector.broadcast %cst_103 : f32 to vector<32x1xf32>
    %194 = arith.divf %192, %193 : vector<32x1xf32>
    %195 = vector.broadcast %194 : vector<32x1xf32> to vector<32x8xf32>
    %196 = arith.subf %186, %195 : vector<32x8xf32>
    %197 = arith.mulf %196, %196 : vector<32x8xf32>
    %cst_104 = arith.constant dense<0.000000e+00> : vector<32xf32>
    %198 = vector.multi_reduction <add>, %197, %cst_104 [1] : vector<32x8xf32> to vector<32xf32>
    %199 = vector.shape_cast %198 : vector<32xf32> to vector<32x1xf32>
    %cst_105 = arith.constant 8.000000e+00 : f32
    %200 = vector.broadcast %cst_105 : f32 to vector<32x1xf32>
    %201 = arith.divf %199, %200 : vector<32x1xf32>
    %cst_106 = arith.constant 9.99999974E-6 : f32
    %202 = vector.broadcast %cst_106 : f32 to vector<32x1xf32>
    %203 = arith.addf %201, %202 : vector<32x1xf32>
    %204 = math.rsqrt %203 : vector<32x1xf32>
    %205 = vector.broadcast %204 : vector<32x1xf32> to vector<32x8xf32>
    %206 = arith.mulf %196, %205 : vector<32x8xf32>
    %207 = vector.broadcast %188 : vector<1x8xf32> to vector<32x8xf32>
    %208 = arith.mulf %206, %207 : vector<32x8xf32>
    %209 = vector.broadcast %190 : vector<1x8xf32> to vector<32x8xf32>
    %210 = arith.addf %208, %209 : vector<32x8xf32>
    %c1_107 = arith.constant 1 : index
    %c0_108 = arith.constant 0 : index
    %c0_109 = arith.constant 0 : index
    %211 = vector.load %arg17[%c1_107, %c0_108, %c0_109] : memref<6x8x2048xf32, #tpu.memory_space<vmem>>, vector<1x8x2048xf32>
    %212 = vector.shape_cast %211 : vector<1x8x2048xf32> to vector<8x2048xf32>
    %cst_110 = arith.constant dense<0.000000e+00> : vector<32x2048xf32>
    %213 = tpu.matmul %210, %212, %cst_110 {dimension_numbers = #tpu.dot_dimension_numbers<[1], [0], [0], [1], [0, 0, 1, 1], [], []>} : vector<32x8xf32>, vector<8x2048xf32>, vector<32x2048xf32> -> vector<32x2048xf32>
    %c1_111 = arith.constant 1 : index
    %c0_112 = arith.constant 0 : index
    %c0_113 = arith.constant 0 : index
    %214 = vector.load %arg18[%c1_111, %c0_112, %c0_113] : memref<6x1x2048xf32, #tpu.memory_space<vmem>>, vector<1x1x2048xf32>
    %215 = vector.shape_cast %214 : vector<1x1x2048xf32> to vector<1x2048xf32>
    %216 = vector.broadcast %215 : vector<1x2048xf32> to vector<32x2048xf32>
    %217 = arith.addf %213, %216 : vector<32x2048xf32>
    %cst_114 = arith.constant 0.000000e+00 : f32
    %218 = vector.broadcast %cst_114 : f32 to vector<32x2048xf32>
    %219 = arith.maximumf %217, %218 : vector<32x2048xf32>
    %c1_115 = arith.constant 1 : index
    %c0_116 = arith.constant 0 : index
    %c0_117 = arith.constant 0 : index
    %220 = vector.load %arg19[%c1_115, %c0_116, %c0_117] : memref<6x8x2048xf32, #tpu.memory_space<vmem>>, vector<1x8x2048xf32>
    %221 = vector.shape_cast %220 : vector<1x8x2048xf32> to vector<8x2048xf32>
    %cst_118 = arith.constant dense<0.000000e+00> : vector<32x8xf32>
    %222 = tpu.matmul %219, %221, %cst_118 {dimension_numbers = #tpu.dot_dimension_numbers<[1], [1], [0], [0], [0, 0, 1, 0], [], []>} : vector<32x2048xf32>, vector<8x2048xf32>, vector<32x8xf32> -> vector<32x8xf32>
    %c1_119 = arith.constant 1 : index
    %c0_120 = arith.constant 0 : index
    %c0_121 = arith.constant 0 : index
    %223 = vector.load %arg20[%c1_119, %c0_120, %c0_121] : memref<6x1x8xf32, #tpu.memory_space<vmem>>, vector<1x1x8xf32>
    %224 = vector.shape_cast %223 : vector<1x1x8xf32> to vector<1x8xf32>
    %225 = vector.broadcast %224 : vector<1x8xf32> to vector<32x8xf32>
    %226 = arith.addf %222, %225 : vector<32x8xf32>
    %227 = arith.addf %210, %226 : vector<32x8xf32>
    %c1_122 = arith.constant 1 : index
    %c0_123 = arith.constant 0 : index
    %c0_124 = arith.constant 0 : index
    %228 = vector.load %arg21[%c1_122, %c0_123, %c0_124] : memref<6x1x8xf32, #tpu.memory_space<vmem>>, vector<1x1x8xf32>
    %229 = vector.shape_cast %228 : vector<1x1x8xf32> to vector<1x8xf32>
    %c1_125 = arith.constant 1 : index
    %c0_126 = arith.constant 0 : index
    %c0_127 = arith.constant 0 : index
    %230 = vector.load %arg22[%c1_125, %c0_126, %c0_127] : memref<6x1x8xf32, #tpu.memory_space<vmem>>, vector<1x1x8xf32>
    %231 = vector.shape_cast %230 : vector<1x1x8xf32> to vector<1x8xf32>
    %cst_128 = arith.constant dense<0.000000e+00> : vector<32xf32>
    %232 = vector.multi_reduction <add>, %227, %cst_128 [1] : vector<32x8xf32> to vector<32xf32>
    %233 = vector.shape_cast %232 : vector<32xf32> to vector<32x1xf32>
    %cst_129 = arith.constant 8.000000e+00 : f32
    %234 = vector.broadcast %cst_129 : f32 to vector<32x1xf32>
    %235 = arith.divf %233, %234 : vector<32x1xf32>
    %236 = vector.broadcast %235 : vector<32x1xf32> to vector<32x8xf32>
    %237 = arith.subf %227, %236 : vector<32x8xf32>
    %238 = arith.mulf %237, %237 : vector<32x8xf32>
    %cst_130 = arith.constant dense<0.000000e+00> : vector<32xf32>
    %239 = vector.multi_reduction <add>, %238, %cst_130 [1] : vector<32x8xf32> to vector<32xf32>
    %240 = vector.shape_cast %239 : vector<32xf32> to vector<32x1xf32>
    %cst_131 = arith.constant 8.000000e+00 : f32
    %241 = vector.broadcast %cst_131 : f32 to vector<32x1xf32>
    %242 = arith.divf %240, %241 : vector<32x1xf32>
    %cst_132 = arith.constant 9.99999974E-6 : f32
    %243 = vector.broadcast %cst_132 : f32 to vector<32x1xf32>
    %244 = arith.addf %242, %243 : vector<32x1xf32>
    %245 = math.rsqrt %244 : vector<32x1xf32>
    %246 = vector.broadcast %245 : vector<32x1xf32> to vector<32x8xf32>
    %247 = arith.mulf %237, %246 : vector<32x8xf32>
    %248 = vector.broadcast %229 : vector<1x8xf32> to vector<32x8xf32>
    %249 = arith.mulf %247, %248 : vector<32x8xf32>
    %250 = vector.broadcast %231 : vector<1x8xf32> to vector<32x8xf32>
    %251 = arith.addf %249, %250 : vector<32x8xf32>
    %c2 = arith.constant 2 : index
    %c0_133 = arith.constant 0 : index
    %c0_134 = arith.constant 0 : index
    %252 = vector.load %arg11[%c2, %c0_133, %c0_134] : memref<6x8x24xf32, #tpu.memory_space<vmem>>, vector<1x8x24xf32>
    %253 = vector.shape_cast %252 : vector<1x8x24xf32> to vector<8x24xf32>
    %cst_135 = arith.constant dense<0.000000e+00> : vector<32x24xf32>
    %254 = tpu.matmul %251, %253, %cst_135 {dimension_numbers = #tpu.dot_dimension_numbers<[1], [0], [0], [1], [0, 0, 1, 1], [], []>} : vector<32x8xf32>, vector<8x24xf32>, vector<32x24xf32> -> vector<32x24xf32>
    %c2_136 = arith.constant 2 : index
    %c0_137 = arith.constant 0 : index
    %c0_138 = arith.constant 0 : index
    %255 = vector.load %arg12[%c2_136, %c0_137, %c0_138] : memref<6x1x24xf32, #tpu.memory_space<vmem>>, vector<1x1x24xf32>
    %256 = vector.shape_cast %255 : vector<1x1x24xf32> to vector<1x24xf32>
    %257 = vector.broadcast %256 : vector<1x24xf32> to vector<32x24xf32>
    %258 = arith.addf %254, %257 : vector<32x24xf32>
    %259 = vector.extract_strided_slice %258 {offsets = [0, 0], sizes = [32, 8], strides = [1, 1]} : vector<32x24xf32> to vector<32x8xf32>
    %260 = vector.extract_strided_slice %258 {offsets = [0, 8], sizes = [32, 8], strides = [1, 1]} : vector<32x24xf32> to vector<32x8xf32>
    %261 = vector.extract_strided_slice %258 {offsets = [0, 16], sizes = [32, 8], strides = [1, 1]} : vector<32x24xf32> to vector<32x8xf32>
    %262 = arith.mulf %259, %260 : vector<32x8xf32>
    %c16_i32_139 = arith.constant 16 : i32
    %263 = tpu.dynamic_rotate %260 by %c16_i32_139 dim 0 : vector<32x8xf32>, i32 -> vector<32x8xf32>
    %264 = arith.mulf %259, %263 : vector<32x8xf32>
    %c16_i32_140 = arith.constant 16 : i32
    %265 = tpu.dynamic_rotate %261 by %c16_i32_140 dim 0 : vector<32x8xf32>, i32 -> vector<32x8xf32>
    %266 = tpu.concatenate %262, %264 in 1 : vector<32x8xf32>, vector<32x8xf32> -> vector<32x16xf32>
    %267 = tpu.concatenate %261, %265 in 1 : vector<32x8xf32>, vector<32x8xf32> -> vector<32x16xf32>
    %cst_141 = arith.constant dense<0.000000e+00> : vector<32x8xf32>
    %268 = tpu.matmul %266, %30, %cst_141 {dimension_numbers = #tpu.dot_dimension_numbers<[1], [0], [0], [1], [0, 0, 1, 1], [], []>} : vector<32x16xf32>, vector<16x8xf32>, vector<32x8xf32> -> vector<32x8xf32>
    %cst_142 = arith.constant 0.707106769 : f32
    %269 = vector.broadcast %cst_142 : f32 to vector<32x8xf32>
    %270 = arith.mulf %268, %269 : vector<32x8xf32>
    %271 = vector.extract_strided_slice %270 {offsets = [0, 0], sizes = [32, 4], strides = [1, 1]} : vector<32x8xf32> to vector<32x4xf32>
    %272 = vector.extract_strided_slice %270 {offsets = [0, 4], sizes = [32, 4], strides = [1, 1]} : vector<32x8xf32> to vector<32x4xf32>
    %273 = arith.maximumf %271, %272 : vector<32x4xf32>
    %274 = tpu.concatenate %273, %273 in 1 : vector<32x4xf32>, vector<32x4xf32> -> vector<32x8xf32>
    %275 = arith.subf %270, %274 : vector<32x8xf32>
    %276 = math.exp %275 : vector<32x8xf32>
    %277 = vector.extract_strided_slice %276 {offsets = [0, 0], sizes = [32, 4], strides = [1, 1]} : vector<32x8xf32> to vector<32x4xf32>
    %278 = vector.extract_strided_slice %276 {offsets = [0, 4], sizes = [32, 4], strides = [1, 1]} : vector<32x8xf32> to vector<32x4xf32>
    %279 = arith.addf %277, %278 : vector<32x4xf32>
    %cst_143 = arith.constant 1.000000e+00 : f32
    %280 = vector.broadcast %cst_143 : f32 to vector<32x4xf32>
    %281 = arith.divf %280, %279 : vector<32x4xf32>
    %282 = tpu.concatenate %281, %281 in 1 : vector<32x4xf32>, vector<32x4xf32> -> vector<32x8xf32>
    %283 = arith.mulf %276, %282 : vector<32x8xf32>
    %cst_144 = arith.constant dense<0.000000e+00> : vector<32x16xf32>
    %284 = tpu.matmul %283, %31, %cst_144 {dimension_numbers = #tpu.dot_dimension_numbers<[1], [0], [0], [1], [0, 0, 1, 1], [], []>} : vector<32x8xf32>, vector<8x16xf32>, vector<32x16xf32> -> vector<32x16xf32>
    %285 = arith.mulf %284, %267 : vector<32x16xf32>
    %286 = vector.extract_strided_slice %285 {offsets = [0, 0], sizes = [32, 8], strides = [1, 1]} : vector<32x16xf32> to vector<32x8xf32>
    %287 = vector.extract_strided_slice %285 {offsets = [0, 8], sizes = [32, 8], strides = [1, 1]} : vector<32x16xf32> to vector<32x8xf32>
    %288 = arith.addf %286, %287 : vector<32x8xf32>
    %c2_145 = arith.constant 2 : index
    %c0_146 = arith.constant 0 : index
    %c0_147 = arith.constant 0 : index
    %289 = vector.load %arg13[%c2_145, %c0_146, %c0_147] : memref<6x8x8xf32, #tpu.memory_space<vmem>>, vector<1x8x8xf32>
    %290 = vector.shape_cast %289 : vector<1x8x8xf32> to vector<8x8xf32>
    %cst_148 = arith.constant dense<0.000000e+00> : vector<32x8xf32>
    %291 = tpu.matmul %288, %290, %cst_148 {dimension_numbers = #tpu.dot_dimension_numbers<[1], [0], [0], [1], [0, 0, 1, 1], [], []>} : vector<32x8xf32>, vector<8x8xf32>, vector<32x8xf32> -> vector<32x8xf32>
    %c2_149 = arith.constant 2 : index
    %c0_150 = arith.constant 0 : index
    %c0_151 = arith.constant 0 : index
    %292 = vector.load %arg14[%c2_149, %c0_150, %c0_151] : memref<6x1x8xf32, #tpu.memory_space<vmem>>, vector<1x1x8xf32>
    %293 = vector.shape_cast %292 : vector<1x1x8xf32> to vector<1x8xf32>
    %294 = vector.broadcast %293 : vector<1x8xf32> to vector<32x8xf32>
    %295 = arith.addf %291, %294 : vector<32x8xf32>
    %296 = arith.addf %251, %295 : vector<32x8xf32>
    %c2_152 = arith.constant 2 : index
    %c0_153 = arith.constant 0 : index
    %c0_154 = arith.constant 0 : index
    %297 = vector.load %arg15[%c2_152, %c0_153, %c0_154] : memref<6x1x8xf32, #tpu.memory_space<vmem>>, vector<1x1x8xf32>
    %298 = vector.shape_cast %297 : vector<1x1x8xf32> to vector<1x8xf32>
    %c2_155 = arith.constant 2 : index
    %c0_156 = arith.constant 0 : index
    %c0_157 = arith.constant 0 : index
    %299 = vector.load %arg16[%c2_155, %c0_156, %c0_157] : memref<6x1x8xf32, #tpu.memory_space<vmem>>, vector<1x1x8xf32>
    %300 = vector.shape_cast %299 : vector<1x1x8xf32> to vector<1x8xf32>
    %cst_158 = arith.constant dense<0.000000e+00> : vector<32xf32>
    %301 = vector.multi_reduction <add>, %296, %cst_158 [1] : vector<32x8xf32> to vector<32xf32>
    %302 = vector.shape_cast %301 : vector<32xf32> to vector<32x1xf32>
    %cst_159 = arith.constant 8.000000e+00 : f32
    %303 = vector.broadcast %cst_159 : f32 to vector<32x1xf32>
    %304 = arith.divf %302, %303 : vector<32x1xf32>
    %305 = vector.broadcast %304 : vector<32x1xf32> to vector<32x8xf32>
    %306 = arith.subf %296, %305 : vector<32x8xf32>
    %307 = arith.mulf %306, %306 : vector<32x8xf32>
    %cst_160 = arith.constant dense<0.000000e+00> : vector<32xf32>
    %308 = vector.multi_reduction <add>, %307, %cst_160 [1] : vector<32x8xf32> to vector<32xf32>
    %309 = vector.shape_cast %308 : vector<32xf32> to vector<32x1xf32>
    %cst_161 = arith.constant 8.000000e+00 : f32
    %310 = vector.broadcast %cst_161 : f32 to vector<32x1xf32>
    %311 = arith.divf %309, %310 : vector<32x1xf32>
    %cst_162 = arith.constant 9.99999974E-6 : f32
    %312 = vector.broadcast %cst_162 : f32 to vector<32x1xf32>
    %313 = arith.addf %311, %312 : vector<32x1xf32>
    %314 = math.rsqrt %313 : vector<32x1xf32>
    %315 = vector.broadcast %314 : vector<32x1xf32> to vector<32x8xf32>
    %316 = arith.mulf %306, %315 : vector<32x8xf32>
    %317 = vector.broadcast %298 : vector<1x8xf32> to vector<32x8xf32>
    %318 = arith.mulf %316, %317 : vector<32x8xf32>
    %319 = vector.broadcast %300 : vector<1x8xf32> to vector<32x8xf32>
    %320 = arith.addf %318, %319 : vector<32x8xf32>
    %c2_163 = arith.constant 2 : index
    %c0_164 = arith.constant 0 : index
    %c0_165 = arith.constant 0 : index
    %321 = vector.load %arg17[%c2_163, %c0_164, %c0_165] : memref<6x8x2048xf32, #tpu.memory_space<vmem>>, vector<1x8x2048xf32>
    %322 = vector.shape_cast %321 : vector<1x8x2048xf32> to vector<8x2048xf32>
    %cst_166 = arith.constant dense<0.000000e+00> : vector<32x2048xf32>
    %323 = tpu.matmul %320, %322, %cst_166 {dimension_numbers = #tpu.dot_dimension_numbers<[1], [0], [0], [1], [0, 0, 1, 1], [], []>} : vector<32x8xf32>, vector<8x2048xf32>, vector<32x2048xf32> -> vector<32x2048xf32>
    %c2_167 = arith.constant 2 : index
    %c0_168 = arith.constant 0 : index
    %c0_169 = arith.constant 0 : index
    %324 = vector.load %arg18[%c2_167, %c0_168, %c0_169] : memref<6x1x2048xf32, #tpu.memory_space<vmem>>, vector<1x1x2048xf32>
    %325 = vector.shape_cast %324 : vector<1x1x2048xf32> to vector<1x2048xf32>
    %326 = vector.broadcast %325 : vector<1x2048xf32> to vector<32x2048xf32>
    %327 = arith.addf %323, %326 : vector<32x2048xf32>
    %cst_170 = arith.constant 0.000000e+00 : f32
    %328 = vector.broadcast %cst_170 : f32 to vector<32x2048xf32>
    %329 = arith.maximumf %327, %328 : vector<32x2048xf32>
    %c2_171 = arith.constant 2 : index
    %c0_172 = arith.constant 0 : index
    %c0_173 = arith.constant 0 : index
    %330 = vector.load %arg19[%c2_171, %c0_172, %c0_173] : memref<6x8x2048xf32, #tpu.memory_space<vmem>>, vector<1x8x2048xf32>
    %331 = vector.shape_cast %330 : vector<1x8x2048xf32> to vector<8x2048xf32>
    %cst_174 = arith.constant dense<0.000000e+00> : vector<32x8xf32>
    %332 = tpu.matmul %329, %331, %cst_174 {dimension_numbers = #tpu.dot_dimension_numbers<[1], [1], [0], [0], [0, 0, 1, 0], [], []>} : vector<32x2048xf32>, vector<8x2048xf32>, vector<32x8xf32> -> vector<32x8xf32>
    %c2_175 = arith.constant 2 : index
    %c0_176 = arith.constant 0 : index
    %c0_177 = arith.constant 0 : index
    %333 = vector.load %arg20[%c2_175, %c0_176, %c0_177] : memref<6x1x8xf32, #tpu.memory_space<vmem>>, vector<1x1x8xf32>
    %334 = vector.shape_cast %333 : vector<1x1x8xf32> to vector<1x8xf32>
    %335 = vector.broadcast %334 : vector<1x8xf32> to vector<32x8xf32>
    %336 = arith.addf %332, %335 : vector<32x8xf32>
    %337 = arith.addf %320, %336 : vector<32x8xf32>
    %c2_178 = arith.constant 2 : index
    %c0_179 = arith.constant 0 : index
    %c0_180 = arith.constant 0 : index
    %338 = vector.load %arg21[%c2_178, %c0_179, %c0_180] : memref<6x1x8xf32, #tpu.memory_space<vmem>>, vector<1x1x8xf32>
    %339 = vector.shape_cast %338 : vector<1x1x8xf32> to vector<1x8xf32>
    %c2_181 = arith.constant 2 : index
    %c0_182 = arith.constant 0 : index
    %c0_183 = arith.constant 0 : index
    %340 = vector.load %arg22[%c2_181, %c0_182, %c0_183] : memref<6x1x8xf32, #tpu.memory_space<vmem>>, vector<1x1x8xf32>
    %341 = vector.shape_cast %340 : vector<1x1x8xf32> to vector<1x8xf32>
    %cst_184 = arith.constant dense<0.000000e+00> : vector<32xf32>
    %342 = vector.multi_reduction <add>, %337, %cst_184 [1] : vector<32x8xf32> to vector<32xf32>
    %343 = vector.shape_cast %342 : vector<32xf32> to vector<32x1xf32>
    %cst_185 = arith.constant 8.000000e+00 : f32
    %344 = vector.broadcast %cst_185 : f32 to vector<32x1xf32>
    %345 = arith.divf %343, %344 : vector<32x1xf32>
    %346 = vector.broadcast %345 : vector<32x1xf32> to vector<32x8xf32>
    %347 = arith.subf %337, %346 : vector<32x8xf32>
    %348 = arith.mulf %347, %347 : vector<32x8xf32>
    %cst_186 = arith.constant dense<0.000000e+00> : vector<32xf32>
    %349 = vector.multi_reduction <add>, %348, %cst_186 [1] : vector<32x8xf32> to vector<32xf32>
    %350 = vector.shape_cast %349 : vector<32xf32> to vector<32x1xf32>
    %cst_187 = arith.constant 8.000000e+00 : f32
    %351 = vector.broadcast %cst_187 : f32 to vector<32x1xf32>
    %352 = arith.divf %350, %351 : vector<32x1xf32>
    %cst_188 = arith.constant 9.99999974E-6 : f32
    %353 = vector.broadcast %cst_188 : f32 to vector<32x1xf32>
    %354 = arith.addf %352, %353 : vector<32x1xf32>
    %355 = math.rsqrt %354 : vector<32x1xf32>
    %356 = vector.broadcast %355 : vector<32x1xf32> to vector<32x8xf32>
    %357 = arith.mulf %347, %356 : vector<32x8xf32>
    %358 = vector.broadcast %339 : vector<1x8xf32> to vector<32x8xf32>
    %359 = arith.mulf %357, %358 : vector<32x8xf32>
    %360 = vector.broadcast %341 : vector<1x8xf32> to vector<32x8xf32>
    %361 = arith.addf %359, %360 : vector<32x8xf32>
    %c3 = arith.constant 3 : index
    %c0_189 = arith.constant 0 : index
    %c0_190 = arith.constant 0 : index
    %362 = vector.load %arg11[%c3, %c0_189, %c0_190] : memref<6x8x24xf32, #tpu.memory_space<vmem>>, vector<1x8x24xf32>
    %363 = vector.shape_cast %362 : vector<1x8x24xf32> to vector<8x24xf32>
    %cst_191 = arith.constant dense<0.000000e+00> : vector<32x24xf32>
    %364 = tpu.matmul %361, %363, %cst_191 {dimension_numbers = #tpu.dot_dimension_numbers<[1], [0], [0], [1], [0, 0, 1, 1], [], []>} : vector<32x8xf32>, vector<8x24xf32>, vector<32x24xf32> -> vector<32x24xf32>
    %c3_192 = arith.constant 3 : index
    %c0_193 = arith.constant 0 : index
    %c0_194 = arith.constant 0 : index
    %365 = vector.load %arg12[%c3_192, %c0_193, %c0_194] : memref<6x1x24xf32, #tpu.memory_space<vmem>>, vector<1x1x24xf32>
    %366 = vector.shape_cast %365 : vector<1x1x24xf32> to vector<1x24xf32>
    %367 = vector.broadcast %366 : vector<1x24xf32> to vector<32x24xf32>
    %368 = arith.addf %364, %367 : vector<32x24xf32>
    %369 = vector.extract_strided_slice %368 {offsets = [0, 0], sizes = [32, 8], strides = [1, 1]} : vector<32x24xf32> to vector<32x8xf32>
    %370 = vector.extract_strided_slice %368 {offsets = [0, 8], sizes = [32, 8], strides = [1, 1]} : vector<32x24xf32> to vector<32x8xf32>
    %371 = vector.extract_strided_slice %368 {offsets = [0, 16], sizes = [32, 8], strides = [1, 1]} : vector<32x24xf32> to vector<32x8xf32>
    %372 = arith.mulf %369, %370 : vector<32x8xf32>
    %c16_i32_195 = arith.constant 16 : i32
    %373 = tpu.dynamic_rotate %370 by %c16_i32_195 dim 0 : vector<32x8xf32>, i32 -> vector<32x8xf32>
    %374 = arith.mulf %369, %373 : vector<32x8xf32>
    %c16_i32_196 = arith.constant 16 : i32
    %375 = tpu.dynamic_rotate %371 by %c16_i32_196 dim 0 : vector<32x8xf32>, i32 -> vector<32x8xf32>
    %376 = tpu.concatenate %372, %374 in 1 : vector<32x8xf32>, vector<32x8xf32> -> vector<32x16xf32>
    %377 = tpu.concatenate %371, %375 in 1 : vector<32x8xf32>, vector<32x8xf32> -> vector<32x16xf32>
    %cst_197 = arith.constant dense<0.000000e+00> : vector<32x8xf32>
    %378 = tpu.matmul %376, %30, %cst_197 {dimension_numbers = #tpu.dot_dimension_numbers<[1], [0], [0], [1], [0, 0, 1, 1], [], []>} : vector<32x16xf32>, vector<16x8xf32>, vector<32x8xf32> -> vector<32x8xf32>
    %cst_198 = arith.constant 0.707106769 : f32
    %379 = vector.broadcast %cst_198 : f32 to vector<32x8xf32>
    %380 = arith.mulf %378, %379 : vector<32x8xf32>
    %381 = vector.extract_strided_slice %380 {offsets = [0, 0], sizes = [32, 4], strides = [1, 1]} : vector<32x8xf32> to vector<32x4xf32>
    %382 = vector.extract_strided_slice %380 {offsets = [0, 4], sizes = [32, 4], strides = [1, 1]} : vector<32x8xf32> to vector<32x4xf32>
    %383 = arith.maximumf %381, %382 : vector<32x4xf32>
    %384 = tpu.concatenate %383, %383 in 1 : vector<32x4xf32>, vector<32x4xf32> -> vector<32x8xf32>
    %385 = arith.subf %380, %384 : vector<32x8xf32>
    %386 = math.exp %385 : vector<32x8xf32>
    %387 = vector.extract_strided_slice %386 {offsets = [0, 0], sizes = [32, 4], strides = [1, 1]} : vector<32x8xf32> to vector<32x4xf32>
    %388 = vector.extract_strided_slice %386 {offsets = [0, 4], sizes = [32, 4], strides = [1, 1]} : vector<32x8xf32> to vector<32x4xf32>
    %389 = arith.addf %387, %388 : vector<32x4xf32>
    %cst_199 = arith.constant 1.000000e+00 : f32
    %390 = vector.broadcast %cst_199 : f32 to vector<32x4xf32>
    %391 = arith.divf %390, %389 : vector<32x4xf32>
    %392 = tpu.concatenate %391, %391 in 1 : vector<32x4xf32>, vector<32x4xf32> -> vector<32x8xf32>
    %393 = arith.mulf %386, %392 : vector<32x8xf32>
    %cst_200 = arith.constant dense<0.000000e+00> : vector<32x16xf32>
    %394 = tpu.matmul %393, %31, %cst_200 {dimension_numbers = #tpu.dot_dimension_numbers<[1], [0], [0], [1], [0, 0, 1, 1], [], []>} : vector<32x8xf32>, vector<8x16xf32>, vector<32x16xf32> -> vector<32x16xf32>
    %395 = arith.mulf %394, %377 : vector<32x16xf32>
    %396 = vector.extract_strided_slice %395 {offsets = [0, 0], sizes = [32, 8], strides = [1, 1]} : vector<32x16xf32> to vector<32x8xf32>
    %397 = vector.extract_strided_slice %395 {offsets = [0, 8], sizes = [32, 8], strides = [1, 1]} : vector<32x16xf32> to vector<32x8xf32>
    %398 = arith.addf %396, %397 : vector<32x8xf32>
    %c3_201 = arith.constant 3 : index
    %c0_202 = arith.constant 0 : index
    %c0_203 = arith.constant 0 : index
    %399 = vector.load %arg13[%c3_201, %c0_202, %c0_203] : memref<6x8x8xf32, #tpu.memory_space<vmem>>, vector<1x8x8xf32>
    %400 = vector.shape_cast %399 : vector<1x8x8xf32> to vector<8x8xf32>
    %cst_204 = arith.constant dense<0.000000e+00> : vector<32x8xf32>
    %401 = tpu.matmul %398, %400, %cst_204 {dimension_numbers = #tpu.dot_dimension_numbers<[1], [0], [0], [1], [0, 0, 1, 1], [], []>} : vector<32x8xf32>, vector<8x8xf32>, vector<32x8xf32> -> vector<32x8xf32>
    %c3_205 = arith.constant 3 : index
    %c0_206 = arith.constant 0 : index
    %c0_207 = arith.constant 0 : index
    %402 = vector.load %arg14[%c3_205, %c0_206, %c0_207] : memref<6x1x8xf32, #tpu.memory_space<vmem>>, vector<1x1x8xf32>
    %403 = vector.shape_cast %402 : vector<1x1x8xf32> to vector<1x8xf32>
    %404 = vector.broadcast %403 : vector<1x8xf32> to vector<32x8xf32>
    %405 = arith.addf %401, %404 : vector<32x8xf32>
    %406 = arith.addf %361, %405 : vector<32x8xf32>
    %c3_208 = arith.constant 3 : index
    %c0_209 = arith.constant 0 : index
    %c0_210 = arith.constant 0 : index
    %407 = vector.load %arg15[%c3_208, %c0_209, %c0_210] : memref<6x1x8xf32, #tpu.memory_space<vmem>>, vector<1x1x8xf32>
    %408 = vector.shape_cast %407 : vector<1x1x8xf32> to vector<1x8xf32>
    %c3_211 = arith.constant 3 : index
    %c0_212 = arith.constant 0 : index
    %c0_213 = arith.constant 0 : index
    %409 = vector.load %arg16[%c3_211, %c0_212, %c0_213] : memref<6x1x8xf32, #tpu.memory_space<vmem>>, vector<1x1x8xf32>
    %410 = vector.shape_cast %409 : vector<1x1x8xf32> to vector<1x8xf32>
    %cst_214 = arith.constant dense<0.000000e+00> : vector<32xf32>
    %411 = vector.multi_reduction <add>, %406, %cst_214 [1] : vector<32x8xf32> to vector<32xf32>
    %412 = vector.shape_cast %411 : vector<32xf32> to vector<32x1xf32>
    %cst_215 = arith.constant 8.000000e+00 : f32
    %413 = vector.broadcast %cst_215 : f32 to vector<32x1xf32>
    %414 = arith.divf %412, %413 : vector<32x1xf32>
    %415 = vector.broadcast %414 : vector<32x1xf32> to vector<32x8xf32>
    %416 = arith.subf %406, %415 : vector<32x8xf32>
    %417 = arith.mulf %416, %416 : vector<32x8xf32>
    %cst_216 = arith.constant dense<0.000000e+00> : vector<32xf32>
    %418 = vector.multi_reduction <add>, %417, %cst_216 [1] : vector<32x8xf32> to vector<32xf32>
    %419 = vector.shape_cast %418 : vector<32xf32> to vector<32x1xf32>
    %cst_217 = arith.constant 8.000000e+00 : f32
    %420 = vector.broadcast %cst_217 : f32 to vector<32x1xf32>
    %421 = arith.divf %419, %420 : vector<32x1xf32>
    %cst_218 = arith.constant 9.99999974E-6 : f32
    %422 = vector.broadcast %cst_218 : f32 to vector<32x1xf32>
    %423 = arith.addf %421, %422 : vector<32x1xf32>
    %424 = math.rsqrt %423 : vector<32x1xf32>
    %425 = vector.broadcast %424 : vector<32x1xf32> to vector<32x8xf32>
    %426 = arith.mulf %416, %425 : vector<32x8xf32>
    %427 = vector.broadcast %408 : vector<1x8xf32> to vector<32x8xf32>
    %428 = arith.mulf %426, %427 : vector<32x8xf32>
    %429 = vector.broadcast %410 : vector<1x8xf32> to vector<32x8xf32>
    %430 = arith.addf %428, %429 : vector<32x8xf32>
    %c3_219 = arith.constant 3 : index
    %c0_220 = arith.constant 0 : index
    %c0_221 = arith.constant 0 : index
    %431 = vector.load %arg17[%c3_219, %c0_220, %c0_221] : memref<6x8x2048xf32, #tpu.memory_space<vmem>>, vector<1x8x2048xf32>
    %432 = vector.shape_cast %431 : vector<1x8x2048xf32> to vector<8x2048xf32>
    %cst_222 = arith.constant dense<0.000000e+00> : vector<32x2048xf32>
    %433 = tpu.matmul %430, %432, %cst_222 {dimension_numbers = #tpu.dot_dimension_numbers<[1], [0], [0], [1], [0, 0, 1, 1], [], []>} : vector<32x8xf32>, vector<8x2048xf32>, vector<32x2048xf32> -> vector<32x2048xf32>
    %c3_223 = arith.constant 3 : index
    %c0_224 = arith.constant 0 : index
    %c0_225 = arith.constant 0 : index
    %434 = vector.load %arg18[%c3_223, %c0_224, %c0_225] : memref<6x1x2048xf32, #tpu.memory_space<vmem>>, vector<1x1x2048xf32>
    %435 = vector.shape_cast %434 : vector<1x1x2048xf32> to vector<1x2048xf32>
    %436 = vector.broadcast %435 : vector<1x2048xf32> to vector<32x2048xf32>
    %437 = arith.addf %433, %436 : vector<32x2048xf32>
    %cst_226 = arith.constant 0.000000e+00 : f32
    %438 = vector.broadcast %cst_226 : f32 to vector<32x2048xf32>
    %439 = arith.maximumf %437, %438 : vector<32x2048xf32>
    %c3_227 = arith.constant 3 : index
    %c0_228 = arith.constant 0 : index
    %c0_229 = arith.constant 0 : index
    %440 = vector.load %arg19[%c3_227, %c0_228, %c0_229] : memref<6x8x2048xf32, #tpu.memory_space<vmem>>, vector<1x8x2048xf32>
    %441 = vector.shape_cast %440 : vector<1x8x2048xf32> to vector<8x2048xf32>
    %cst_230 = arith.constant dense<0.000000e+00> : vector<32x8xf32>
    %442 = tpu.matmul %439, %441, %cst_230 {dimension_numbers = #tpu.dot_dimension_numbers<[1], [1], [0], [0], [0, 0, 1, 0], [], []>} : vector<32x2048xf32>, vector<8x2048xf32>, vector<32x8xf32> -> vector<32x8xf32>
    %c3_231 = arith.constant 3 : index
    %c0_232 = arith.constant 0 : index
    %c0_233 = arith.constant 0 : index
    %443 = vector.load %arg20[%c3_231, %c0_232, %c0_233] : memref<6x1x8xf32, #tpu.memory_space<vmem>>, vector<1x1x8xf32>
    %444 = vector.shape_cast %443 : vector<1x1x8xf32> to vector<1x8xf32>
    %445 = vector.broadcast %444 : vector<1x8xf32> to vector<32x8xf32>
    %446 = arith.addf %442, %445 : vector<32x8xf32>
    %447 = arith.addf %430, %446 : vector<32x8xf32>
    %c3_234 = arith.constant 3 : index
    %c0_235 = arith.constant 0 : index
    %c0_236 = arith.constant 0 : index
    %448 = vector.load %arg21[%c3_234, %c0_235, %c0_236] : memref<6x1x8xf32, #tpu.memory_space<vmem>>, vector<1x1x8xf32>
    %449 = vector.shape_cast %448 : vector<1x1x8xf32> to vector<1x8xf32>
    %c3_237 = arith.constant 3 : index
    %c0_238 = arith.constant 0 : index
    %c0_239 = arith.constant 0 : index
    %450 = vector.load %arg22[%c3_237, %c0_238, %c0_239] : memref<6x1x8xf32, #tpu.memory_space<vmem>>, vector<1x1x8xf32>
    %451 = vector.shape_cast %450 : vector<1x1x8xf32> to vector<1x8xf32>
    %cst_240 = arith.constant dense<0.000000e+00> : vector<32xf32>
    %452 = vector.multi_reduction <add>, %447, %cst_240 [1] : vector<32x8xf32> to vector<32xf32>
    %453 = vector.shape_cast %452 : vector<32xf32> to vector<32x1xf32>
    %cst_241 = arith.constant 8.000000e+00 : f32
    %454 = vector.broadcast %cst_241 : f32 to vector<32x1xf32>
    %455 = arith.divf %453, %454 : vector<32x1xf32>
    %456 = vector.broadcast %455 : vector<32x1xf32> to vector<32x8xf32>
    %457 = arith.subf %447, %456 : vector<32x8xf32>
    %458 = arith.mulf %457, %457 : vector<32x8xf32>
    %cst_242 = arith.constant dense<0.000000e+00> : vector<32xf32>
    %459 = vector.multi_reduction <add>, %458, %cst_242 [1] : vector<32x8xf32> to vector<32xf32>
    %460 = vector.shape_cast %459 : vector<32xf32> to vector<32x1xf32>
    %cst_243 = arith.constant 8.000000e+00 : f32
    %461 = vector.broadcast %cst_243 : f32 to vector<32x1xf32>
    %462 = arith.divf %460, %461 : vector<32x1xf32>
    %cst_244 = arith.constant 9.99999974E-6 : f32
    %463 = vector.broadcast %cst_244 : f32 to vector<32x1xf32>
    %464 = arith.addf %462, %463 : vector<32x1xf32>
    %465 = math.rsqrt %464 : vector<32x1xf32>
    %466 = vector.broadcast %465 : vector<32x1xf32> to vector<32x8xf32>
    %467 = arith.mulf %457, %466 : vector<32x8xf32>
    %468 = vector.broadcast %449 : vector<1x8xf32> to vector<32x8xf32>
    %469 = arith.mulf %467, %468 : vector<32x8xf32>
    %470 = vector.broadcast %451 : vector<1x8xf32> to vector<32x8xf32>
    %471 = arith.addf %469, %470 : vector<32x8xf32>
    %c4 = arith.constant 4 : index
    %c0_245 = arith.constant 0 : index
    %c0_246 = arith.constant 0 : index
    %472 = vector.load %arg11[%c4, %c0_245, %c0_246] : memref<6x8x24xf32, #tpu.memory_space<vmem>>, vector<1x8x24xf32>
    %473 = vector.shape_cast %472 : vector<1x8x24xf32> to vector<8x24xf32>
    %cst_247 = arith.constant dense<0.000000e+00> : vector<32x24xf32>
    %474 = tpu.matmul %471, %473, %cst_247 {dimension_numbers = #tpu.dot_dimension_numbers<[1], [0], [0], [1], [0, 0, 1, 1], [], []>} : vector<32x8xf32>, vector<8x24xf32>, vector<32x24xf32> -> vector<32x24xf32>
    %c4_248 = arith.constant 4 : index
    %c0_249 = arith.constant 0 : index
    %c0_250 = arith.constant 0 : index
    %475 = vector.load %arg12[%c4_248, %c0_249, %c0_250] : memref<6x1x24xf32, #tpu.memory_space<vmem>>, vector<1x1x24xf32>
    %476 = vector.shape_cast %475 : vector<1x1x24xf32> to vector<1x24xf32>
    %477 = vector.broadcast %476 : vector<1x24xf32> to vector<32x24xf32>
    %478 = arith.addf %474, %477 : vector<32x24xf32>
    %479 = vector.extract_strided_slice %478 {offsets = [0, 0], sizes = [32, 8], strides = [1, 1]} : vector<32x24xf32> to vector<32x8xf32>
    %480 = vector.extract_strided_slice %478 {offsets = [0, 8], sizes = [32, 8], strides = [1, 1]} : vector<32x24xf32> to vector<32x8xf32>
    %481 = vector.extract_strided_slice %478 {offsets = [0, 16], sizes = [32, 8], strides = [1, 1]} : vector<32x24xf32> to vector<32x8xf32>
    %482 = arith.mulf %479, %480 : vector<32x8xf32>
    %c16_i32_251 = arith.constant 16 : i32
    %483 = tpu.dynamic_rotate %480 by %c16_i32_251 dim 0 : vector<32x8xf32>, i32 -> vector<32x8xf32>
    %484 = arith.mulf %479, %483 : vector<32x8xf32>
    %c16_i32_252 = arith.constant 16 : i32
    %485 = tpu.dynamic_rotate %481 by %c16_i32_252 dim 0 : vector<32x8xf32>, i32 -> vector<32x8xf32>
    %486 = tpu.concatenate %482, %484 in 1 : vector<32x8xf32>, vector<32x8xf32> -> vector<32x16xf32>
    %487 = tpu.concatenate %481, %485 in 1 : vector<32x8xf32>, vector<32x8xf32> -> vector<32x16xf32>
    %cst_253 = arith.constant dense<0.000000e+00> : vector<32x8xf32>
    %488 = tpu.matmul %486, %30, %cst_253 {dimension_numbers = #tpu.dot_dimension_numbers<[1], [0], [0], [1], [0, 0, 1, 1], [], []>} : vector<32x16xf32>, vector<16x8xf32>, vector<32x8xf32> -> vector<32x8xf32>
    %cst_254 = arith.constant 0.707106769 : f32
    %489 = vector.broadcast %cst_254 : f32 to vector<32x8xf32>
    %490 = arith.mulf %488, %489 : vector<32x8xf32>
    %491 = vector.extract_strided_slice %490 {offsets = [0, 0], sizes = [32, 4], strides = [1, 1]} : vector<32x8xf32> to vector<32x4xf32>
    %492 = vector.extract_strided_slice %490 {offsets = [0, 4], sizes = [32, 4], strides = [1, 1]} : vector<32x8xf32> to vector<32x4xf32>
    %493 = arith.maximumf %491, %492 : vector<32x4xf32>
    %494 = tpu.concatenate %493, %493 in 1 : vector<32x4xf32>, vector<32x4xf32> -> vector<32x8xf32>
    %495 = arith.subf %490, %494 : vector<32x8xf32>
    %496 = math.exp %495 : vector<32x8xf32>
    %497 = vector.extract_strided_slice %496 {offsets = [0, 0], sizes = [32, 4], strides = [1, 1]} : vector<32x8xf32> to vector<32x4xf32>
    %498 = vector.extract_strided_slice %496 {offsets = [0, 4], sizes = [32, 4], strides = [1, 1]} : vector<32x8xf32> to vector<32x4xf32>
    %499 = arith.addf %497, %498 : vector<32x4xf32>
    %cst_255 = arith.constant 1.000000e+00 : f32
    %500 = vector.broadcast %cst_255 : f32 to vector<32x4xf32>
    %501 = arith.divf %500, %499 : vector<32x4xf32>
    %502 = tpu.concatenate %501, %501 in 1 : vector<32x4xf32>, vector<32x4xf32> -> vector<32x8xf32>
    %503 = arith.mulf %496, %502 : vector<32x8xf32>
    %cst_256 = arith.constant dense<0.000000e+00> : vector<32x16xf32>
    %504 = tpu.matmul %503, %31, %cst_256 {dimension_numbers = #tpu.dot_dimension_numbers<[1], [0], [0], [1], [0, 0, 1, 1], [], []>} : vector<32x8xf32>, vector<8x16xf32>, vector<32x16xf32> -> vector<32x16xf32>
    %505 = arith.mulf %504, %487 : vector<32x16xf32>
    %506 = vector.extract_strided_slice %505 {offsets = [0, 0], sizes = [32, 8], strides = [1, 1]} : vector<32x16xf32> to vector<32x8xf32>
    %507 = vector.extract_strided_slice %505 {offsets = [0, 8], sizes = [32, 8], strides = [1, 1]} : vector<32x16xf32> to vector<32x8xf32>
    %508 = arith.addf %506, %507 : vector<32x8xf32>
    %c4_257 = arith.constant 4 : index
    %c0_258 = arith.constant 0 : index
    %c0_259 = arith.constant 0 : index
    %509 = vector.load %arg13[%c4_257, %c0_258, %c0_259] : memref<6x8x8xf32, #tpu.memory_space<vmem>>, vector<1x8x8xf32>
    %510 = vector.shape_cast %509 : vector<1x8x8xf32> to vector<8x8xf32>
    %cst_260 = arith.constant dense<0.000000e+00> : vector<32x8xf32>
    %511 = tpu.matmul %508, %510, %cst_260 {dimension_numbers = #tpu.dot_dimension_numbers<[1], [0], [0], [1], [0, 0, 1, 1], [], []>} : vector<32x8xf32>, vector<8x8xf32>, vector<32x8xf32> -> vector<32x8xf32>
    %c4_261 = arith.constant 4 : index
    %c0_262 = arith.constant 0 : index
    %c0_263 = arith.constant 0 : index
    %512 = vector.load %arg14[%c4_261, %c0_262, %c0_263] : memref<6x1x8xf32, #tpu.memory_space<vmem>>, vector<1x1x8xf32>
    %513 = vector.shape_cast %512 : vector<1x1x8xf32> to vector<1x8xf32>
    %514 = vector.broadcast %513 : vector<1x8xf32> to vector<32x8xf32>
    %515 = arith.addf %511, %514 : vector<32x8xf32>
    %516 = arith.addf %471, %515 : vector<32x8xf32>
    %c4_264 = arith.constant 4 : index
    %c0_265 = arith.constant 0 : index
    %c0_266 = arith.constant 0 : index
    %517 = vector.load %arg15[%c4_264, %c0_265, %c0_266] : memref<6x1x8xf32, #tpu.memory_space<vmem>>, vector<1x1x8xf32>
    %518 = vector.shape_cast %517 : vector<1x1x8xf32> to vector<1x8xf32>
    %c4_267 = arith.constant 4 : index
    %c0_268 = arith.constant 0 : index
    %c0_269 = arith.constant 0 : index
    %519 = vector.load %arg16[%c4_267, %c0_268, %c0_269] : memref<6x1x8xf32, #tpu.memory_space<vmem>>, vector<1x1x8xf32>
    %520 = vector.shape_cast %519 : vector<1x1x8xf32> to vector<1x8xf32>
    %cst_270 = arith.constant dense<0.000000e+00> : vector<32xf32>
    %521 = vector.multi_reduction <add>, %516, %cst_270 [1] : vector<32x8xf32> to vector<32xf32>
    %522 = vector.shape_cast %521 : vector<32xf32> to vector<32x1xf32>
    %cst_271 = arith.constant 8.000000e+00 : f32
    %523 = vector.broadcast %cst_271 : f32 to vector<32x1xf32>
    %524 = arith.divf %522, %523 : vector<32x1xf32>
    %525 = vector.broadcast %524 : vector<32x1xf32> to vector<32x8xf32>
    %526 = arith.subf %516, %525 : vector<32x8xf32>
    %527 = arith.mulf %526, %526 : vector<32x8xf32>
    %cst_272 = arith.constant dense<0.000000e+00> : vector<32xf32>
    %528 = vector.multi_reduction <add>, %527, %cst_272 [1] : vector<32x8xf32> to vector<32xf32>
    %529 = vector.shape_cast %528 : vector<32xf32> to vector<32x1xf32>
    %cst_273 = arith.constant 8.000000e+00 : f32
    %530 = vector.broadcast %cst_273 : f32 to vector<32x1xf32>
    %531 = arith.divf %529, %530 : vector<32x1xf32>
    %cst_274 = arith.constant 9.99999974E-6 : f32
    %532 = vector.broadcast %cst_274 : f32 to vector<32x1xf32>
    %533 = arith.addf %531, %532 : vector<32x1xf32>
    %534 = math.rsqrt %533 : vector<32x1xf32>
    %535 = vector.broadcast %534 : vector<32x1xf32> to vector<32x8xf32>
    %536 = arith.mulf %526, %535 : vector<32x8xf32>
    %537 = vector.broadcast %518 : vector<1x8xf32> to vector<32x8xf32>
    %538 = arith.mulf %536, %537 : vector<32x8xf32>
    %539 = vector.broadcast %520 : vector<1x8xf32> to vector<32x8xf32>
    %540 = arith.addf %538, %539 : vector<32x8xf32>
    %c4_275 = arith.constant 4 : index
    %c0_276 = arith.constant 0 : index
    %c0_277 = arith.constant 0 : index
    %541 = vector.load %arg17[%c4_275, %c0_276, %c0_277] : memref<6x8x2048xf32, #tpu.memory_space<vmem>>, vector<1x8x2048xf32>
    %542 = vector.shape_cast %541 : vector<1x8x2048xf32> to vector<8x2048xf32>
    %cst_278 = arith.constant dense<0.000000e+00> : vector<32x2048xf32>
    %543 = tpu.matmul %540, %542, %cst_278 {dimension_numbers = #tpu.dot_dimension_numbers<[1], [0], [0], [1], [0, 0, 1, 1], [], []>} : vector<32x8xf32>, vector<8x2048xf32>, vector<32x2048xf32> -> vector<32x2048xf32>
    %c4_279 = arith.constant 4 : index
    %c0_280 = arith.constant 0 : index
    %c0_281 = arith.constant 0 : index
    %544 = vector.load %arg18[%c4_279, %c0_280, %c0_281] : memref<6x1x2048xf32, #tpu.memory_space<vmem>>, vector<1x1x2048xf32>
    %545 = vector.shape_cast %544 : vector<1x1x2048xf32> to vector<1x2048xf32>
    %546 = vector.broadcast %545 : vector<1x2048xf32> to vector<32x2048xf32>
    %547 = arith.addf %543, %546 : vector<32x2048xf32>
    %cst_282 = arith.constant 0.000000e+00 : f32
    %548 = vector.broadcast %cst_282 : f32 to vector<32x2048xf32>
    %549 = arith.maximumf %547, %548 : vector<32x2048xf32>
    %c4_283 = arith.constant 4 : index
    %c0_284 = arith.constant 0 : index
    %c0_285 = arith.constant 0 : index
    %550 = vector.load %arg19[%c4_283, %c0_284, %c0_285] : memref<6x8x2048xf32, #tpu.memory_space<vmem>>, vector<1x8x2048xf32>
    %551 = vector.shape_cast %550 : vector<1x8x2048xf32> to vector<8x2048xf32>
    %cst_286 = arith.constant dense<0.000000e+00> : vector<32x8xf32>
    %552 = tpu.matmul %549, %551, %cst_286 {dimension_numbers = #tpu.dot_dimension_numbers<[1], [1], [0], [0], [0, 0, 1, 0], [], []>} : vector<32x2048xf32>, vector<8x2048xf32>, vector<32x8xf32> -> vector<32x8xf32>
    %c4_287 = arith.constant 4 : index
    %c0_288 = arith.constant 0 : index
    %c0_289 = arith.constant 0 : index
    %553 = vector.load %arg20[%c4_287, %c0_288, %c0_289] : memref<6x1x8xf32, #tpu.memory_space<vmem>>, vector<1x1x8xf32>
    %554 = vector.shape_cast %553 : vector<1x1x8xf32> to vector<1x8xf32>
    %555 = vector.broadcast %554 : vector<1x8xf32> to vector<32x8xf32>
    %556 = arith.addf %552, %555 : vector<32x8xf32>
    %557 = arith.addf %540, %556 : vector<32x8xf32>
    %c4_290 = arith.constant 4 : index
    %c0_291 = arith.constant 0 : index
    %c0_292 = arith.constant 0 : index
    %558 = vector.load %arg21[%c4_290, %c0_291, %c0_292] : memref<6x1x8xf32, #tpu.memory_space<vmem>>, vector<1x1x8xf32>
    %559 = vector.shape_cast %558 : vector<1x1x8xf32> to vector<1x8xf32>
    %c4_293 = arith.constant 4 : index
    %c0_294 = arith.constant 0 : index
    %c0_295 = arith.constant 0 : index
    %560 = vector.load %arg22[%c4_293, %c0_294, %c0_295] : memref<6x1x8xf32, #tpu.memory_space<vmem>>, vector<1x1x8xf32>
    %561 = vector.shape_cast %560 : vector<1x1x8xf32> to vector<1x8xf32>
    %cst_296 = arith.constant dense<0.000000e+00> : vector<32xf32>
    %562 = vector.multi_reduction <add>, %557, %cst_296 [1] : vector<32x8xf32> to vector<32xf32>
    %563 = vector.shape_cast %562 : vector<32xf32> to vector<32x1xf32>
    %cst_297 = arith.constant 8.000000e+00 : f32
    %564 = vector.broadcast %cst_297 : f32 to vector<32x1xf32>
    %565 = arith.divf %563, %564 : vector<32x1xf32>
    %566 = vector.broadcast %565 : vector<32x1xf32> to vector<32x8xf32>
    %567 = arith.subf %557, %566 : vector<32x8xf32>
    %568 = arith.mulf %567, %567 : vector<32x8xf32>
    %cst_298 = arith.constant dense<0.000000e+00> : vector<32xf32>
    %569 = vector.multi_reduction <add>, %568, %cst_298 [1] : vector<32x8xf32> to vector<32xf32>
    %570 = vector.shape_cast %569 : vector<32xf32> to vector<32x1xf32>
    %cst_299 = arith.constant 8.000000e+00 : f32
    %571 = vector.broadcast %cst_299 : f32 to vector<32x1xf32>
    %572 = arith.divf %570, %571 : vector<32x1xf32>
    %cst_300 = arith.constant 9.99999974E-6 : f32
    %573 = vector.broadcast %cst_300 : f32 to vector<32x1xf32>
    %574 = arith.addf %572, %573 : vector<32x1xf32>
    %575 = math.rsqrt %574 : vector<32x1xf32>
    %576 = vector.broadcast %575 : vector<32x1xf32> to vector<32x8xf32>
    %577 = arith.mulf %567, %576 : vector<32x8xf32>
    %578 = vector.broadcast %559 : vector<1x8xf32> to vector<32x8xf32>
    %579 = arith.mulf %577, %578 : vector<32x8xf32>
    %580 = vector.broadcast %561 : vector<1x8xf32> to vector<32x8xf32>
    %581 = arith.addf %579, %580 : vector<32x8xf32>
    %c5 = arith.constant 5 : index
    %c0_301 = arith.constant 0 : index
    %c0_302 = arith.constant 0 : index
    %582 = vector.load %arg11[%c5, %c0_301, %c0_302] : memref<6x8x24xf32, #tpu.memory_space<vmem>>, vector<1x8x24xf32>
    %583 = vector.shape_cast %582 : vector<1x8x24xf32> to vector<8x24xf32>
    %cst_303 = arith.constant dense<0.000000e+00> : vector<32x24xf32>
    %584 = tpu.matmul %581, %583, %cst_303 {dimension_numbers = #tpu.dot_dimension_numbers<[1], [0], [0], [1], [0, 0, 1, 1], [], []>} : vector<32x8xf32>, vector<8x24xf32>, vector<32x24xf32> -> vector<32x24xf32>
    %c5_304 = arith.constant 5 : index
    %c0_305 = arith.constant 0 : index
    %c0_306 = arith.constant 0 : index
    %585 = vector.load %arg12[%c5_304, %c0_305, %c0_306] : memref<6x1x24xf32, #tpu.memory_space<vmem>>, vector<1x1x24xf32>
    %586 = vector.shape_cast %585 : vector<1x1x24xf32> to vector<1x24xf32>
    %587 = vector.broadcast %586 : vector<1x24xf32> to vector<32x24xf32>
    %588 = arith.addf %584, %587 : vector<32x24xf32>
    %589 = vector.extract_strided_slice %588 {offsets = [0, 0], sizes = [32, 8], strides = [1, 1]} : vector<32x24xf32> to vector<32x8xf32>
    %590 = vector.extract_strided_slice %588 {offsets = [0, 8], sizes = [32, 8], strides = [1, 1]} : vector<32x24xf32> to vector<32x8xf32>
    %591 = vector.extract_strided_slice %588 {offsets = [0, 16], sizes = [32, 8], strides = [1, 1]} : vector<32x24xf32> to vector<32x8xf32>
    %592 = arith.mulf %589, %590 : vector<32x8xf32>
    %c16_i32_307 = arith.constant 16 : i32
    %593 = tpu.dynamic_rotate %590 by %c16_i32_307 dim 0 : vector<32x8xf32>, i32 -> vector<32x8xf32>
    %594 = arith.mulf %589, %593 : vector<32x8xf32>
    %c16_i32_308 = arith.constant 16 : i32
    %595 = tpu.dynamic_rotate %591 by %c16_i32_308 dim 0 : vector<32x8xf32>, i32 -> vector<32x8xf32>
    %596 = tpu.concatenate %592, %594 in 1 : vector<32x8xf32>, vector<32x8xf32> -> vector<32x16xf32>
    %597 = tpu.concatenate %591, %595 in 1 : vector<32x8xf32>, vector<32x8xf32> -> vector<32x16xf32>
    %cst_309 = arith.constant dense<0.000000e+00> : vector<32x8xf32>
    %598 = tpu.matmul %596, %30, %cst_309 {dimension_numbers = #tpu.dot_dimension_numbers<[1], [0], [0], [1], [0, 0, 1, 1], [], []>} : vector<32x16xf32>, vector<16x8xf32>, vector<32x8xf32> -> vector<32x8xf32>
    %cst_310 = arith.constant 0.707106769 : f32
    %599 = vector.broadcast %cst_310 : f32 to vector<32x8xf32>
    %600 = arith.mulf %598, %599 : vector<32x8xf32>
    %601 = vector.extract_strided_slice %600 {offsets = [0, 0], sizes = [32, 4], strides = [1, 1]} : vector<32x8xf32> to vector<32x4xf32>
    %602 = vector.extract_strided_slice %600 {offsets = [0, 4], sizes = [32, 4], strides = [1, 1]} : vector<32x8xf32> to vector<32x4xf32>
    %603 = arith.maximumf %601, %602 : vector<32x4xf32>
    %604 = tpu.concatenate %603, %603 in 1 : vector<32x4xf32>, vector<32x4xf32> -> vector<32x8xf32>
    %605 = arith.subf %600, %604 : vector<32x8xf32>
    %606 = math.exp %605 : vector<32x8xf32>
    %607 = vector.extract_strided_slice %606 {offsets = [0, 0], sizes = [32, 4], strides = [1, 1]} : vector<32x8xf32> to vector<32x4xf32>
    %608 = vector.extract_strided_slice %606 {offsets = [0, 4], sizes = [32, 4], strides = [1, 1]} : vector<32x8xf32> to vector<32x4xf32>
    %609 = arith.addf %607, %608 : vector<32x4xf32>
    %cst_311 = arith.constant 1.000000e+00 : f32
    %610 = vector.broadcast %cst_311 : f32 to vector<32x4xf32>
    %611 = arith.divf %610, %609 : vector<32x4xf32>
    %612 = tpu.concatenate %611, %611 in 1 : vector<32x4xf32>, vector<32x4xf32> -> vector<32x8xf32>
    %613 = arith.mulf %606, %612 : vector<32x8xf32>
    %cst_312 = arith.constant dense<0.000000e+00> : vector<32x16xf32>
    %614 = tpu.matmul %613, %31, %cst_312 {dimension_numbers = #tpu.dot_dimension_numbers<[1], [0], [0], [1], [0, 0, 1, 1], [], []>} : vector<32x8xf32>, vector<8x16xf32>, vector<32x16xf32> -> vector<32x16xf32>
    %615 = arith.mulf %614, %597 : vector<32x16xf32>
    %616 = vector.extract_strided_slice %615 {offsets = [0, 0], sizes = [32, 8], strides = [1, 1]} : vector<32x16xf32> to vector<32x8xf32>
    %617 = vector.extract_strided_slice %615 {offsets = [0, 8], sizes = [32, 8], strides = [1, 1]} : vector<32x16xf32> to vector<32x8xf32>
    %618 = arith.addf %616, %617 : vector<32x8xf32>
    %c5_313 = arith.constant 5 : index
    %c0_314 = arith.constant 0 : index
    %c0_315 = arith.constant 0 : index
    %619 = vector.load %arg13[%c5_313, %c0_314, %c0_315] : memref<6x8x8xf32, #tpu.memory_space<vmem>>, vector<1x8x8xf32>
    %620 = vector.shape_cast %619 : vector<1x8x8xf32> to vector<8x8xf32>
    %cst_316 = arith.constant dense<0.000000e+00> : vector<32x8xf32>
    %621 = tpu.matmul %618, %620, %cst_316 {dimension_numbers = #tpu.dot_dimension_numbers<[1], [0], [0], [1], [0, 0, 1, 1], [], []>} : vector<32x8xf32>, vector<8x8xf32>, vector<32x8xf32> -> vector<32x8xf32>
    %c5_317 = arith.constant 5 : index
    %c0_318 = arith.constant 0 : index
    %c0_319 = arith.constant 0 : index
    %622 = vector.load %arg14[%c5_317, %c0_318, %c0_319] : memref<6x1x8xf32, #tpu.memory_space<vmem>>, vector<1x1x8xf32>
    %623 = vector.shape_cast %622 : vector<1x1x8xf32> to vector<1x8xf32>
    %624 = vector.broadcast %623 : vector<1x8xf32> to vector<32x8xf32>
    %625 = arith.addf %621, %624 : vector<32x8xf32>
    %626 = arith.addf %581, %625 : vector<32x8xf32>
    %c5_320 = arith.constant 5 : index
    %c0_321 = arith.constant 0 : index
    %c0_322 = arith.constant 0 : index
    %627 = vector.load %arg15[%c5_320, %c0_321, %c0_322] : memref<6x1x8xf32, #tpu.memory_space<vmem>>, vector<1x1x8xf32>
    %628 = vector.shape_cast %627 : vector<1x1x8xf32> to vector<1x8xf32>
    %c5_323 = arith.constant 5 : index
    %c0_324 = arith.constant 0 : index
    %c0_325 = arith.constant 0 : index
    %629 = vector.load %arg16[%c5_323, %c0_324, %c0_325] : memref<6x1x8xf32, #tpu.memory_space<vmem>>, vector<1x1x8xf32>
    %630 = vector.shape_cast %629 : vector<1x1x8xf32> to vector<1x8xf32>
    %cst_326 = arith.constant dense<0.000000e+00> : vector<32xf32>
    %631 = vector.multi_reduction <add>, %626, %cst_326 [1] : vector<32x8xf32> to vector<32xf32>
    %632 = vector.shape_cast %631 : vector<32xf32> to vector<32x1xf32>
    %cst_327 = arith.constant 8.000000e+00 : f32
    %633 = vector.broadcast %cst_327 : f32 to vector<32x1xf32>
    %634 = arith.divf %632, %633 : vector<32x1xf32>
    %635 = vector.broadcast %634 : vector<32x1xf32> to vector<32x8xf32>
    %636 = arith.subf %626, %635 : vector<32x8xf32>
    %637 = arith.mulf %636, %636 : vector<32x8xf32>
    %cst_328 = arith.constant dense<0.000000e+00> : vector<32xf32>
    %638 = vector.multi_reduction <add>, %637, %cst_328 [1] : vector<32x8xf32> to vector<32xf32>
    %639 = vector.shape_cast %638 : vector<32xf32> to vector<32x1xf32>
    %cst_329 = arith.constant 8.000000e+00 : f32
    %640 = vector.broadcast %cst_329 : f32 to vector<32x1xf32>
    %641 = arith.divf %639, %640 : vector<32x1xf32>
    %cst_330 = arith.constant 9.99999974E-6 : f32
    %642 = vector.broadcast %cst_330 : f32 to vector<32x1xf32>
    %643 = arith.addf %641, %642 : vector<32x1xf32>
    %644 = math.rsqrt %643 : vector<32x1xf32>
    %645 = vector.broadcast %644 : vector<32x1xf32> to vector<32x8xf32>
    %646 = arith.mulf %636, %645 : vector<32x8xf32>
    %647 = vector.broadcast %628 : vector<1x8xf32> to vector<32x8xf32>
    %648 = arith.mulf %646, %647 : vector<32x8xf32>
    %649 = vector.broadcast %630 : vector<1x8xf32> to vector<32x8xf32>
    %650 = arith.addf %648, %649 : vector<32x8xf32>
    %c5_331 = arith.constant 5 : index
    %c0_332 = arith.constant 0 : index
    %c0_333 = arith.constant 0 : index
    %651 = vector.load %arg17[%c5_331, %c0_332, %c0_333] : memref<6x8x2048xf32, #tpu.memory_space<vmem>>, vector<1x8x2048xf32>
    %652 = vector.shape_cast %651 : vector<1x8x2048xf32> to vector<8x2048xf32>
    %cst_334 = arith.constant dense<0.000000e+00> : vector<32x2048xf32>
    %653 = tpu.matmul %650, %652, %cst_334 {dimension_numbers = #tpu.dot_dimension_numbers<[1], [0], [0], [1], [0, 0, 1, 1], [], []>} : vector<32x8xf32>, vector<8x2048xf32>, vector<32x2048xf32> -> vector<32x2048xf32>
    %c5_335 = arith.constant 5 : index
    %c0_336 = arith.constant 0 : index
    %c0_337 = arith.constant 0 : index
    %654 = vector.load %arg18[%c5_335, %c0_336, %c0_337] : memref<6x1x2048xf32, #tpu.memory_space<vmem>>, vector<1x1x2048xf32>
    %655 = vector.shape_cast %654 : vector<1x1x2048xf32> to vector<1x2048xf32>
    %656 = vector.broadcast %655 : vector<1x2048xf32> to vector<32x2048xf32>
    %657 = arith.addf %653, %656 : vector<32x2048xf32>
    %cst_338 = arith.constant 0.000000e+00 : f32
    %658 = vector.broadcast %cst_338 : f32 to vector<32x2048xf32>
    %659 = arith.maximumf %657, %658 : vector<32x2048xf32>
    %c5_339 = arith.constant 5 : index
    %c0_340 = arith.constant 0 : index
    %c0_341 = arith.constant 0 : index
    %660 = vector.load %arg19[%c5_339, %c0_340, %c0_341] : memref<6x8x2048xf32, #tpu.memory_space<vmem>>, vector<1x8x2048xf32>
    %661 = vector.shape_cast %660 : vector<1x8x2048xf32> to vector<8x2048xf32>
    %cst_342 = arith.constant dense<0.000000e+00> : vector<32x8xf32>
    %662 = tpu.matmul %659, %661, %cst_342 {dimension_numbers = #tpu.dot_dimension_numbers<[1], [1], [0], [0], [0, 0, 1, 0], [], []>} : vector<32x2048xf32>, vector<8x2048xf32>, vector<32x8xf32> -> vector<32x8xf32>
    %c5_343 = arith.constant 5 : index
    %c0_344 = arith.constant 0 : index
    %c0_345 = arith.constant 0 : index
    %663 = vector.load %arg20[%c5_343, %c0_344, %c0_345] : memref<6x1x8xf32, #tpu.memory_space<vmem>>, vector<1x1x8xf32>
    %664 = vector.shape_cast %663 : vector<1x1x8xf32> to vector<1x8xf32>
    %665 = vector.broadcast %664 : vector<1x8xf32> to vector<32x8xf32>
    %666 = arith.addf %662, %665 : vector<32x8xf32>
    %667 = arith.addf %650, %666 : vector<32x8xf32>
    %c5_346 = arith.constant 5 : index
    %c0_347 = arith.constant 0 : index
    %c0_348 = arith.constant 0 : index
    %668 = vector.load %arg21[%c5_346, %c0_347, %c0_348] : memref<6x1x8xf32, #tpu.memory_space<vmem>>, vector<1x1x8xf32>
    %669 = vector.shape_cast %668 : vector<1x1x8xf32> to vector<1x8xf32>
    %c5_349 = arith.constant 5 : index
    %c0_350 = arith.constant 0 : index
    %c0_351 = arith.constant 0 : index
    %670 = vector.load %arg22[%c5_349, %c0_350, %c0_351] : memref<6x1x8xf32, #tpu.memory_space<vmem>>, vector<1x1x8xf32>
    %671 = vector.shape_cast %670 : vector<1x1x8xf32> to vector<1x8xf32>
    %cst_352 = arith.constant dense<0.000000e+00> : vector<32xf32>
    %672 = vector.multi_reduction <add>, %667, %cst_352 [1] : vector<32x8xf32> to vector<32xf32>
    %673 = vector.shape_cast %672 : vector<32xf32> to vector<32x1xf32>
    %cst_353 = arith.constant 8.000000e+00 : f32
    %674 = vector.broadcast %cst_353 : f32 to vector<32x1xf32>
    %675 = arith.divf %673, %674 : vector<32x1xf32>
    %676 = vector.broadcast %675 : vector<32x1xf32> to vector<32x8xf32>
    %677 = arith.subf %667, %676 : vector<32x8xf32>
    %678 = arith.mulf %677, %677 : vector<32x8xf32>
    %cst_354 = arith.constant dense<0.000000e+00> : vector<32xf32>
    %679 = vector.multi_reduction <add>, %678, %cst_354 [1] : vector<32x8xf32> to vector<32xf32>
    %680 = vector.shape_cast %679 : vector<32xf32> to vector<32x1xf32>
    %cst_355 = arith.constant 8.000000e+00 : f32
    %681 = vector.broadcast %cst_355 : f32 to vector<32x1xf32>
    %682 = arith.divf %680, %681 : vector<32x1xf32>
    %cst_356 = arith.constant 9.99999974E-6 : f32
    %683 = vector.broadcast %cst_356 : f32 to vector<32x1xf32>
    %684 = arith.addf %682, %683 : vector<32x1xf32>
    %685 = math.rsqrt %684 : vector<32x1xf32>
    %686 = vector.broadcast %685 : vector<32x1xf32> to vector<32x8xf32>
    %687 = arith.mulf %677, %686 : vector<32x8xf32>
    %688 = vector.broadcast %669 : vector<1x8xf32> to vector<32x8xf32>
    %689 = arith.mulf %687, %688 : vector<32x8xf32>
    %690 = vector.broadcast %671 : vector<1x8xf32> to vector<32x8xf32>
    %691 = arith.addf %689, %690 : vector<32x8xf32>
    %cst_357 = arith.constant 0.000000e+00 : f32
    %692 = vector.broadcast %cst_357 : f32 to vector<32x8xf32>
    %693 = arith.maximumf %691, %692 : vector<32x8xf32>
    %c0_358 = arith.constant 0 : index
    %c0_359 = arith.constant 0 : index
    %694 = vector.load %arg23[%c0_358, %c0_359] : memref<32x8xf32, #tpu.memory_space<vmem>>, vector<32x8xf32>
    tpu.vector_store %arg23[%c0_358, %c0_359], %693 {strides = array<i32>} : memref<32x8xf32, #tpu.memory_space<vmem>>, vector<32x8xf32>,
    return
  }
  func.func @transform_0(%arg0: i32) -> (i32, i32) {
    %c0_i32 = arith.constant 0 : i32
    %c0_i32_0 = arith.constant 0 : i32
    %c0_i32_1 = arith.constant 0 : i32
    return %c0_i32, %c0_i32_0 : i32, i32
  }
  func.func @transform_1(%arg0: i32) -> (i32, i32) {
    %c0_i32 = arith.constant 0 : i32
    %c0_i32_0 = arith.constant 0 : i32
    %c0_i32_1 = arith.constant 0 : i32
    return %c0_i32, %c0_i32_0 : i32, i32
  }
  func.func @transform_2(%arg0: i32) -> (i32, i32) {
    %c0_i32 = arith.constant 0 : i32
    %c0_i32_0 = arith.constant 0 : i32
    %c0_i32_1 = arith.constant 0 : i32
    return %c0_i32, %c0_i32_0 : i32, i32
  }
  func.func @transform_3(%arg0: i32) -> (i32, i32) {
    %c0_i32 = arith.constant 0 : i32
    %c0_i32_0 = arith.constant 0 : i32
    %c0_i32_1 = arith.constant 0 : i32
    return %c0_i32, %c0_i32_0 : i32, i32
  }
  func.func @transform_4(%arg0: i32) -> (i32, i32) {
    %c0_i32 = arith.constant 0 : i32
    %c0_i32_0 = arith.constant 0 : i32
    %c0_i32_1 = arith.constant 0 : i32
    return %c0_i32, %c0_i32_0 : i32, i32
  }
  func.func @transform_5(%arg0: i32) -> (i32, i32) {
    %c0_i32 = arith.constant 0 : i32
    %c0_i32_0 = arith.constant 0 : i32
    %c0_i32_1 = arith.constant 0 : i32
    return %c0_i32, %c0_i32_0 : i32, i32
  }
  func.func @transform_6(%arg0: i32) -> (i32, i32) {
    %c0_i32 = arith.constant 0 : i32
    %c0_i32_0 = arith.constant 0 : i32
    %c0_i32_1 = arith.constant 0 : i32
    return %c0_i32, %c0_i32_0 : i32, i32
  }
  func.func @transform_7(%arg0: i32) -> (i32, i32) {
    %c0_i32 = arith.constant 0 : i32
    %c0_i32_0 = arith.constant 0 : i32
    %c0_i32_1 = arith.constant 0 : i32
    return %c0_i32, %c0_i32_0 : i32, i32
  }
  func.func @transform_8(%arg0: i32) -> (i32, i32) {
    %c0_i32 = arith.constant 0 : i32
    %c0_i32_0 = arith.constant 0 : i32
    %c0_i32_1 = arith.constant 0 : i32
    return %c0_i32, %c0_i32_0 : i32, i32
  }
  func.func @transform_9(%arg0: i32) -> (i32, i32) {
    %c0_i32 = arith.constant 0 : i32
    %c0_i32_0 = arith.constant 0 : i32
    %c0_i32_1 = arith.constant 0 : i32
    return %c0_i32, %c0_i32_0 : i32, i32
  }
  func.func @transform_10(%arg0: i32) -> (i32, i32, i32) {
    %c0_i32 = arith.constant 0 : i32
    %c0_i32_0 = arith.constant 0 : i32
    %c0_i32_1 = arith.constant 0 : i32
    %c0_i32_2 = arith.constant 0 : i32
    return %c0_i32, %c0_i32_0, %c0_i32_1 : i32, i32, i32
  }
  func.func @transform_11(%arg0: i32) -> (i32, i32, i32) {
    %c0_i32 = arith.constant 0 : i32
    %c0_i32_0 = arith.constant 0 : i32
    %c0_i32_1 = arith.constant 0 : i32
    %c0_i32_2 = arith.constant 0 : i32
    return %c0_i32, %c0_i32_0, %c0_i32_1 : i32, i32, i32
  }
  func.func @transform_12(%arg0: i32) -> (i32, i32, i32) {
    %c0_i32 = arith.constant 0 : i32
    %c0_i32_0 = arith.constant 0 : i32
    %c0_i32_1 = arith.constant 0 : i32
    %c0_i32_2 = arith.constant 0 : i32
    return %c0_i32, %c0_i32_0, %c0_i32_1 : i32, i32, i32
  }
  func.func @transform_13(%arg0: i32) -> (i32, i32, i32) {
    %c0_i32 = arith.constant 0 : i32
    %c0_i32_0 = arith.constant 0 : i32
    %c0_i32_1 = arith.constant 0 : i32
    %c0_i32_2 = arith.constant 0 : i32
    return %c0_i32, %c0_i32_0, %c0_i32_1 : i32, i32, i32
  }
  func.func @transform_14(%arg0: i32) -> (i32, i32, i32) {
    %c0_i32 = arith.constant 0 : i32
    %c0_i32_0 = arith.constant 0 : i32
    %c0_i32_1 = arith.constant 0 : i32
    %c0_i32_2 = arith.constant 0 : i32
    return %c0_i32, %c0_i32_0, %c0_i32_1 : i32, i32, i32
  }
  func.func @transform_15(%arg0: i32) -> (i32, i32, i32) {
    %c0_i32 = arith.constant 0 : i32
    %c0_i32_0 = arith.constant 0 : i32
    %c0_i32_1 = arith.constant 0 : i32
    %c0_i32_2 = arith.constant 0 : i32
    return %c0_i32, %c0_i32_0, %c0_i32_1 : i32, i32, i32
  }
  func.func @transform_16(%arg0: i32) -> (i32, i32, i32) {
    %c0_i32 = arith.constant 0 : i32
    %c0_i32_0 = arith.constant 0 : i32
    %c0_i32_1 = arith.constant 0 : i32
    %c0_i32_2 = arith.constant 0 : i32
    return %c0_i32, %c0_i32_0, %c0_i32_1 : i32, i32, i32
  }
  func.func @transform_17(%arg0: i32) -> (i32, i32, i32) {
    %c0_i32 = arith.constant 0 : i32
    %c0_i32_0 = arith.constant 0 : i32
    %c0_i32_1 = arith.constant 0 : i32
    %c0_i32_2 = arith.constant 0 : i32
    return %c0_i32, %c0_i32_0, %c0_i32_1 : i32, i32, i32
  }
  func.func @transform_18(%arg0: i32) -> (i32, i32, i32) {
    %c0_i32 = arith.constant 0 : i32
    %c0_i32_0 = arith.constant 0 : i32
    %c0_i32_1 = arith.constant 0 : i32
    %c0_i32_2 = arith.constant 0 : i32
    return %c0_i32, %c0_i32_0, %c0_i32_1 : i32, i32, i32
  }
  func.func @transform_19(%arg0: i32) -> (i32, i32, i32) {
    %c0_i32 = arith.constant 0 : i32
    %c0_i32_0 = arith.constant 0 : i32
    %c0_i32_1 = arith.constant 0 : i32
    %c0_i32_2 = arith.constant 0 : i32
    return %c0_i32, %c0_i32_0, %c0_i32_1 : i32, i32, i32
  }
  func.func @transform_20(%arg0: i32) -> (i32, i32, i32) {
    %c0_i32 = arith.constant 0 : i32
    %c0_i32_0 = arith.constant 0 : i32
    %c0_i32_1 = arith.constant 0 : i32
    %c0_i32_2 = arith.constant 0 : i32
    return %c0_i32, %c0_i32_0, %c0_i32_1 : i32, i32, i32
  }
  func.func @transform_21(%arg0: i32) -> (i32, i32, i32) {
    %c0_i32 = arith.constant 0 : i32
    %c0_i32_0 = arith.constant 0 : i32
    %c0_i32_1 = arith.constant 0 : i32
    %c0_i32_2 = arith.constant 0 : i32
    return %c0_i32, %c0_i32_0, %c0_i32_1 : i32, i32, i32
  }
  func.func @transform_22(%arg0: i32) -> (i32, i32) {
    %c0_i32 = arith.constant 0 : i32
    %c0_i32_0 = arith.constant 0 : i32
    %c0_i32_1 = arith.constant 0 : i32
    return %c0_i32, %c0_i32_0 : i32, i32
  }
}

</mosaic_0001>

<bundles_post_ra>
// kernel: down_t_sampling_forward.1
= control target key start
LH: loop header
LB: loop body
LE: loop exit
PB: predicated region body
PF: predicated region fallthrough
CT: control target
= control target key end

     0   :  { %s15628_s0 = inlined_call_operand.vmem [shape: f32[32,36], index: 0, kind: input, shape index: {}]   ;;  %s15629_s1 = inlined_call_operand.vmem [shape: f32[36,8], index: 1, kind: input, shape index: {}]   ;;  %s15630_s2 = inlined_call_operand.vmem [shape: f32[1,8], index: 2, kind: input, shape index: {}]   ;;  %s15631_s3 = inlined_call_operand.vmem [shape: f32[1,8], index: 3, kind: input, shape index: {}]   ;;  %s15632_s4 = inlined_call_operand.hbm [shape: f32[32,72], index: 4, kind: input, shape index: {}]   ;;  %s15633_s5 = inlined_call_operand.vmem [shape: f32[72,8], index: 5, kind: input, shape index: {}]   ;;  %s15634_s6 = inlined_call_operand.vmem [shape: f32[1,8], index: 6, kind: input, shape index: {}]   ;;  %s15635_s7 = inlined_call_operand.vmem [shape: f32[1,8], index: 7, kind: input, shape index: {}]   ;;  %s15636_s8 = inlined_call_operand.hbm [shape: f32[16,8], index: 8, kind: input, shape index: {}]   ;;  %s15637_s9 = inlined_call_operand.hbm [shape: f32[8,16], index: 9, kind: input, shape index: {}]   ;;  %s15638_s10 = inlined_call_operand.vmem [shape: f32[6,8,24], index: 10, kind: input, shape index: {}]   ;;  %s15639_s11 = inlined_call_operand.vmem [shape: f32[6,1,24], index: 11, kind: input, shape index: {}]   ;;  %s15640_s12 = inlined_call_operand.vmem [shape: f32[6,8,8], index: 12, kind: input, shape index: {}]   ;;  %s15641_s13 = inlined_call_operand.vmem [shape: f32[6,1,8], index: 13, kind: input, shape index: {}]   ;;  %s15642_s14 = inlined_call_operand.vmem [shape: f32[6,1,8], index: 14, kind: input, shape index: {}]   ;;  %s15643_s15 = inlined_call_operand.vmem [shape: f32[6,1,8], index: 15, kind: input, shape index: {}]   ;;  %s15644_s16 = inlined_call_operand.vmem [shape: f32[6,8,2048], index: 16, kind: input, shape index: {}]   ;;  %s15645_s17 = inlined_call_operand.vmem [shape: f32[6,1,2048], index: 17, kind: input, shape index: {}]   ;;  %s15646_s18 = inlined_call_operand.vmem [shape: f32[6,8,2048], index: 18, kind: input, shape index: {}]   ;;  %s15647_s19 = inlined_call_operand.vmem [shape: f32[6,1,8], index: 19, kind: input, shape index: {}]   ;;  %s15648_s20 = inlined_call_operand.hbm [shape: f32[6,1,8], index: 20, kind: input, shape index: {}]   ;;  %s15649_s21 = inlined_call_operand.hbm [shape: f32[6,1,8], index: 21, kind: input, shape index: {}]   ;;  %s15650_s22 = inlined_call_operand.hbm [shape: f32[32,8], index: 22, kind: output, shape index: {}]  }
   0x1   :  { %15654 = sst [smem:[#allocation16_spill]] %s15628_s0 }
   0x2   :  { %15655 = sst [smem:[#allocation17_spill]] %s15629_s1 }
   0x3   :  { %15656 = sst [smem:[#allocation18_spill]] %s15630_s2 }
   0x4   :  { %15657 = sst [smem:[#allocation19_spill]] %s15631_s3 }
   0x5   :  { %15658 = sst [smem:[#allocation20_spill]] %s15632_s4 }
   0x6   :  { %15659 = sst [smem:[#allocation21_spill]] %s15633_s5 }
   0x7   :  { %15660 = sst [smem:[#allocation22_spill]] %s15634_s6 }
   0x8   :  { %27 = vsyncpa [#allocation3], 0 }
   0x9   :  { %28 = vsyncpa [#allocation6], 0 }
   0xa   :  { %29 = vsyncpa [#allocation9], 0 }
   0xb   :  { %30 = vsyncpa [#allocation4], 0  ;;  %s62_s29 = sshll.u32 %s15636_s8, 4  ;;  %s12061_s30 = smov [#allocation5]   ;;  %s63_s29 = int_to_ptr.hbm [resolvable:$true] %s62_s29 }
   0xc   :  { %s64_s4 = sshll.u32 %s12061_s30, 4  ;;  %s106_s1 = sshll.u32 %s15648_s20, 4  ;;  %s65_s4 = int_to_ptr.vmem [resolvable:$true] %s64_s4  ;;  %s107_s1 = int_to_ptr.hbm [resolvable:$true] %s106_s1 }
   0xd   :  { %s12062_s5 = smov 128   ;;  %s12063_s24 = smov 8  }
   0xe   :  { %70 = dma.hbm_to_vmem [thread:$0]  %s63_s29, 256, %s65_s4, [#allocation6], %s12062_s5, %s12062_s5, %s12063_s24  }
   0xf   :  { %s12064_s6 = smov [#allocation8]   ;;  %s12065_s26 = smov 16  }
  0x10   :  { %s108_s25 = sshll.u32 %s12064_s6, 4  ;;  %s12066_s8 = smov 1   ;;  %s109_s25 = int_to_ptr.vmem [resolvable:$true] %s108_s25 }
  0x11   :  { %114 = dma.hbm_to_vmem [thread:$0]  %s107_s1, 96, %s109_s25, [#allocation9], %s12065_s26, %s12065_s26, %s12066_s8  }
  0x12   :  { %s15661_s3 = sld [smem:[#allocation20_spill]]  ;;  %s12067_s20 = smov [#allocation2]  }
  0x13   :  { %s45_s30 = sshll.u32 %s12067_s20, 4  ;;  %s76_s29 = sshll.u32 %s15637_s9, 4  ;;  %s46_s30 = int_to_ptr.vmem [resolvable:$true] %s45_s30  ;;  %s77_s29 = int_to_ptr.hbm [resolvable:$true] %s76_s29 }
  0x14   :  { %s12068_s4 = smov [#allocation7]   ;;  %s119_s2 = sshll.u32 %s15649_s21, 4  ;;  %s120_s2 = int_to_ptr.hbm [resolvable:$true] %s119_s2 }
  0x15   :  { %s78_s6 = sshll.u32 %s12068_s4, 4  ;;  %s12069_s27 = smov [#allocation10]   ;;  %s79_s6 = int_to_ptr.vmem [resolvable:$true] %s78_s6 }
  0x16   :  { %81 = dma.hbm_to_vmem [thread:$0]  %s77_s29, 128, %s79_s6, [#allocation6]  }
  0x18   :  { %s43_s28 = sshll.u32 %s15661_s3, 4  ;;  %s121_s3 = sshll.u32 %s12069_s27, 4  ;;  %s44_s28 = int_to_ptr.hbm [resolvable:$true] %s43_s28  ;;  %s122_s3 = int_to_ptr.vmem [resolvable:$true] %s121_s3 }
  0x19   :  { %51 = dma.hbm_to_vmem [thread:$0]  %s44_s28, 512, %s46_s30, [#allocation3], %s12062_s5, %s12062_s5, %s12063_s24  }
  0x1a   :  { %127 = dma.hbm_to_vmem [thread:$0]  %s120_s2, 96, %s122_s3, [#allocation9], %s12065_s26, %s12065_s26, %s12066_s8  }
  0x1b   :  { %12053 = dma.done.wait [#allocation3], 512  }
  0x1c   :  { %12054 = vsyncadd [#allocation3], 4294966784 }
  0x1d   :  { %12055 = dma.done.wait [#allocation6], 384  }
  0x1e   :  { %12056 = vsyncadd [#allocation6], 4294966912 }
  0x1f   :  { %12057 = dma.done.wait [#allocation9], 192  }
  0x20   :  { %12058 = vsyncadd [#allocation9], 4294967104  ;;  %vm170_vm0 = vcmask 1043456   ;;  %s15662_s20 = sld [smem:[#allocation17_spill]]  ;;  %vm157_vm1 = vcmask 293888   ;;  %v227_v15 = vlaneseq  ;;  %s12070_s6 = smov 32  }
  0x21   :  { %s15663_s2 = sld [smem:[#allocation16_spill]]  ;;  %s12071_s1 = smov 64   ;;  %vm390_vm7 = vcmask 64512   ;;  %vm395_vm8 = vcmask 130048   ;;  %vm400_vm9 = vcmask 195584   ;;  %vm405_vm10 = vcmask 261120  }
  0x22   :  { %s15664_s23 = sld [smem:[#allocation18_spill]]  ;;  %v12262_v18 = vshrl.u32 %v227_v15, 7  ;;  %s12072_s25 = smov 56   ;;  %vm410_vm11 = vcmask 326656   ;;  %vm415_vm12 = vcmask 392192   ;;  %vm420_vm13 = vcmask 457728  }
  0x23   :  { %s15665_s4 = sld [smem:[#allocation19_spill]]  ;;  %s12074_s27 = smov 24   ;;  %vm425_vm14 = vcmask 523264   ;;  %vm447_vm15 = vcmask 588800  }
  0x24   :  { %vm247_vm2 = vcmp.lt.s32.totalorder %v12262_v18, 3  ;;  %vm238_vm3 = vcmp.lt.s32.totalorder %v12262_v18, 4  ;;  %vm265_vm4 = vcmp.lt.s32.totalorder %v12262_v18, 7  ;;  %vm256_vm5 = vcmp.lt.s32.totalorder %v12262_v18, 1  ;;  %s12075_s3 = smov 48   ;;  %s15666_s28 = sld [smem:[#allocation21_spill]] }
  0x25   :  { %vm229_vm6 = vcmp.lt.s32.totalorder %v12262_v18, 5  ;;  %s15667_s0 = sld [smem:[#allocation22_spill]] }
  0x26   :  { %v156_v0 = vld [vmem:[%s15662_s20 + $0x20] sm:$0xf]  ;;  %v155_v1 = vld [vmem:[%s15662_s20 + $0x18] sm:$0xff]  ;;  %v154_v2 = vld [vmem:[%s15662_s20 + $0x10] sm:$0xff] }
  0x27   :  { %10937 = vmatpush.msk.msra.mxu0 %vm170_vm0, %v156_v0  ;;  %v153_v3 = vld [vmem:[%s15662_s20 + $0x8] sm:$0xff]  ;;  %v152_v4 = vld [vmem:[%s15662_s20] sm:$0xff]  ;;  %v150_v7 = vld [vmem:[%s15663_s2 + $0x10] sm:$0xff]  ;;  %vm707_vm0 = vcmask 31744  }
  0x28   :  { %v148_v5 = vld [vmem:[%s15663_s2] sm:$0xff]  ;;  %v149_v6 = vld [vmem:[%s15663_s2 + $0x8] sm:$0xff]  ;;  %v151_v8 = vld [vmem:[%s15663_s2 + $0x18] sm:$0xff]  ;;  %s12073_s2 = smov 40  }
  0x29   :  { %186 = vmatpush.msra.mxu0 %v155_v1  ;;  %v11655_v9 = vld [vmem:[%s15664_s23] ss:$0 sm:$0xff] }
  0x2a   :  { %v12255_v10 = vld [vmem:[%s15665_s4] ss:$0 sm:$0xff]  ;;  %v444_v15 = vld [vmem:[%s15666_s28 + $0x30] sm:$0xff]  ;;  %s12076_s4 = smov 120  }
  0x2b   :  { %187 = vmatpush.msra.mxu0 %v154_v2 }
  0x2d   :  { %188 = vmatpush.msra.mxu0 %v153_v3 }
  0x2f   :  { %189 = vmatpush.msra.mxu0 %v152_v4 }
  0x30   :  { %10938 = vmatmul.msk.f32.vlgmr.msra.gmra.mxu0 %vm157_vm1, %v148_v5 }
  0x38   :  { %10939 = vmatmul.msk.f32.gmra.mxu0 %vm157_vm1, %v149_v6 }
  0x40   :  { %10940 = vmatmul.msk.f32.gmra.mxu0 %vm157_vm1, %v150_v7 }
  0x48   :  { %10941 = vmatmul.msk.f32.gmra.mxu0 %vm157_vm1, %v151_v8 }
  0xad   :  { %v191_v11 = vpop.f32.mrf.mxu0 }
  0xae   :  { %v207_v12 = vmul.f32 %v11655_v9, %v191_v11 }
  0xb0   :  { %v215_v13 = vadd.f32 %v12255_v10, %v207_v12 }
  0xb2   :  { %v12258_v14 = vmax.f32 %v215_v13, 0.0  ;;  %v446_v13 = vld [vmem:[%s15666_s28 + $0x40] sm:$0xff] }
  0xb3   :  { %467 = vmatpush.msra.mxu1 %v446_v13 }
  0xb4   :  { %322 = vrot.lane.b32.xlu1 %v12258_v14, %s12070_s6  ;;  %v243_v21 = vrot.slane %v12258_v14, 5  ;;  %v234_v23 = vrot.slane %v12258_v14, 4  ;;  %v261_v30 = vrot.slane %v12258_v14, 1  ;;  %v252_v34 = vrot.slane %v12258_v14, 7 }
  0xb5   :  { %v194_v16 = vpop.f32.mrf.mxu0  ;;  %v223_v38 = vrot.slane %v12258_v14, 3  ;;  %v445_v14 = vld [vmem:[%s15666_s28 + $0x38] sm:$0xff] }
  0xb6   :  { %v208_v17 = vmul.f32 %v11655_v9, %v194_v16  ;;  %468 = vmatpush.msra.mxu1 %v445_v14  ;;  %v443_v16 = vld [vmem:[%s15666_s28 + $0x28] sm:$0xff] }
  0xb8   :  { %v216_v19 = vadd.f32 %v12255_v10, %v208_v17  ;;  %469 = vmatpush.msra.mxu1 %v444_v15 }
  0xba   :  { %v220_v20 = vmax.f32 %v216_v19, 0.0  ;;  %470 = vmatpush.msra.mxu1 %v443_v16  ;;  %v442_v19 = vld [vmem:[%s15666_s28 + $0x20] sm:$0xff] }
  0xbc   :  { %324 = vrot.lane.b32.xlu2 %v220_v20, %s12070_s6  ;;  %v244_v22 = vrot.slane %v220_v20, 5  ;;  %v235_v24 = vrot.slane %v220_v20, 4  ;;  %v262_v29 = vrot.slane %v220_v20, 1  ;;  %v253_v32 = vrot.slane %v220_v20, 7  ;;  %471 = vmatpush.msra.mxu1 %v442_v19 }
  0xbd   :  { %v197_v25 = vpop.f32.mrf.mxu0  ;;  %v224_v37 = vrot.slane %v220_v20, 3 }
  0xbe   :  { %v209_v26 = vmul.f32 %v11655_v9, %v197_v25  ;;  %v250_v27 = vsel %vm247_vm2, %v243_v21, %v244_v22  ;;  %v241_v28 = vsel %vm238_vm3, %v234_v23, %v235_v24  ;;  %v268_v33 = vsel %vm265_vm4, %v261_v30, %v262_v29 }
  0xbf   :  { %378 = vrot.lane.b32.xlu1 %v250_v27, %s12071_s1  ;;  %366 = vrot.lane.b32.xlu0 %v241_v28, %s12072_s25  ;;  %v259_v36 = vsel %vm256_vm5, %v252_v34, %v253_v32  ;;  %v12296_v40 = vsel %vm229_vm6, %v223_v38, %v224_v37 }
  0xc0   :  { %v217_v31 = vadd.f32 %v12255_v10, %v209_v26  ;;  %v438_v26 = vld [vmem:[%s15666_s28] sm:$0xff] }
  0xc2   :  { %v221_v35 = vmax.f32 %v217_v31, 0.0 }
  0xc4   :  { %338 = vrot.lane.b32.xlu2 %v268_v33, %s12073_s2  ;;  %v263_v39 = vrot.slane %v221_v35, 1  ;;  %v245_v42 = vrot.slane %v221_v35, 5  ;;  %v225_v43 = vrot.slane %v221_v35, 3  ;;  %v236_v48 = vrot.slane %v221_v35, 4 }
  0xc5   :  { %v200_v44 = vpop.f32.mrf.mxu0  ;;  %v254_v50 = vrot.slane %v221_v35, 7 }
  0xc6   :  { %v267_v41 = vsel %vm265_vm4, %v262_v29, %v263_v39  ;;  %v210_v45 = vmul.f32 %v11655_v9, %v200_v44  ;;  %v249_v46 = vsel %vm247_vm2, %v244_v22, %v245_v42  ;;  %v12309_v47 = vsel %vm229_vm6, %v224_v37, %v225_v43  ;;  %v440_v22 = vld [vmem:[%s15666_s28 + $0x10] sm:$0xff] }
  0xc7   :  { %308 = vrot.lane.b32.xlu1 %v259_v36, %s12074_s27  ;;  %292 = vrot.lane.b32.xlu0 %v250_v27, %s12065_s26  ;;  %v240_v51 = vsel %vm238_vm3, %v235_v24, %v236_v48  ;;  %v258_v53 = vsel %vm256_vm5, %v253_v32, %v254_v50 }
  0xc8   :  { %v218_v49 = vadd.f32 %v12255_v10, %v210_v45 }
  0xca   :  { %v222_v52 = vmax.f32 %v218_v49, 0.0 }
  0xcc   :  { %354 = vrot.lane.b32.xlu2 %v12296_v40, %s12075_s3  ;;  %v255_v54 = vrot.slane %v222_v52, 7  ;;  %v237_v55 = vrot.slane %v222_v52, 4  ;;  %v264_v58 = vrot.slane %v222_v52, 1  ;;  %v246_v59 = vrot.slane %v222_v52, 5 }
  0xcd   :  { %v226_v0 = vrot.slane %v222_v52, 3 }
  0xce   :  { %v260_v56 = vsel %vm256_vm5, %v255_v54, %v252_v34  ;;  %v242_v57 = vsel %vm238_vm3, %v237_v55, %v234_v23  ;;  %v266_v60 = vsel %vm265_vm4, %v263_v39, %v264_v58  ;;  %v251_v61 = vsel %vm247_vm2, %v246_v59, %v243_v21  ;;  %v441_v21 = vld [vmem:[%s15666_s28 + $0x18] sm:$0xff]  ;;  %v439_v23 = vld [vmem:[%s15666_s28 + $0x8] sm:$0xff] }
  0xcf   :  { %326 = vrot.lane.b32.xlu1 %v221_v35, %s12070_s6  ;;  %340 = vrot.lane.b32.xlu0 %v267_v41, %s12073_s2  ;;  %v239_v62 = vsel %vm238_vm3, %v236_v48, %v237_v55  ;;  %v248_v63 = vsel %vm247_vm2, %v245_v42, %v246_v59  ;;  %v257_v1 = vsel %vm256_vm5, %v254_v50, %v255_v54  ;;  %v430_v48 = vld [vmem:[#allocation2] sm:$0xff] }
  0xd0   :  { %v269_v2 = vsel %vm265_vm4, %v264_v58, %v261_v30  ;;  %v12354_v3 = vsel %vm229_vm6, %v225_v43, %v226_v0  ;;  %v233_v4 = vsel %vm229_vm6, %v226_v0, %v223_v38  ;;  %472 = vmatpush.msra.mxu1 %v441_v21 }
  0xd2   :  { %473 = vmatpush.msra.mxu1 %v440_v22  ;;  %v508_v22 = vld [vmem:[%s15638_s10] sm:$0xff] }
  0xd3   :  { %540 = vmatpush.msrb.mxu0 %v508_v22  ;;  %11631 = vmatpush.msra.mxu2 %v508_v22 }
  0xd4   :  { %276 = vrot.lane.b32.xlu2 %v241_v28, %s12063_s24  ;;  %474 = vmatpush.msra.mxu1 %v439_v23  ;;  %v11657_v23 = vld [vmem:[%s15667_s0] ss:$0 sm:$0xff] }
  0xd6   :  { %475 = vmatpush.msra.mxu1 %v438_v26 }
  0xd7   :  { %380 = vrot.lane.b32.xlu0 %v249_v46, %s12071_s1  ;;  %356 = vrot.lane.b32.xlu1 %v12309_v47, %s12075_s3 }
  0xdc   :  { %368 = vrot.lane.b32.xlu2 %v240_v51, %s12072_s25 }
  0xdf   :  { %310 = vrot.lane.b32.xlu0 %v258_v53, %s12074_s27  ;;  %278 = vrot.lane.b32.xlu1 %v240_v51, %s12063_s24 }
  0xe4   :  { %294 = vrot.lane.b32.xlu2 %v249_v46, %s12065_s26 }
  0xe7   :  { %306 = vrot.lane.b32.xlu1 %v260_v56, %s12074_s27  ;;  %274 = vrot.lane.b32.xlu0 %v242_v57, %s12063_s24 }
  0xec   :  { %342 = vrot.lane.b32.xlu2 %v266_v60, %s12073_s2 }
  0xef   :  { %290 = vrot.lane.b32.xlu0 %v251_v61, %s12065_s26  ;;  %370 = vrot.lane.b32.xlu1 %v239_v62, %s12072_s25 }
  0xf4   :  { %382 = vrot.lane.b32.xlu2 %v248_v63, %s12071_s1 }
  0xf7   :  { %328 = vrot.lane.b32.xlu0 %v222_v52, %s12070_s6  ;;  %296 = vrot.lane.b32.xlu1 %v248_v63, %s12065_s26  ;;  %s12077_s6 = smov 124  }
  0xfc   :  { %312 = vrot.lane.b32.xlu2 %v257_v1, %s12074_s27 }
  0xff   :  { %344 = vrot.lane.b32.xlu1 %v269_v2, %s12073_s2  ;;  %358 = vrot.lane.b32.xlu0 %v12354_v3, %s12075_s3 }
 0x104   :  { %360 = vrot.lane.b32.xlu2 %v233_v4, %s12075_s3 }
 0x107   :  { %384 = vrot.lane.b32.xlu1 %v251_v61, %s12071_s1  ;;  %280 = vrot.lane.b32.xlu0 %v239_v62, %s12063_s24  ;;  %v431_v61 = vld [vmem:[#allocation2 + $0x8] sm:$0xff]  ;;  %s12078_s1 = smov 4  }
 0x10f   :  { %372 = vrot.lane.b32.xlu0 %v242_v57, %s12072_s25  ;;  %s12079_s25 = smov 112  }
 0x116   :  { %v325_v5 = vpop.permute.xlu2 %324 }
 0x11e   :  { %v339_v7 = vpop.permute.xlu2 %338 }
 0x126   :  { %v323_v6 = vpop.permute.xlu1 %322  ;;  %v355_v12 = vpop.permute.xlu2 %354 }
 0x12e   :  { %v277_v20 = vpop.permute.xlu2 %276 }
 0x12f   :  { %v392_v33 = vsel %vm390_vm7, %v12296_v40, %v277_v20 }
 0x131   :  { %v379_v8 = vpop.permute.xlu1 %378  ;;  %v367_v9 = vpop.permute.xlu0 %366 }
 0x136   :  { %v369_v27 = vpop.permute.xlu2 %368 }
 0x139   :  { %v309_v10 = vpop.permute.xlu1 %308  ;;  %v293_v11 = vpop.permute.xlu0 %292 }
 0x13a   :  { %v397_v34 = vsel %vm395_vm8, %v392_v33, %v293_v11 }
 0x13b   :  { %v402_v39 = vsel %vm400_vm9, %v397_v34, %v309_v10 }
 0x13c   :  { %v407_v45 = vsel %vm405_vm10, %v402_v39, %v325_v5 }
 0x13e   :  { %v295_v30 = vpop.permute.xlu2 %294 }
 0x141   :  { %v327_v17 = vpop.permute.xlu1 %326  ;;  %v341_v18 = vpop.permute.xlu0 %340 }
 0x142   :  { %v412_v49 = vsel %vm410_vm11, %v407_v45, %v341_v18  ;;  %v433_v18 = vld [vmem:[#allocation2 + $0x18] sm:$0xff] }
 0x146   :  { %v343_v37 = vpop.permute.xlu2 %342 }
 0x149   :  { %v381_v24 = vpop.permute.xlu0 %380  ;;  %v357_v25 = vpop.permute.xlu1 %356 }
 0x14a   :  { %v417_v51 = vsel %vm415_vm12, %v412_v49, %v357_v25 }
 0x14b   :  { %v422_v55 = vsel %vm420_vm13, %v417_v51, %v369_v27 }
 0x14c   :  { %v427_v60 = vsel %vm425_vm14, %v422_v55, %v381_v24  ;;  %v11658_v24 = vld [vmem:[%s15635_s7] ss:$0 sm:$0xff] }
 0x14d   :  { %v435_v0 = vmul.f32 %v431_v61, %v427_v60  ;;  %v505_v55 = vld [vmem:[#allocation5] sm:$0xff] }
 0x14e   :  { %v383_v57 = vpop.permute.xlu2 %382 }
 0x151   :  { %v311_v28 = vpop.permute.xlu0 %310  ;;  %v279_v29 = vpop.permute.xlu1 %278 }
 0x152   :  { %v393_v40 = vsel %vm390_vm7, %v12309_v47, %v279_v29 }
 0x153   :  { %v398_v52 = vsel %vm395_vm8, %v393_v40, %v295_v30 }
 0x154   :  { %v403_v56 = vsel %vm400_vm9, %v398_v52, %v311_v28 }
 0x155   :  { %v408_v59 = vsel %vm405_vm10, %v403_v56, %v327_v17 }
 0x156   :  { %v413_v62 = vsel %vm410_vm11, %v408_v59, %v343_v37  ;;  %v11659_v37 = vld [vmem:[%s15639_s11] ss:$0 sm:$0xff] }
 0x159   :  { %v275_v31 = vpop.permute.xlu0 %274  ;;  %v307_v32 = vpop.permute.xlu1 %306 }
 0x15a   :  { %v391_v35 = vsel %vm390_vm7, %v233_v4, %v275_v31  ;;  %v313_v4 = vpop.permute.xlu2 %312 }
 0x161   :  { %v291_v36 = vpop.permute.xlu0 %290  ;;  %v371_v43 = vpop.permute.xlu1 %370 }
 0x162   :  { %v396_v38 = vsel %vm395_vm8, %v391_v35, %v291_v36  ;;  %v361_v15 = vpop.permute.xlu2 %360 }
 0x163   :  { %v401_v41 = vsel %vm400_vm9, %v396_v38, %v307_v32 }
 0x164   :  { %v406_v42 = vsel %vm405_vm10, %v401_v41, %v323_v6  ;;  %v432_v6 = vld [vmem:[#allocation2 + $0x10] sm:$0xff] }
 0x165   :  { %v411_v44 = vsel %vm410_vm11, %v406_v42, %v339_v7 }
 0x166   :  { %v416_v46 = vsel %vm415_vm12, %v411_v44, %v355_v12 }
 0x167   :  { %v421_v50 = vsel %vm420_vm13, %v416_v46, %v367_v9 }
 0x168   :  { %v426_v53 = vsel %vm425_vm14, %v421_v50, %v379_v8 }
 0x169   :  { %v329_v47 = vpop.permute.xlu0 %328  ;;  %v434_v54 = vmul.f32 %v430_v48, %v426_v53  ;;  %v297_v58 = vpop.permute.xlu1 %296 }
 0x16b   :  { %10942 = vmatmul.msk.f32.vlgmr.msra.gmra.mxu1 %vm447_vm15, %v434_v54  ;;  %v506_v54 = vld [vmem:[#allocation5 + $0x8] sm:$0xff] }
 0x16c   :  { %652 = vmatpush.msra.mxu0 %v506_v54  ;;  %11632 = vmatpush.msra.mxu3 %v506_v54 }
 0x16e   :  { %653 = vmatpush.msra.mxu0 %v505_v55  ;;  %11633 = vmatpush.msra.mxu3 %v505_v55 }
 0x171   :  { %v359_v63 = vpop.permute.xlu0 %358  ;;  %v345_v7 = vpop.permute.xlu1 %344 }
 0x172   :  { %v418_v1 = vsel %vm415_vm12, %v413_v62, %v359_v63 }
 0x173   :  { %v423_v2 = vsel %vm420_vm13, %v418_v1, %v371_v43  ;;  %10943 = vmatmul.msk.f32.gmra.mxu1 %vm447_vm15, %v435_v0 }
 0x174   :  { %v428_v5 = vsel %vm425_vm14, %v423_v2, %v383_v57 }
 0x175   :  { %v436_v9 = vmul.f32 %v432_v6, %v428_v5 }
 0x179   :  { %v281_v8 = vpop.permute.xlu0 %280  ;;  %v385_v19 = vpop.permute.xlu1 %384 }
 0x17a   :  { %v394_v10 = vsel %vm390_vm7, %v12354_v3, %v281_v8 }
 0x17b   :  { %v399_v11 = vsel %vm395_vm8, %v394_v10, %v297_v58  ;;  %10944 = vmatmul.msk.f32.gmra.mxu1 %vm447_vm15, %v436_v9 }
 0x17c   :  { %v404_v12 = vsel %vm400_vm9, %v399_v11, %v313_v4 }
 0x17d   :  { %v409_v13 = vsel %vm405_vm10, %v404_v12, %v329_v47 }
 0x17e   :  { %v414_v14 = vsel %vm410_vm11, %v409_v13, %v345_v7 }
 0x17f   :  { %v419_v16 = vsel %vm415_vm12, %v414_v14, %v361_v15 }
 0x181   :  { %v373_v17 = vpop.permute.xlu0 %372 }
 0x182   :  { %v424_v20 = vsel %vm420_vm13, %v419_v16, %v373_v17 }
 0x183   :  { %v429_v3 = vsel %vm425_vm14, %v424_v20, %v385_v19 }
 0x184   :  { %v437_v21 = vmul.f32 %v433_v18, %v429_v3 }
 0x186   :  { %10945 = vmatmul.msk.f32.gmra.mxu1 %vm447_vm15, %v437_v21 }
 0x1e8   :  { %v477_v25 = vpop.f32.mrf.mxu1 }
 0x1e9   :  { %v493_v26 = vmul.f32 %v11657_v23, %v477_v25 }
 0x1eb   :  { %v12440_v27 = vadd.f32 %v11658_v24, %v493_v26 }
 0x1ed   :  { %10946 = vmatmul.msk.f32.vlgmr.msrb.gmra.mxu0 %vm390_vm7, %v12440_v27 }
 0x1f0   :  { %v480_v28 = vpop.f32.mrf.mxu1 }
 0x1f1   :  { %v494_v29 = vmul.f32 %v11657_v23, %v480_v28 }
 0x1f3   :  { %v12444_v30 = vadd.f32 %v11658_v24, %v494_v29 }
 0x1f5   :  { %10947 = vmatmul.msk.f32.vlgmr.msra.gmra.mxu2 %vm390_vm7, %v12444_v30 }
 0x1f8   :  { %v483_v31 = vpop.f32.mrf.mxu1 }
 0x1f9   :  { %v495_v32 = vmul.f32 %v11657_v23, %v483_v31 }
 0x1fb   :  { %v12448_v33 = vadd.f32 %v11658_v24, %v495_v32 }
 0x1fd   :  { %10948 = vmatmul.msk.f32.gmra.mxu2 %vm390_vm7, %v12448_v33 }
 0x203   :  { %v486_v34 = vpop.f32.mrf.mxu1 }
 0x204   :  { %v496_v35 = vmul.f32 %v11657_v23, %v486_v34 }
 0x206   :  { %v12452_v36 = vadd.f32 %v11658_v24, %v496_v35 }
 0x208   :  { %10949 = vmatmul.msk.f32.gmra.mxu2 %vm390_vm7, %v12452_v36 }
 0x26a   :  { %v542_v38 = vpop.f32.mrf.mxu0 }
 0x26b   :  { %v12459_v39 = vadd.f32 %v11659_v37, %v542_v38 }
 0x26d   :  { %558 = vrot.lane.b32.xlu1 %v12459_v39, %s12076_s4 }
 0x278   :  { %v545_v41 = vpop.f32.mrf.mxu2 }
 0x279   :  { %v12467_v40 = vadd.f32 %v11659_v37, %v545_v41 }
 0x280   :  { %v548_v42 = vpop.f32.mrf.mxu2 }
 0x281   :  { %v12463_v43 = vadd.f32 %v11659_v37, %v548_v42 }
 0x283   :  { %562 = vrot.lane.b32.xlu2 %v12463_v43, %s12076_s4 }
 0x28b   :  { %560 = vrot.lane.b32.xlu2 %v12467_v40, %s12076_s4  ;;  %v551_v44 = vpop.f32.mrf.mxu2 }
 0x28c   :  { %v12471_v45 = vadd.f32 %v11659_v37, %v551_v44 }
 0x28e   :  { %564 = vrot.lane.b32.xlu0 %v12471_v45, %s12076_s4 }
 0x2dd   :  { %v563_v46 = vpop.permute.xlu2 %562 }
 0x2de   :  { %v574_v48 = vmul.f32 %v563_v46, %v12459_v39  ;;  %v572_v63 = vmul.f32 %v563_v46, %v12463_v43 }
 0x2df   :  { %v559_v49 = vpop.permute.xlu1 %558 }
 0x2e0   :  { %590 = vrot.lane.b32.xlu0 %v574_v48, %s12063_s24  ;;  %v576_v50 = vmul.f32 %v559_v49, %v12463_v43  ;;  %v570_v56 = vmul.f32 %v559_v49, %v12459_v39 }
 0x2e2   :  { %594 = vrot.lane.b32.xlu2 %v576_v50, %s12063_s24 }
 0x2e5   :  { %v561_v51 = vpop.permute.xlu2 %560 }
 0x2e6   :  { %v577_v52 = vmul.f32 %v561_v51, %v12471_v45  ;;  %v571_v59 = vmul.f32 %v561_v51, %v12467_v40 }
 0x2e8   :  { %596 = vrot.lane.b32.xlu0 %v577_v52, %s12063_s24 }
 0x300   :  { %v565_v53 = vpop.permute.xlu0 %564 }
 0x301   :  { %v575_v47 = vmul.f32 %v565_v53, %v12467_v40  ;;  %v573_v2 = vmul.f32 %v565_v53, %v12471_v45 }
 0x303   :  { %592 = vrot.lane.b32.xlu1 %v575_v47, %s12063_s24 }
 0x33c   :  { %v595_v62 = vpop.permute.xlu2 %594 }
 0x33d   :  { %v604_v0 = vsel %vm390_vm7, %v572_v63, %v595_v62 }
 0x352   :  { %v591_v57 = vpop.permute.xlu0 %590 }
 0x353   :  { %v602_v58 = vsel %vm390_vm7, %v570_v56, %v591_v57 }
 0x354   :  { %10950 = vmatmul.msk.f32.vlgmr.msra.gmra.mxu0 %vm395_vm8, %v602_v58 }
 0x35a   :  { %v597_v1 = vpop.permute.xlu0 %596 }
 0x35b   :  { %v605_v4 = vsel %vm390_vm7, %v573_v2, %v597_v1 }
 0x375   :  { %v593_v60 = vpop.permute.xlu1 %592 }
 0x376   :  { %v603_v61 = vsel %vm390_vm7, %v571_v59, %v593_v60 }
 0x377   :  { %10951 = vmatmul.msk.f32.vlgmr.msra.gmra.mxu3 %vm395_vm8, %v603_v61 }
 0x37f   :  { %10952 = vmatmul.msk.f32.gmra.mxu3 %vm395_vm8, %v604_v0 }
 0x387   :  { %10953 = vmatmul.msk.f32.gmra.mxu3 %vm395_vm8, %v605_v4 }
 0x3d1   :  { %v655_v5 = vpop.f32.mrf.mxu0 }
 0x3d2   :  { %v667_v6 = vmul.f32 0.70710677, %v655_v5 }
 0x3d4   :  { %675 = vrot.lane.b32.xlu1 %v667_v6, %s12077_s6 }
 0x3fa   :  { %v658_v7 = vpop.f32.mrf.mxu3 }
 0x3fb   :  { %v668_v8 = vmul.f32 0.70710677, %v658_v7 }
 0x3fd   :  { %677 = vrot.lane.b32.xlu2 %v668_v8, %s12077_s6 }
 0x402   :  { %v661_v9 = vpop.f32.mrf.mxu3 }
 0x403   :  { %v669_v10 = vmul.f32 0.70710677, %v661_v9 }
 0x405   :  { %679 = vrot.lane.b32.xlu0 %v669_v10, %s12077_s6 }
 0x40a   :  { %v664_v11 = vpop.f32.mrf.mxu3 }
 0x40b   :  { %v670_v12 = vmul.f32 0.70710677, %v664_v11 }
 0x40d   :  { %681 = vrot.lane.b32.xlu1 %v670_v12, %s12077_s6 }
 0x446   :  { %v676_v13 = vpop.permute.xlu1 %675 }
 0x447   :  { %v687_v14 = vmax.f32 %v667_v6, %v676_v13 }
 0x449   :  { %695 = vrot.lane.b32.xlu2 %v687_v14, %s12078_s1 }
 0x457   :  { %v678_v15 = vpop.permute.xlu2 %677 }
 0x458   :  { %v688_v16 = vmax.f32 %v668_v8, %v678_v15 }
 0x45a   :  { %697 = vrot.lane.b32.xlu0 %v688_v16, %s12078_s1 }
 0x477   :  { %v680_v17 = vpop.permute.xlu0 %679 }
 0x478   :  { %v689_v18 = vmax.f32 %v669_v10, %v680_v17 }
 0x47a   :  { %699 = vrot.lane.b32.xlu1 %v689_v18, %s12078_s1 }
 0x47f   :  { %v682_v19 = vpop.permute.xlu1 %681 }
 0x480   :  { %v690_v20 = vmax.f32 %v670_v12, %v682_v19 }
 0x482   :  { %701 = vrot.lane.b32.xlu2 %v690_v20, %s12078_s1 }
 0x4a3   :  { %v696_v3 = vpop.permute.xlu2 %695 }
 0x4a4   :  { %v708_v21 = vsel %vm707_vm0, %v687_v14, %v696_v3 }
 0x4a5   :  { %v712_v22 = vsub.f32 %v667_v6, %v708_v21 }
 0x4a7   :  { %v716_v23 = vmul.f32 1.442695, %v712_v22 }
 0x4a9   :  { %11701 = vpow2.f32 %v716_v23 }
 0x4af   :  { %v12504_v24 = vpop.eup %11701 }
 0x4b0   :  { %728 = vrot.lane.b32.xlu0 %v12504_v24, %s12077_s6 }
 0x4cc   :  { %v698_v25 = vpop.permute.xlu0 %697 }
 0x4cd   :  { %v709_v26 = vsel %vm707_vm0, %v688_v16, %v698_v25 }
 0x4ce   :  { %v713_v28 = vsub.f32 %v668_v8, %v709_v26 }
 0x4d0   :  { %v718_v29 = vmul.f32 1.442695, %v713_v28 }
 0x4d2   :  { %11703 = vpow2.f32 %v718_v29 }
 0x4d8   :  { %v12509_v31 = vpop.eup %11703 }
 0x4d9   :  { %730 = vrot.lane.b32.xlu1 %v12509_v31, %s12077_s6 }
 0x4dc   :  { %v702_v32 = vpop.permute.xlu2 %701 }
 0x4dd   :  { %v711_v34 = vsel %vm707_vm0, %v690_v20, %v702_v32 }
 0x4de   :  { %v715_v35 = vsub.f32 %v670_v12, %v711_v34 }
 0x4e0   :  { %v722_v37 = vmul.f32 1.442695, %v715_v35 }
 0x4e2   :  { %11705 = vpow2.f32 %v722_v37 }
 0x4e8   :  { %v12514_v38 = vpop.eup %11705 }
 0x4e9   :  { %734 = vrot.lane.b32.xlu0 %v12514_v38, %s12077_s6 }
 0x4ec   :  { %v700_v41 = vpop.permute.xlu1 %699 }
 0x4ed   :  { %v710_v42 = vsel %vm707_vm0, %v689_v18, %v700_v41 }
 0x4ee   :  { %v714_v44 = vsub.f32 %v669_v10, %v710_v42 }
 0x4f0   :  { %v720_v46 = vmul.f32 1.442695, %v714_v44 }
 0x4f2   :  { %11707 = vpow2.f32 %v720_v46 }
 0x4f8   :  { %v12519_v48 = vpop.eup %11707 }
 0x4f9   :  { %732 = vrot.lane.b32.xlu2 %v12519_v48, %s12077_s6 }
 0x522   :  { %v729_v49 = vpop.permute.xlu0 %728 }
 0x523   :  { %v740_v50 = vadd.f32 %v12504_v24, %v729_v49 }
 0x525   :  { %11709 = vrcp.f32 %v740_v50  ;;  %v755_v47 = vand.u32 2147483648, %v740_v50  ;;  %v753_v55 = vand.u32 2147483647, %v740_v50  ;;  %vm749_vm2 = vweird.f32 %v740_v50 }
 0x527   :  { %v756_v57 = vor.u32 1.1754944e-38, %v755_v47  ;;  %vm754_vm4 = vcmp.eq.f32.partialorder %v753_v55, 8.507059e+37 }
 0x52b   :  { %v11710_v51 = vpop.eup %11709 }
 0x52c   :  { %v745_v52 = vmul.f32 %v11710_v51, %v740_v50  ;;  %vm750_vm1 = vweird.f32 %v11710_v51 }
 0x52d   :  { %vm751_vm3 = vmor %vm749_vm2, %vm750_vm1 }
 0x52e   :  { %v746_v53 = vsub.f32 1.0, %v745_v52 }
 0x530   :  { %v747_v54 = vmul.f32 %v11710_v51, %v746_v53 }
 0x532   :  { %v748_v56 = vadd.f32 %v11710_v51, %v747_v54 }
 0x534   :  { %v752_v58 = vsel %vm751_vm3, %v11710_v51, %v748_v56 }
 0x535   :  { %v12524_v59 = vsel %vm754_vm4, %v756_v57, %v752_v58 }
 0x536   :  { %808 = vrot.lane.b32.xlu1 %v12524_v59, %s12078_s1 }
 0x54b   :  { %v731_v60 = vpop.permute.xlu1 %730 }
 0x54c   :  { %v741_v61 = vadd.f32 %v12509_v31, %v731_v60 }
 0x54e   :  { %11711 = vrcp.f32 %v741_v61  ;;  %v770_v4 = vand.u32 2147483648, %v741_v61  ;;  %v768_v6 = vand.u32 2147483647, %v741_v61  ;;  %vm764_vm6 = vweird.f32 %v741_v61 }
 0x550   :  { %v771_v11 = vor.u32 1.1754944e-38, %v770_v4  ;;  %vm769_vm10 = vcmp.eq.f32.partialorder %v768_v6, 8.507059e+37  ;;  %v893_v6 = vld [vmem:[%s15640_s12] sm:$0xff] }
 0x551   :  { %925 = vmatpush.msrb.mxu3 %v893_v6 }
 0x553   :  { %v733_v62 = vpop.permute.xlu2 %732 }
 0x554   :  { %v11712_v63 = vpop.eup %11711  ;;  %v742_v0 = vadd.f32 %v12519_v48, %v733_v62 }
 0x555   :  { %v760_v1 = vmul.f32 %v11712_v63, %v741_v61  ;;  %vm765_vm5 = vweird.f32 %v11712_v63 }
 0x556   :  { %11713 = vrcp.f32 %v742_v0  ;;  %vm766_vm9 = vmor %vm764_vm6, %vm765_vm5  ;;  %v785_v16 = vand.u32 2147483648, %v742_v0  ;;  %v783_v18 = vand.u32 2147483647, %v742_v0  ;;  %vm779_vm12 = vweird.f32 %v742_v0 }
 0x557   :  { %v761_v2 = vsub.f32 1.0, %v760_v1 }
 0x558   :  { %v786_v3 = vor.u32 1.1754944e-38, %v785_v16  ;;  %vm784_vm14 = vcmp.eq.f32.partialorder %v783_v18, 8.507059e+37 }
 0x559   :  { %v762_v5 = vmul.f32 %v11712_v63, %v761_v2 }
 0x55b   :  { %v735_v7 = vpop.permute.xlu0 %734  ;;  %v763_v8 = vadd.f32 %v11712_v63, %v762_v5 }
 0x55c   :  { %v11714_v9 = vpop.eup %11713  ;;  %v743_v10 = vadd.f32 %v12514_v38, %v735_v7 }
 0x55d   :  { %v767_v12 = vsel %vm766_vm9, %v11712_v63, %v763_v8  ;;  %v775_v13 = vmul.f32 %v11714_v9, %v742_v0  ;;  %vm780_vm11 = vweird.f32 %v11714_v9 }
 0x55e   :  { %11715 = vrcp.f32 %v743_v10  ;;  %v772_v14 = vsel %vm769_vm10, %v771_v11, %v767_v12  ;;  %vm781_vm13 = vmor %vm779_vm12, %vm780_vm11  ;;  %v800_v26 = vand.u32 2147483648, %v743_v10  ;;  %v798_v29 = vand.u32 2147483647, %v743_v10 }
 0x55f   :  { %810 = vrot.lane.b32.xlu2 %v772_v14, %s12078_s1  ;;  %v776_v15 = vsub.f32 1.0, %v775_v13  ;;  %vm794_vm1 = vweird.f32 %v743_v10 }
 0x560   :  { %v801_v34 = vor.u32 1.1754944e-38, %v800_v26  ;;  %vm799_vm3 = vcmp.eq.f32.partialorder %v798_v29, 8.507059e+37 }
 0x561   :  { %v777_v17 = vmul.f32 %v11714_v9, %v776_v15  ;;  %v11660_v15 = vld [vmem:[%s15641_s13] ss:$0 sm:$0xff] }
 0x563   :  { %v778_v19 = vadd.f32 %v11714_v9, %v777_v17 }
 0x564   :  { %v11716_v20 = vpop.eup %11715 }
 0x565   :  { %v782_v21 = vsel %vm781_vm13, %v11714_v9, %v778_v19  ;;  %v790_v22 = vmul.f32 %v11716_v20, %v743_v10  ;;  %vm795_vm15 = vweird.f32 %v11716_v20 }
 0x566   :  { %v787_v23 = vsel %vm784_vm14, %v786_v3, %v782_v21  ;;  %vm796_vm2 = vmor %vm794_vm1, %vm795_vm15 }
 0x567   :  { %812 = vrot.lane.b32.xlu0 %v787_v23, %s12078_s1  ;;  %582 = vrot.lane.b32.xlu2 %v12463_v43, %s12079_s25  ;;  %v791_v25 = vsub.f32 1.0, %v790_v22  ;;  %v12542_v43 = vld [vmem:[#allocation7] sm:$0xff] }
 0x568   :  { %855 = vmatpush.msrb.mxu2 %v12542_v43 }
 0x569   :  { %v792_v28 = vmul.f32 %v11716_v20, %v791_v25 }
 0x56b   :  { %v793_v32 = vadd.f32 %v11716_v20, %v792_v28 }
 0x56d   :  { %v797_v35 = vsel %vm796_vm2, %v11716_v20, %v793_v32 }
 0x56e   :  { %v802_v37 = vsel %vm799_vm3, %v801_v34, %v797_v35  ;;  %v12080_v35 = vmov 8.0  }
 0x56f   :  { %584 = vrot.lane.b32.xlu0 %v12471_v45, %s12079_s25  ;;  %580 = vrot.lane.b32.xlu2 %v12467_v40, %s12079_s25  ;;  %11717 = vrcp.f32 %v12080_v35  ;;  %v1061_v35 = vld [vmem:[%s15644_s16 + $0x38] sm:$0xff] }
 0x570   :  { %814 = vrot.lane.b32.xlu1 %v802_v37, %s12078_s1 }
 0x578   :  { %578 = vrot.lane.b32.xlu1 %v12459_v39, %s12079_s25 }
 0x5a8   :  { %v809_v41 = vpop.permute.xlu1 %808 }
 0x5a9   :  { %v820_v42 = vsel %vm707_vm0, %v12524_v59, %v809_v41 }
 0x5aa   :  { %v824_v44 = vmul.f32 %v12504_v24, %v820_v42 }
 0x5ac   :  { %10954 = vmatmul.msk.f32.vlgmr.msrb.gmra.mxu2 %vm390_vm7, %v824_v44 }
 0x5b9   :  { %v811_v45 = vpop.permute.xlu2 %810 }
 0x5ba   :  { %v821_v40 = vsel %vm707_vm0, %v772_v14, %v811_v45 }
 0x5bb   :  { %v825_v46 = vmul.f32 %v12509_v31, %v821_v40 }
 0x5bd   :  { %10955 = vmatmul.msk.f32.gmra.mxu2 %vm390_vm7, %v825_v46 }
 0x5c1   :  { %v583_v39 = vpop.permute.xlu2 %582 }
 0x5c2   :  { %610 = vrot.lane.b32.xlu0 %v583_v39, %s12063_s24 }
 0x5c9   :  { %v581_v49 = vpop.permute.xlu2 %580 }
 0x5ca   :  { %616 = vrot.lane.b32.xlu0 %v581_v49, %s12063_s24 }
 0x5d9   :  { %v813_v50 = vpop.permute.xlu0 %812 }
 0x5da   :  { %v822_v51 = vsel %vm707_vm0, %v787_v23, %v813_v50 }
 0x5db   :  { %v826_v24 = vmul.f32 %v12519_v48, %v822_v51 }
 0x5dd   :  { %10956 = vmatmul.msk.f32.gmra.mxu2 %vm390_vm7, %v826_v24 }
 0x5e1   :  { %v585_v52 = vpop.permute.xlu0 %584 }
 0x5e2   :  { %v815_v53 = vpop.permute.xlu1 %814  ;;  %612 = vrot.lane.b32.xlu1 %v585_v52, %s12063_s24 }
 0x5e3   :  { %v823_v31 = vsel %vm707_vm0, %v802_v37, %v815_v53 }
 0x5e4   :  { %v827_v47 = vmul.f32 %v12514_v38, %v823_v31 }
 0x5e6   :  { %10957 = vmatmul.msk.f32.gmra.mxu2 %vm390_vm7, %v827_v47 }
 0x5ea   :  { %v579_v54 = vpop.permute.xlu1 %578 }
 0x5eb   :  { %614 = vrot.lane.b32.xlu2 %v579_v54, %s12063_s24 }
 0x62f   :  { %v857_v56 = vpop.f32.mrf.mxu2 }
 0x634   :  { %v611_v55 = vpop.permute.xlu0 %610 }
 0x635   :  { %v622_v57 = vsel %vm390_vm7, %v579_v54, %v611_v55 }
 0x636   :  { %v869_v48 = vmul.f32 %v857_v56, %v622_v57 }
 0x638   :  { %877 = vrot.lane.b32.xlu1 %v869_v48, %s12076_s4 }
 0x63c   :  { %v617_v1 = vpop.permute.xlu0 %616 }
 0x63d   :  { %v625_v2 = vsel %vm390_vm7, %v585_v52, %v617_v1 }
 0x640   :  { %v860_v59 = vpop.f32.mrf.mxu2 }
 0x645   :  { %v615_v38 = vpop.permute.xlu2 %614 }
 0x646   :  { %v624_v62 = vsel %vm390_vm7, %v583_v39, %v615_v38  ;;  %v1054_v38 = vld [vmem:[%s15644_s16] sm:$0xff] }
 0x647   :  { %1133 = vmatpush.msrb.mxu0 %v1054_v38 }
 0x654   :  { %v613_v58 = vpop.permute.xlu1 %612 }
 0x655   :  { %v623_v60 = vsel %vm390_vm7, %v581_v49, %v613_v58 }
 0x656   :  { %v870_v61 = vmul.f32 %v860_v59, %v623_v60  ;;  %v1056_v60 = vld [vmem:[%s15644_s16 + $0x10] sm:$0xff] }
 0x657   :  { %1191 = vmatpush.msra.mxu2 %v1056_v60 }
 0x658   :  { %879 = vrot.lane.b32.xlu2 %v870_v61, %s12076_s4 }
 0x660   :  { %v863_v63 = vpop.f32.mrf.mxu2 }
 0x661   :  { %v871_v0 = vmul.f32 %v863_v63, %v624_v62  ;;  %v1055_v62 = vld [vmem:[%s15644_s16 + $0x8] sm:$0xff] }
 0x662   :  { %1162 = vmatpush.msrb.mxu1 %v1055_v62 }
 0x663   :  { %881 = vrot.lane.b32.xlu0 %v871_v0, %s12076_s4 }
 0x669   :  { %v866_v4 = vpop.f32.mrf.mxu2 }
 0x66a   :  { %v872_v5 = vmul.f32 %v866_v4, %v625_v2 }
 0x66c   :  { %883 = vrot.lane.b32.xlu1 %v872_v5, %s12076_s4 }
 0x6aa   :  { %v878_v7 = vpop.permute.xlu1 %877 }
 0x6ab   :  { %v889_v8 = vadd.f32 %v878_v7, %v869_v48 }
 0x6ad   :  { %10958 = vmatmul.msk.f32.vlgmr.msrb.gmra.mxu3 %vm390_vm7, %v889_v8 }
 0x6b2   :  { %v880_v9 = vpop.permute.xlu2 %879 }
 0x6b3   :  { %v890_v10 = vadd.f32 %v880_v9, %v870_v61  ;;  %v1057_v61 = vld [vmem:[%s15644_s16 + $0x18] sm:$0xff] }
 0x6b4   :  { %1220 = vmatpush.msra.mxu3 %v1057_v61 }
 0x6b5   :  { %10959 = vmatmul.msk.f32.gmra.mxu3 %vm390_vm7, %v890_v10 }
 0x6b6   :  { %1336 = vmatpush.msrb.mxu3 %v1061_v35 }
 0x6d5   :  { %v882_v11 = vpop.permute.xlu0 %881 }
 0x6d6   :  { %v891_v12 = vadd.f32 %v882_v11, %v871_v0 }
 0x6d8   :  { %10960 = vmatmul.msk.f32.gmra.mxu3 %vm390_vm7, %v891_v12 }
 0x6de   :  { %v884_v13 = vpop.permute.xlu1 %883 }
 0x6df   :  { %v892_v14 = vadd.f32 %v884_v13, %v872_v5 }
 0x6e1   :  { %10961 = vmatmul.msk.f32.gmra.mxu3 %vm390_vm7, %v892_v14  ;;  %v12623_v14 = vld [vmem:[%s15642_s14] ss:$0 sm:$0xff] }
 0x730   :  { %v927_v16 = vpop.f32.mrf.mxu3 }
 0x731   :  { %v928_v17 = vadd.f32 %v11660_v15, %v927_v16 }
 0x733   :  { %v939_v18 = vadd.f32 %v928_v17, %v12440_v27  ;;  %v12628_v17 = vld [vmem:[%s15643_s15] ss:$0 sm:$0xff] }
 0x735   :  { %v945_v19 = vsel %vm390_vm7, %v939_v18, 0.0 }
 0x736   :  { %946 = vadd.xlane.f32.xlu2 %v945_v19 }
 0x738   :  { %v930_v20 = vpop.f32.mrf.mxu3 }
 0x739   :  { %v931_v3 = vadd.f32 %v11660_v15, %v930_v20 }
 0x73b   :  { %v940_v21 = vadd.f32 %v931_v3, %v12444_v30  ;;  %v11718_v30 = vpop.eup %11717 }
 0x73c   :  { %v958_v37 = vmul.f32 8.0, %v11718_v30  ;;  %vm962_vm4 = vweird.f32 %v11718_v30 }
 0x73d   :  { %v948_v22 = vsel %vm390_vm7, %v940_v21, 0.0 }
 0x73e   :  { %949 = vadd.xlane.f32.xlu0 %v948_v22  ;;  %v959_v41 = vsub.f32 1.0, %v958_v37  ;;  %v1059_v37 = vld [vmem:[%s15644_s16 + $0x28] sm:$0xff] }
 0x73f   :  { %1278 = vmatpush.msra.mxu1 %v1059_v37 }
 0x740   :  { %v960_v42 = vmul.f32 %v11718_v30, %v959_v41 }
 0x742   :  { %v961_v44 = vadd.f32 %v11718_v30, %v960_v42 }
 0x744   :  { %v12588_v45 = vsel %vm962_vm4, %v11718_v30, %v961_v44  ;;  %v1058_v30 = vld [vmem:[%s15644_s16 + $0x20] sm:$0xff] }
 0x745   :  { %1249 = vmatpush.msra.mxu0 %v1058_v30 }
 0x75b   :  { %v933_v23 = vpop.f32.mrf.mxu3 }
 0x75c   :  { %v934_v25 = vadd.f32 %v11660_v15, %v933_v23 }
 0x75e   :  { %v941_v26 = vadd.f32 %v934_v25, %v12448_v33 }
 0x760   :  { %v951_v28 = vsel %vm390_vm7, %v941_v26, 0.0 }
 0x761   :  { %952 = vadd.xlane.f32.xlu1 %v951_v28 }
 0x764   :  { %v936_v29 = vpop.f32.mrf.mxu3 }
 0x765   :  { %v937_v32 = vadd.f32 %v11660_v15, %v936_v29 }
 0x767   :  { %v942_v27 = vadd.f32 %v937_v32, %v12452_v36 }
 0x769   :  { %v954_v34 = vsel %vm390_vm7, %v942_v27, 0.0 }
 0x76a   :  { %955 = vadd.xlane.f32.xlu2 %v954_v34  ;;  %v1060_v34 = vld [vmem:[%s15644_s16 + $0x30] sm:$0xff] }
 0x76b   :  { %1307 = vmatpush.msrb.mxu2 %v1060_v34 }
 0x7a9   :  { %v947_v33 = vpop.xlane.xlu2 %946 }
 0x7aa   :  { %v964_v40 = vmul.f32 %v12588_v45, %v947_v33 }
 0x7ac   :  { %v968_v46 = vsub.f32 %v939_v18, %v964_v40 }
 0x7ae   :  { %v972_v39 = vmul.f32 %v968_v46, %v968_v46 }
 0x7b0   :  { %v976_v36 = vsel %vm390_vm7, %v972_v39, 0.0  ;;  %v1064_v39 = vld [vmem:[%s15644_s16 + $0x50] sm:$0xff] }
 0x7b1   :  { %977 = vadd.xlane.f32.xlu2 %v976_v36  ;;  %v950_v49 = vpop.xlane.xlu0 %949  ;;  %v1065_v36 = vld [vmem:[%s15644_s16 + $0x58] sm:$0xff] }
 0x7b2   :  { %v965_v50 = vmul.f32 %v12588_v45, %v950_v49 }
 0x7b4   :  { %v969_v51 = vsub.f32 %v940_v21, %v965_v50 }
 0x7b6   :  { %v973_v24 = vmul.f32 %v969_v51, %v969_v51 }
 0x7b8   :  { %v979_v52 = vsel %vm390_vm7, %v973_v24, 0.0 }
 0x7b9   :  { %980 = vadd.xlane.f32.xlu0 %v979_v52 }
 0x7d4   :  { %v953_v53 = vpop.xlane.xlu1 %952 }
 0x7d5   :  { %v966_v31 = vmul.f32 %v12588_v45, %v953_v53 }
 0x7d7   :  { %v12595_v47 = vsub.f32 %v941_v26, %v966_v31 }
 0x7d9   :  { %v974_v54 = vmul.f32 %v12595_v47, %v12595_v47 }
 0x7db   :  { %v982_v55 = vsel %vm390_vm7, %v974_v54, 0.0 }
 0x7dc   :  { %983 = vadd.xlane.f32.xlu1 %v982_v55  ;;  %v1062_v55 = vld [vmem:[%s15644_s16 + $0x40] sm:$0xff] }
 0x7dd   :  { %v956_v56 = vpop.xlane.xlu2 %955 }
 0x7de   :  { %v967_v57 = vmul.f32 %v12588_v45, %v956_v56  ;;  %v1063_v56 = vld [vmem:[%s15644_s16 + $0x48] sm:$0xff] }
 0x7e0   :  { %v12601_v48 = vsub.f32 %v942_v27, %v967_v57 }
 0x7e2   :  { %v975_v58 = vmul.f32 %v12601_v48, %v12601_v48 }
 0x7e4   :  { %v985_v59 = vsel %vm390_vm7, %v975_v58, 0.0 }
 0x7e5   :  { %986 = vadd.xlane.f32.xlu2 %v985_v59 }
 0x824   :  { %v978_v63 = vpop.xlane.xlu2 %977 }
 0x825   :  { %v988_v0 = vmul.f32 %v978_v63, %v12588_v45 }
 0x827   :  { %v992_v1 = vadd.f32 1e-05, %v988_v0  ;;  %v1069_v0 = vld [vmem:[%s15644_s16 + $0x78] sm:$0xff] }
 0x829   :  { %11719 = vrsqrt.f32 %v992_v1  ;;  %vm1002_vm6 = vweird.f32 %v992_v1 }
 0x82c   :  { %v981_v2 = vpop.xlane.xlu0 %980 }
 0x82d   :  { %v989_v4 = vmul.f32 %v981_v2, %v12588_v45  ;;  %v1067_v2 = vld [vmem:[%s15644_s16 + $0x68] sm:$0xff] }
 0x82f   :  { %v11720_v5 = vpop.eup %11719  ;;  %v993_v6 = vadd.f32 1e-05, %v989_v4  ;;  %v1648_v4 = vld [vmem:[%s15646_s18 + $0x10] sm:$0xff] }
 0x830   :  { %v997_v7 = vmul.f32 %v11720_v5, %v992_v1  ;;  %vm1003_vm5 = vweird.f32 %v11720_v5  ;;  %v1066_v1 = vld [vmem:[%s15644_s16 + $0x60] sm:$0xff] }
 0x831   :  { %11721 = vrsqrt.f32 %v993_v6  ;;  %vm1004_vm9 = vmor %vm1002_vm6, %vm1003_vm5  ;;  %vm1012_vm11 = vweird.f32 %v993_v6 }
 0x832   :  { %v998_v8 = vmul.f32 %v11720_v5, %v997_v7  ;;  %v1647_v7 = vld [vmem:[%s15646_s18 + $0x8] sm:$0xff] }
 0x834   :  { %v999_v9 = vmul.f32 0.5, %v998_v8  ;;  %v1652_v8 = vld [vmem:[%s15646_s18 + $0x30] sm:$0xff] }
 0x836   :  { %v1000_v10 = vsub.f32 1.5, %v999_v9  ;;  %v1650_v9 = vld [vmem:[%s15646_s18 + $0x20] sm:$0xff] }
 0x837   :  { %v11722_v11 = vpop.eup %11721 }
 0x838   :  { %v1001_v12 = vmul.f32 %v11720_v5, %v1000_v10  ;;  %v1007_v13 = vmul.f32 %v11722_v11, %v993_v6  ;;  %vm1013_vm10 = vweird.f32 %v11722_v11  ;;  %v1649_v6 = vld [vmem:[%s15646_s18 + $0x18] sm:$0xff] }
 0x839   :  { %vm1014_vm12 = vmor %vm1012_vm11, %vm1013_vm10  ;;  %v1653_v10 = vld [vmem:[%s15646_s18 + $0x38] sm:$0xff] }
 0x83a   :  { %v1005_v15 = vsel %vm1004_vm9, %v11720_v5, %v1001_v12  ;;  %v1008_v16 = vmul.f32 %v11722_v11, %v1007_v13  ;;  %v1646_v5 = vld [vmem:[%s15646_s18] sm:$0xff] }
 0x83b   :  { %v1036_v18 = vmul.f32 %v1005_v15, %v968_v46  ;;  %v12833_v12 = vld [vmem:[%s15645_s17] sm:$0xff] }
 0x83c   :  { %v1009_v19 = vmul.f32 0.5, %v1008_v16  ;;  %v1074_v15 = vperm.slane %v12833_v12, 0  ;;  %v1075_v16 = vperm.slane %v12833_v12, 1 }
 0x83d   :  { %v1043_v20 = vmul.f32 %v12623_v14, %v1036_v18 }
 0x83e   :  { %v1010_v3 = vsub.f32 1.5, %v1009_v19  ;;  %v12838_v19 = vperm.slane %v12833_v12, 2 }
 0x83f   :  { %v12632_v21 = vadd.f32 %v12628_v17, %v1043_v20  ;;  %v12841_v20 = vperm.slane %v12833_v12, 3 }
 0x840   :  { %v1011_v22 = vmul.f32 %v11722_v11, %v1010_v3 }
 0x841   :  { %10962 = vmatmul.msk.f32.vlgmr.msrb.gmra.mxu0 %vm390_vm7, %v12632_v21  ;;  %10966 = vmatmul.msk.f32.vlgmr.msrb.gmra.mxu1 %vm390_vm7, %v12632_v21 }
 0x842   :  { %v1015_v23 = vsel %vm1014_vm12, %v11722_v11, %v1011_v22  ;;  %10970 = vmatmul.msk.f32.vlgmr.msra.gmra.mxu2 %vm390_vm7, %v12632_v21  ;;  %10974 = vmatmul.msk.f32.vlgmr.msra.gmra.mxu3 %vm390_vm7, %v12632_v21  ;;  %v1651_v11 = vld [vmem:[%s15646_s18 + $0x28] sm:$0xff] }
 0x843   :  { %v1037_v25 = vmul.f32 %v1015_v23, %v969_v51  ;;  %1423 = vmatpush.msra.mxu2 %v1064_v39  ;;  %1452 = vmatpush.msra.mxu3 %v1065_v36 }
 0x844   :  { %1365 = vmatpush.msrb.mxu0 %v1062_v55  ;;  %1394 = vmatpush.msrb.mxu1 %v1063_v56  ;;  %v1655_v56 = vld [vmem:[%s15646_s18 + $0x48] sm:$0xff] }
 0x845   :  { %v1044_v26 = vmul.f32 %v12623_v14, %v1037_v25 }
 0x847   :  { %v12644_v28 = vadd.f32 %v12628_v17, %v1044_v26 }
 0x849   :  { %10963 = vmatmul.msk.f32.gmra.mxu0 %vm390_vm7, %v12644_v28  ;;  %10967 = vmatmul.msk.f32.gmra.mxu1 %vm390_vm7, %v12644_v28 }
 0x84a   :  { %10971 = vmatmul.msk.f32.gmra.mxu2 %vm390_vm7, %v12644_v28  ;;  %10975 = vmatmul.msk.f32.gmra.mxu3 %vm390_vm7, %v12644_v28 }
 0x84f   :  { %v984_v29 = vpop.xlane.xlu1 %983 }
 0x850   :  { %v990_v32 = vmul.f32 %v984_v29, %v12588_v45 }
 0x852   :  { %v994_v27 = vadd.f32 1e-05, %v990_v32 }
 0x854   :  { %11723 = vrsqrt.f32 %v994_v27  ;;  %vm1022_vm14 = vweird.f32 %v994_v27 }
 0x858   :  { %v987_v41 = vpop.xlane.xlu2 %986 }
 0x859   :  { %v991_v42 = vmul.f32 %v987_v41, %v12588_v45 }
 0x85a   :  { %v11724_v44 = vpop.eup %11723 }
 0x85b   :  { %v1017_v33 = vmul.f32 %v11724_v44, %v994_v27  ;;  %v995_v40 = vadd.f32 1e-05, %v991_v42  ;;  %vm1023_vm13 = vweird.f32 %v11724_v44 }
 0x85c   :  { %vm1024_vm15 = vmor %vm1022_vm14, %vm1023_vm13 }
 0x85d   :  { %v1018_v46 = vmul.f32 %v11724_v44, %v1017_v33  ;;  %11725 = vrsqrt.f32 %v995_v40  ;;  %vm1032_vm2 = vweird.f32 %v995_v40 }
 0x85f   :  { %v1019_v49 = vmul.f32 0.5, %v1018_v46 }
 0x861   :  { %v1020_v50 = vsub.f32 1.5, %v1019_v49  ;;  %v1656_v49 = vld [vmem:[%s15646_s18 + $0x50] sm:$0xff] }
 0x863   :  { %v11726_v51 = vpop.eup %11725  ;;  %v1021_v24 = vmul.f32 %v11724_v44, %v1020_v50  ;;  %v1654_v50 = vld [vmem:[%s15646_s18 + $0x40] sm:$0xff] }
 0x864   :  { %v1027_v52 = vmul.f32 %v11726_v51, %v995_v40  ;;  %vm1033_vm1 = vweird.f32 %v11726_v51 }
 0x865   :  { %v1025_v53 = vsel %vm1024_vm15, %v11724_v44, %v1021_v24  ;;  %vm1034_vm3 = vmor %vm1032_vm2, %vm1033_vm1 }
 0x866   :  { %v1038_v31 = vmul.f32 %v1025_v53, %v12595_v47  ;;  %v1028_v54 = vmul.f32 %v11726_v51, %v1027_v52 }
 0x868   :  { %v1045_v57 = vmul.f32 %v12623_v14, %v1038_v31  ;;  %v1029_v58 = vmul.f32 0.5, %v1028_v54 }
 0x86a   :  { %v12683_v59 = vadd.f32 %v12628_v17, %v1045_v57  ;;  %v1030_v60 = vsub.f32 1.5, %v1029_v58 }
 0x86c   :  { %v1031_v47 = vmul.f32 %v11726_v51, %v1030_v60  ;;  %10964 = vmatmul.msk.f32.gmra.mxu0 %vm390_vm7, %v12683_v59  ;;  %10968 = vmatmul.msk.f32.gmra.mxu1 %vm390_vm7, %v12683_v59 }
 0x86d   :  { %10972 = vmatmul.msk.f32.gmra.mxu2 %vm390_vm7, %v12683_v59  ;;  %10976 = vmatmul.msk.f32.gmra.mxu3 %vm390_vm7, %v12683_v59 }
 0x86e   :  { %v1035_v61 = vsel %vm1034_vm3, %v11726_v51, %v1031_v47  ;;  %v1657_v51 = vld [vmem:[%s15646_s18 + $0x58] sm:$0xff] }
 0x86f   :  { %v1039_v38 = vmul.f32 %v1035_v61, %v12601_v48  ;;  %v1068_v48 = vld [vmem:[%s15644_s16 + $0x70] sm:$0xff] }
 0x871   :  { %v1046_v62 = vmul.f32 %v12623_v14, %v1039_v38 }
 0x873   :  { %v12696_v63 = vadd.f32 %v12628_v17, %v1046_v62 }
 0x875   :  { %10965 = vmatmul.msk.f32.gmra.mxu0 %vm390_vm7, %v12696_v63  ;;  %10969 = vmatmul.msk.f32.gmra.mxu1 %vm390_vm7, %v12696_v63 }
 0x876   :  { %10973 = vmatmul.msk.f32.gmra.mxu2 %vm390_vm7, %v12696_v63  ;;  %10977 = vmatmul.msk.f32.gmra.mxu3 %vm390_vm7, %v12696_v63 }
 0x87d   :  { %10978 = vmatmul.msk.f32.vlgmr.msra.gmra.mxu0 %vm390_vm7, %v12632_v21  ;;  %10982 = vmatmul.msk.f32.vlgmr.msra.gmra.mxu1 %vm390_vm7, %v12632_v21 }
 0x87e   :  { %10986 = vmatmul.msk.f32.vlgmr.msrb.gmra.mxu2 %vm390_vm7, %v12632_v21  ;;  %10990 = vmatmul.msk.f32.vlgmr.msrb.gmra.mxu3 %vm390_vm7, %v12632_v21 }
 0x87f   :  { %1539 = vmatpush.msrb.mxu2 %v1068_v48  ;;  %1568 = vmatpush.msrb.mxu3 %v1069_v0 }
 0x880   :  { %1481 = vmatpush.msra.mxu0 %v1066_v1  ;;  %1510 = vmatpush.msra.mxu1 %v1067_v2 }
 0x885   :  { %10979 = vmatmul.msk.f32.gmra.mxu0 %vm390_vm7, %v12644_v28  ;;  %10983 = vmatmul.msk.f32.gmra.mxu1 %vm390_vm7, %v12644_v28 }
 0x886   :  { %10987 = vmatmul.msk.f32.gmra.mxu2 %vm390_vm7, %v12644_v28  ;;  %10991 = vmatmul.msk.f32.gmra.mxu3 %vm390_vm7, %v12644_v28 }
 0x88d   :  { %10980 = vmatmul.msk.f32.gmra.mxu0 %vm390_vm7, %v12683_v59  ;;  %10984 = vmatmul.msk.f32.gmra.mxu1 %vm390_vm7, %v12683_v59 }
 0x88e   :  { %10988 = vmatmul.msk.f32.gmra.mxu2 %vm390_vm7, %v12683_v59  ;;  %10992 = vmatmul.msk.f32.gmra.mxu3 %vm390_vm7, %v12683_v59 }
 0x895   :  { %10981 = vmatmul.msk.f32.gmra.mxu0 %vm390_vm7, %v12696_v63  ;;  %10985 = vmatmul.msk.f32.gmra.mxu1 %vm390_vm7, %v12696_v63 }
 0x896   :  { %10989 = vmatmul.msk.f32.gmra.mxu2 %vm390_vm7, %v12696_v63  ;;  %10993 = vmatmul.msk.f32.gmra.mxu3 %vm390_vm7, %v12696_v63 }
 0x89d   :  { %10994 = vmatmul.msk.f32.vlgmr.msrb.gmra.mxu0 %vm390_vm7, %v12632_v21  ;;  %10998 = vmatmul.msk.f32.vlgmr.msrb.gmra.mxu1 %vm390_vm7, %v12632_v21 }
 0x89e   :  { %11002 = vmatmul.msk.f32.vlgmr.msra.gmra.mxu2 %vm390_vm7, %v12632_v21  ;;  %11006 = vmatmul.msk.f32.vlgmr.msra.gmra.mxu3 %vm390_vm7, %v12632_v21 }
 0x89f   :  { %1739 = vmatpush.xpose.msra.mxu2 %v1648_v4  ;;  %1681 = vmatpush.xpose.msrb.mxu0 %v1646_v5  ;;  %v12870_v5 = vperm.slane %v12833_v12, 4 }
 0x8a0   :  { %1768 = vmatpush.xpose.msra.mxu3 %v1649_v6  ;;  %1710 = vmatpush.xpose.msrb.mxu1 %v1647_v7  ;;  %v12873_v6 = vperm.slane %v12833_v12, 5 }
 0x8a5   :  { %10995 = vmatmul.msk.f32.gmra.mxu0 %vm390_vm7, %v12644_v28  ;;  %10999 = vmatmul.msk.f32.gmra.mxu1 %vm390_vm7, %v12644_v28 }
 0x8a6   :  { %11003 = vmatmul.msk.f32.gmra.mxu2 %vm390_vm7, %v12644_v28  ;;  %11007 = vmatmul.msk.f32.gmra.mxu3 %vm390_vm7, %v12644_v28 }
 0x8ad   :  { %10996 = vmatmul.msk.f32.gmra.mxu0 %vm390_vm7, %v12683_v59  ;;  %11000 = vmatmul.msk.f32.gmra.mxu1 %vm390_vm7, %v12683_v59 }
 0x8ae   :  { %11004 = vmatmul.msk.f32.gmra.mxu2 %vm390_vm7, %v12683_v59  ;;  %11008 = vmatmul.msk.f32.gmra.mxu3 %vm390_vm7, %v12683_v59 }
 0x8b5   :  { %10997 = vmatmul.msk.f32.gmra.mxu0 %vm390_vm7, %v12696_v63  ;;  %11001 = vmatmul.msk.f32.gmra.mxu1 %vm390_vm7, %v12696_v63 }
 0x8b6   :  { %11005 = vmatmul.msk.f32.gmra.mxu2 %vm390_vm7, %v12696_v63  ;;  %11009 = vmatmul.msk.f32.gmra.mxu3 %vm390_vm7, %v12696_v63 }
 0x8bd   :  { %11010 = vmatmul.msk.f32.vlgmr.msra.gmra.mxu0 %vm390_vm7, %v12632_v21  ;;  %11014 = vmatmul.msk.f32.vlgmr.msra.gmra.mxu1 %vm390_vm7, %v12632_v21 }
 0x8be   :  { %11018 = vmatmul.msk.f32.vlgmr.msrb.gmra.mxu2 %vm390_vm7, %v12632_v21  ;;  %11022 = vmatmul.msk.f32.vlgmr.msrb.gmra.mxu3 %vm390_vm7, %v12632_v21  ;;  %v1135_v13 = vpop.f32.mrf.mxu0  ;;  %v1164_v14 = vpop.f32.mrf.mxu1 }
 0x8bf   :  { %1855 = vmatpush.xpose.msrb.mxu2 %v1652_v8  ;;  %1797 = vmatpush.xpose.msra.mxu0 %v1650_v9  ;;  %v1136_v3 = vadd.f32 %v1135_v13, %v1074_v15  ;;  %v1165_v22 = vadd.f32 %v1164_v14, %v1075_v16 }
 0x8c0   :  { %1884 = vmatpush.xpose.msrb.mxu3 %v1653_v10  ;;  %1826 = vmatpush.xpose.msra.mxu1 %v1651_v11 }
 0x8c1   :  { %v1582_v26 = vmax.f32 %v1136_v3, 0.0  ;;  %v1583_v29 = vmax.f32 %v1165_v22, 0.0  ;;  %v12880_v22 = vperm.slane %v12833_v12, 6 }
 0x8c5   :  { %11011 = vmatmul.msk.f32.gmra.mxu0 %vm390_vm7, %v12644_v28  ;;  %11015 = vmatmul.msk.f32.gmra.mxu1 %vm390_vm7, %v12644_v28  ;;  %v1193_v17 = vpop.f32.mrf.mxu2  ;;  %v1222_v18 = vpop.f32.mrf.mxu3 }
 0x8c6   :  { %11019 = vmatmul.msk.f32.gmra.mxu2 %vm390_vm7, %v12644_v28  ;;  %11023 = vmatmul.msk.f32.gmra.mxu3 %vm390_vm7, %v12644_v28  ;;  %v1194_v23 = vadd.f32 %v1193_v17, %v12838_v19  ;;  %v1223_v25 = vadd.f32 %v1222_v18, %v12841_v20  ;;  %v1138_v34 = vpop.f32.mrf.mxu0  ;;  %v1167_v35 = vpop.f32.mrf.mxu1 }
 0x8c7   :  { %v1139_v41 = vadd.f32 %v1138_v34, %v1074_v15  ;;  %v1168_v42 = vadd.f32 %v1167_v35, %v1075_v16 }
 0x8c8   :  { %v1584_v32 = vmax.f32 %v1194_v23, 0.0  ;;  %v1585_v27 = vmax.f32 %v1223_v25, 0.0  ;;  %v12883_v23 = vperm.slane %v12833_v12, 7  ;;  %v1660_v12 = vld [vmem:[%s15646_s18 + $0x70] sm:$0xff] }
 0x8c9   :  { %v1598_v40 = vmax.f32 %v1139_v41, 0.0  ;;  %v1599_v46 = vmax.f32 %v1168_v42, 0.0  ;;  %v1658_v42 = vld [vmem:[%s15646_s18 + $0x60] sm:$0xff] }
 0x8cd   :  { %11012 = vmatmul.msk.f32.gmra.mxu0 %vm390_vm7, %v12683_v59  ;;  %11016 = vmatmul.msk.f32.gmra.mxu1 %vm390_vm7, %v12683_v59  ;;  %v1196_v30 = vpop.f32.mrf.mxu2  ;;  %v1225_v37 = vpop.f32.mrf.mxu3 }
 0x8ce   :  { %11020 = vmatmul.msk.f32.gmra.mxu2 %vm390_vm7, %v12683_v59  ;;  %11024 = vmatmul.msk.f32.gmra.mxu3 %vm390_vm7, %v12683_v59  ;;  %v1197_v44 = vadd.f32 %v1196_v30, %v12838_v19  ;;  %v1226_v33 = vadd.f32 %v1225_v37, %v12841_v20 }
 0x8d0   :  { %v1600_v39 = vmax.f32 %v1197_v44, 0.0  ;;  %v1601_v36 = vmax.f32 %v1226_v33, 0.0  ;;  %v1661_v44 = vld [vmem:[%s15646_s18 + $0x78] sm:$0xff] }
 0x8d5   :  { %11013 = vmatmul.msk.f32.gmra.mxu0 %vm390_vm7, %v12696_v63  ;;  %11017 = vmatmul.msk.f32.gmra.mxu1 %vm390_vm7, %v12696_v63 }
 0x8d6   :  { %11021 = vmatmul.msk.f32.gmra.mxu2 %vm390_vm7, %v12696_v63  ;;  %11025 = vmatmul.msk.f32.gmra.mxu3 %vm390_vm7, %v12696_v63 }
 0x8dd   :  { %1682 = vmatmul.f32.vlgmr.msrb.gmra.mxu0 %v1582_v26  ;;  %1711 = vmatmul.f32.vlgmr.msrb.gmra.mxu1 %v1583_v29 }
 0x8de   :  { %1740 = vmatmul.f32.vlgmr.msra.gmra.mxu2 %v1584_v32  ;;  %1769 = vmatmul.f32.vlgmr.msra.gmra.mxu3 %v1585_v27 }
 0x8df   :  { %1971 = vmatpush.xpose.msra.mxu2 %v1656_v49  ;;  %1913 = vmatpush.xpose.msrb.mxu0 %v1654_v50 }
 0x8e0   :  { %2000 = vmatpush.xpose.msra.mxu3 %v1657_v51  ;;  %1942 = vmatpush.xpose.msrb.mxu1 %v1655_v56 }
 0x8e5   :  { %1685 = vmatmul.f32.gmra.mxu0 %v1598_v40  ;;  %1714 = vmatmul.f32.gmra.mxu1 %v1599_v46 }
 0x8e6   :  { %1743 = vmatmul.f32.gmra.mxu2 %v1600_v39  ;;  %1772 = vmatmul.f32.gmra.mxu3 %v1601_v36 }
 0x8e9   :  { %v1141_v24 = vpop.f32.mrf.mxu0  ;;  %v1170_v52 = vpop.f32.mrf.mxu1 }
 0x8ea   :  { %v1142_v53 = vadd.f32 %v1141_v24, %v1074_v15  ;;  %v1171_v31 = vadd.f32 %v1170_v52, %v1075_v16 }
 0x8ec   :  { %v1614_v54 = vmax.f32 %v1142_v53, 0.0  ;;  %v1615_v55 = vmax.f32 %v1171_v31, 0.0  ;;  %v1659_v53 = vld [vmem:[%s15646_s18 + $0x68] sm:$0xff] }
 0x8ee   :  { %1688 = vmatmul.f32.gmra.mxu0 %v1614_v54  ;;  %1717 = vmatmul.f32.gmra.mxu1 %v1615_v55 }
 0x8f0   :  { %v1199_v57 = vpop.f32.mrf.mxu2  ;;  %v1228_v58 = vpop.f32.mrf.mxu3 }
 0x8f1   :  { %v1200_v60 = vadd.f32 %v1199_v57, %v12838_v19  ;;  %v1229_v47 = vadd.f32 %v1228_v58, %v12841_v20 }
 0x8f2   :  { %v1144_v61 = vpop.f32.mrf.mxu0  ;;  %v1173_v38 = vpop.f32.mrf.mxu1 }
 0x8f3   :  { %v1616_v62 = vmax.f32 %v1200_v60, 0.0  ;;  %v1617_v48 = vmax.f32 %v1229_v47, 0.0  ;;  %v1145_v0 = vadd.f32 %v1144_v61, %v1074_v15  ;;  %v1174_v1 = vadd.f32 %v1173_v38, %v1075_v16 }
 0x8f5   :  { %v1630_v2 = vmax.f32 %v1145_v0, 0.0  ;;  %1746 = vmatmul.f32.gmra.mxu2 %v1616_v62  ;;  %1775 = vmatmul.f32.gmra.mxu3 %v1617_v48  ;;  %v1631_v4 = vmax.f32 %v1174_v1, 0.0  ;;  %v12912_v0 = vld [vmem:[%s15645_s17 + $0x8] sm:$0xff] }
 0x8f7   :  { %1691 = vmatmul.f32.gmra.mxu0 %v1630_v2  ;;  %1720 = vmatmul.f32.gmra.mxu1 %v1631_v4  ;;  %v12915_v4 = vperm.slane %v12912_v0, 0 }
 0x8f9   :  { %v1202_v7 = vpop.f32.mrf.mxu2  ;;  %v1231_v8 = vpop.f32.mrf.mxu3 }
 0x8fa   :  { %v1203_v9 = vadd.f32 %v1202_v7, %v12838_v19  ;;  %v1232_v10 = vadd.f32 %v1231_v8, %v12841_v20  ;;  %v1251_v11 = vpop.f32.mrf.mxu0  ;;  %v1280_v13 = vpop.f32.mrf.mxu1 }
 0x8fb   :  { %v1252_v14 = vadd.f32 %v1251_v11, %v12870_v5  ;;  %v1281_v15 = vadd.f32 %v1280_v13, %v12873_v6 }
 0x8fc   :  { %v1632_v16 = vmax.f32 %v1203_v9, 0.0  ;;  %v1633_v17 = vmax.f32 %v1232_v10, 0.0 }
 0x8fd   :  { %v1586_v18 = vmax.f32 %v1252_v14, 0.0  ;;  %v1587_v3 = vmax.f32 %v1281_v15, 0.0 }
 0x8fe   :  { %1749 = vmatmul.f32.gmra.mxu2 %v1632_v16  ;;  %1778 = vmatmul.f32.gmra.mxu3 %v1633_v17 }
 0x8ff   :  { %1798 = vmatmul.f32.vlgmr.msra.gmra.mxu0 %v1586_v18  ;;  %1827 = vmatmul.f32.vlgmr.msra.gmra.mxu1 %v1587_v3  ;;  %v1084_v3 = vperm.slane %v12912_v0, 2 }
 0x900   :  { %2029 = vmatpush.xpose.msra.mxu0 %v1658_v42  ;;  %2058 = vmatpush.xpose.msra.mxu1 %v1659_v53 }
 0x901   :  { %v1309_v19 = vpop.f32.mrf.mxu2  ;;  %v1338_v20 = vpop.f32.mrf.mxu3 }
 0x902   :  { %v1310_v25 = vadd.f32 %v1309_v19, %v12880_v22  ;;  %v1339_v26 = vadd.f32 %v1338_v20, %v12883_v23  ;;  %v1254_v29 = vpop.f32.mrf.mxu0  ;;  %v1283_v32 = vpop.f32.mrf.mxu1  ;;  %v1085_v19 = vperm.slane %v12912_v0, 3 }
 0x903   :  { %v1255_v27 = vadd.f32 %v1254_v29, %v12870_v5  ;;  %v1284_v34 = vadd.f32 %v1283_v32, %v12873_v6 }
 0x904   :  { %v1588_v35 = vmax.f32 %v1310_v25, 0.0  ;;  %v1589_v30 = vmax.f32 %v1339_v26, 0.0 }
 0x905   :  { %v1602_v37 = vmax.f32 %v1255_v27, 0.0  ;;  %v1603_v41 = vmax.f32 %v1284_v34, 0.0  ;;  %v11896_v27 = vld [vmem:[#allocation5] sm:$0xff] }
 0x906   :  { %1856 = vmatmul.f32.vlgmr.msrb.gmra.mxu2 %v1588_v35  ;;  %1885 = vmatmul.f32.vlgmr.msrb.gmra.mxu3 %v1589_v30 }
 0x907   :  { %1801 = vmatmul.f32.gmra.mxu0 %v1602_v37  ;;  %1830 = vmatmul.f32.gmra.mxu1 %v1603_v41 }
 0x908   :  { %2087 = vmatpush.xpose.msrb.mxu2 %v1660_v12  ;;  %2116 = vmatpush.xpose.msrb.mxu3 %v1661_v44 }
 0x909   :  { %v1312_v33 = vpop.f32.mrf.mxu2  ;;  %v1341_v40 = vpop.f32.mrf.mxu3 }
 0x90a   :  { %v1313_v46 = vadd.f32 %v1312_v33, %v12880_v22  ;;  %v1342_v39 = vadd.f32 %v1341_v40, %v12883_v23  ;;  %v1257_v36 = vpop.f32.mrf.mxu0  ;;  %v1286_v49 = vpop.f32.mrf.mxu1 }
 0x90b   :  { %v1258_v50 = vadd.f32 %v1257_v36, %v12870_v5  ;;  %v1287_v51 = vadd.f32 %v1286_v49, %v12873_v6 }
 0x90c   :  { %v1604_v24 = vmax.f32 %v1313_v46, 0.0  ;;  %v1605_v52 = vmax.f32 %v1342_v39, 0.0 }
 0x90d   :  { %v1618_v31 = vmax.f32 %v1258_v50, 0.0  ;;  %v1619_v54 = vmax.f32 %v1287_v51, 0.0 }
 0x90e   :  { %1859 = vmatmul.f32.gmra.mxu2 %v1604_v24  ;;  %1888 = vmatmul.f32.gmra.mxu3 %v1605_v52 }
 0x90f   :  { %1804 = vmatmul.f32.gmra.mxu0 %v1618_v31  ;;  %1833 = vmatmul.f32.gmra.mxu1 %v1619_v54 }
 0x911   :  { %v1315_v55 = vpop.f32.mrf.mxu2  ;;  %v1344_v56 = vpop.f32.mrf.mxu3 }
 0x912   :  { %v1316_v57 = vadd.f32 %v1315_v55, %v12880_v22  ;;  %v1345_v58 = vadd.f32 %v1344_v56, %v12883_v23  ;;  %v1260_v60 = vpop.f32.mrf.mxu0  ;;  %v1289_v47 = vpop.f32.mrf.mxu1 }
 0x913   :  { %v1261_v61 = vadd.f32 %v1260_v60, %v12870_v5  ;;  %v1290_v38 = vadd.f32 %v1289_v47, %v12873_v6  ;;  %v12918_v5 = vperm.slane %v12912_v0, 1 }
 0x914   :  { %v1620_v62 = vmax.f32 %v1316_v57, 0.0  ;;  %v1621_v48 = vmax.f32 %v1345_v58, 0.0 }
 0x915   :  { %v1634_v1 = vmax.f32 %v1261_v61, 0.0  ;;  %v1635_v2 = vmax.f32 %v1290_v38, 0.0 }
 0x916   :  { %1862 = vmatmul.f32.gmra.mxu2 %v1620_v62  ;;  %1891 = vmatmul.f32.gmra.mxu3 %v1621_v48  ;;  %v1086_v62 = vperm.slane %v12912_v0, 4  ;;  %v1087_v48 = vperm.slane %v12912_v0, 5 }
 0x917   :  { %1807 = vmatmul.f32.gmra.mxu0 %v1634_v1  ;;  %1836 = vmatmul.f32.gmra.mxu1 %v1635_v2 }
 0x919   :  { %v1318_v6 = vpop.f32.mrf.mxu2  ;;  %v1347_v7 = vpop.f32.mrf.mxu3 }
 0x91a   :  { %v1319_v8 = vadd.f32 %v1318_v6, %v12880_v22  ;;  %v1348_v9 = vadd.f32 %v1347_v7, %v12883_v23  ;;  %v1367_v10 = vpop.f32.mrf.mxu0  ;;  %v1396_v11 = vpop.f32.mrf.mxu1  ;;  %v11895_v22 = vld [vmem:[#allocation5 + $0x8] sm:$0xff] }
 0x91b   :  { %v1368_v13 = vadd.f32 %v1367_v10, %v12915_v4  ;;  %v1397_v14 = vadd.f32 %v1396_v11, %v12918_v5 }
 0x91c   :  { %v1636_v15 = vmax.f32 %v1319_v8, 0.0  ;;  %v1637_v16 = vmax.f32 %v1348_v9, 0.0 }
 0x91d   :  { %v1590_v17 = vmax.f32 %v1368_v13, 0.0  ;;  %v1591_v18 = vmax.f32 %v1397_v14, 0.0 }
 0x91e   :  { %1865 = vmatmul.f32.gmra.mxu2 %v1636_v15  ;;  %1894 = vmatmul.f32.gmra.mxu3 %v1637_v16  ;;  %v1088_v15 = vperm.slane %v12912_v0, 6  ;;  %v1089_v16 = vperm.slane %v12912_v0, 7 }
 0x91f   :  { %1914 = vmatmul.f32.vlgmr.msrb.gmra.mxu0 %v1590_v17  ;;  %1943 = vmatmul.f32.vlgmr.msrb.gmra.mxu1 %v1591_v18 }
 0x920   :  { %2384 = vmatpush.msrb.mxu1 %v11895_v22 }
 0x921   :  { %v1425_v23 = vpop.f32.mrf.mxu2  ;;  %v1454_v20 = vpop.f32.mrf.mxu3 }
 0x922   :  { %v1426_v25 = vadd.f32 %v1425_v23, %v1084_v3  ;;  %v1455_v26 = vadd.f32 %v1454_v20, %v1085_v19  ;;  %v1370_v29 = vpop.f32.mrf.mxu0  ;;  %v1399_v32 = vpop.f32.mrf.mxu1  ;;  %2385 = vmatpush.msrb.mxu1 %v11896_v27 }
 0x923   :  { %v1371_v34 = vadd.f32 %v1370_v29, %v12915_v4  ;;  %v1400_v35 = vadd.f32 %v1399_v32, %v12918_v5 }
 0x924   :  { %v1592_v30 = vmax.f32 %v1426_v25, 0.0  ;;  %v1593_v37 = vmax.f32 %v1455_v26, 0.0 }
 0x925   :  { %v1606_v41 = vmax.f32 %v1371_v34, 0.0  ;;  %v1607_v12 = vmax.f32 %v1400_v35, 0.0 }
 0x926   :  { %1972 = vmatmul.f32.vlgmr.msra.gmra.mxu2 %v1592_v30  ;;  %2001 = vmatmul.f32.vlgmr.msra.gmra.mxu3 %v1593_v37 }
 0x927   :  { %1917 = vmatmul.f32.gmra.mxu0 %v1606_v41  ;;  %1946 = vmatmul.f32.gmra.mxu1 %v1607_v12 }
 0x928   :  { %2586 = vmatpush.msra.mxu2 %v12542_v43 }
 0x929   :  { %v1428_v42 = vpop.f32.mrf.mxu2  ;;  %v1457_v44 = vpop.f32.mrf.mxu3 }
 0x92a   :  { %v1429_v33 = vadd.f32 %v1428_v42, %v1084_v3  ;;  %v1458_v40 = vadd.f32 %v1457_v44, %v1085_v19  ;;  %v1373_v46 = vpop.f32.mrf.mxu0  ;;  %v1402_v39 = vpop.f32.mrf.mxu1 }
 0x92b   :  { %v1374_v36 = vadd.f32 %v1373_v46, %v12915_v4  ;;  %v1403_v49 = vadd.f32 %v1402_v39, %v12918_v5 }
 0x92c   :  { %v1608_v50 = vmax.f32 %v1429_v33, 0.0  ;;  %v1609_v51 = vmax.f32 %v1458_v40, 0.0 }
 0x92d   :  { %v1622_v24 = vmax.f32 %v1374_v36, 0.0  ;;  %v1623_v52 = vmax.f32 %v1403_v49, 0.0 }
 0x92e   :  { %1975 = vmatmul.f32.gmra.mxu2 %v1608_v50  ;;  %2004 = vmatmul.f32.gmra.mxu3 %v1609_v51 }
 0x92f   :  { %1920 = vmatmul.f32.gmra.mxu0 %v1622_v24  ;;  %1949 = vmatmul.f32.gmra.mxu1 %v1623_v52 }
 0x931   :  { %v1431_v53 = vpop.f32.mrf.mxu2  ;;  %v1460_v43 = vpop.f32.mrf.mxu3 }
 0x932   :  { %v1432_v31 = vadd.f32 %v1431_v53, %v1084_v3  ;;  %v1461_v54 = vadd.f32 %v1460_v43, %v1085_v19  ;;  %v1376_v55 = vpop.f32.mrf.mxu0  ;;  %v1405_v56 = vpop.f32.mrf.mxu1 }
 0x933   :  { %v1377_v57 = vadd.f32 %v1376_v55, %v12915_v4  ;;  %v1406_v58 = vadd.f32 %v1405_v56, %v12918_v5 }
 0x934   :  { %v1624_v60 = vmax.f32 %v1432_v31, 0.0  ;;  %v1625_v47 = vmax.f32 %v1461_v54, 0.0 }
 0x935   :  { %v1638_v61 = vmax.f32 %v1377_v57, 0.0  ;;  %v1639_v38 = vmax.f32 %v1406_v58, 0.0 }
 0x936   :  { %1978 = vmatmul.f32.gmra.mxu2 %v1624_v60  ;;  %2007 = vmatmul.f32.gmra.mxu3 %v1625_v47 }
 0x937   :  { %1923 = vmatmul.f32.gmra.mxu0 %v1638_v61  ;;  %1952 = vmatmul.f32.gmra.mxu1 %v1639_v38 }
 0x939   :  { %v1434_v1 = vpop.f32.mrf.mxu2  ;;  %v1463_v2 = vpop.f32.mrf.mxu3 }
 0x93a   :  { %v1435_v6 = vadd.f32 %v1434_v1, %v1084_v3  ;;  %v1464_v7 = vadd.f32 %v1463_v2, %v1085_v19  ;;  %v1483_v8 = vpop.f32.mrf.mxu0  ;;  %v1512_v4 = vpop.f32.mrf.mxu1 }
 0x93b   :  { %v1484_v9 = vadd.f32 %v1483_v8, %v1086_v62  ;;  %v1513_v5 = vadd.f32 %v1512_v4, %v1087_v48 }
 0x93c   :  { %v1640_v10 = vmax.f32 %v1435_v6, 0.0  ;;  %v1641_v11 = vmax.f32 %v1464_v7, 0.0 }
 0x93d   :  { %v1594_v13 = vmax.f32 %v1484_v9, 0.0  ;;  %v1595_v14 = vmax.f32 %v1513_v5, 0.0 }
 0x93e   :  { %1981 = vmatmul.f32.gmra.mxu2 %v1640_v10  ;;  %2010 = vmatmul.f32.gmra.mxu3 %v1641_v11 }
 0x93f   :  { %2030 = vmatmul.f32.vlgmr.msra.gmra.mxu0 %v1594_v13  ;;  %2059 = vmatmul.f32.vlgmr.msra.gmra.mxu1 %v1595_v14 }
 0x941   :  { %v1541_v17 = vpop.f32.mrf.mxu2  ;;  %v1570_v18 = vpop.f32.mrf.mxu3 }
 0x942   :  { %v1542_v3 = vadd.f32 %v1541_v17, %v1088_v15  ;;  %v1571_v19 = vadd.f32 %v1570_v18, %v1089_v16  ;;  %v1486_v22 = vpop.f32.mrf.mxu0  ;;  %v1515_v23 = vpop.f32.mrf.mxu1 }
 0x943   :  { %v1487_v20 = vadd.f32 %v1486_v22, %v1086_v62  ;;  %v1516_v25 = vadd.f32 %v1515_v23, %v1087_v48 }
 0x944   :  { %v1596_v26 = vmax.f32 %v1542_v3, 0.0  ;;  %v1597_v29 = vmax.f32 %v1571_v19, 0.0 }
 0x945   :  { %v1610_v32 = vmax.f32 %v1487_v20, 0.0  ;;  %v1611_v27 = vmax.f32 %v1516_v25, 0.0 }
 0x946   :  { %2088 = vmatmul.f32.vlgmr.msrb.gmra.mxu2 %v1596_v26  ;;  %2117 = vmatmul.f32.vlgmr.msrb.gmra.mxu3 %v1597_v29 }
 0x947   :  { %2033 = vmatmul.f32.gmra.mxu0 %v1610_v32  ;;  %2062 = vmatmul.f32.gmra.mxu1 %v1611_v27 }
 0x949   :  { %v1544_v34 = vpop.f32.mrf.mxu2  ;;  %v1573_v0 = vpop.f32.mrf.mxu3 }
 0x94a   :  { %v1545_v35 = vadd.f32 %v1544_v34, %v1088_v15  ;;  %v1574_v30 = vadd.f32 %v1573_v0, %v1089_v16  ;;  %v1489_v37 = vpop.f32.mrf.mxu0  ;;  %v1518_v41 = vpop.f32.mrf.mxu1  ;;  %v11663_v0 = vld [vmem:[%s15647_s19] ss:$0 sm:$0xff] }
 0x94b   :  { %v1490_v12 = vadd.f32 %v1489_v37, %v1086_v62  ;;  %v1519_v42 = vadd.f32 %v1518_v41, %v1087_v48 }
 0x94c   :  { %v1612_v44 = vmax.f32 %v1545_v35, 0.0  ;;  %v1613_v33 = vmax.f32 %v1574_v30, 0.0 }
 0x94d   :  { %v1626_v40 = vmax.f32 %v1490_v12, 0.0  ;;  %v1627_v46 = vmax.f32 %v1519_v42, 0.0 }
 0x94e   :  { %2091 = vmatmul.f32.gmra.mxu2 %v1612_v44  ;;  %2120 = vmatmul.f32.gmra.mxu3 %v1613_v33 }
 0x94f   :  { %2036 = vmatmul.f32.gmra.mxu0 %v1626_v40  ;;  %2065 = vmatmul.f32.gmra.mxu1 %v1627_v46 }
 0x951   :  { %v1547_v39 = vpop.f32.mrf.mxu2  ;;  %v1576_v36 = vpop.f32.mrf.mxu3 }
 0x952   :  { %v1548_v49 = vadd.f32 %v1547_v39, %v1088_v15  ;;  %v1577_v50 = vadd.f32 %v1576_v36, %v1089_v16  ;;  %v1492_v51 = vpop.f32.mrf.mxu0  ;;  %v1521_v24 = vpop.f32.mrf.mxu1 }
 0x953   :  { %v1493_v52 = vadd.f32 %v1492_v51, %v1086_v62  ;;  %v1522_v53 = vadd.f32 %v1521_v24, %v1087_v48 }
 0x954   :  { %v1628_v43 = vmax.f32 %v1548_v49, 0.0  ;;  %v1629_v31 = vmax.f32 %v1577_v50, 0.0 }
 0x955   :  { %v1642_v54 = vmax.f32 %v1493_v52, 0.0  ;;  %v1643_v55 = vmax.f32 %v1522_v53, 0.0 }
 0x956   :  { %2094 = vmatmul.f32.gmra.mxu2 %v1628_v43  ;;  %2123 = vmatmul.f32.gmra.mxu3 %v1629_v31 }
 0x957   :  { %2039 = vmatmul.f32.gmra.mxu0 %v1642_v54  ;;  %2068 = vmatmul.f32.gmra.mxu1 %v1643_v55 }
 0x959   :  { %v1550_v56 = vpop.f32.mrf.mxu2  ;;  %v1579_v57 = vpop.f32.mrf.mxu3 }
 0x95a   :  { %v1551_v58 = vadd.f32 %v1550_v56, %v1088_v15  ;;  %v1580_v60 = vadd.f32 %v1579_v57, %v1089_v16  ;;  %v1683_v47 = vpop.f32.mrf.mxu0  ;;  %v1712_v61 = vpop.f32.mrf.mxu1 }
 0x95b   :  { %v1684_v37 = vadd.f32 %v11663_v0, %v1683_v47 }
 0x95c   :  { %v1644_v38 = vmax.f32 %v1551_v58, 0.0  ;;  %v1645_v1 = vmax.f32 %v1580_v60, 0.0 }
 0x95d   :  { %v1713_v42 = vadd.f32 %v1712_v61, %v1684_v37 }
 0x95e   :  { %2097 = vmatmul.f32.gmra.mxu2 %v1644_v38  ;;  %2126 = vmatmul.f32.gmra.mxu3 %v1645_v1 }
 0x961   :  { %v1741_v2 = vpop.f32.mrf.mxu2  ;;  %v1770_v6 = vpop.f32.mrf.mxu3 }
 0x962   :  { %v1686_v62 = vpop.f32.mrf.mxu0  ;;  %v1715_v48 = vpop.f32.mrf.mxu1  ;;  %v1742_v40 = vadd.f32 %v1741_v2, %v1713_v42 }
 0x963   :  { %v1687_v46 = vadd.f32 %v11663_v0, %v1686_v62 }
 0x964   :  { %v1771_v49 = vadd.f32 %v1770_v6, %v1742_v40 }
 0x965   :  { %v1716_v50 = vadd.f32 %v1715_v48, %v1687_v46 }
 0x969   :  { %v1744_v4 = vpop.f32.mrf.mxu2  ;;  %v1773_v9 = vpop.f32.mrf.mxu3 }
 0x96a   :  { %v1745_v53 = vadd.f32 %v1744_v4, %v1716_v50 }
 0x96b   :  { %v1689_v7 = vpop.f32.mrf.mxu0  ;;  %v1718_v8 = vpop.f32.mrf.mxu1 }
 0x96c   :  { %v1690_v43 = vadd.f32 %v11663_v0, %v1689_v7  ;;  %v1774_v56 = vadd.f32 %v1773_v9, %v1745_v53 }
 0x96e   :  { %v1719_v58 = vadd.f32 %v1718_v8, %v1690_v43 }
 0x974   :  { %v1692_v5 = vpop.f32.mrf.mxu0  ;;  %v1721_v10 = vpop.f32.mrf.mxu1 }
 0x975   :  { %v1693_v62 = vadd.f32 %v11663_v0, %v1692_v5 }
 0x977   :  { %v1722_v4 = vadd.f32 %v1721_v10, %v1693_v62 }
 0x978   :  { %v1747_v11 = vpop.f32.mrf.mxu2  ;;  %v1776_v13 = vpop.f32.mrf.mxu3 }
 0x979   :  { %v1748_v61 = vadd.f32 %v1747_v11, %v1719_v58 }
 0x97b   :  { %v1777_v37 = vadd.f32 %v1776_v13, %v1748_v61 }
 0x97c   :  { %v1799_v14 = vpop.f32.mrf.mxu0  ;;  %v1828_v15 = vpop.f32.mrf.mxu1 }
 0x97d   :  { %v1800_v51 = vadd.f32 %v1799_v14, %v1771_v49 }
 0x97f   :  { %v1829_v31 = vadd.f32 %v1828_v15, %v1800_v51 }
 0x981   :  { %v1750_v16 = vpop.f32.mrf.mxu2  ;;  %v12937_v17 = vpop.f32.mrf.mxu3 }
 0x982   :  { %v1751_v46 = vadd.f32 %v1750_v16, %v1722_v4 }
 0x984   :  { %v1802_v18 = vpop.f32.mrf.mxu0  ;;  %v1831_v3 = vpop.f32.mrf.mxu1  ;;  %v1780_v5 = vadd.f32 %v12937_v17, %v1751_v46 }
 0x985   :  { %v1803_v60 = vadd.f32 %v1802_v18, %v1774_v56 }
 0x987   :  { %v1832_v2 = vadd.f32 %v1831_v3, %v1803_v60 }
 0x989   :  { %v1857_v19 = vpop.f32.mrf.mxu2  ;;  %v1886_v22 = vpop.f32.mrf.mxu3 }
 0x98a   :  { %v1858_v57 = vadd.f32 %v1857_v19, %v1829_v31 }
 0x98c   :  { %v1805_v23 = vpop.f32.mrf.mxu0  ;;  %v1834_v20 = vpop.f32.mrf.mxu1  ;;  %v1887_v38 = vadd.f32 %v1886_v22, %v1858_v57 }
 0x98d   :  { %v1806_v7 = vadd.f32 %v1805_v23, %v1777_v37 }
 0x98f   :  { %v1835_v8 = vadd.f32 %v1834_v20, %v1806_v7 }
 0x991   :  { %v1860_v25 = vpop.f32.mrf.mxu2  ;;  %v1889_v26 = vpop.f32.mrf.mxu3 }
 0x992   :  { %v1861_v42 = vadd.f32 %v1860_v25, %v1832_v2 }
 0x994   :  { %v1808_v29 = vpop.f32.mrf.mxu0  ;;  %v1837_v32 = vpop.f32.mrf.mxu1  ;;  %v1890_v9 = vadd.f32 %v1889_v26, %v1861_v42 }
 0x999   :  { %v1863_v27 = vpop.f32.mrf.mxu2  ;;  %v1892_v34 = vpop.f32.mrf.mxu3 }
 0x99a   :  { %v1864_v3 = vadd.f32 %v1863_v27, %v1835_v8 }
 0x99c   :  { %v1915_v35 = vpop.f32.mrf.mxu0  ;;  %v1944_v30 = vpop.f32.mrf.mxu1  ;;  %v1893_v10 = vadd.f32 %v1892_v34, %v1864_v3 }
 0x99d   :  { %v1916_v6 = vadd.f32 %v1915_v35, %v1887_v38  ;;  %v1809_v35 = vadd.f32 %v1808_v29, %v1780_v5 }
 0x99f   :  { %v1945_v15 = vadd.f32 %v1944_v30, %v1916_v6  ;;  %v1838_v30 = vadd.f32 %v1837_v32, %v1809_v35 }
 0x9a1   :  { %v1866_v41 = vpop.f32.mrf.mxu2  ;;  %v12942_v12 = vpop.f32.mrf.mxu3 }
 0x9a2   :  { %v1867_v20 = vadd.f32 %v1866_v41, %v1838_v30 }
 0x9a4   :  { %v1918_v44 = vpop.f32.mrf.mxu0  ;;  %v1947_v33 = vpop.f32.mrf.mxu1  ;;  %v1896_v27 = vadd.f32 %v12942_v12, %v1867_v20 }
 0x9a5   :  { %v1919_v18 = vadd.f32 %v1918_v44, %v1890_v9 }
 0x9a7   :  { %v1948_v50 = vadd.f32 %v1947_v33, %v1919_v18 }
 0x9a9   :  { %v1973_v39 = vpop.f32.mrf.mxu2  ;;  %v2002_v36 = vpop.f32.mrf.mxu3 }
 0x9aa   :  { %v1974_v19 = vadd.f32 %v1973_v39, %v1945_v15 }
 0x9ac   :  { %v1921_v24 = vpop.f32.mrf.mxu0  ;;  %v1950_v52 = vpop.f32.mrf.mxu1  ;;  %v2003_v0 = vadd.f32 %v2002_v36, %v1974_v19 }
 0x9ad   :  { %v1922_v51 = vadd.f32 %v1921_v24, %v1893_v10 }
 0x9af   :  { %v1951_v31 = vadd.f32 %v1950_v52, %v1922_v51 }
 0x9b1   :  { %v1976_v54 = vpop.f32.mrf.mxu2  ;;  %v2005_v55 = vpop.f32.mrf.mxu3 }
 0x9b2   :  { %v1977_v23 = vadd.f32 %v1976_v54, %v1948_v50 }
 0x9b4   :  { %v1924_v47 = vpop.f32.mrf.mxu0  ;;  %v1953_v1 = vpop.f32.mrf.mxu1  ;;  %v2006_v44 = vadd.f32 %v2005_v55, %v1977_v23 }
 0x9b5   :  { %v1925_v34 = vadd.f32 %v1924_v47, %v1896_v27 }
 0x9b7   :  { %v1954_v58 = vadd.f32 %v1953_v1, %v1925_v34 }
 0x9b9   :  { %v1979_v48 = vpop.f32.mrf.mxu2  ;;  %v2008_v14 = vpop.f32.mrf.mxu3 }
 0x9ba   :  { %v1980_v29 = vadd.f32 %v1979_v48, %v1951_v31 }
 0x9bc   :  { %v2031_v40 = vpop.f32.mrf.mxu0  ;;  %v2060_v49 = vpop.f32.mrf.mxu1  ;;  %v2009_v41 = vadd.f32 %v2008_v14, %v1980_v29 }
 0x9bd   :  { %v2032_v13 = vadd.f32 %v2031_v40, %v2003_v0 }
 0x9bf   :  { %v2061_v16 = vadd.f32 %v2060_v49, %v2032_v13  ;;  %v11026_v49 = vld [vmem:[%s15638_s10 + $0x8] sm:$0xff] }
 0x9c0   :  { %2272 = vmatpush.msrb.mxu0 %v11026_v49 }
 0x9c1   :  { %v1982_v11 = vpop.f32.mrf.mxu2  ;;  %v2011_v22 = vpop.f32.mrf.mxu3 }
 0x9c2   :  { %v1983_v38 = vadd.f32 %v1982_v11, %v1954_v58  ;;  %v11664_v58 = vld [vmem:[#allocation8] ss:$0 sm:$0xff] }
 0x9c4   :  { %v2034_v25 = vpop.f32.mrf.mxu0  ;;  %v2063_v43 = vpop.f32.mrf.mxu1  ;;  %v2012_v48 = vadd.f32 %v2011_v22, %v1983_v38 }
 0x9c5   :  { %v2035_v56 = vadd.f32 %v2034_v25, %v2006_v44 }
 0x9c7   :  { %v2064_v54 = vadd.f32 %v2063_v43, %v2035_v56 }
 0x9c9   :  { %v2089_v26 = vpop.f32.mrf.mxu2  ;;  %v2118_v39 = vpop.f32.mrf.mxu3 }
 0x9ca   :  { %v2090_v53 = vadd.f32 %v2089_v26, %v2061_v16 }
 0x9cc   :  { %v2119_v17 = vadd.f32 %v2118_v39, %v2090_v53  ;;  %v2037_v33 = vpop.f32.mrf.mxu0  ;;  %v2066_v61 = vpop.f32.mrf.mxu1 }
 0x9cd   :  { %v2038_v60 = vadd.f32 %v2037_v33, %v2009_v41 }
 0x9ce   :  { %v2130_v36 = vadd.f32 %v2119_v17, %v12632_v21 }
 0x9cf   :  { %v2067_v62 = vadd.f32 %v2066_v61, %v2038_v60  ;;  %v11665_v61 = vld [vmem:[#allocation10] ss:$0 sm:$0xff] }
 0x9d0   :  { %v2136_v32 = vsel %vm390_vm7, %v2130_v36, 0.0 }
 0x9d1   :  { %v2092_v24 = vpop.f32.mrf.mxu2  ;;  %v2121_v57 = vpop.f32.mrf.mxu3  ;;  %2137 = vadd.xlane.f32.xlu0 %v2136_v32 }
 0x9d2   :  { %v2093_v55 = vadd.f32 %v2092_v24, %v2064_v54 }
 0x9d4   :  { %v2122_v52 = vadd.f32 %v2121_v57, %v2093_v55  ;;  %v2040_v2 = vpop.f32.mrf.mxu0  ;;  %v2069_v1 = vpop.f32.mrf.mxu1 }
 0x9d5   :  { %v2041_v42 = vadd.f32 %v2040_v2, %v2012_v48 }
 0x9d6   :  { %v2131_v12 = vadd.f32 %v2122_v52, %v12644_v28 }
 0x9d7   :  { %v2070_v7 = vadd.f32 %v2069_v1, %v2041_v42 }
 0x9d8   :  { %v2139_v21 = vsel %vm390_vm7, %v2131_v12, 0.0 }
 0x9d9   :  { %v2095_v47 = vpop.f32.mrf.mxu2  ;;  %v2124_v6 = vpop.f32.mrf.mxu3  ;;  %2140 = vadd.xlane.f32.xlu1 %v2139_v21 }
 0x9da   :  { %v2096_v37 = vadd.f32 %v2095_v47, %v2067_v62 }
 0x9dc   :  { %v2125_v4 = vadd.f32 %v2124_v6, %v2096_v37 }
 0x9de   :  { %v2132_v14 = vadd.f32 %v2125_v4, %v12683_v59 }
 0x9e0   :  { %v2142_v15 = vsel %vm390_vm7, %v2132_v14, 0.0 }
 0x9e1   :  { %v2098_v40 = vpop.f32.mrf.mxu2  ;;  %2143 = vadd.xlane.f32.xlu2 %v2142_v15  ;;  %v2127_v46 = vpop.f32.mrf.mxu3 }
 0x9e2   :  { %v2099_v28 = vadd.f32 %v2098_v40, %v2070_v7 }
 0x9e4   :  { %v2128_v9 = vadd.f32 %v2127_v46, %v2099_v28 }
 0x9e6   :  { %v2133_v19 = vadd.f32 %v2128_v9, %v12696_v63 }
 0x9e8   :  { %v2145_v8 = vsel %vm390_vm7, %v2133_v19, 0.0 }
 0x9e9   :  { %2146 = vadd.xlane.f32.xlu0 %v2145_v8 }
 0xa44   :  { %v2138_v18 = vpop.xlane.xlu0 %2137 }
 0xa45   :  { %v2148_v59 = vmul.f32 %v2138_v18, %v12588_v45 }
 0xa47   :  { %v2152_v11 = vsub.f32 %v2130_v36, %v2148_v59 }
 0xa49   :  { %v2156_v22 = vmul.f32 %v2152_v11, %v2152_v11 }
 0xa4b   :  { %v2160_v5 = vsel %vm390_vm7, %v2156_v22, 0.0 }
 0xa4c   :  { %2161 = vadd.xlane.f32.xlu1 %v2160_v5  ;;  %v2141_v3 = vpop.xlane.xlu1 %2140 }
 0xa4d   :  { %v2149_v0 = vmul.f32 %v2141_v3, %v12588_v45 }
 0xa4f   :  { %v2153_v63 = vsub.f32 %v2131_v12, %v2149_v0 }
 0xa51   :  { %v2157_v35 = vmul.f32 %v2153_v63, %v2153_v63 }
 0xa53   :  { %v2163_v50 = vsel %vm390_vm7, %v2157_v35, 0.0 }
 0xa54   :  { %v2144_v13 = vpop.xlane.xlu2 %2143  ;;  %2164 = vadd.xlane.f32.xlu2 %v2163_v50 }
 0xa55   :  { %v2150_v25 = vmul.f32 %v2144_v13, %v12588_v45 }
 0xa57   :  { %v12962_v10 = vsub.f32 %v2132_v14, %v2150_v25  ;;  %v11666_v25 = vld [vmem:[%s15639_s11 + $0x1] ss:$0 sm:$0xff] }
 0xa59   :  { %v2158_v23 = vmul.f32 %v12962_v10, %v12962_v10 }
 0xa5b   :  { %v2166_v30 = vsel %vm390_vm7, %v2158_v23, 0.0 }
 0xa5c   :  { %v2147_v51 = vpop.xlane.xlu0 %2146  ;;  %2167 = vadd.xlane.f32.xlu0 %v2166_v30 }
 0xa5d   :  { %v2151_v16 = vmul.f32 %v2147_v51, %v12588_v45 }
 0xa5f   :  { %v12968_v26 = vsub.f32 %v2133_v19, %v2151_v16 }
 0xa61   :  { %v2159_v39 = vmul.f32 %v12968_v26, %v12968_v26 }
 0xa63   :  { %v2169_v20 = vsel %vm390_vm7, %v2159_v39, 0.0 }
 0xa64   :  { %2170 = vadd.xlane.f32.xlu1 %v2169_v20 }
 0xabf   :  { %v2162_v44 = vpop.xlane.xlu1 %2161 }
 0xac0   :  { %v2172_v53 = vmul.f32 %v2162_v44, %v12588_v45 }
 0xac2   :  { %v2176_v43 = vadd.f32 1e-05, %v2172_v53 }
 0xac4   :  { %11727 = vrsqrt.f32 %v2176_v43  ;;  %vm2186_vm5 = vweird.f32 %v2176_v43 }
 0xac7   :  { %v2165_v31 = vpop.xlane.xlu2 %2164 }
 0xac8   :  { %v2173_v56 = vmul.f32 %v2165_v31, %v12588_v45 }
 0xaca   :  { %v11728_v17 = vpop.eup %11727  ;;  %v2177_v27 = vadd.f32 1e-05, %v2173_v56 }
 0xacb   :  { %v2181_v29 = vmul.f32 %v11728_v17, %v2176_v43  ;;  %vm2187_vm4 = vweird.f32 %v11728_v17 }
 0xacc   :  { %11729 = vrsqrt.f32 %v2177_v27  ;;  %vm2188_vm6 = vmor %vm2186_vm5, %vm2187_vm4  ;;  %vm2196_vm10 = vweird.f32 %v2177_v27 }
 0xacd   :  { %v2182_v33 = vmul.f32 %v11728_v17, %v2181_v29 }
 0xacf   :  { %v2183_v36 = vmul.f32 0.5, %v2182_v33  ;;  %v2168_v34 = vpop.xlane.xlu0 %2167 }
 0xad0   :  { %v2174_v54 = vmul.f32 %v2168_v34, %v12588_v45 }
 0xad1   :  { %v2184_v32 = vsub.f32 1.5, %v2183_v36 }
 0xad2   :  { %v11730_v24 = vpop.eup %11729  ;;  %v2178_v57 = vadd.f32 1e-05, %v2174_v54 }
 0xad3   :  { %v2185_v41 = vmul.f32 %v11728_v17, %v2184_v32  ;;  %v2191_v55 = vmul.f32 %v11730_v24, %v2177_v27  ;;  %vm2197_vm9 = vweird.f32 %v11730_v24 }
 0xad4   :  { %11731 = vrsqrt.f32 %v2178_v57  ;;  %vm2198_vm11 = vmor %vm2196_vm10, %vm2197_vm9  ;;  %vm2206_vm13 = vweird.f32 %v2178_v57 }
 0xad5   :  { %v2189_v60 = vsel %vm2188_vm6, %v11728_v17, %v2185_v41  ;;  %v2192_v52 = vmul.f32 %v11730_v24, %v2191_v55 }
 0xad6   :  { %v2220_v38 = vmul.f32 %v2189_v60, %v2152_v11 }
 0xad7   :  { %v2193_v12 = vmul.f32 0.5, %v2192_v52  ;;  %v2171_v62 = vpop.xlane.xlu1 %2170 }
 0xad8   :  { %v2227_v2 = vmul.f32 %v11664_v58, %v2220_v38  ;;  %v2175_v21 = vmul.f32 %v2171_v62, %v12588_v45 }
 0xad9   :  { %v2194_v47 = vsub.f32 1.5, %v2193_v12 }
 0xada   :  { %v11732_v6 = vpop.eup %11731  ;;  %v12977_v48 = vadd.f32 %v11665_v61, %v2227_v2  ;;  %v2179_v37 = vadd.f32 1e-05, %v2175_v21 }
 0xadb   :  { %v2195_v42 = vmul.f32 %v11730_v24, %v2194_v47  ;;  %v2201_v4 = vmul.f32 %v11732_v6, %v2178_v57  ;;  %vm2207_vm12 = vweird.f32 %v11732_v6 }
 0xadc   :  { %11733 = vrsqrt.f32 %v2179_v37  ;;  %11028 = vmatmul.msk.f32.vlgmr.msrb.gmra.mxu0 %vm390_vm7, %v12977_v48  ;;  %vm2208_vm14 = vmor %vm2206_vm13, %vm2207_vm12  ;;  %vm2216_vm1 = vweird.f32 %v2179_v37 }
 0xadd   :  { %v2199_v14 = vsel %vm2198_vm11, %v11730_v24, %v2195_v42  ;;  %v2202_v1 = vmul.f32 %v11732_v6, %v2201_v4 }
 0xade   :  { %v2221_v7 = vmul.f32 %v2199_v14, %v2153_v63 }
 0xadf   :  { %v2203_v15 = vmul.f32 0.5, %v2202_v1 }
 0xae0   :  { %v2228_v40 = vmul.f32 %v11664_v58, %v2221_v7 }
 0xae1   :  { %v2204_v28 = vsub.f32 1.5, %v2203_v15 }
 0xae2   :  { %v11734_v46 = vpop.eup %11733  ;;  %v12981_v9 = vadd.f32 %v11665_v61, %v2228_v40 }
 0xae3   :  { %v2205_v19 = vmul.f32 %v11732_v6, %v2204_v28  ;;  %v2211_v8 = vmul.f32 %v11734_v46, %v2179_v37  ;;  %vm2217_vm15 = vweird.f32 %v11734_v46 }
 0xae4   :  { %11029 = vmatmul.msk.f32.gmra.mxu0 %vm390_vm7, %v12981_v9  ;;  %vm2218_vm2 = vmor %vm2216_vm1, %vm2217_vm15 }
 0xae5   :  { %v2209_v18 = vsel %vm2208_vm14, %v11732_v6, %v2205_v19  ;;  %v2212_v49 = vmul.f32 %v11734_v46, %v2211_v8 }
 0xae6   :  { %v2222_v59 = vmul.f32 %v2209_v18, %v12962_v10 }
 0xae7   :  { %v2213_v11 = vmul.f32 0.5, %v2212_v49 }
 0xae8   :  { %v2229_v22 = vmul.f32 %v11664_v58, %v2222_v59 }
 0xae9   :  { %v2214_v5 = vsub.f32 1.5, %v2213_v11 }
 0xaea   :  { %v12986_v3 = vadd.f32 %v11665_v61, %v2229_v22 }
 0xaeb   :  { %v2215_v0 = vmul.f32 %v11734_v46, %v2214_v5 }
 0xaec   :  { %11030 = vmatmul.msk.f32.gmra.mxu0 %vm390_vm7, %v12986_v3 }
 0xaed   :  { %v2219_v63 = vsel %vm2218_vm2, %v11734_v46, %v2215_v0 }
 0xaee   :  { %v2223_v35 = vmul.f32 %v2219_v63, %v12968_v26 }
 0xaf0   :  { %v2230_v50 = vmul.f32 %v11664_v58, %v2223_v35 }
 0xaf2   :  { %v12991_v13 = vadd.f32 %v11665_v61, %v2230_v50 }
 0xaf4   :  { %11031 = vmatmul.msk.f32.gmra.mxu0 %vm390_vm7, %v12991_v13 }
 0xb59   :  { %v2274_v10 = vpop.f32.mrf.mxu0 }
 0xb5a   :  { %v12998_v23 = vadd.f32 %v11666_v25, %v2274_v10 }
 0xb5c   :  { %2290 = vrot.lane.b32.xlu1 %v12998_v23, %s12076_s4 }
 0xb61   :  { %v2277_v30 = vpop.f32.mrf.mxu0 }
 0xb62   :  { %v13010_v20 = vadd.f32 %v11666_v25, %v2277_v30 }
 0xb69   :  { %v2280_v51 = vpop.f32.mrf.mxu0 }
 0xb6a   :  { %v13002_v16 = vadd.f32 %v11666_v25, %v2280_v51 }
 0xb6c   :  { %2294 = vrot.lane.b32.xlu2 %v13002_v16, %s12076_s4 }
 0xb71   :  { %v2283_v26 = vpop.f32.mrf.mxu0 }
 0xb72   :  { %v13006_v39 = vadd.f32 %v11666_v25, %v2283_v26 }
 0xb74   :  { %2296 = vrot.lane.b32.xlu0 %v13006_v39, %s12076_s4 }
 0xb7c   :  { %2292 = vrot.lane.b32.xlu0 %v13010_v20, %s12076_s4 }
 0xbc6   :  { %v2295_v44 = vpop.permute.xlu2 %2294 }
 0xbc7   :  { %v2306_v53 = vmul.f32 %v2295_v44, %v12998_v23  ;;  %v2304_v41 = vmul.f32 %v2295_v44, %v13002_v16 }
 0xbc9   :  { %2322 = vrot.lane.b32.xlu2 %v2306_v53, %s12063_s24 }
 0xbce   :  { %v2291_v43 = vpop.permute.xlu1 %2290 }
 0xbcf   :  { %v2308_v31 = vmul.f32 %v2291_v43, %v13002_v16  ;;  %v2302_v33 = vmul.f32 %v2291_v43, %v12998_v23 }
 0xbd1   :  { %2326 = vrot.lane.b32.xlu0 %v2308_v31, %s12063_s24 }
 0xbe6   :  { %v2297_v56 = vpop.permute.xlu0 %2296 }
 0xbe7   :  { %v2307_v17 = vmul.f32 %v2297_v56, %v13010_v20  ;;  %v2305_v60 = vmul.f32 %v2297_v56, %v13006_v39 }
 0xbe9   :  { %2324 = vrot.lane.b32.xlu1 %v2307_v17, %s12063_s24 }
 0xbee   :  { %v2293_v27 = vpop.permute.xlu0 %2292 }
 0xbef   :  { %v2309_v29 = vmul.f32 %v2293_v27, %v13006_v39  ;;  %v2303_v54 = vmul.f32 %v2293_v27, %v13010_v20 }
 0xbf1   :  { %2328 = vrot.lane.b32.xlu2 %v2309_v29, %s12063_s24 }
 0xc23   :  { %v2323_v36 = vpop.permute.xlu2 %2322 }
 0xc24   :  { %v2334_v34 = vsel %vm390_vm7, %v2302_v33, %v2323_v36 }
 0xc25   :  { %11032 = vmatmul.msk.f32.vlgmr.msrb.gmra.mxu1 %vm395_vm8, %v2334_v34 }
 0xc43   :  { %v2327_v57 = vpop.permute.xlu0 %2326 }
 0xc44   :  { %v2336_v55 = vsel %vm390_vm7, %v2304_v41, %v2327_v57 }
 0xc4b   :  { %v2329_v58 = vpop.permute.xlu2 %2328 }
 0xc4c   :  { %v2337_v52 = vsel %vm390_vm7, %v2305_v60, %v2329_v58 }
 0xc5b   :  { %v2325_v32 = vpop.permute.xlu1 %2324 }
 0xc5c   :  { %v2335_v24 = vsel %vm390_vm7, %v2303_v54, %v2325_v32 }
 0xc5d   :  { %11033 = vmatmul.msk.f32.gmra.mxu1 %vm395_vm8, %v2335_v24 }
 0xc65   :  { %11034 = vmatmul.msk.f32.gmra.mxu1 %vm395_vm8, %v2336_v55 }
 0xc6d   :  { %11035 = vmatmul.msk.f32.gmra.mxu1 %vm395_vm8, %v2337_v52 }
 0xca2   :  { %v2387_v61 = vpop.f32.mrf.mxu1 }
 0xca3   :  { %v2399_v38 = vmul.f32 0.70710677, %v2387_v61 }
 0xca5   :  { %2407 = vrot.lane.b32.xlu1 %v2399_v38, %s12077_s6 }
 0xcda   :  { %v2390_v12 = vpop.f32.mrf.mxu1 }
 0xcdb   :  { %v2400_v62 = vmul.f32 0.70710677, %v2390_v12 }
 0xcdd   :  { %2409 = vrot.lane.b32.xlu0 %v2400_v62, %s12077_s6 }
 0xce2   :  { %v2393_v2 = vpop.f32.mrf.mxu1 }
 0xce3   :  { %v2401_v21 = vmul.f32 0.70710677, %v2393_v2 }
 0xce5   :  { %2411 = vrot.lane.b32.xlu2 %v2401_v21, %s12077_s6 }
 0xcea   :  { %v2396_v47 = vpop.f32.mrf.mxu1 }
 0xceb   :  { %v2402_v6 = vmul.f32 0.70710677, %v2396_v47 }
 0xced   :  { %2413 = vrot.lane.b32.xlu1 %v2402_v6, %s12077_s6 }
 0xd17   :  { %v2408_v37 = vpop.permute.xlu1 %2407 }
 0xd18   :  { %v2419_v42 = vmax.f32 %v2399_v38, %v2408_v37 }
 0xd1a   :  { %2427 = vrot.lane.b32.xlu0 %v2419_v42, %s12078_s1 }
 0xd3f   :  { %v2412_v4 = vpop.permute.xlu2 %2411 }
 0xd40   :  { %v2421_v14 = vmax.f32 %v2401_v21, %v2412_v4 }
 0xd42   :  { %2431 = vrot.lane.b32.xlu1 %v2421_v14, %s12078_s1 }
 0xd4f   :  { %v2410_v1 = vpop.permute.xlu0 %2409 }
 0xd50   :  { %v2420_v7 = vmax.f32 %v2400_v62, %v2410_v1 }
 0xd52   :  { %2429 = vrot.lane.b32.xlu2 %v2420_v7, %s12078_s1 }
 0xd5f   :  { %v2414_v15 = vpop.permute.xlu1 %2413 }
 0xd60   :  { %v2422_v40 = vmax.f32 %v2402_v6, %v2414_v15 }
 0xd62   :  { %2433 = vrot.lane.b32.xlu0 %v2422_v40, %s12078_s1 }
 0xd8c   :  { %v2428_v28 = vpop.permute.xlu0 %2427 }
 0xd8d   :  { %v2439_v46 = vsel %vm707_vm0, %v2419_v42, %v2428_v28 }
 0xd8e   :  { %v2443_v19 = vsub.f32 %v2399_v38, %v2439_v46 }
 0xd90   :  { %v2447_v8 = vmul.f32 1.442695, %v2443_v19 }
 0xd92   :  { %11735 = vpow2.f32 %v2447_v8 }
 0xd98   :  { %v13043_v18 = vpop.eup %11735 }
 0xd99   :  { %2459 = vrot.lane.b32.xlu2 %v13043_v18, %s12077_s6 }
 0xdac   :  { %v2430_v49 = vpop.permute.xlu2 %2429 }
 0xdad   :  { %v2440_v59 = vsel %vm707_vm0, %v2420_v7, %v2430_v49 }
 0xdae   :  { %v2444_v11 = vsub.f32 %v2400_v62, %v2440_v59 }
 0xdb0   :  { %v2449_v22 = vmul.f32 1.442695, %v2444_v11 }
 0xdb2   :  { %11737 = vpow2.f32 %v2449_v22 }
 0xdb4   :  { %v2432_v5 = vpop.permute.xlu1 %2431 }
 0xdb5   :  { %v2441_v0 = vsel %vm707_vm0, %v2421_v14, %v2432_v5 }
 0xdb6   :  { %v2445_v63 = vsub.f32 %v2401_v21, %v2441_v0 }
 0xdb8   :  { %v13049_v35 = vpop.eup %11737  ;;  %v2451_v50 = vmul.f32 1.442695, %v2445_v63 }
 0xdb9   :  { %2461 = vrot.lane.b32.xlu1 %v13049_v35, %s12077_s6 }
 0xdba   :  { %11739 = vpow2.f32 %v2451_v50 }
 0xdc0   :  { %v13053_v25 = vpop.eup %11739 }
 0xdc1   :  { %2463 = vrot.lane.b32.xlu0 %v13053_v25, %s12077_s6 }
 0xdd4   :  { %v2434_v10 = vpop.permute.xlu0 %2433 }
 0xdd5   :  { %v2442_v30 = vsel %vm707_vm0, %v2422_v40, %v2434_v10 }
 0xdd6   :  { %v2446_v51 = vsub.f32 %v2402_v6, %v2442_v30 }
 0xdd8   :  { %v2453_v26 = vmul.f32 1.442695, %v2446_v51 }
 0xdda   :  { %11741 = vpow2.f32 %v2453_v26 }
 0xde0   :  { %v13058_v44 = vpop.eup %11741 }
 0xde1   :  { %2465 = vrot.lane.b32.xlu2 %v13058_v44, %s12077_s6 }
 0xdf3   :  { %v2460_v53 = vpop.permute.xlu2 %2459 }
 0xdf4   :  { %v2471_v43 = vadd.f32 %v13043_v18, %v2460_v53 }
 0xdf6   :  { %11743 = vrcp.f32 %v2471_v43  ;;  %v2486_v27 = vand.u32 2147483648, %v2471_v43  ;;  %v2484_v33 = vand.u32 2147483647, %v2471_v43  ;;  %vm2480_vm4 = vweird.f32 %v2471_v43 }
 0xdf8   :  { %v2487_v34 = vor.u32 1.1754944e-38, %v2486_v27  ;;  %vm2485_vm6 = vcmp.eq.f32.partialorder %v2484_v33, 8.507059e+37 }
 0xdfc   :  { %v11744_v31 = vpop.eup %11743 }
 0xdfd   :  { %v2476_v56 = vmul.f32 %v11744_v31, %v2471_v43  ;;  %vm2481_vm3 = vweird.f32 %v11744_v31 }
 0xdfe   :  { %vm2482_vm5 = vmor %vm2480_vm4, %vm2481_vm3 }
 0xdff   :  { %v2477_v17 = vsub.f32 1.0, %v2476_v56 }
 0xe01   :  { %v2478_v29 = vmul.f32 %v11744_v31, %v2477_v17 }
 0xe03   :  { %v2479_v36 = vadd.f32 %v11744_v31, %v2478_v29 }
 0xe05   :  { %v2483_v54 = vsel %vm2482_vm5, %v11744_v31, %v2479_v36 }
 0xe06   :  { %v2488_v32 = vsel %vm2485_vm6, %v2487_v34, %v2483_v54  ;;  %v11040_v54 = vld [vmem:[%s15640_s12 + $0x8] sm:$0xff] }
 0xe07   :  { %2539 = vrot.lane.b32.xlu1 %v2488_v32, %s12078_s1  ;;  %2658 = vmatpush.msra.mxu3 %v11040_v54 }
 0xe2b   :  { %v2462_v24 = vpop.permute.xlu1 %2461 }
 0xe2c   :  { %v2472_v57 = vadd.f32 %v13049_v35, %v2462_v24 }
 0xe2e   :  { %11745 = vrcp.f32 %v2472_v57  ;;  %v2501_v61 = vand.u32 2147483648, %v2472_v57  ;;  %v2499_v12 = vand.u32 2147483647, %v2472_v57  ;;  %vm2495_vm10 = vweird.f32 %v2472_v57 }
 0xe30   :  { %v2502_v6 = vor.u32 1.1754944e-38, %v2501_v61  ;;  %vm2500_vm12 = vcmp.eq.f32.partialorder %v2499_v12, 8.507059e+37 }
 0xe33   :  { %v2464_v41 = vpop.permute.xlu0 %2463 }
 0xe34   :  { %v11746_v55 = vpop.eup %11745  ;;  %v2473_v58 = vadd.f32 %v13053_v25, %v2464_v41 }
 0xe35   :  { %v2491_v60 = vmul.f32 %v11746_v55, %v2472_v57  ;;  %vm2496_vm9 = vweird.f32 %v11746_v55 }
 0xe36   :  { %11747 = vrcp.f32 %v2473_v58  ;;  %vm2497_vm11 = vmor %vm2495_vm10, %vm2496_vm9  ;;  %v2516_v1 = vand.u32 2147483648, %v2473_v58  ;;  %v2514_v15 = vand.u32 2147483647, %v2473_v58  ;;  %vm2510_vm14 = vweird.f32 %v2473_v58 }
 0xe37   :  { %v2492_v52 = vsub.f32 1.0, %v2491_v60 }
 0xe38   :  { %v2517_v46 = vor.u32 1.1754944e-38, %v2516_v1  ;;  %vm2515_vm1 = vcmp.eq.f32.partialorder %v2514_v15, 8.507059e+37 }
 0xe39   :  { %v2493_v38 = vmul.f32 %v11746_v55, %v2492_v52 }
 0xe3b   :  { %v2466_v62 = vpop.permute.xlu2 %2465  ;;  %v2494_v2 = vadd.f32 %v11746_v55, %v2493_v38 }
 0xe3c   :  { %v11748_v21 = vpop.eup %11747  ;;  %v2474_v47 = vadd.f32 %v13058_v44, %v2466_v62 }
 0xe3d   :  { %v2498_v37 = vsel %vm2497_vm11, %v11746_v55, %v2494_v2  ;;  %v2506_v42 = vmul.f32 %v11748_v21, %v2473_v58  ;;  %vm2511_vm13 = vweird.f32 %v11748_v21 }
 0xe3e   :  { %11749 = vrcp.f32 %v2474_v47  ;;  %v2503_v4 = vsel %vm2500_vm12, %v2502_v6, %v2498_v37  ;;  %vm2512_vm15 = vmor %vm2510_vm14, %vm2511_vm13  ;;  %v2531_v11 = vand.u32 2147483648, %v2474_v47  ;;  %v2529_v5 = vand.u32 2147483647, %v2474_v47 }
 0xe3f   :  { %2541 = vrot.lane.b32.xlu0 %v2503_v4, %s12078_s1  ;;  %v2507_v14 = vsub.f32 1.0, %v2506_v42  ;;  %vm2525_vm3 = vweird.f32 %v2474_v47 }
 0xe40   :  { %v2532_v63 = vor.u32 1.1754944e-38, %v2531_v11  ;;  %vm2530_vm5 = vcmp.eq.f32.partialorder %v2529_v5, 8.507059e+37 }
 0xe41   :  { %v2508_v7 = vmul.f32 %v11748_v21, %v2507_v14  ;;  %v11667_v14 = vld [vmem:[%s15641_s13 + $0x1] ss:$0 sm:$0xff] }
 0xe43   :  { %v2509_v40 = vadd.f32 %v11748_v21, %v2508_v7 }
 0xe44   :  { %v11750_v28 = vpop.eup %11749 }
 0xe45   :  { %v2513_v19 = vsel %vm2512_vm15, %v11748_v21, %v2509_v40  ;;  %v2521_v8 = vmul.f32 %v11750_v28, %v2474_v47  ;;  %vm2526_vm2 = vweird.f32 %v11750_v28 }
 0xe46   :  { %v2518_v49 = vsel %vm2515_vm1, %v2517_v46, %v2513_v19  ;;  %vm2527_vm4 = vmor %vm2525_vm3, %vm2526_vm2 }
 0xe47   :  { %2543 = vrot.lane.b32.xlu2 %v2518_v49, %s12078_s1  ;;  %2314 = vrot.lane.b32.xlu0 %v13002_v16, %s12079_s25  ;;  %v2522_v59 = vsub.f32 1.0, %v2521_v8 }
 0xe49   :  { %v2523_v22 = vmul.f32 %v11750_v28, %v2522_v59 }
 0xe4b   :  { %v2524_v0 = vadd.f32 %v11750_v28, %v2523_v22 }
 0xe4d   :  { %v2528_v50 = vsel %vm2527_vm4, %v11750_v28, %v2524_v0 }
 0xe4e   :  { %v2533_v10 = vsel %vm2530_vm5, %v2532_v63, %v2528_v50 }
 0xe4f   :  { %2545 = vrot.lane.b32.xlu1 %v2533_v10, %s12078_s1  ;;  %2316 = vrot.lane.b32.xlu2 %v13006_v39, %s12079_s25 }
 0xe50   :  { %2312 = vrot.lane.b32.xlu0 %v13010_v20, %s12079_s25 }
 0xe57   :  { %2310 = vrot.lane.b32.xlu1 %v12998_v23, %s12079_s25 }
 0xe79   :  { %v2540_v16 = vpop.permute.xlu1 %2539 }
 0xe7a   :  { %v2551_v30 = vsel %vm707_vm0, %v2488_v32, %v2540_v16 }
 0xe7b   :  { %v2555_v51 = vmul.f32 %v13043_v18, %v2551_v30 }
 0xe7d   :  { %11036 = vmatmul.msk.f32.vlgmr.msra.gmra.mxu2 %vm390_vm7, %v2555_v51 }
 0xea1   :  { %v2544_v26 = vpop.permute.xlu2 %2543 }
 0xea2   :  { %v2553_v23 = vsel %vm707_vm0, %v2518_v49, %v2544_v26 }
 0xea3   :  { %v2557_v18 = vmul.f32 %v13053_v25, %v2553_v23 }
 0xea9   :  { %v2317_v53 = vpop.permute.xlu2 %2316 }
 0xeaa   :  { %2344 = vrot.lane.b32.xlu1 %v2317_v53, %s12063_s24 }
 0xeb1   :  { %v2542_v43 = vpop.permute.xlu0 %2541 }
 0xeb2   :  { %v2552_v39 = vsel %vm707_vm0, %v2503_v4, %v2542_v43 }
 0xeb3   :  { %v2556_v31 = vmul.f32 %v13049_v35, %v2552_v39 }
 0xeb5   :  { %11037 = vmatmul.msk.f32.gmra.mxu2 %vm390_vm7, %v2556_v31 }
 0xeb9   :  { %v2315_v20 = vpop.permute.xlu0 %2314 }
 0xeba   :  { %2342 = vrot.lane.b32.xlu2 %v2315_v20, %s12063_s24 }
 0xebd   :  { %11038 = vmatmul.msk.f32.gmra.mxu2 %vm390_vm7, %v2557_v18 }
 0xec1   :  { %v2546_v56 = vpop.permute.xlu1 %2545 }
 0xec2   :  { %v2313_v17 = vpop.permute.xlu0 %2312  ;;  %v2554_v27 = vsel %vm707_vm0, %v2533_v10, %v2546_v56 }
 0xec3   :  { %v2558_v29 = vmul.f32 %v13058_v44, %v2554_v27  ;;  %2348 = vrot.lane.b32.xlu2 %v2313_v17, %s12063_s24 }
 0xec5   :  { %11039 = vmatmul.msk.f32.gmra.mxu2 %vm390_vm7, %v2558_v29 }
 0xec9   :  { %v2311_v35 = vpop.permute.xlu1 %2310 }
 0xeca   :  { %2346 = vrot.lane.b32.xlu0 %v2311_v35, %s12063_s24 }
 0xf00   :  { %v2588_v36 = vpop.f32.mrf.mxu2 }
 0xf14   :  { %v2343_v33 = vpop.permute.xlu2 %2342 }
 0xf15   :  { %v2354_v34 = vsel %vm390_vm7, %v2311_v35, %v2343_v33  ;;  %v11050_v35 = vld [vmem:[%s15644_s16 + $0x90] sm:$0xff]  ;;  %v11051_v33 = vld [vmem:[%s15644_s16 + $0x98] sm:$0xff] }
 0xf16   :  { %v2600_v25 = vmul.f32 %v2588_v36, %v2354_v34  ;;  %v11048_v36 = vld [vmem:[%s15644_s16 + $0x80] sm:$0xff]  ;;  %2921 = vmatpush.msrb.mxu2 %v11050_v35  ;;  %2950 = vmatpush.msrb.mxu3 %v11051_v33  ;;  %v11049_v34 = vld [vmem:[%s15644_s16 + $0x88] sm:$0xff] }
 0xf17   :  { %2863 = vmatpush.msra.mxu0 %v11048_v36  ;;  %2892 = vmatpush.msra.mxu1 %v11049_v34 }
 0xf18   :  { %2608 = vrot.lane.b32.xlu1 %v2600_v25, %s12076_s4 }
 0xf1c   :  { %v2345_v44 = vpop.permute.xlu1 %2344 }
 0xf1d   :  { %v2355_v32 = vsel %vm390_vm7, %v2313_v17, %v2345_v44  ;;  %v2349_v52 = vpop.permute.xlu2 %2348 }
 0xf1e   :  { %v2357_v61 = vsel %vm390_vm7, %v2317_v53, %v2349_v52 }
 0xf38   :  { %v2591_v24 = vpop.f32.mrf.mxu2 }
 0xf39   :  { %v2601_v57 = vmul.f32 %v2591_v24, %v2355_v32 }
 0xf3b   :  { %2610 = vrot.lane.b32.xlu0 %v2601_v57, %s12076_s4 }
 0xf3c   :  { %v2347_v41 = vpop.permute.xlu0 %2346 }
 0xf3d   :  { %v2356_v55 = vsel %vm390_vm7, %v2315_v20, %v2347_v41 }
 0xf40   :  { %v2594_v58 = vpop.f32.mrf.mxu2 }
 0xf41   :  { %v2602_v60 = vmul.f32 %v2594_v58, %v2356_v55 }
 0xf43   :  { %2612 = vrot.lane.b32.xlu2 %v2602_v60, %s12076_s4 }
 0xf48   :  { %v2597_v38 = vpop.f32.mrf.mxu2 }
 0xf49   :  { %v2603_v12 = vmul.f32 %v2597_v38, %v2357_v61  ;;  %v13161_v61 = vld [vmem:[%s15643_s15 + $0x1] ss:$0 sm:$0xff] }
 0xf4b   :  { %2614 = vrot.lane.b32.xlu1 %v2603_v12, %s12076_s4 }
 0xf8a   :  { %v2609_v62 = vpop.permute.xlu1 %2608 }
 0xf8b   :  { %v2620_v2 = vadd.f32 %v2609_v62, %v2600_v25 }
 0xf8d   :  { %11042 = vmatmul.msk.f32.vlgmr.msra.gmra.mxu3 %vm390_vm7, %v2620_v2 }
 0xf9d   :  { %v2613_v6 = vpop.permute.xlu2 %2612 }
 0xf9e   :  { %v2622_v37 = vadd.f32 %v2613_v6, %v2602_v60  ;;  %v13156_v60 = vld [vmem:[%s15642_s14 + $0x1] ss:$0 sm:$0xff] }
 0xfad   :  { %v2611_v21 = vpop.permute.xlu0 %2610 }
 0xfae   :  { %v2621_v47 = vadd.f32 %v2611_v21, %v2601_v57 }
 0xfb0   :  { %11043 = vmatmul.msk.f32.gmra.mxu3 %vm390_vm7, %v2621_v47 }
 0xfb8   :  { %11044 = vmatmul.msk.f32.gmra.mxu3 %vm390_vm7, %v2622_v37 }
 0xfbd   :  { %v2615_v42 = vpop.permute.xlu1 %2614 }
 0xfbe   :  { %v2623_v4 = vadd.f32 %v2615_v42, %v2603_v12 }
 0xfc0   :  { %11045 = vmatmul.msk.f32.gmra.mxu3 %vm390_vm7, %v2623_v4 }
0x1010   :  { %v2660_v1 = vpop.f32.mrf.mxu3 }
0x1011   :  { %v2661_v7 = vadd.f32 %v11667_v14, %v2660_v1  ;;  %v11055_v1 = vld [vmem:[%s15644_s16 + $0xb8] sm:$0xff] }
0x1012   :  { %3066 = vmatpush.msra.mxu3 %v11055_v1 }
0x1013   :  { %v2672_v15 = vadd.f32 %v2661_v7, %v12977_v48  ;;  %v11052_v7 = vld [vmem:[%s15644_s16 + $0xa0] sm:$0xff] }
0x1014   :  { %2979 = vmatpush.msrb.mxu0 %v11052_v7 }
0x1015   :  { %v2680_v40 = vsel %vm390_vm7, %v2672_v15, 0.0 }
0x1016   :  { %2681 = vadd.xlane.f32.xlu0 %v2680_v40  ;;  %v11053_v40 = vld [vmem:[%s15644_s16 + $0xa8] sm:$0xff] }
0x1017   :  { %3008 = vmatpush.msrb.mxu1 %v11053_v40 }
0x1033   :  { %v2663_v28 = vpop.f32.mrf.mxu3 }
0x1034   :  { %v2664_v46 = vadd.f32 %v11667_v14, %v2663_v28 }
0x1036   :  { %v2673_v19 = vadd.f32 %v2664_v46, %v12981_v9 }
0x1038   :  { %v2683_v8 = vsel %vm390_vm7, %v2673_v19, 0.0 }
0x1039   :  { %2684 = vadd.xlane.f32.xlu2 %v2683_v8 }
0x103b   :  { %v2666_v49 = vpop.f32.mrf.mxu3 }
0x103c   :  { %v2667_v59 = vadd.f32 %v11667_v14, %v2666_v49 }
0x103e   :  { %v2674_v11 = vadd.f32 %v2667_v59, %v12986_v3 }
0x1040   :  { %v2686_v22 = vsel %vm390_vm7, %v2674_v11, 0.0 }
0x1041   :  { %2687 = vadd.xlane.f32.xlu1 %v2686_v22 }
0x1043   :  { %v2669_v5 = vpop.f32.mrf.mxu3 }
0x1044   :  { %v2670_v0 = vadd.f32 %v11667_v14, %v2669_v5  ;;  %v11054_v14 = vld [vmem:[%s15644_s16 + $0xb0] sm:$0xff] }
0x1045   :  { %3037 = vmatpush.msra.mxu2 %v11054_v14 }
0x1046   :  { %v2675_v48 = vadd.f32 %v2670_v0, %v12991_v13 }
0x1048   :  { %v2689_v63 = vsel %vm390_vm7, %v2675_v48, 0.0 }
0x1049   :  { %2690 = vadd.xlane.f32.xlu0 %v2689_v63  ;;  %v11058_v63 = vld [vmem:[%s15644_s16 + $0xd0] sm:$0xff] }
0x1089   :  { %v2682_v50 = vpop.xlane.xlu0 %2681 }
0x108a   :  { %v2692_v9 = vmul.f32 %v2682_v50, %v12588_v45  ;;  %v11059_v50 = vld [vmem:[%s15644_s16 + $0xd8] sm:$0xff] }
0x108c   :  { %v2696_v10 = vsub.f32 %v2672_v15, %v2692_v9 }
0x108e   :  { %v2700_v16 = vmul.f32 %v2696_v10, %v2696_v10 }
0x1090   :  { %v2704_v30 = vsel %vm390_vm7, %v2700_v16, 0.0 }
0x1091   :  { %2705 = vadd.xlane.f32.xlu2 %v2704_v30 }
0x10ac   :  { %v2685_v51 = vpop.xlane.xlu2 %2684 }
0x10ad   :  { %v2693_v3 = vmul.f32 %v2685_v51, %v12588_v45 }
0x10af   :  { %v13123_v26 = vsub.f32 %v2673_v19, %v2693_v3 }
0x10b1   :  { %v2701_v53 = vmul.f32 %v13123_v26, %v13123_v26 }
0x10b3   :  { %v2707_v13 = vsel %vm390_vm7, %v2701_v53, 0.0 }
0x10b4   :  { %2708 = vadd.xlane.f32.xlu1 %v2707_v13  ;;  %v2688_v43 = vpop.xlane.xlu1 %2687 }
0x10b5   :  { %v2694_v39 = vmul.f32 %v2688_v43, %v12588_v45 }
0x10b7   :  { %v13129_v31 = vsub.f32 %v2674_v11, %v2694_v39  ;;  %v11056_v39 = vld [vmem:[%s15644_s16 + $0xc0] sm:$0xff] }
0x10b9   :  { %v2702_v23 = vmul.f32 %v13129_v31, %v13129_v31 }
0x10bb   :  { %v2710_v20 = vsel %vm390_vm7, %v2702_v23, 0.0  ;;  %v11057_v23 = vld [vmem:[%s15644_s16 + $0xc8] sm:$0xff] }
0x10bc   :  { %v2691_v18 = vpop.xlane.xlu0 %2690  ;;  %2711 = vadd.xlane.f32.xlu0 %v2710_v20 }
0x10bd   :  { %v2695_v56 = vmul.f32 %v2691_v18, %v12588_v45 }
0x10bf   :  { %v13135_v17 = vsub.f32 %v2675_v48, %v2695_v56 }
0x10c1   :  { %v2703_v27 = vmul.f32 %v13135_v17, %v13135_v17 }
0x10c3   :  { %v2713_v29 = vsel %vm390_vm7, %v2703_v27, 0.0 }
0x10c4   :  { %2714 = vadd.xlane.f32.xlu2 %v2713_v29 }
0x1104   :  { %v2706_v25 = vpop.xlane.xlu2 %2705 }
0x1105   :  { %v2716_v54 = vmul.f32 %v2706_v25, %v12588_v45  ;;  %v11063_v25 = vld [vmem:[%s15644_s16 + $0xf8] sm:$0xff] }
0x1107   :  { %v2720_v44 = vadd.f32 1e-05, %v2716_v54  ;;  %v11060_v54 = vld [vmem:[%s15644_s16 + $0xe0] sm:$0xff] }
0x1109   :  { %11751 = vrsqrt.f32 %v2720_v44  ;;  %vm2730_vm9 = vweird.f32 %v2720_v44 }
0x110f   :  { %v11752_v32 = vpop.eup %11751 }
0x1110   :  { %v2725_v24 = vmul.f32 %v11752_v32, %v2720_v44  ;;  %vm2731_vm6 = vweird.f32 %v11752_v32  ;;  %v11061_v44 = vld [vmem:[%s15644_s16 + $0xe8] sm:$0xff] }
0x1111   :  { %vm2732_vm10 = vmor %vm2730_vm9, %vm2731_vm6 }
0x1112   :  { %v2726_v57 = vmul.f32 %v11752_v32, %v2725_v24  ;;  %v11130_v24 = vld [vmem:[%s15646_s18 + $0x80] sm:$0xff] }
0x1114   :  { %v2727_v41 = vmul.f32 0.5, %v2726_v57  ;;  %v11133_v57 = vld [vmem:[%s15646_s18 + $0x98] sm:$0xff] }
0x1116   :  { %v2728_v55 = vsub.f32 1.5, %v2727_v41  ;;  %v11131_v41 = vld [vmem:[%s15646_s18 + $0x88] sm:$0xff] }
0x1118   :  { %v2729_v58 = vmul.f32 %v11752_v32, %v2728_v55  ;;  %v11136_v55 = vld [vmem:[%s15646_s18 + $0xb0] sm:$0xff] }
0x111a   :  { %v2733_v52 = vsel %vm2732_vm10, %v11752_v32, %v2729_v58  ;;  %v11132_v32 = vld [vmem:[%s15646_s18 + $0x90] sm:$0xff]  ;;  %v11134_v58 = vld [vmem:[%s15646_s18 + $0xa0] sm:$0xff] }
0x111b   :  { %v2764_v38 = vmul.f32 %v2733_v52, %v2696_v10  ;;  %v11135_v52 = vld [vmem:[%s15646_s18 + $0xa8] sm:$0xff] }
0x111d   :  { %v2771_v12 = vmul.f32 %v13156_v60, %v2764_v38 }
0x111f   :  { %v13165_v62 = vadd.f32 %v13161_v61, %v2771_v12 }
0x1121   :  { %11066 = vmatmul.msk.f32.vlgmr.msra.gmra.mxu0 %vm390_vm7, %v13165_v62  ;;  %11070 = vmatmul.msk.f32.vlgmr.msra.gmra.mxu1 %vm390_vm7, %v13165_v62 }
0x1122   :  { %11074 = vmatmul.msk.f32.vlgmr.msrb.gmra.mxu2 %vm390_vm7, %v13165_v62  ;;  %11078 = vmatmul.msk.f32.vlgmr.msrb.gmra.mxu3 %vm390_vm7, %v13165_v62 }
0x1123   :  { %3153 = vmatpush.msrb.mxu2 %v11058_v63  ;;  %3182 = vmatpush.msrb.mxu3 %v11059_v50 }
0x1124   :  { %3095 = vmatpush.msra.mxu0 %v11056_v39  ;;  %3124 = vmatpush.msra.mxu1 %v11057_v23 }
0x1127   :  { %v2709_v2 = vpop.xlane.xlu1 %2708 }
0x1128   :  { %v2717_v21 = vmul.f32 %v2709_v2, %v12588_v45 }
0x112a   :  { %v2721_v47 = vadd.f32 1e-05, %v2717_v21 }
0x112c   :  { %11753 = vrsqrt.f32 %v2721_v47  ;;  %vm2740_vm12 = vweird.f32 %v2721_v47 }
0x112f   :  { %v2712_v6 = vpop.xlane.xlu0 %2711 }
0x1130   :  { %v2718_v37 = vmul.f32 %v2712_v6, %v12588_v45 }
0x1132   :  { %v11754_v42 = vpop.eup %11753  ;;  %v2722_v4 = vadd.f32 1e-05, %v2718_v37 }
0x1133   :  { %v2735_v15 = vmul.f32 %v11754_v42, %v2721_v47  ;;  %vm2741_vm11 = vweird.f32 %v11754_v42 }
0x1134   :  { %11755 = vrsqrt.f32 %v2722_v4  ;;  %vm2742_vm13 = vmor %vm2740_vm12, %vm2741_vm11  ;;  %vm2750_vm15 = vweird.f32 %v2722_v4 }
0x1135   :  { %v2736_v28 = vmul.f32 %v11754_v42, %v2735_v15 }
0x1137   :  { %v2737_v46 = vmul.f32 0.5, %v2736_v28  ;;  %v2715_v19 = vpop.xlane.xlu2 %2714 }
0x1138   :  { %v2719_v8 = vmul.f32 %v2715_v19, %v12588_v45 }
0x1139   :  { %v2738_v49 = vsub.f32 1.5, %v2737_v46 }
0x113a   :  { %v11756_v59 = vpop.eup %11755  ;;  %v2723_v11 = vadd.f32 1e-05, %v2719_v8 }
0x113b   :  { %v2739_v22 = vmul.f32 %v11754_v42, %v2738_v49  ;;  %v2745_v5 = vmul.f32 %v11756_v59, %v2722_v4  ;;  %vm2751_vm14 = vweird.f32 %v11756_v59 }
0x113c   :  { %11757 = vrsqrt.f32 %v2723_v11  ;;  %vm2752_vm1 = vmor %vm2750_vm15, %vm2751_vm14  ;;  %vm2760_vm3 = vweird.f32 %v2723_v11 }
0x113d   :  { %v2743_v0 = vsel %vm2742_vm13, %v11754_v42, %v2739_v22  ;;  %v2746_v48 = vmul.f32 %v11756_v59, %v2745_v5  ;;  %v11140_v5 = vld [vmem:[%s15646_s18 + $0xd0] sm:$0xff] }
0x113e   :  { %v2765_v9 = vmul.f32 %v2743_v0, %v13123_v26  ;;  %v11138_v0 = vld [vmem:[%s15646_s18 + $0xc0] sm:$0xff] }
0x113f   :  { %v2747_v10 = vmul.f32 0.5, %v2746_v48  ;;  %v11141_v48 = vld [vmem:[%s15646_s18 + $0xd8] sm:$0xff] }
0x1140   :  { %v2772_v16 = vmul.f32 %v13156_v60, %v2765_v9 }
0x1141   :  { %v2748_v30 = vsub.f32 1.5, %v2747_v10 }
0x1142   :  { %v11758_v51 = vpop.eup %11757  ;;  %v13199_v3 = vadd.f32 %v13161_v61, %v2772_v16 }
0x1143   :  { %v2749_v53 = vmul.f32 %v11756_v59, %v2748_v30  ;;  %v2755_v13 = vmul.f32 %v11758_v51, %v2723_v11  ;;  %vm2761_vm2 = vweird.f32 %v11758_v51 }
0x1144   :  { %11067 = vmatmul.msk.f32.gmra.mxu0 %vm390_vm7, %v13199_v3  ;;  %11071 = vmatmul.msk.f32.gmra.mxu1 %vm390_vm7, %v13199_v3  ;;  %vm2762_vm4 = vmor %vm2760_vm3, %vm2761_vm2 }
0x1145   :  { %v2753_v26 = vsel %vm2752_vm1, %v11756_v59, %v2749_v53  ;;  %v2756_v43 = vmul.f32 %v11758_v51, %v2755_v13  ;;  %11075 = vmatmul.msk.f32.gmra.mxu2 %vm390_vm7, %v13199_v3  ;;  %11079 = vmatmul.msk.f32.gmra.mxu3 %vm390_vm7, %v13199_v3 }
0x1146   :  { %v2766_v20 = vmul.f32 %v2753_v26, %v13129_v31 }
0x1147   :  { %v2757_v18 = vmul.f32 0.5, %v2756_v43  ;;  %v11139_v43 = vld [vmem:[%s15646_s18 + $0xc8] sm:$0xff] }
0x1148   :  { %v2773_v56 = vmul.f32 %v13156_v60, %v2766_v20 }
0x1149   :  { %v2758_v27 = vsub.f32 1.5, %v2757_v18 }
0x114a   :  { %v13218_v29 = vadd.f32 %v13161_v61, %v2773_v56 }
0x114b   :  { %v2759_v35 = vmul.f32 %v11758_v51, %v2758_v27 }
0x114c   :  { %11068 = vmatmul.msk.f32.gmra.mxu0 %vm390_vm7, %v13218_v29  ;;  %11072 = vmatmul.msk.f32.gmra.mxu1 %vm390_vm7, %v13218_v29 }
0x114d   :  { %v2763_v31 = vsel %vm2762_vm4, %v11758_v51, %v2759_v35  ;;  %11076 = vmatmul.msk.f32.gmra.mxu2 %vm390_vm7, %v13218_v29  ;;  %11080 = vmatmul.msk.f32.gmra.mxu3 %vm390_vm7, %v13218_v29 }
0x114e   :  { %v2767_v33 = vmul.f32 %v2763_v31, %v13135_v17  ;;  %v11062_v17 = vld [vmem:[%s15644_s16 + $0xf0] sm:$0xff] }
0x1150   :  { %v2774_v36 = vmul.f32 %v13156_v60, %v2767_v33  ;;  %v11137_v60 = vld [vmem:[%s15646_s18 + $0xb8] sm:$0xff] }
0x1152   :  { %v13231_v34 = vadd.f32 %v13161_v61, %v2774_v36  ;;  %v13368_v61 = vld [vmem:[%s15645_s17 + $0x10] sm:$0xff] }
0x1153   :  { %v2804_v38 = vperm.slane %v13368_v61, 0  ;;  %v2805_v12 = vperm.slane %v13368_v61, 1  ;;  %v13373_v47 = vperm.slane %v13368_v61, 2  ;;  %v13376_v6 = vperm.slane %v13368_v61, 3 }
0x1154   :  { %11069 = vmatmul.msk.f32.gmra.mxu0 %vm390_vm7, %v13231_v34  ;;  %11073 = vmatmul.msk.f32.gmra.mxu1 %vm390_vm7, %v13231_v34 }
0x1155   :  { %11077 = vmatmul.msk.f32.gmra.mxu2 %vm390_vm7, %v13231_v34  ;;  %11081 = vmatmul.msk.f32.gmra.mxu3 %vm390_vm7, %v13231_v34 }
0x115c   :  { %11082 = vmatmul.msk.f32.vlgmr.msrb.gmra.mxu0 %vm390_vm7, %v13165_v62  ;;  %11086 = vmatmul.msk.f32.vlgmr.msrb.gmra.mxu1 %vm390_vm7, %v13165_v62 }
0x115d   :  { %11090 = vmatmul.msk.f32.vlgmr.msra.gmra.mxu2 %vm390_vm7, %v13165_v62  ;;  %11094 = vmatmul.msk.f32.vlgmr.msra.gmra.mxu3 %vm390_vm7, %v13165_v62 }
0x115e   :  { %3269 = vmatpush.msra.mxu2 %v11062_v17  ;;  %3298 = vmatpush.msra.mxu3 %v11063_v25 }
0x115f   :  { %3211 = vmatpush.msrb.mxu0 %v11060_v54  ;;  %3240 = vmatpush.msrb.mxu1 %v11061_v44 }
0x1164   :  { %11083 = vmatmul.msk.f32.gmra.mxu0 %vm390_vm7, %v13199_v3  ;;  %11087 = vmatmul.msk.f32.gmra.mxu1 %vm390_vm7, %v13199_v3 }
0x1165   :  { %11091 = vmatmul.msk.f32.gmra.mxu2 %vm390_vm7, %v13199_v3  ;;  %11095 = vmatmul.msk.f32.gmra.mxu3 %vm390_vm7, %v13199_v3 }
0x116c   :  { %11084 = vmatmul.msk.f32.gmra.mxu0 %vm390_vm7, %v13218_v29  ;;  %11088 = vmatmul.msk.f32.gmra.mxu1 %vm390_vm7, %v13218_v29 }
0x116d   :  { %11092 = vmatmul.msk.f32.gmra.mxu2 %vm390_vm7, %v13218_v29  ;;  %11096 = vmatmul.msk.f32.gmra.mxu3 %vm390_vm7, %v13218_v29 }
0x1174   :  { %11085 = vmatmul.msk.f32.gmra.mxu0 %vm390_vm7, %v13231_v34  ;;  %11089 = vmatmul.msk.f32.gmra.mxu1 %vm390_vm7, %v13231_v34 }
0x1175   :  { %11093 = vmatmul.msk.f32.gmra.mxu2 %vm390_vm7, %v13231_v34  ;;  %11097 = vmatmul.msk.f32.gmra.mxu3 %vm390_vm7, %v13231_v34 }
0x117c   :  { %11098 = vmatmul.msk.f32.vlgmr.msra.gmra.mxu0 %vm390_vm7, %v13165_v62  ;;  %11102 = vmatmul.msk.f32.vlgmr.msra.gmra.mxu1 %vm390_vm7, %v13165_v62 }
0x117d   :  { %11106 = vmatmul.msk.f32.vlgmr.msrb.gmra.mxu2 %vm390_vm7, %v13165_v62  ;;  %11110 = vmatmul.msk.f32.vlgmr.msrb.gmra.mxu3 %vm390_vm7, %v13165_v62 }
0x117e   :  { %3471 = vmatpush.xpose.msrb.mxu2 %v11132_v32  ;;  %3413 = vmatpush.xpose.msra.mxu0 %v11130_v24  ;;  %v13405_v32 = vperm.slane %v13368_v61, 4  ;;  %v13408_v24 = vperm.slane %v13368_v61, 5 }
0x117f   :  { %3500 = vmatpush.xpose.msrb.mxu3 %v11133_v57  ;;  %3442 = vmatpush.xpose.msra.mxu1 %v11131_v41 }
0x1184   :  { %11099 = vmatmul.msk.f32.gmra.mxu0 %vm390_vm7, %v13199_v3  ;;  %11103 = vmatmul.msk.f32.gmra.mxu1 %vm390_vm7, %v13199_v3 }
0x1185   :  { %11107 = vmatmul.msk.f32.gmra.mxu2 %vm390_vm7, %v13199_v3  ;;  %11111 = vmatmul.msk.f32.gmra.mxu3 %vm390_vm7, %v13199_v3 }
0x118c   :  { %11100 = vmatmul.msk.f32.gmra.mxu0 %vm390_vm7, %v13218_v29  ;;  %11104 = vmatmul.msk.f32.gmra.mxu1 %vm390_vm7, %v13218_v29 }
0x118d   :  { %11108 = vmatmul.msk.f32.gmra.mxu2 %vm390_vm7, %v13218_v29  ;;  %11112 = vmatmul.msk.f32.gmra.mxu3 %vm390_vm7, %v13218_v29 }
0x1194   :  { %11101 = vmatmul.msk.f32.gmra.mxu0 %vm390_vm7, %v13231_v34  ;;  %11105 = vmatmul.msk.f32.gmra.mxu1 %vm390_vm7, %v13231_v34 }
0x1195   :  { %11109 = vmatmul.msk.f32.gmra.mxu2 %vm390_vm7, %v13231_v34  ;;  %11113 = vmatmul.msk.f32.gmra.mxu3 %vm390_vm7, %v13231_v34 }
0x119c   :  { %11114 = vmatmul.msk.f32.vlgmr.msrb.gmra.mxu0 %vm390_vm7, %v13165_v62  ;;  %11118 = vmatmul.msk.f32.vlgmr.msrb.gmra.mxu1 %vm390_vm7, %v13165_v62 }
0x119d   :  { %11122 = vmatmul.msk.f32.vlgmr.msra.gmra.mxu2 %vm390_vm7, %v13165_v62  ;;  %11126 = vmatmul.msk.f32.vlgmr.msra.gmra.mxu3 %vm390_vm7, %v13165_v62 }
0x119e   :  { %3587 = vmatpush.xpose.msra.mxu2 %v11136_v55  ;;  %3529 = vmatpush.xpose.msrb.mxu0 %v11134_v58  ;;  %v2865_v2 = vpop.f32.mrf.mxu0  ;;  %v2894_v21 = vpop.f32.mrf.mxu1 }
0x119f   :  { %3616 = vmatpush.xpose.msra.mxu3 %v11137_v60  ;;  %3558 = vmatpush.xpose.msrb.mxu1 %v11135_v52  ;;  %v2866_v4 = vadd.f32 %v2865_v2, %v2804_v38  ;;  %v2895_v14 = vadd.f32 %v2894_v21, %v2805_v12 }
0x11a1   :  { %v3312_v15 = vmax.f32 %v2866_v4, 0.0  ;;  %v3313_v40 = vmax.f32 %v2895_v14, 0.0  ;;  %v13415_v4 = vperm.slane %v13368_v61, 6  ;;  %v13418_v14 = vperm.slane %v13368_v61, 7  ;;  %v11144_v61 = vld [vmem:[%s15646_s18 + $0xf0] sm:$0xff] }
0x11a4   :  { %11115 = vmatmul.msk.f32.gmra.mxu0 %vm390_vm7, %v13199_v3  ;;  %11119 = vmatmul.msk.f32.gmra.mxu1 %vm390_vm7, %v13199_v3 }
0x11a5   :  { %11123 = vmatmul.msk.f32.gmra.mxu2 %vm390_vm7, %v13199_v3  ;;  %11127 = vmatmul.msk.f32.gmra.mxu3 %vm390_vm7, %v13199_v3  ;;  %v2923_v37 = vpop.f32.mrf.mxu2  ;;  %v2952_v42 = vpop.f32.mrf.mxu3 }
0x11a6   :  { %v2924_v1 = vadd.f32 %v2923_v37, %v13373_v47  ;;  %v2953_v7 = vadd.f32 %v2952_v42, %v13376_v6 }
0x11a8   :  { %v3314_v28 = vmax.f32 %v2924_v1, 0.0  ;;  %v3315_v46 = vmax.f32 %v2953_v7, 0.0 }
0x11ac   :  { %11116 = vmatmul.msk.f32.gmra.mxu0 %vm390_vm7, %v13218_v29  ;;  %11120 = vmatmul.msk.f32.gmra.mxu1 %vm390_vm7, %v13218_v29 }
0x11ad   :  { %11124 = vmatmul.msk.f32.gmra.mxu2 %vm390_vm7, %v13218_v29  ;;  %11128 = vmatmul.msk.f32.gmra.mxu3 %vm390_vm7, %v13218_v29 }
0x11b4   :  { %11117 = vmatmul.msk.f32.gmra.mxu0 %vm390_vm7, %v13231_v34  ;;  %11121 = vmatmul.msk.f32.gmra.mxu1 %vm390_vm7, %v13231_v34 }
0x11b5   :  { %11125 = vmatmul.msk.f32.gmra.mxu2 %vm390_vm7, %v13231_v34  ;;  %11129 = vmatmul.msk.f32.gmra.mxu3 %vm390_vm7, %v13231_v34 }
0x11bc   :  { %3414 = vmatmul.f32.vlgmr.msra.gmra.mxu0 %v3312_v15  ;;  %3443 = vmatmul.f32.vlgmr.msra.gmra.mxu1 %v3313_v40 }
0x11bd   :  { %3472 = vmatmul.f32.vlgmr.msrb.gmra.mxu2 %v3314_v28  ;;  %3501 = vmatmul.f32.vlgmr.msrb.gmra.mxu3 %v3315_v46 }
0x11be   :  { %3703 = vmatpush.xpose.msrb.mxu2 %v11140_v5  ;;  %3645 = vmatpush.xpose.msra.mxu0 %v11138_v0 }
0x11bf   :  { %3732 = vmatpush.xpose.msrb.mxu3 %v11141_v48  ;;  %3674 = vmatpush.xpose.msra.mxu1 %v11139_v43 }
0x11c1   :  { %v2868_v19 = vpop.f32.mrf.mxu0  ;;  %v2897_v8 = vpop.f32.mrf.mxu1 }
0x11c2   :  { %v2869_v49 = vadd.f32 %v2868_v19, %v2804_v38  ;;  %v2898_v59 = vadd.f32 %v2897_v8, %v2805_v12 }
0x11c4   :  { %v3328_v11 = vmax.f32 %v2869_v49, 0.0  ;;  %v3329_v22 = vmax.f32 %v2898_v59, 0.0 }
0x11c6   :  { %3417 = vmatmul.f32.gmra.mxu0 %v3328_v11  ;;  %3446 = vmatmul.f32.gmra.mxu1 %v3329_v22  ;;  %v11142_v11 = vld [vmem:[%s15646_s18 + $0xe0] sm:$0xff]  ;;  %v11145_v22 = vld [vmem:[%s15646_s18 + $0xf8] sm:$0xff] }
0x11c8   :  { %v2926_v63 = vpop.f32.mrf.mxu2  ;;  %v2955_v50 = vpop.f32.mrf.mxu3 }
0x11c9   :  { %v2927_v9 = vadd.f32 %v2926_v63, %v13373_v47  ;;  %v2956_v10 = vadd.f32 %v2955_v50, %v13376_v6  ;;  %v2871_v16 = vpop.f32.mrf.mxu0  ;;  %v2900_v30 = vpop.f32.mrf.mxu1 }
0x11ca   :  { %v2872_v51 = vadd.f32 %v2871_v16, %v2804_v38  ;;  %v2901_v53 = vadd.f32 %v2900_v30, %v2805_v12 }
0x11cb   :  { %v3330_v13 = vmax.f32 %v2927_v9, 0.0  ;;  %v3331_v26 = vmax.f32 %v2956_v10, 0.0 }
0x11cc   :  { %v3344_v39 = vmax.f32 %v2872_v51, 0.0  ;;  %v3345_v23 = vmax.f32 %v2901_v53, 0.0  ;;  %v11143_v53 = vld [vmem:[%s15646_s18 + $0xe8] sm:$0xff] }
0x11cd   :  { %3475 = vmatmul.f32.gmra.mxu2 %v3330_v13  ;;  %3504 = vmatmul.f32.gmra.mxu3 %v3331_v26 }
0x11ce   :  { %3420 = vmatmul.f32.gmra.mxu0 %v3344_v39  ;;  %3449 = vmatmul.f32.gmra.mxu1 %v3345_v23 }
0x11d0   :  { %v2929_v20 = vpop.f32.mrf.mxu2  ;;  %v2958_v18 = vpop.f32.mrf.mxu3 }
0x11d1   :  { %v2930_v56 = vadd.f32 %v2929_v20, %v13373_v47  ;;  %v2959_v27 = vadd.f32 %v2958_v18, %v13376_v6  ;;  %v2874_v35 = vpop.f32.mrf.mxu0  ;;  %v2903_v31 = vpop.f32.mrf.mxu1 }
0x11d2   :  { %v2875_v33 = vadd.f32 %v2874_v35, %v2804_v38  ;;  %v2904_v36 = vadd.f32 %v2903_v31, %v2805_v12 }
0x11d3   :  { %v3346_v17 = vmax.f32 %v2930_v56, 0.0  ;;  %v3347_v25 = vmax.f32 %v2959_v27, 0.0 }
0x11d4   :  { %v3360_v54 = vmax.f32 %v2875_v33, 0.0  ;;  %v3361_v44 = vmax.f32 %v2904_v36, 0.0  ;;  %v13447_v36 = vld [vmem:[%s15645_s17 + $0x18] sm:$0xff] }
0x11d5   :  { %3478 = vmatmul.f32.gmra.mxu2 %v3346_v17  ;;  %3507 = vmatmul.f32.gmra.mxu3 %v3347_v25 }
0x11d6   :  { %3423 = vmatmul.f32.gmra.mxu0 %v3360_v54  ;;  %3452 = vmatmul.f32.gmra.mxu1 %v3361_v44  ;;  %v13450_v54 = vperm.slane %v13447_v36, 0  ;;  %v13453_v44 = vperm.slane %v13447_v36, 1 }
0x11d8   :  { %v2932_v57 = vpop.f32.mrf.mxu2  ;;  %v2961_v41 = vpop.f32.mrf.mxu3 }
0x11d9   :  { %v2933_v55 = vadd.f32 %v2932_v57, %v13373_v47  ;;  %v2962_v58 = vadd.f32 %v2961_v41, %v13376_v6  ;;  %v2981_v60 = vpop.f32.mrf.mxu0  ;;  %v3010_v52 = vpop.f32.mrf.mxu1 }
0x11da   :  { %v2982_v38 = vadd.f32 %v2981_v60, %v13405_v32  ;;  %v3011_v12 = vadd.f32 %v3010_v52, %v13408_v24 }
0x11db   :  { %v3362_v2 = vmax.f32 %v2933_v55, 0.0  ;;  %v3363_v21 = vmax.f32 %v2962_v58, 0.0 }
0x11dc   :  { %v3316_v37 = vmax.f32 %v2982_v38, 0.0  ;;  %v3317_v42 = vmax.f32 %v3011_v12, 0.0 }
0x11dd   :  { %3481 = vmatmul.f32.gmra.mxu2 %v3362_v2  ;;  %3510 = vmatmul.f32.gmra.mxu3 %v3363_v21 }
0x11de   :  { %3530 = vmatmul.f32.vlgmr.msrb.gmra.mxu0 %v3316_v37  ;;  %3559 = vmatmul.f32.vlgmr.msrb.gmra.mxu1 %v3317_v42  ;;  %v2814_v37 = vperm.slane %v13447_v36, 2  ;;  %v2815_v42 = vperm.slane %v13447_v36, 3 }
0x11df   :  { %3761 = vmatpush.xpose.msrb.mxu0 %v11142_v11  ;;  %3790 = vmatpush.xpose.msrb.mxu1 %v11143_v53 }
0x11e0   :  { %v3039_v47 = vpop.f32.mrf.mxu2  ;;  %v3068_v6 = vpop.f32.mrf.mxu3 }
0x11e1   :  { %v3040_v1 = vadd.f32 %v3039_v47, %v13415_v4  ;;  %v3069_v7 = vadd.f32 %v3068_v6, %v13418_v14  ;;  %v2984_v15 = vpop.f32.mrf.mxu0  ;;  %v3013_v40 = vpop.f32.mrf.mxu1 }
0x11e2   :  { %v2985_v28 = vadd.f32 %v2984_v15, %v13405_v32  ;;  %v3014_v46 = vadd.f32 %v3013_v40, %v13408_v24  ;;  %v11898_v40 = vld [vmem:[#allocation5] sm:$0xff] }
0x11e3   :  { %v3318_v19 = vmax.f32 %v3040_v1, 0.0  ;;  %v3319_v8 = vmax.f32 %v3069_v7, 0.0 }
0x11e4   :  { %v3332_v49 = vmax.f32 %v2985_v28, 0.0  ;;  %v3333_v59 = vmax.f32 %v3014_v46, 0.0 }
0x11e5   :  { %3588 = vmatmul.f32.vlgmr.msra.gmra.mxu2 %v3318_v19  ;;  %3617 = vmatmul.f32.vlgmr.msra.gmra.mxu3 %v3319_v8 }
0x11e6   :  { %3533 = vmatmul.f32.gmra.mxu0 %v3332_v49  ;;  %3562 = vmatmul.f32.gmra.mxu1 %v3333_v59 }
0x11e7   :  { %3819 = vmatpush.xpose.msra.mxu2 %v11144_v61  ;;  %3848 = vmatpush.xpose.msra.mxu3 %v11145_v22  ;;  %v11899_v61 = vld [vmem:[#allocation7] sm:$0xff] }
0x11e8   :  { %v3042_v5 = vpop.f32.mrf.mxu2  ;;  %v3071_v0 = vpop.f32.mrf.mxu3 }
0x11e9   :  { %v3043_v48 = vadd.f32 %v3042_v5, %v13415_v4  ;;  %v3072_v63 = vadd.f32 %v3071_v0, %v13418_v14  ;;  %v2987_v50 = vpop.f32.mrf.mxu0  ;;  %v3016_v9 = vpop.f32.mrf.mxu1 }
0x11ea   :  { %v2988_v10 = vadd.f32 %v2987_v50, %v13405_v32  ;;  %v3017_v16 = vadd.f32 %v3016_v9, %v13408_v24 }
0x11eb   :  { %v3334_v30 = vmax.f32 %v3043_v48, 0.0  ;;  %v3335_v51 = vmax.f32 %v3072_v63, 0.0 }
0x11ec   :  { %v3348_v13 = vmax.f32 %v2988_v10, 0.0  ;;  %v3349_v26 = vmax.f32 %v3017_v16, 0.0 }
0x11ed   :  { %3591 = vmatmul.f32.gmra.mxu2 %v3334_v30  ;;  %3620 = vmatmul.f32.gmra.mxu3 %v3335_v51 }
0x11ee   :  { %3536 = vmatmul.f32.gmra.mxu0 %v3348_v13  ;;  %3565 = vmatmul.f32.gmra.mxu1 %v3349_v26 }
0x11f0   :  { %v3045_v43 = vpop.f32.mrf.mxu2  ;;  %v3074_v39 = vpop.f32.mrf.mxu3 }
0x11f1   :  { %v3046_v23 = vadd.f32 %v3045_v43, %v13415_v4  ;;  %v3075_v20 = vadd.f32 %v3074_v39, %v13418_v14  ;;  %v2990_v18 = vpop.f32.mrf.mxu0  ;;  %v3019_v56 = vpop.f32.mrf.mxu1 }
0x11f2   :  { %v2991_v27 = vadd.f32 %v2990_v18, %v13405_v32  ;;  %v3020_v35 = vadd.f32 %v3019_v56, %v13408_v24 }
0x11f3   :  { %v3350_v31 = vmax.f32 %v3046_v23, 0.0  ;;  %v3351_v33 = vmax.f32 %v3075_v20, 0.0 }
0x11f4   :  { %v3364_v17 = vmax.f32 %v2991_v27, 0.0  ;;  %v3365_v25 = vmax.f32 %v3020_v35, 0.0 }
0x11f5   :  { %3594 = vmatmul.f32.gmra.mxu2 %v3350_v31  ;;  %3623 = vmatmul.f32.gmra.mxu3 %v3351_v33  ;;  %v2816_v33 = vperm.slane %v13447_v36, 4 }
0x11f6   :  { %3539 = vmatmul.f32.gmra.mxu0 %v3364_v17  ;;  %3568 = vmatmul.f32.gmra.mxu1 %v3365_v25  ;;  %v2817_v17 = vperm.slane %v13447_v36, 5 }
0x11f8   :  { %v3048_v32 = vpop.f32.mrf.mxu2  ;;  %v3077_v24 = vpop.f32.mrf.mxu3 }
0x11f9   :  { %v3049_v57 = vadd.f32 %v3048_v32, %v13415_v4  ;;  %v3078_v41 = vadd.f32 %v3077_v24, %v13418_v14  ;;  %v3097_v55 = vpop.f32.mrf.mxu0  ;;  %v3126_v58 = vpop.f32.mrf.mxu1  ;;  %v11897_v4 = vld [vmem:[#allocation5 + $0x8] sm:$0xff] }
0x11fa   :  { %v3098_v60 = vadd.f32 %v3097_v55, %v13450_v54  ;;  %v3127_v52 = vadd.f32 %v3126_v58, %v13453_v44 }
0x11fb   :  { %v3366_v38 = vmax.f32 %v3049_v57, 0.0  ;;  %v3367_v12 = vmax.f32 %v3078_v41, 0.0 }
0x11fc   :  { %v3320_v2 = vmax.f32 %v3098_v60, 0.0  ;;  %v3321_v21 = vmax.f32 %v3127_v52, 0.0 }
0x11fd   :  { %3597 = vmatmul.f32.gmra.mxu2 %v3366_v38  ;;  %3626 = vmatmul.f32.gmra.mxu3 %v3367_v12  ;;  %v2818_v12 = vperm.slane %v13447_v36, 6 }
0x11fe   :  { %3646 = vmatmul.f32.vlgmr.msra.gmra.mxu0 %v3320_v2  ;;  %3675 = vmatmul.f32.vlgmr.msra.gmra.mxu1 %v3321_v21  ;;  %v2819_v2 = vperm.slane %v13447_v36, 7 }
0x11ff   :  { %4118 = vmatpush.msra.mxu1 %v11897_v4 }
0x1200   :  { %v3155_v14 = vpop.f32.mrf.mxu2  ;;  %v3184_v47 = vpop.f32.mrf.mxu3 }
0x1201   :  { %v3156_v6 = vadd.f32 %v3155_v14, %v2814_v37  ;;  %v3185_v1 = vadd.f32 %v3184_v47, %v2815_v42  ;;  %v3100_v7 = vpop.f32.mrf.mxu0  ;;  %v3129_v15 = vpop.f32.mrf.mxu1  ;;  %4119 = vmatpush.msra.mxu1 %v11898_v40 }
0x1202   :  { %v3101_v28 = vadd.f32 %v3100_v7, %v13450_v54  ;;  %v3130_v46 = vadd.f32 %v3129_v15, %v13453_v44 }
0x1203   :  { %v3322_v19 = vmax.f32 %v3156_v6, 0.0  ;;  %v3323_v8 = vmax.f32 %v3185_v1, 0.0 }
0x1204   :  { %v3336_v49 = vmax.f32 %v3101_v28, 0.0  ;;  %v3337_v59 = vmax.f32 %v3130_v46, 0.0 }
0x1205   :  { %3704 = vmatmul.f32.vlgmr.msrb.gmra.mxu2 %v3322_v19  ;;  %3733 = vmatmul.f32.vlgmr.msrb.gmra.mxu3 %v3323_v8 }
0x1206   :  { %3649 = vmatmul.f32.gmra.mxu0 %v3336_v49  ;;  %3678 = vmatmul.f32.gmra.mxu1 %v3337_v59 }
0x1207   :  { %4320 = vmatpush.msrb.mxu2 %v11899_v61 }
0x1208   :  { %v3158_v11 = vpop.f32.mrf.mxu2  ;;  %v3187_v22 = vpop.f32.mrf.mxu3 }
0x1209   :  { %v3159_v5 = vadd.f32 %v3158_v11, %v2814_v37  ;;  %v3188_v0 = vadd.f32 %v3187_v22, %v2815_v42  ;;  %v3103_v48 = vpop.f32.mrf.mxu0  ;;  %v3132_v63 = vpop.f32.mrf.mxu1 }
0x120a   :  { %v3104_v50 = vadd.f32 %v3103_v48, %v13450_v54  ;;  %v3133_v9 = vadd.f32 %v3132_v63, %v13453_v44 }
0x120b   :  { %v3338_v10 = vmax.f32 %v3159_v5, 0.0  ;;  %v3339_v16 = vmax.f32 %v3188_v0, 0.0 }
0x120c   :  { %v3352_v30 = vmax.f32 %v3104_v50, 0.0  ;;  %v3353_v51 = vmax.f32 %v3133_v9, 0.0 }
0x120d   :  { %3707 = vmatmul.f32.gmra.mxu2 %v3338_v10  ;;  %3736 = vmatmul.f32.gmra.mxu3 %v3339_v16 }
0x120e   :  { %3652 = vmatmul.f32.gmra.mxu0 %v3352_v30  ;;  %3681 = vmatmul.f32.gmra.mxu1 %v3353_v51 }
0x1210   :  { %v3161_v53 = vpop.f32.mrf.mxu2  ;;  %v3190_v13 = vpop.f32.mrf.mxu3 }
0x1211   :  { %v3162_v26 = vadd.f32 %v3161_v53, %v2814_v37  ;;  %v3191_v43 = vadd.f32 %v3190_v13, %v2815_v42  ;;  %v3106_v39 = vpop.f32.mrf.mxu0  ;;  %v3135_v23 = vpop.f32.mrf.mxu1 }
0x1212   :  { %v3107_v20 = vadd.f32 %v3106_v39, %v13450_v54  ;;  %v3136_v18 = vadd.f32 %v3135_v23, %v13453_v44 }
0x1213   :  { %v3354_v56 = vmax.f32 %v3162_v26, 0.0  ;;  %v3355_v27 = vmax.f32 %v3191_v43, 0.0 }
0x1214   :  { %v3368_v35 = vmax.f32 %v3107_v20, 0.0  ;;  %v3369_v31 = vmax.f32 %v3136_v18, 0.0 }
0x1215   :  { %3710 = vmatmul.f32.gmra.mxu2 %v3354_v56  ;;  %3739 = vmatmul.f32.gmra.mxu3 %v3355_v27 }
0x1216   :  { %3655 = vmatmul.f32.gmra.mxu0 %v3368_v35  ;;  %3684 = vmatmul.f32.gmra.mxu1 %v3369_v31 }
0x1218   :  { %v3164_v25 = vpop.f32.mrf.mxu2  ;;  %v3193_v32 = vpop.f32.mrf.mxu3 }
0x1219   :  { %v3165_v24 = vadd.f32 %v3164_v25, %v2814_v37  ;;  %v3194_v57 = vadd.f32 %v3193_v32, %v2815_v42  ;;  %v3213_v41 = vpop.f32.mrf.mxu0  ;;  %v3242_v54 = vpop.f32.mrf.mxu1 }
0x121a   :  { %v3214_v55 = vadd.f32 %v3213_v41, %v2816_v33  ;;  %v3243_v44 = vadd.f32 %v3242_v54, %v2817_v17 }
0x121b   :  { %v3370_v58 = vmax.f32 %v3165_v24, 0.0  ;;  %v3371_v60 = vmax.f32 %v3194_v57, 0.0 }
0x121c   :  { %v3324_v52 = vmax.f32 %v3214_v55, 0.0  ;;  %v3325_v38 = vmax.f32 %v3243_v44, 0.0 }
0x121d   :  { %3713 = vmatmul.f32.gmra.mxu2 %v3370_v58  ;;  %3742 = vmatmul.f32.gmra.mxu3 %v3371_v60 }
0x121e   :  { %3762 = vmatmul.f32.vlgmr.msrb.gmra.mxu0 %v3324_v52  ;;  %3791 = vmatmul.f32.vlgmr.msrb.gmra.mxu1 %v3325_v38 }
0x1220   :  { %v3271_v21 = vpop.f32.mrf.mxu2  ;;  %v3300_v4 = vpop.f32.mrf.mxu3 }
0x1221   :  { %v3272_v37 = vadd.f32 %v3271_v21, %v2818_v12  ;;  %v3301_v42 = vadd.f32 %v3300_v4, %v2819_v2  ;;  %v3216_v14 = vpop.f32.mrf.mxu0  ;;  %v3245_v47 = vpop.f32.mrf.mxu1 }
0x1222   :  { %v3217_v6 = vadd.f32 %v3216_v14, %v2816_v33  ;;  %v3246_v1 = vadd.f32 %v3245_v47, %v2817_v17 }
0x1223   :  { %v3326_v7 = vmax.f32 %v3272_v37, 0.0  ;;  %v3327_v15 = vmax.f32 %v3301_v42, 0.0 }
0x1224   :  { %v3340_v40 = vmax.f32 %v3217_v6, 0.0  ;;  %v3341_v28 = vmax.f32 %v3246_v1, 0.0 }
0x1225   :  { %3820 = vmatmul.f32.vlgmr.msra.gmra.mxu2 %v3326_v7  ;;  %3849 = vmatmul.f32.vlgmr.msra.gmra.mxu3 %v3327_v15 }
0x1226   :  { %3765 = vmatmul.f32.gmra.mxu0 %v3340_v40  ;;  %3794 = vmatmul.f32.gmra.mxu1 %v3341_v28 }
0x1228   :  { %v3274_v46 = vpop.f32.mrf.mxu2  ;;  %v3303_v36 = vpop.f32.mrf.mxu3 }
0x1229   :  { %v3275_v19 = vadd.f32 %v3274_v46, %v2818_v12  ;;  %v3304_v8 = vadd.f32 %v3303_v36, %v2819_v2  ;;  %v3219_v49 = vpop.f32.mrf.mxu0  ;;  %v3248_v59 = vpop.f32.mrf.mxu1  ;;  %v11670_v36 = vld [vmem:[%s15647_s19 + $0x1] ss:$0 sm:$0xff] }
0x122a   :  { %v3220_v61 = vadd.f32 %v3219_v49, %v2816_v33  ;;  %v3249_v11 = vadd.f32 %v3248_v59, %v2817_v17 }
0x122b   :  { %v3342_v22 = vmax.f32 %v3275_v19, 0.0  ;;  %v3343_v5 = vmax.f32 %v3304_v8, 0.0 }
0x122c   :  { %v3356_v0 = vmax.f32 %v3220_v61, 0.0  ;;  %v3357_v48 = vmax.f32 %v3249_v11, 0.0 }
0x122d   :  { %3823 = vmatmul.f32.gmra.mxu2 %v3342_v22  ;;  %3852 = vmatmul.f32.gmra.mxu3 %v3343_v5 }
0x122e   :  { %3768 = vmatmul.f32.gmra.mxu0 %v3356_v0  ;;  %3797 = vmatmul.f32.gmra.mxu1 %v3357_v48 }
0x1230   :  { %v3277_v63 = vpop.f32.mrf.mxu2  ;;  %v3306_v50 = vpop.f32.mrf.mxu3 }
0x1231   :  { %v3278_v9 = vadd.f32 %v3277_v63, %v2818_v12  ;;  %v3307_v10 = vadd.f32 %v3306_v50, %v2819_v2  ;;  %v3222_v16 = vpop.f32.mrf.mxu0  ;;  %v3251_v30 = vpop.f32.mrf.mxu1 }
0x1232   :  { %v3223_v51 = vadd.f32 %v3222_v16, %v2816_v33  ;;  %v3252_v53 = vadd.f32 %v3251_v30, %v2817_v17 }
0x1233   :  { %v3358_v13 = vmax.f32 %v3278_v9, 0.0  ;;  %v3359_v26 = vmax.f32 %v3307_v10, 0.0 }
0x1234   :  { %v3372_v43 = vmax.f32 %v3223_v51, 0.0  ;;  %v3373_v39 = vmax.f32 %v3252_v53, 0.0 }
0x1235   :  { %3826 = vmatmul.f32.gmra.mxu2 %v3358_v13  ;;  %3855 = vmatmul.f32.gmra.mxu3 %v3359_v26 }
0x1236   :  { %3771 = vmatmul.f32.gmra.mxu0 %v3372_v43  ;;  %3800 = vmatmul.f32.gmra.mxu1 %v3373_v39 }
0x1238   :  { %v3280_v23 = vpop.f32.mrf.mxu2  ;;  %v3309_v20 = vpop.f32.mrf.mxu3 }
0x1239   :  { %v3281_v18 = vadd.f32 %v3280_v23, %v2818_v12  ;;  %v3310_v56 = vadd.f32 %v3309_v20, %v2819_v2  ;;  %v3415_v31 = vpop.f32.mrf.mxu0  ;;  %v3444_v25 = vpop.f32.mrf.mxu1 }
0x123a   :  { %v3416_v49 = vadd.f32 %v11670_v36, %v3415_v31 }
0x123b   :  { %v3374_v27 = vmax.f32 %v3281_v18, 0.0  ;;  %v3375_v35 = vmax.f32 %v3310_v56, 0.0 }
0x123c   :  { %v3445_v11 = vadd.f32 %v3444_v25, %v3416_v49 }
0x123d   :  { %3829 = vmatmul.f32.gmra.mxu2 %v3374_v27  ;;  %3858 = vmatmul.f32.gmra.mxu3 %v3375_v35 }
0x1240   :  { %v3473_v32 = vpop.f32.mrf.mxu2  ;;  %v3502_v24 = vpop.f32.mrf.mxu3 }
0x1241   :  { %v3474_v0 = vadd.f32 %v3473_v32, %v3445_v11 }
0x1243   :  { %v3418_v33 = vpop.f32.mrf.mxu0  ;;  %v3447_v17 = vpop.f32.mrf.mxu1  ;;  %v3503_v9 = vadd.f32 %v3502_v24, %v3474_v0 }
0x1244   :  { %v3419_v48 = vadd.f32 %v11670_v36, %v3418_v33 }
0x1246   :  { %v3448_v10 = vadd.f32 %v3447_v17, %v3419_v48 }
0x124b   :  { %v3421_v57 = vpop.f32.mrf.mxu0  ;;  %v3450_v41 = vpop.f32.mrf.mxu1 }
0x124c   :  { %v3422_v13 = vadd.f32 %v11670_v36, %v3421_v57 }
0x124e   :  { %v3451_v18 = vadd.f32 %v3450_v41, %v3422_v13 }
0x1250   :  { %v3476_v54 = vpop.f32.mrf.mxu2  ;;  %v3505_v55 = vpop.f32.mrf.mxu3 }
0x1251   :  { %v3477_v53 = vadd.f32 %v3476_v54, %v3448_v10 }
0x1253   :  { %v3424_v44 = vpop.f32.mrf.mxu0  ;;  %v3453_v58 = vpop.f32.mrf.mxu1  ;;  %v3506_v23 = vadd.f32 %v3505_v55, %v3477_v53 }
0x1254   :  { %v3425_v33 = vadd.f32 %v11670_v36, %v3424_v44 }
0x1256   :  { %v3454_v54 = vadd.f32 %v3453_v58, %v3425_v33 }
0x1258   :  { %v3479_v60 = vpop.f32.mrf.mxu2  ;;  %v3508_v52 = vpop.f32.mrf.mxu3 }
0x1259   :  { %v3480_v35 = vadd.f32 %v3479_v60, %v3451_v18 }
0x125b   :  { %v3531_v38 = vpop.f32.mrf.mxu0  ;;  %v3560_v12 = vpop.f32.mrf.mxu1  ;;  %v3509_v49 = vadd.f32 %v3508_v52, %v3480_v35 }
0x125c   :  { %v3532_v16 = vadd.f32 %v3531_v38, %v3503_v9 }
0x125e   :  { %v3561_v26 = vadd.f32 %v3560_v12, %v3532_v16 }
0x1260   :  { %v3482_v2 = vpop.f32.mrf.mxu2  ;;  %v13471_v21 = vpop.f32.mrf.mxu3 }
0x1261   :  { %v3483_v48 = vadd.f32 %v3482_v2, %v3454_v54 }
0x1263   :  { %v3534_v4 = vpop.f32.mrf.mxu0  ;;  %v3563_v37 = vpop.f32.mrf.mxu1  ;;  %v3512_v44 = vadd.f32 %v13471_v21, %v3483_v48 }
0x1264   :  { %v3535_v56 = vadd.f32 %v3534_v4, %v3506_v23 }
0x1266   :  { %v3564_v32 = vadd.f32 %v3563_v37, %v3535_v56 }
0x1268   :  { %v3589_v42 = vpop.f32.mrf.mxu2  ;;  %v3618_v14 = vpop.f32.mrf.mxu3 }
0x1269   :  { %v3590_v20 = vadd.f32 %v3589_v42, %v3561_v26 }
0x126b   :  { %v3537_v47 = vpop.f32.mrf.mxu0  ;;  %v3566_v6 = vpop.f32.mrf.mxu1  ;;  %v3619_v31 = vadd.f32 %v3618_v14, %v3590_v20 }
0x126c   :  { %v3538_v57 = vadd.f32 %v3537_v47, %v3509_v49 }
0x126e   :  { %v3567_v41 = vadd.f32 %v3566_v6, %v3538_v57 }
0x1270   :  { %v3592_v1 = vpop.f32.mrf.mxu2  ;;  %v3621_v7 = vpop.f32.mrf.mxu3 }
0x1271   :  { %v3593_v11 = vadd.f32 %v3592_v1, %v3564_v32 }
0x1273   :  { %v3540_v15 = vpop.f32.mrf.mxu0  ;;  %v3569_v40 = vpop.f32.mrf.mxu1  ;;  %v3622_v55 = vadd.f32 %v3621_v7, %v3593_v11 }
0x1278   :  { %v3595_v28 = vpop.f32.mrf.mxu2  ;;  %v3624_v46 = vpop.f32.mrf.mxu3 }
0x1279   :  { %v3596_v37 = vadd.f32 %v3595_v28, %v3567_v41 }
0x127b   :  { %v3647_v19 = vpop.f32.mrf.mxu0  ;;  %v3676_v8 = vpop.f32.mrf.mxu1  ;;  %v3625_v58 = vadd.f32 %v3624_v46, %v3596_v37 }
0x127c   :  { %v3648_v24 = vadd.f32 %v3647_v19, %v3619_v31  ;;  %v3541_v19 = vadd.f32 %v3540_v15, %v3512_v44 }
0x127e   :  { %v3677_v12 = vadd.f32 %v3676_v8, %v3648_v24  ;;  %v3570_v8 = vadd.f32 %v3569_v40, %v3541_v19 }
0x1280   :  { %v3598_v59 = vpop.f32.mrf.mxu2  ;;  %v13476_v61 = vpop.f32.mrf.mxu3 }
0x1281   :  { %v3599_v6 = vadd.f32 %v3598_v59, %v3570_v8 }
0x1283   :  { %v3650_v22 = vpop.f32.mrf.mxu0  ;;  %v3679_v5 = vpop.f32.mrf.mxu1  ;;  %v3628_v28 = vadd.f32 %v13476_v61, %v3599_v6 }
0x1284   :  { %v3651_v4 = vadd.f32 %v3650_v22, %v3622_v55 }
0x1286   :  { %v3680_v10 = vadd.f32 %v3679_v5, %v3651_v4 }
0x1288   :  { %v3705_v63 = vpop.f32.mrf.mxu2  ;;  %v3734_v50 = vpop.f32.mrf.mxu3 }
0x1289   :  { %v3706_v42 = vadd.f32 %v3705_v63, %v3677_v12 }
0x128b   :  { %v3653_v30 = vpop.f32.mrf.mxu0  ;;  %v3682_v51 = vpop.f32.mrf.mxu1  ;;  %v3735_v36 = vadd.f32 %v3734_v50, %v3706_v42 }
0x128c   :  { %v3654_v16 = vadd.f32 %v3653_v30, %v3625_v58 }
0x128e   :  { %v3683_v26 = vadd.f32 %v3682_v51, %v3654_v16 }
0x1290   :  { %v3708_v43 = vpop.f32.mrf.mxu2  ;;  %v3737_v39 = vpop.f32.mrf.mxu3 }
0x1291   :  { %v3709_v47 = vadd.f32 %v3708_v43, %v3680_v10 }
0x1293   :  { %v3656_v27 = vpop.f32.mrf.mxu0  ;;  %v3685_v25 = vpop.f32.mrf.mxu1  ;;  %v3738_v22 = vadd.f32 %v3737_v39, %v3709_v47 }
0x1294   :  { %v3657_v46 = vadd.f32 %v3656_v27, %v3628_v28 }
0x1296   :  { %v3686_v18 = vadd.f32 %v3685_v25, %v3657_v46 }
0x1298   :  { %v3711_v17 = vpop.f32.mrf.mxu2  ;;  %v3740_v38 = vpop.f32.mrf.mxu3 }
0x1299   :  { %v3712_v15 = vadd.f32 %v3711_v17, %v3683_v26 }
0x129b   :  { %v3763_v0 = vpop.f32.mrf.mxu0  ;;  %v3792_v9 = vpop.f32.mrf.mxu1  ;;  %v3741_v59 = vadd.f32 %v3740_v38, %v3712_v15 }
0x129c   :  { %v3764_v52 = vadd.f32 %v3763_v0, %v3735_v36 }
0x129e   :  { %v3793_v2 = vadd.f32 %v3792_v9, %v3764_v52  ;;  %v11147_v9 = vld [vmem:[%s15638_s10 + $0x10] sm:$0xff] }
0x129f   :  { %4006 = vmatpush.msra.mxu0 %v11147_v9 }
0x12a0   :  { %v3714_v60 = vpop.f32.mrf.mxu2  ;;  %v3743_v14 = vpop.f32.mrf.mxu3 }
0x12a1   :  { %v3715_v31 = vadd.f32 %v3714_v60, %v3686_v18  ;;  %v11671_v18 = vld [vmem:[#allocation8 + $0x1] ss:$0 sm:$0xff] }
0x12a3   :  { %v3766_v1 = vpop.f32.mrf.mxu0  ;;  %v3795_v13 = vpop.f32.mrf.mxu1  ;;  %v3744_v17 = vadd.f32 %v3743_v14, %v3715_v31 }
0x12a4   :  { %v3767_v23 = vadd.f32 %v3766_v1, %v3738_v22 }
0x12a6   :  { %v3796_v43 = vadd.f32 %v3795_v13, %v3767_v23 }
0x12a8   :  { %v3821_v7 = vpop.f32.mrf.mxu2  ;;  %v3850_v63 = vpop.f32.mrf.mxu3 }
0x12a9   :  { %v3822_v53 = vadd.f32 %v3821_v7, %v3793_v2 }
0x12ab   :  { %v3851_v21 = vadd.f32 %v3850_v63, %v3822_v53  ;;  %v3769_v5 = vpop.f32.mrf.mxu0  ;;  %v3798_v35 = vpop.f32.mrf.mxu1 }
0x12ac   :  { %v3770_v56 = vadd.f32 %v3769_v5, %v3741_v59 }
0x12ad   :  { %v3862_v50 = vadd.f32 %v3851_v21, %v13165_v62 }
0x12ae   :  { %v3799_v33 = vadd.f32 %v3798_v35, %v3770_v56  ;;  %v11672_v35 = vld [vmem:[#allocation10 + $0x1] ss:$0 sm:$0xff] }
0x12af   :  { %v3870_v40 = vsel %vm390_vm7, %v3862_v50, 0.0 }
0x12b0   :  { %v3824_v30 = vpop.f32.mrf.mxu2  ;;  %v3853_v20 = vpop.f32.mrf.mxu3  ;;  %3871 = vadd.xlane.f32.xlu1 %v3870_v40 }
0x12b1   :  { %v3825_v39 = vadd.f32 %v3824_v30, %v3796_v43 }
0x12b3   :  { %v3854_v51 = vadd.f32 %v3853_v20, %v3825_v39  ;;  %v3772_v32 = vpop.f32.mrf.mxu0  ;;  %v3801_v25 = vpop.f32.mrf.mxu1 }
0x12b4   :  { %v3773_v11 = vadd.f32 %v3772_v32, %v3744_v17 }
0x12b5   :  { %v3863_v61 = vadd.f32 %v3854_v51, %v13199_v3 }
0x12b6   :  { %v3802_v57 = vadd.f32 %v3801_v25, %v3773_v11 }
0x12b7   :  { %v3873_v62 = vsel %vm390_vm7, %v3863_v61, 0.0 }
0x12b8   :  { %v3827_v27 = vpop.f32.mrf.mxu2  ;;  %v3856_v24 = vpop.f32.mrf.mxu3  ;;  %3874 = vadd.xlane.f32.xlu0 %v3873_v62 }
0x12b9   :  { %v3828_v49 = vadd.f32 %v3827_v27, %v3799_v33 }
0x12bb   :  { %v3857_v54 = vadd.f32 %v3856_v24, %v3828_v49 }
0x12bd   :  { %v3864_v38 = vadd.f32 %v3857_v54, %v13218_v29 }
0x12bf   :  { %v3876_v12 = vsel %vm390_vm7, %v3864_v38, 0.0 }
0x12c0   :  { %v3830_v0 = vpop.f32.mrf.mxu2  ;;  %3877 = vadd.xlane.f32.xlu2 %v3876_v12  ;;  %v3859_v48 = vpop.f32.mrf.mxu3 }
0x12c1   :  { %v3831_v3 = vadd.f32 %v3830_v0, %v3802_v57 }
0x12c3   :  { %v3860_v55 = vadd.f32 %v3859_v48, %v3831_v3 }
0x12c5   :  { %v3865_v42 = vadd.f32 %v3860_v55, %v13231_v34 }
0x12c7   :  { %v3879_v41 = vsel %vm390_vm7, %v3865_v42, 0.0 }
0x12c8   :  { %3880 = vadd.xlane.f32.xlu1 %v3879_v41 }
0x1323   :  { %v3872_v4 = vpop.xlane.xlu1 %3871 }
0x1324   :  { %v3882_v29 = vmul.f32 %v3872_v4, %v12588_v45 }
0x1326   :  { %v3886_v60 = vsub.f32 %v3862_v50, %v3882_v29 }
0x1328   :  { %v3890_v14 = vmul.f32 %v3886_v60, %v3886_v60 }
0x132a   :  { %v3894_v44 = vsel %vm390_vm7, %v3890_v14, 0.0 }
0x132b   :  { %3895 = vadd.xlane.f32.xlu0 %v3894_v44  ;;  %v3875_v37 = vpop.xlane.xlu0 %3874 }
0x132c   :  { %v3883_v36 = vmul.f32 %v3875_v37, %v12588_v45 }
0x132e   :  { %v3887_v34 = vsub.f32 %v3863_v61, %v3883_v36 }
0x1330   :  { %v3891_v19 = vmul.f32 %v3887_v34, %v3887_v34 }
0x1332   :  { %v3897_v10 = vsel %vm390_vm7, %v3891_v19, 0.0 }
0x1333   :  { %v3878_v52 = vpop.xlane.xlu2 %3877  ;;  %3898 = vadd.xlane.f32.xlu2 %v3897_v10 }
0x1334   :  { %v3884_v1 = vmul.f32 %v3878_v52, %v12588_v45 }
0x1336   :  { %v13496_v58 = vsub.f32 %v3864_v38, %v3884_v1  ;;  %v11673_v1 = vld [vmem:[%s15639_s11 + $0x2] ss:$0 sm:$0xff] }
0x1338   :  { %v3892_v47 = vmul.f32 %v13496_v58, %v13496_v58 }
0x133a   :  { %v3900_v8 = vsel %vm390_vm7, %v3892_v47, 0.0 }
0x133b   :  { %v3881_v16 = vpop.xlane.xlu1 %3880  ;;  %3901 = vadd.xlane.f32.xlu1 %v3900_v8 }
0x133c   :  { %v3885_v2 = vmul.f32 %v3881_v16, %v12588_v45 }
0x133e   :  { %v13502_v7 = vsub.f32 %v3865_v42, %v3885_v2 }
0x1340   :  { %v3893_v63 = vmul.f32 %v13502_v7, %v13502_v7 }
0x1342   :  { %v3903_v6 = vsel %vm390_vm7, %v3893_v63, 0.0 }
0x1343   :  { %3904 = vadd.xlane.f32.xlu0 %v3903_v6 }
0x139e   :  { %v3896_v22 = vpop.xlane.xlu0 %3895 }
0x139f   :  { %v3906_v53 = vmul.f32 %v3896_v22, %v12588_v45 }
0x13a1   :  { %v3910_v13 = vadd.f32 1e-05, %v3906_v53 }
0x13a3   :  { %11759 = vrsqrt.f32 %v3910_v13  ;;  %vm3920_vm6 = vweird.f32 %v3910_v13 }
0x13a6   :  { %v3899_v26 = vpop.xlane.xlu2 %3898 }
0x13a7   :  { %v3907_v23 = vmul.f32 %v3899_v26, %v12588_v45 }
0x13a9   :  { %v11760_v21 = vpop.eup %11759  ;;  %v3911_v28 = vadd.f32 1e-05, %v3907_v23 }
0x13aa   :  { %v3915_v15 = vmul.f32 %v11760_v21, %v3910_v13  ;;  %vm3921_vm5 = vweird.f32 %v11760_v21 }
0x13ab   :  { %11761 = vrsqrt.f32 %v3911_v28  ;;  %vm3922_vm9 = vmor %vm3920_vm6, %vm3921_vm5  ;;  %vm3930_vm11 = vweird.f32 %v3911_v28 }
0x13ac   :  { %v3916_v5 = vmul.f32 %v11760_v21, %v3915_v15 }
0x13ae   :  { %v3917_v50 = vmul.f32 0.5, %v3916_v5  ;;  %v3902_v46 = vpop.xlane.xlu1 %3901 }
0x13af   :  { %v3908_v43 = vmul.f32 %v3902_v46, %v12588_v45 }
0x13b0   :  { %v3918_v40 = vsub.f32 1.5, %v3917_v50 }
0x13b1   :  { %v11762_v30 = vpop.eup %11761  ;;  %v3912_v20 = vadd.f32 1e-05, %v3908_v43 }
0x13b2   :  { %v3919_v59 = vmul.f32 %v11760_v21, %v3918_v40  ;;  %v3925_v39 = vmul.f32 %v11762_v30, %v3911_v28  ;;  %vm3931_vm10 = vweird.f32 %v11762_v30 }
0x13b3   :  { %11763 = vrsqrt.f32 %v3912_v20  ;;  %vm3932_vm12 = vmor %vm3930_vm11, %vm3931_vm10  ;;  %vm3940_vm14 = vweird.f32 %v3912_v20 }
0x13b4   :  { %v3923_v56 = vsel %vm3922_vm9, %v11760_v21, %v3919_v59  ;;  %v3926_v51 = vmul.f32 %v11762_v30, %v3925_v39 }
0x13b5   :  { %v3954_v31 = vmul.f32 %v3923_v56, %v3886_v60 }
0x13b6   :  { %v3927_v61 = vmul.f32 0.5, %v3926_v51  ;;  %v3905_v33 = vpop.xlane.xlu0 %3904 }
0x13b7   :  { %v3961_v32 = vmul.f32 %v11671_v18, %v3954_v31  ;;  %v3909_v62 = vmul.f32 %v3905_v33, %v12588_v45 }
0x13b8   :  { %v3928_v27 = vsub.f32 1.5, %v3927_v61 }
0x13b9   :  { %v11764_v24 = vpop.eup %11763  ;;  %v13511_v17 = vadd.f32 %v11672_v35, %v3961_v32  ;;  %v3913_v49 = vadd.f32 1e-05, %v3909_v62 }
0x13ba   :  { %v3929_v11 = vmul.f32 %v11762_v30, %v3928_v27  ;;  %v3935_v54 = vmul.f32 %v11764_v24, %v3912_v20  ;;  %vm3941_vm13 = vweird.f32 %v11764_v24 }
0x13bb   :  { %11765 = vrsqrt.f32 %v3913_v49  ;;  %11149 = vmatmul.msk.f32.vlgmr.msra.gmra.mxu0 %vm390_vm7, %v13511_v17  ;;  %vm3942_vm15 = vmor %vm3940_vm14, %vm3941_vm13  ;;  %vm3950_vm2 = vweird.f32 %v3913_v49 }
0x13bc   :  { %v3933_v38 = vsel %vm3932_vm12, %v11762_v30, %v3929_v11  ;;  %v3936_v25 = vmul.f32 %v11764_v24, %v3935_v54 }
0x13bd   :  { %v3955_v57 = vmul.f32 %v3933_v38, %v3887_v34 }
0x13be   :  { %v3937_v12 = vmul.f32 0.5, %v3936_v25 }
0x13bf   :  { %v3962_v0 = vmul.f32 %v11671_v18, %v3955_v57 }
0x13c0   :  { %v3938_v3 = vsub.f32 1.5, %v3937_v12 }
0x13c1   :  { %v11766_v48 = vpop.eup %11765  ;;  %v13515_v55 = vadd.f32 %v11672_v35, %v3962_v0 }
0x13c2   :  { %v3939_v42 = vmul.f32 %v11764_v24, %v3938_v3  ;;  %v3945_v41 = vmul.f32 %v11766_v48, %v3913_v49  ;;  %vm3951_vm1 = vweird.f32 %v11766_v48 }
0x13c3   :  { %11150 = vmatmul.msk.f32.gmra.mxu0 %vm390_vm7, %v13515_v55  ;;  %vm3952_vm3 = vmor %vm3950_vm2, %vm3951_vm1 }
0x13c4   :  { %v3943_v4 = vsel %vm3942_vm15, %v11764_v24, %v3939_v42  ;;  %v3946_v9 = vmul.f32 %v11766_v48, %v3945_v41 }
0x13c5   :  { %v3956_v29 = vmul.f32 %v3943_v4, %v13496_v58 }
0x13c6   :  { %v3947_v60 = vmul.f32 0.5, %v3946_v9 }
0x13c7   :  { %v3963_v14 = vmul.f32 %v11671_v18, %v3956_v29 }
0x13c8   :  { %v3948_v44 = vsub.f32 1.5, %v3947_v60 }
0x13c9   :  { %v13520_v37 = vadd.f32 %v11672_v35, %v3963_v14 }
0x13ca   :  { %v3949_v36 = vmul.f32 %v11766_v48, %v3948_v44 }
0x13cb   :  { %11151 = vmatmul.msk.f32.gmra.mxu0 %vm390_vm7, %v13520_v37 }
0x13cc   :  { %v3953_v34 = vsel %vm3952_vm3, %v11766_v48, %v3949_v36 }
0x13cd   :  { %v3957_v19 = vmul.f32 %v3953_v34, %v13502_v7 }
0x13cf   :  { %v3964_v10 = vmul.f32 %v11671_v18, %v3957_v19 }
0x13d1   :  { %v13525_v52 = vadd.f32 %v11672_v35, %v3964_v10 }
0x13d3   :  { %11152 = vmatmul.msk.f32.gmra.mxu0 %vm390_vm7, %v13525_v52 }
0x1438   :  { %v4008_v58 = vpop.f32.mrf.mxu0 }
0x1439   :  { %v13532_v47 = vadd.f32 %v11673_v1, %v4008_v58 }
0x143b   :  { %4024 = vrot.lane.b32.xlu0 %v13532_v47, %s12076_s4 }
0x1440   :  { %v4011_v8 = vpop.f32.mrf.mxu0 }
0x1441   :  { %v13540_v63 = vadd.f32 %v11673_v1, %v4011_v8 }
0x1448   :  { %v4014_v16 = vpop.f32.mrf.mxu0 }
0x1449   :  { %v13536_v2 = vadd.f32 %v11673_v1, %v4014_v16 }
0x144b   :  { %4028 = vrot.lane.b32.xlu2 %v13536_v2, %s12076_s4 }
0x1450   :  { %v4017_v7 = vpop.f32.mrf.mxu0 }
0x1451   :  { %v13542_v6 = vadd.f32 %v11673_v1, %v4017_v7 }
0x1453   :  { %4026 = vrot.lane.b32.xlu2 %v13540_v63, %s12076_s4  ;;  %4030 = vrot.lane.b32.xlu1 %v13542_v6, %s12076_s4 }
0x14a5   :  { %v4029_v22 = vpop.permute.xlu2 %4028 }
0x14a6   :  { %v4040_v53 = vmul.f32 %v4029_v22, %v13532_v47  ;;  %v4038_v59 = vmul.f32 %v4029_v22, %v13536_v2 }
0x14a8   :  { %4056 = vrot.lane.b32.xlu0 %v4040_v53, %s12063_s24 }
0x14ad   :  { %v4027_v13 = vpop.permute.xlu2 %4026  ;;  %v4025_v26 = vpop.permute.xlu0 %4024 }
0x14ae   :  { %v4043_v23 = vmul.f32 %v4027_v13, %v13542_v6  ;;  %v4042_v21 = vmul.f32 %v4025_v26, %v13536_v2  ;;  %v4036_v5 = vmul.f32 %v4025_v26, %v13532_v47  ;;  %v4037_v43 = vmul.f32 %v4027_v13, %v13540_v63 }
0x14b0   :  { %4062 = vrot.lane.b32.xlu0 %v4043_v23, %s12063_s24  ;;  %4060 = vrot.lane.b32.xlu2 %v4042_v21, %s12063_s24 }
0x14c5   :  { %v4031_v28 = vpop.permute.xlu1 %4030 }
0x14c6   :  { %v4041_v15 = vmul.f32 %v4031_v28, %v13540_v63  ;;  %v4039_v56 = vmul.f32 %v4031_v28, %v13542_v6 }
0x14c8   :  { %4058 = vrot.lane.b32.xlu1 %v4041_v15, %s12063_s24 }
0x150a   :  { %v4061_v20 = vpop.permute.xlu2 %4060 }
0x150b   :  { %v4070_v39 = vsel %vm390_vm7, %v4038_v59, %v4061_v20 }
0x151a   :  { %v4057_v50 = vpop.permute.xlu0 %4056 }
0x151b   :  { %v4068_v46 = vsel %vm390_vm7, %v4036_v5, %v4057_v50 }
0x151c   :  { %11153 = vmatmul.msk.f32.vlgmr.msra.gmra.mxu1 %vm395_vm8, %v4068_v46 }
0x1522   :  { %v4063_v18 = vpop.permute.xlu0 %4062 }
0x1523   :  { %v4071_v51 = vsel %vm390_vm7, %v4039_v56, %v4063_v18 }
0x153a   :  { %v4059_v40 = vpop.permute.xlu1 %4058 }
0x153b   :  { %v4069_v30 = vsel %vm390_vm7, %v4037_v43, %v4059_v40 }
0x153c   :  { %11154 = vmatmul.msk.f32.gmra.mxu1 %vm395_vm8, %v4069_v30 }
0x1544   :  { %11155 = vmatmul.msk.f32.gmra.mxu1 %vm395_vm8, %v4070_v39 }
0x154c   :  { %11156 = vmatmul.msk.f32.gmra.mxu1 %vm395_vm8, %v4071_v51 }
0x1599   :  { %v4121_v35 = vpop.f32.mrf.mxu1 }
0x159a   :  { %v4133_v31 = vmul.f32 0.70710677, %v4121_v35 }
0x159c   :  { %4141 = vrot.lane.b32.xlu1 %v4133_v31, %s12077_s6 }
0x15b9   :  { %v4124_v61 = vpop.f32.mrf.mxu1 }
0x15ba   :  { %v4134_v33 = vmul.f32 0.70710677, %v4124_v61 }
0x15bc   :  { %4143 = vrot.lane.b32.xlu2 %v4134_v33, %s12077_s6 }
0x15c1   :  { %v4127_v32 = vpop.f32.mrf.mxu1 }
0x15c2   :  { %v4135_v62 = vmul.f32 0.70710677, %v4127_v32 }
0x15c4   :  { %4145 = vrot.lane.b32.xlu0 %v4135_v62, %s12077_s6 }
0x15c9   :  { %v4130_v27 = vpop.f32.mrf.mxu1 }
0x15ca   :  { %v4136_v24 = vmul.f32 0.70710677, %v4130_v27 }
0x15cc   :  { %4147 = vrot.lane.b32.xlu1 %v4136_v24, %s12077_s6 }
0x160e   :  { %v4142_v49 = vpop.permute.xlu1 %4141 }
0x160f   :  { %v4153_v11 = vmax.f32 %v4133_v31, %v4142_v49 }
0x1611   :  { %4161 = vrot.lane.b32.xlu2 %v4153_v11, %s12078_s1 }
0x1616   :  { %v4144_v54 = vpop.permute.xlu2 %4143 }
0x1617   :  { %v4154_v38 = vmax.f32 %v4134_v33, %v4144_v54 }
0x1619   :  { %4163 = vrot.lane.b32.xlu0 %v4154_v38, %s12078_s1 }
0x1636   :  { %v4146_v25 = vpop.permute.xlu0 %4145 }
0x1637   :  { %v4155_v57 = vmax.f32 %v4135_v62, %v4146_v25 }
0x1639   :  { %4165 = vrot.lane.b32.xlu1 %v4155_v57, %s12078_s1 }
0x163e   :  { %v4148_v12 = vpop.permute.xlu1 %4147 }
0x163f   :  { %v4156_v0 = vmax.f32 %v4136_v24, %v4148_v12 }
0x1641   :  { %4167 = vrot.lane.b32.xlu2 %v4156_v0, %s12078_s1 }
0x166b   :  { %v4162_v3 = vpop.permute.xlu2 %4161 }
0x166c   :  { %v4173_v48 = vsel %vm707_vm0, %v4153_v11, %v4162_v3 }
0x166d   :  { %v4177_v42 = vsub.f32 %v4133_v31, %v4173_v48 }
0x166f   :  { %v4181_v41 = vmul.f32 1.442695, %v4177_v42 }
0x1671   :  { %11767 = vpow2.f32 %v4181_v41 }
0x1677   :  { %v13577_v4 = vpop.eup %11767 }
0x1678   :  { %4193 = vrot.lane.b32.xlu0 %v13577_v4, %s12077_s6 }
0x168b   :  { %v4164_v9 = vpop.permute.xlu0 %4163 }
0x168c   :  { %v4174_v29 = vsel %vm707_vm0, %v4154_v38, %v4164_v9 }
0x168d   :  { %v4178_v60 = vsub.f32 %v4134_v33, %v4174_v29 }
0x168f   :  { %v4183_v14 = vmul.f32 1.442695, %v4178_v60 }
0x1691   :  { %11769 = vpow2.f32 %v4183_v14 }
0x1697   :  { %v13582_v44 = vpop.eup %11769 }
0x1698   :  { %4195 = vrot.lane.b32.xlu1 %v13582_v44, %s12077_s6 }
0x169b   :  { %v4168_v36 = vpop.permute.xlu2 %4167 }
0x169c   :  { %v4176_v34 = vsel %vm707_vm0, %v4156_v0, %v4168_v36 }
0x169d   :  { %v4180_v19 = vsub.f32 %v4136_v24, %v4176_v34 }
0x169f   :  { %v4187_v10 = vmul.f32 1.442695, %v4180_v19 }
0x16a1   :  { %11771 = vpow2.f32 %v4187_v10 }
0x16a7   :  { %v13587_v1 = vpop.eup %11771 }
0x16a8   :  { %4199 = vrot.lane.b32.xlu0 %v13587_v1, %s12077_s6 }
0x16ab   :  { %v4166_v58 = vpop.permute.xlu1 %4165 }
0x16ac   :  { %v4175_v8 = vsel %vm707_vm0, %v4155_v57, %v4166_v58 }
0x16ad   :  { %v4179_v16 = vsub.f32 %v4135_v62, %v4175_v8 }
0x16af   :  { %v4185_v7 = vmul.f32 1.442695, %v4179_v16 }
0x16b1   :  { %11773 = vpow2.f32 %v4185_v7 }
0x16b7   :  { %v13592_v22 = vpop.eup %11773 }
0x16b8   :  { %4197 = vrot.lane.b32.xlu2 %v13592_v22, %s12077_s6 }
0x16ea   :  { %v4194_v53 = vpop.permute.xlu0 %4193 }
0x16eb   :  { %v4205_v13 = vadd.f32 %v13577_v4, %v4194_v53 }
0x16ed   :  { %11775 = vrcp.f32 %v4205_v13  ;;  %v4220_v28 = vand.u32 2147483648, %v4205_v13  ;;  %v4218_v5 = vand.u32 2147483647, %v4205_v13  ;;  %vm4214_vm5 = vweird.f32 %v4205_v13 }
0x16ef   :  { %v4221_v46 = vor.u32 1.1754944e-38, %v4220_v28  ;;  %vm4219_vm9 = vcmp.eq.f32.partialorder %v4218_v5, 8.507059e+37 }
0x16f3   :  { %v11776_v26 = vpop.eup %11775 }
0x16f4   :  { %v4210_v23 = vmul.f32 %v11776_v26, %v4205_v13  ;;  %vm4215_vm4 = vweird.f32 %v11776_v26 }
0x16f5   :  { %vm4216_vm6 = vmor %vm4214_vm5, %vm4215_vm4 }
0x16f6   :  { %v4211_v21 = vsub.f32 1.0, %v4210_v23 }
0x16f8   :  { %v4212_v15 = vmul.f32 %v11776_v26, %v4211_v21 }
0x16fa   :  { %v4213_v50 = vadd.f32 %v11776_v26, %v4212_v15 }
0x16fc   :  { %v4217_v43 = vsel %vm4216_vm6, %v11776_v26, %v4213_v50 }
0x16fd   :  { %v4222_v40 = vsel %vm4219_vm9, %v4221_v46, %v4217_v43  ;;  %v11161_v43 = vld [vmem:[%s15640_s12 + $0x10] sm:$0xff] }
0x16fe   :  { %4273 = vrot.lane.b32.xlu1 %v4222_v40, %s12078_s1  ;;  %4392 = vmatpush.msrb.mxu3 %v11161_v43 }
0x170a   :  { %v4196_v30 = vpop.permute.xlu1 %4195 }
0x170b   :  { %v4206_v20 = vadd.f32 %v13582_v44, %v4196_v30 }
0x170d   :  { %11777 = vrcp.f32 %v4206_v20  ;;  %v4235_v35 = vand.u32 2147483648, %v4206_v20  ;;  %v4233_v61 = vand.u32 2147483647, %v4206_v20  ;;  %vm4229_vm11 = vweird.f32 %v4206_v20 }
0x170f   :  { %v4236_v24 = vor.u32 1.1754944e-38, %v4235_v35  ;;  %vm4234_vm13 = vcmp.eq.f32.partialorder %v4233_v61, 8.507059e+37 }
0x1712   :  { %v4198_v59 = vpop.permute.xlu2 %4197 }
0x1713   :  { %v11778_v39 = vpop.eup %11777  ;;  %v4207_v18 = vadd.f32 %v13592_v22, %v4198_v59 }
0x1714   :  { %v4225_v56 = vmul.f32 %v11778_v39, %v4206_v20  ;;  %vm4230_vm10 = vweird.f32 %v11778_v39 }
0x1715   :  { %11779 = vrcp.f32 %v4207_v18  ;;  %vm4231_vm12 = vmor %vm4229_vm11, %vm4230_vm10  ;;  %v4250_v25 = vand.u32 2147483648, %v4207_v18  ;;  %v4248_v12 = vand.u32 2147483647, %v4207_v18  ;;  %vm4244_vm15 = vweird.f32 %v4207_v18 }
0x1716   :  { %v4226_v51 = vsub.f32 1.0, %v4225_v56 }
0x1717   :  { %v4251_v48 = vor.u32 1.1754944e-38, %v4250_v25  ;;  %vm4249_vm2 = vcmp.eq.f32.partialorder %v4248_v12, 8.507059e+37 }
0x1718   :  { %v4227_v31 = vmul.f32 %v11778_v39, %v4226_v51 }
0x171a   :  { %v4200_v33 = vpop.permute.xlu0 %4199  ;;  %v4228_v32 = vadd.f32 %v11778_v39, %v4227_v31 }
0x171b   :  { %v11780_v62 = vpop.eup %11779  ;;  %v4208_v27 = vadd.f32 %v13587_v1, %v4200_v33 }
0x171c   :  { %v4240_v49 = vmul.f32 %v11780_v62, %v4207_v18  ;;  %v4232_v11 = vsel %vm4231_vm12, %v11778_v39, %v4228_v32  ;;  %vm4245_vm14 = vweird.f32 %v11780_v62 }
0x171d   :  { %11781 = vrcp.f32 %v4208_v27  ;;  %v4237_v54 = vsel %vm4234_vm13, %v4236_v24, %v4232_v11  ;;  %vm4246_vm1 = vmor %vm4244_vm15, %vm4245_vm14  ;;  %v4265_v60 = vand.u32 2147483648, %v4208_v27  ;;  %v4263_v36 = vand.u32 2147483647, %v4208_v27 }
0x171e   :  { %4275 = vrot.lane.b32.xlu2 %v4237_v54, %s12078_s1  ;;  %v4241_v38 = vsub.f32 1.0, %v4240_v49  ;;  %vm4259_vm4 = vweird.f32 %v4208_v27 }
0x171f   :  { %v4266_v19 = vor.u32 1.1754944e-38, %v4265_v60  ;;  %vm4264_vm6 = vcmp.eq.f32.partialorder %v4263_v36, 8.507059e+37 }
0x1720   :  { %v4242_v57 = vmul.f32 %v11780_v62, %v4241_v38  ;;  %v11674_v38 = vld [vmem:[%s15641_s13 + $0x2] ss:$0 sm:$0xff] }
0x1722   :  { %v4243_v0 = vadd.f32 %v11780_v62, %v4242_v57 }
0x1723   :  { %v11782_v3 = vpop.eup %11781 }
0x1724   :  { %v4255_v42 = vmul.f32 %v11782_v3, %v4208_v27  ;;  %v4247_v41 = vsel %vm4246_vm1, %v11780_v62, %v4243_v0  ;;  %vm4260_vm3 = vweird.f32 %v11782_v3 }
0x1725   :  { %v4252_v9 = vsel %vm4249_vm2, %v4251_v48, %v4247_v41  ;;  %vm4261_vm5 = vmor %vm4259_vm4, %vm4260_vm3 }
0x1726   :  { %4277 = vrot.lane.b32.xlu0 %v4252_v9, %s12078_s1  ;;  %4048 = vrot.lane.b32.xlu2 %v13536_v2, %s12079_s25  ;;  %v4256_v29 = vsub.f32 1.0, %v4255_v42 }
0x1728   :  { %v4257_v14 = vmul.f32 %v11782_v3, %v4256_v29 }
0x172a   :  { %v4258_v34 = vadd.f32 %v11782_v3, %v4257_v14 }
0x172c   :  { %v4262_v10 = vsel %vm4261_vm5, %v11782_v3, %v4258_v34 }
0x172d   :  { %v4267_v58 = vsel %vm4264_vm6, %v4266_v19, %v4262_v10 }
0x172e   :  { %4050 = vrot.lane.b32.xlu0 %v13542_v6, %s12079_s25  ;;  %4046 = vrot.lane.b32.xlu2 %v13540_v63, %s12079_s25 }
0x172f   :  { %4279 = vrot.lane.b32.xlu1 %v4267_v58, %s12078_s1 }
0x1737   :  { %4044 = vrot.lane.b32.xlu1 %v13532_v47, %s12079_s25 }
0x1770   :  { %v4274_v2 = vpop.permute.xlu1 %4273 }
0x1771   :  { %v4285_v8 = vsel %vm707_vm0, %v4222_v40, %v4274_v2 }
0x1772   :  { %v4289_v16 = vmul.f32 %v13577_v4, %v4285_v8 }
0x1774   :  { %11157 = vmatmul.msk.f32.vlgmr.msrb.gmra.mxu2 %vm390_vm7, %v4289_v16 }
0x1778   :  { %v4276_v7 = vpop.permute.xlu2 %4275 }
0x1779   :  { %v4286_v53 = vsel %vm707_vm0, %v4237_v54, %v4276_v7 }
0x177a   :  { %v4290_v6 = vmul.f32 %v13582_v44, %v4286_v53 }
0x177c   :  { %11158 = vmatmul.msk.f32.gmra.mxu2 %vm390_vm7, %v4290_v6 }
0x1780   :  { %v4049_v63 = vpop.permute.xlu2 %4048 }
0x1781   :  { %4076 = vrot.lane.b32.xlu0 %v4049_v63, %s12063_s24 }
0x1788   :  { %v4047_v13 = vpop.permute.xlu2 %4046 }
0x1789   :  { %4082 = vrot.lane.b32.xlu0 %v4047_v13, %s12063_s24 }
0x1798   :  { %v4278_v47 = vpop.permute.xlu0 %4277 }
0x1799   :  { %v4287_v26 = vsel %vm707_vm0, %v4252_v9, %v4278_v47 }
0x179a   :  { %v4291_v4 = vmul.f32 %v13592_v22, %v4287_v26 }
0x179c   :  { %11159 = vmatmul.msk.f32.gmra.mxu2 %vm390_vm7, %v4291_v4 }
0x17a0   :  { %v4051_v23 = vpop.permute.xlu0 %4050 }
0x17a1   :  { %v4280_v21 = vpop.permute.xlu1 %4279  ;;  %4078 = vrot.lane.b32.xlu1 %v4051_v23, %s12063_s24 }
0x17a2   :  { %v4288_v44 = vsel %vm707_vm0, %v4267_v58, %v4280_v21 }
0x17a3   :  { %v4292_v28 = vmul.f32 %v13587_v1, %v4288_v44 }
0x17a5   :  { %11160 = vmatmul.msk.f32.gmra.mxu2 %vm390_vm7, %v4292_v28 }
0x17a9   :  { %v4045_v15 = vpop.permute.xlu1 %4044 }
0x17aa   :  { %4080 = vrot.lane.b32.xlu2 %v4045_v15, %s12063_s24 }
0x17f3   :  { %v4077_v5 = vpop.permute.xlu0 %4076 }
0x17f4   :  { %v4088_v50 = vsel %vm390_vm7, %v4045_v15, %v4077_v5  ;;  %v11171_v15 = vld [vmem:[%s15644_s16 + $0x110] sm:$0xff]  ;;  %v11172_v5 = vld [vmem:[%s15644_s16 + $0x118] sm:$0xff] }
0x17f5   :  { %4655 = vmatpush.msra.mxu2 %v11171_v15  ;;  %4684 = vmatpush.msra.mxu3 %v11172_v5 }
0x17f7   :  { %v4322_v46 = vpop.f32.mrf.mxu2 }
0x17f8   :  { %v4334_v22 = vmul.f32 %v4322_v46, %v4088_v50  ;;  %v11169_v50 = vld [vmem:[%s15644_s16 + $0x100] sm:$0xff]  ;;  %v11170_v46 = vld [vmem:[%s15644_s16 + $0x108] sm:$0xff] }
0x17f9   :  { %4597 = vmatpush.msrb.mxu0 %v11169_v50  ;;  %4626 = vmatpush.msrb.mxu1 %v11170_v46 }
0x17fa   :  { %4342 = vrot.lane.b32.xlu1 %v4334_v22, %s12076_s4 }
0x17fb   :  { %v4083_v51 = vpop.permute.xlu0 %4082 }
0x17fc   :  { %v4091_v35 = vsel %vm390_vm7, %v4051_v23, %v4083_v51 }
0x17ff   :  { %v4325_v30 = vpop.f32.mrf.mxu2 }
0x1804   :  { %v4081_v59 = vpop.permute.xlu2 %4080 }
0x1805   :  { %v4090_v39 = vsel %vm390_vm7, %v4049_v63, %v4081_v59 }
0x1813   :  { %v4079_v40 = vpop.permute.xlu1 %4078 }
0x1814   :  { %v4089_v1 = vsel %vm390_vm7, %v4047_v13, %v4079_v40 }
0x1815   :  { %v4335_v20 = vmul.f32 %v4325_v30, %v4089_v1 }
0x1817   :  { %4344 = vrot.lane.b32.xlu2 %v4335_v20, %s12076_s4 }
0x181f   :  { %v4328_v18 = vpop.f32.mrf.mxu2 }
0x1820   :  { %v4336_v56 = vmul.f32 %v4328_v18, %v4090_v39 }
0x1822   :  { %4346 = vrot.lane.b32.xlu0 %v4336_v56, %s12076_s4 }
0x1828   :  { %v4331_v31 = vpop.f32.mrf.mxu2 }
0x1829   :  { %v4337_v61 = vmul.f32 %v4331_v31, %v4091_v35 }
0x182b   :  { %4348 = vrot.lane.b32.xlu1 %v4337_v61, %s12076_s4 }
0x186c   :  { %v4343_v33 = vpop.permute.xlu1 %4342 }
0x186d   :  { %v4354_v32 = vadd.f32 %v4343_v33, %v4334_v22  ;;  %v13687_v33 = vld [vmem:[%s15642_s14 + $0x2] ss:$0 sm:$0xff] }
0x186f   :  { %11163 = vmatmul.msk.f32.vlgmr.msrb.gmra.mxu3 %vm390_vm7, %v4354_v32 }
0x1871   :  { %v4345_v62 = vpop.permute.xlu2 %4344 }
0x1872   :  { %v4355_v27 = vadd.f32 %v4345_v62, %v4335_v20 }
0x1877   :  { %11164 = vmatmul.msk.f32.gmra.mxu3 %vm390_vm7, %v4355_v27  ;;  %v13692_v27 = vld [vmem:[%s15643_s15 + $0x2] ss:$0 sm:$0xff] }
0x1894   :  { %v4347_v24 = vpop.permute.xlu0 %4346 }
0x1895   :  { %v4356_v49 = vadd.f32 %v4347_v24, %v4336_v56 }
0x1897   :  { %11165 = vmatmul.msk.f32.gmra.mxu3 %vm390_vm7, %v4356_v49 }
0x189d   :  { %v4349_v11 = vpop.permute.xlu1 %4348 }
0x189e   :  { %v4357_v54 = vadd.f32 %v4349_v11, %v4337_v61 }
0x18a0   :  { %11166 = vmatmul.msk.f32.gmra.mxu3 %vm390_vm7, %v4357_v54 }
0x18f2   :  { %v4394_v25 = vpop.f32.mrf.mxu3 }
0x18f3   :  { %v4395_v57 = vadd.f32 %v11674_v38, %v4394_v25 }
0x18f5   :  { %v4406_v12 = vadd.f32 %v4395_v57, %v13511_v17 }
0x18f7   :  { %v4414_v0 = vsel %vm390_vm7, %v4406_v12, 0.0 }
0x18f8   :  { %4415 = vadd.xlane.f32.xlu2 %v4414_v0 }
0x18fa   :  { %v4397_v3 = vpop.f32.mrf.mxu3 }
0x18fb   :  { %v4398_v48 = vadd.f32 %v11674_v38, %v4397_v3 }
0x18fd   :  { %v4407_v42 = vadd.f32 %v4398_v48, %v13515_v55 }
0x18ff   :  { %v4417_v41 = vsel %vm390_vm7, %v4407_v42, 0.0 }
0x1900   :  { %4418 = vadd.xlane.f32.xlu0 %v4417_v41 }
0x191a   :  { %v4400_v9 = vpop.f32.mrf.mxu3 }
0x191b   :  { %v4401_v29 = vadd.f32 %v11674_v38, %v4400_v9  ;;  %v11175_v9 = vld [vmem:[%s15644_s16 + $0x130] sm:$0xff] }
0x191c   :  { %4771 = vmatpush.msrb.mxu2 %v11175_v9 }
0x191d   :  { %v4408_v60 = vadd.f32 %v4401_v29, %v13520_v37  ;;  %v11176_v29 = vld [vmem:[%s15644_s16 + $0x138] sm:$0xff] }
0x191e   :  { %4800 = vmatpush.msrb.mxu3 %v11176_v29 }
0x191f   :  { %v4420_v14 = vsel %vm390_vm7, %v4408_v60, 0.0 }
0x1920   :  { %4421 = vadd.xlane.f32.xlu1 %v4420_v14  ;;  %v11174_v14 = vld [vmem:[%s15644_s16 + $0x128] sm:$0xff] }
0x1921   :  { %4742 = vmatpush.msra.mxu1 %v11174_v14 }
0x1923   :  { %v4403_v36 = vpop.f32.mrf.mxu3 }
0x1924   :  { %v4404_v34 = vadd.f32 %v11674_v38, %v4403_v36 }
0x1926   :  { %v4409_v17 = vadd.f32 %v4404_v34, %v13525_v52 }
0x1928   :  { %v4423_v19 = vsel %vm390_vm7, %v4409_v17, 0.0 }
0x1929   :  { %4424 = vadd.xlane.f32.xlu2 %v4423_v19 }
0x196b   :  { %v4416_v10 = vpop.xlane.xlu2 %4415 }
0x196c   :  { %v4426_v55 = vmul.f32 %v4416_v10, %v12588_v45 }
0x196e   :  { %v4430_v58 = vsub.f32 %v4406_v12, %v4426_v55 }
0x1970   :  { %v4434_v2 = vmul.f32 %v4430_v58, %v4430_v58 }
0x1972   :  { %v4438_v8 = vsel %vm390_vm7, %v4434_v2, 0.0  ;;  %v11180_v2 = vld [vmem:[%s15644_s16 + $0x158] sm:$0xff] }
0x1973   :  { %4439 = vadd.xlane.f32.xlu0 %v4438_v8  ;;  %v4419_v16 = vpop.xlane.xlu0 %4418 }
0x1974   :  { %v4427_v37 = vmul.f32 %v4419_v16, %v12588_v45 }
0x1976   :  { %v4431_v7 = vsub.f32 %v4407_v42, %v4427_v37 }
0x1978   :  { %v4435_v53 = vmul.f32 %v4431_v7, %v4431_v7 }
0x197a   :  { %v4441_v6 = vsel %vm390_vm7, %v4435_v53, 0.0 }
0x197b   :  { %4442 = vadd.xlane.f32.xlu1 %v4441_v6 }
0x1993   :  { %v4422_v52 = vpop.xlane.xlu1 %4421 }
0x1994   :  { %v4428_v63 = vmul.f32 %v4422_v52, %v12588_v45 }
0x1996   :  { %v13659_v13 = vsub.f32 %v4408_v60, %v4428_v63  ;;  %v11173_v60 = vld [vmem:[%s15644_s16 + $0x120] sm:$0xff] }
0x1997   :  { %4713 = vmatpush.msra.mxu0 %v11173_v60 }
0x1998   :  { %v4436_v47 = vmul.f32 %v13659_v13, %v13659_v13 }
0x199a   :  { %v4444_v26 = vsel %vm390_vm7, %v4436_v47, 0.0  ;;  %v11177_v47 = vld [vmem:[%s15644_s16 + $0x140] sm:$0xff] }
0x199b   :  { %4445 = vadd.xlane.f32.xlu2 %v4444_v26  ;;  %v11178_v26 = vld [vmem:[%s15644_s16 + $0x148] sm:$0xff] }
0x199c   :  { %v4425_v4 = vpop.xlane.xlu2 %4424 }
0x199d   :  { %v4429_v23 = vmul.f32 %v4425_v4, %v12588_v45 }
0x199f   :  { %v13665_v21 = vsub.f32 %v4409_v17, %v4429_v23 }
0x19a1   :  { %v4437_v44 = vmul.f32 %v13665_v21, %v13665_v21 }
0x19a3   :  { %v4447_v28 = vsel %vm390_vm7, %v4437_v44, 0.0 }
0x19a4   :  { %4448 = vadd.xlane.f32.xlu0 %v4447_v28 }
0x19e6   :  { %v4440_v22 = vpop.xlane.xlu0 %4439 }
0x19e7   :  { %v4450_v43 = vmul.f32 %v4440_v22, %v12588_v45  ;;  %v11184_v22 = vld [vmem:[%s15644_s16 + $0x178] sm:$0xff] }
0x19e9   :  { %v4454_v40 = vadd.f32 1e-05, %v4450_v43  ;;  %v11181_v43 = vld [vmem:[%s15644_s16 + $0x160] sm:$0xff] }
0x19eb   :  { %11783 = vrsqrt.f32 %v4454_v40  ;;  %vm4464_vm10 = vweird.f32 %v4454_v40 }
0x19ee   :  { %v4443_v30 = vpop.xlane.xlu1 %4442 }
0x19ef   :  { %v4451_v1 = vmul.f32 %v4443_v30, %v12588_v45  ;;  %v11253_v30 = vld [vmem:[%s15646_s18 + $0x110] sm:$0xff] }
0x19f1   :  { %v11784_v20 = vpop.eup %11783  ;;  %v4455_v59 = vadd.f32 1e-05, %v4451_v1  ;;  %v11251_v1 = vld [vmem:[%s15646_s18 + $0x100] sm:$0xff] }
0x19f2   :  { %v4459_v39 = vmul.f32 %v11784_v20, %v4454_v40  ;;  %vm4465_vm9 = vweird.f32 %v11784_v20  ;;  %v11182_v40 = vld [vmem:[%s15644_s16 + $0x168] sm:$0xff] }
0x19f3   :  { %11785 = vrsqrt.f32 %v4455_v59  ;;  %vm4466_vm11 = vmor %vm4464_vm10, %vm4465_vm9  ;;  %vm4474_vm13 = vweird.f32 %v4455_v59 }
0x19f4   :  { %v4460_v18 = vmul.f32 %v11784_v20, %v4459_v39  ;;  %v11257_v39 = vld [vmem:[%s15646_s18 + $0x130] sm:$0xff] }
0x19f6   :  { %v4461_v56 = vmul.f32 0.5, %v4460_v18  ;;  %v11255_v18 = vld [vmem:[%s15646_s18 + $0x120] sm:$0xff] }
0x19f8   :  { %v4462_v51 = vsub.f32 1.5, %v4461_v56  ;;  %v11258_v56 = vld [vmem:[%s15646_s18 + $0x138] sm:$0xff] }
0x19f9   :  { %v11786_v35 = vpop.eup %11785 }
0x19fa   :  { %v4463_v31 = vmul.f32 %v11784_v20, %v4462_v51  ;;  %v4469_v61 = vmul.f32 %v11786_v35, %v4455_v59  ;;  %vm4475_vm12 = vweird.f32 %v11786_v35  ;;  %v11252_v59 = vld [vmem:[%s15646_s18 + $0x108] sm:$0xff] }
0x19fb   :  { %vm4476_vm14 = vmor %vm4474_vm13, %vm4475_vm12  ;;  %v11256_v51 = vld [vmem:[%s15646_s18 + $0x128] sm:$0xff] }
0x19fc   :  { %v4467_v32 = vsel %vm4466_vm11, %v11784_v20, %v4463_v31  ;;  %v4470_v62 = vmul.f32 %v11786_v35, %v4469_v61  ;;  %v11254_v20 = vld [vmem:[%s15646_s18 + $0x118] sm:$0xff] }
0x19fd   :  { %v4498_v24 = vmul.f32 %v4467_v32, %v4430_v58  ;;  %v11179_v58 = vld [vmem:[%s15644_s16 + $0x150] sm:$0xff] }
0x19fe   :  { %v4471_v49 = vmul.f32 0.5, %v4470_v62 }
0x19ff   :  { %v4505_v11 = vmul.f32 %v13687_v33, %v4498_v24 }
0x1a00   :  { %v4472_v54 = vsub.f32 1.5, %v4471_v49 }
0x1a01   :  { %v13696_v38 = vadd.f32 %v13692_v27, %v4505_v11 }
0x1a02   :  { %v4473_v25 = vmul.f32 %v11786_v35, %v4472_v54 }
0x1a03   :  { %11187 = vmatmul.msk.f32.vlgmr.msrb.gmra.mxu0 %vm390_vm7, %v13696_v38  ;;  %11191 = vmatmul.msk.f32.vlgmr.msrb.gmra.mxu1 %vm390_vm7, %v13696_v38 }
0x1a04   :  { %v4477_v57 = vsel %vm4476_vm14, %v11786_v35, %v4473_v25  ;;  %11195 = vmatmul.msk.f32.vlgmr.msra.gmra.mxu2 %vm390_vm7, %v13696_v38  ;;  %11199 = vmatmul.msk.f32.vlgmr.msra.gmra.mxu3 %vm390_vm7, %v13696_v38  ;;  %v13897_v35 = vld [vmem:[%s15645_s17 + $0x20] sm:$0xff] }
0x1a05   :  { %v4499_v12 = vmul.f32 %v4477_v57, %v4431_v7  ;;  %4887 = vmatpush.msra.mxu2 %v11179_v58  ;;  %4916 = vmatpush.msra.mxu3 %v11180_v2  ;;  %v4539_v32 = vperm.slane %v13897_v35, 1  ;;  %v13902_v24 = vperm.slane %v13897_v35, 2  ;;  %v13905_v49 = vperm.slane %v13897_v35, 3  ;;  %v11261_v2 = vld [vmem:[%s15646_s18 + $0x150] sm:$0xff] }
0x1a06   :  { %4829 = vmatpush.msrb.mxu0 %v11177_v47  ;;  %4858 = vmatpush.msrb.mxu1 %v11178_v26  ;;  %v11260_v47 = vld [vmem:[%s15646_s18 + $0x148] sm:$0xff] }
0x1a07   :  { %v4506_v0 = vmul.f32 %v13687_v33, %v4499_v12 }
0x1a09   :  { %v13708_v3 = vadd.f32 %v13692_v27, %v4506_v0 }
0x1a0b   :  { %11188 = vmatmul.msk.f32.gmra.mxu0 %vm390_vm7, %v13708_v3  ;;  %11192 = vmatmul.msk.f32.gmra.mxu1 %vm390_vm7, %v13708_v3 }
0x1a0c   :  { %11196 = vmatmul.msk.f32.gmra.mxu2 %vm390_vm7, %v13708_v3  ;;  %11200 = vmatmul.msk.f32.gmra.mxu3 %vm390_vm7, %v13708_v3 }
0x1a0e   :  { %v4446_v48 = vpop.xlane.xlu2 %4445 }
0x1a0f   :  { %v4452_v42 = vmul.f32 %v4446_v48, %v12588_v45 }
0x1a11   :  { %v4456_v41 = vadd.f32 1e-05, %v4452_v42 }
0x1a13   :  { %11787 = vrsqrt.f32 %v4456_v41  ;;  %vm4484_vm1 = vweird.f32 %v4456_v41 }
0x1a17   :  { %v4449_v36 = vpop.xlane.xlu0 %4448 }
0x1a18   :  { %v4453_v34 = vmul.f32 %v4449_v36, %v12588_v45 }
0x1a19   :  { %v11788_v17 = vpop.eup %11787 }
0x1a1a   :  { %v4479_v19 = vmul.f32 %v11788_v17, %v4456_v41  ;;  %v4457_v10 = vadd.f32 1e-05, %v4453_v34  ;;  %vm4485_vm15 = vweird.f32 %v11788_v17 }
0x1a1b   :  { %vm4486_vm2 = vmor %vm4484_vm1, %vm4485_vm15 }
0x1a1c   :  { %v4480_v55 = vmul.f32 %v11788_v17, %v4479_v19  ;;  %11789 = vrsqrt.f32 %v4457_v10  ;;  %vm4494_vm4 = vweird.f32 %v4457_v10 }
0x1a1e   :  { %v4481_v8 = vmul.f32 0.5, %v4480_v55 }
0x1a20   :  { %v4482_v16 = vsub.f32 1.5, %v4481_v8  ;;  %v11259_v8 = vld [vmem:[%s15646_s18 + $0x140] sm:$0xff] }
0x1a22   :  { %v11790_v37 = vpop.eup %11789  ;;  %v4483_v7 = vmul.f32 %v11788_v17, %v4482_v16  ;;  %v11262_v16 = vld [vmem:[%s15646_s18 + $0x158] sm:$0xff] }
0x1a23   :  { %v4489_v53 = vmul.f32 %v11790_v37, %v4457_v10  ;;  %vm4495_vm3 = vweird.f32 %v11790_v37 }
0x1a24   :  { %v4487_v6 = vsel %vm4486_vm2, %v11788_v17, %v4483_v7  ;;  %vm4496_vm5 = vmor %vm4494_vm4, %vm4495_vm3 }
0x1a25   :  { %v4500_v52 = vmul.f32 %v4487_v6, %v13659_v13  ;;  %v4490_v63 = vmul.f32 %v11790_v37, %v4489_v53 }
0x1a27   :  { %v4507_v4 = vmul.f32 %v13687_v33, %v4500_v52  ;;  %v4491_v23 = vmul.f32 0.5, %v4490_v63 }
0x1a29   :  { %v13747_v44 = vadd.f32 %v13692_v27, %v4507_v4  ;;  %v4492_v28 = vsub.f32 1.5, %v4491_v23 }
0x1a2b   :  { %v4493_v13 = vmul.f32 %v11790_v37, %v4492_v28  ;;  %11189 = vmatmul.msk.f32.gmra.mxu0 %vm390_vm7, %v13747_v44  ;;  %11193 = vmatmul.msk.f32.gmra.mxu1 %vm390_vm7, %v13747_v44 }
0x1a2c   :  { %11197 = vmatmul.msk.f32.gmra.mxu2 %vm390_vm7, %v13747_v44  ;;  %11201 = vmatmul.msk.f32.gmra.mxu3 %vm390_vm7, %v13747_v44 }
0x1a2d   :  { %v4497_v15 = vsel %vm4496_vm5, %v11790_v37, %v4493_v13 }
0x1a2e   :  { %v4501_v5 = vmul.f32 %v4497_v15, %v13665_v21  ;;  %v11183_v21 = vld [vmem:[%s15644_s16 + $0x170] sm:$0xff] }
0x1a30   :  { %v4508_v50 = vmul.f32 %v13687_v33, %v4501_v5  ;;  %v4538_v33 = vperm.slane %v13897_v35, 0 }
0x1a32   :  { %v13760_v46 = vadd.f32 %v13692_v27, %v4508_v50 }
0x1a34   :  { %11190 = vmatmul.msk.f32.gmra.mxu0 %vm390_vm7, %v13760_v46  ;;  %11194 = vmatmul.msk.f32.gmra.mxu1 %vm390_vm7, %v13760_v46 }
0x1a35   :  { %11198 = vmatmul.msk.f32.gmra.mxu2 %vm390_vm7, %v13760_v46  ;;  %11202 = vmatmul.msk.f32.gmra.mxu3 %vm390_vm7, %v13760_v46 }
0x1a3c   :  { %11203 = vmatmul.msk.f32.vlgmr.msra.gmra.mxu0 %vm390_vm7, %v13696_v38  ;;  %11207 = vmatmul.msk.f32.vlgmr.msra.gmra.mxu1 %vm390_vm7, %v13696_v38 }
0x1a3d   :  { %11211 = vmatmul.msk.f32.vlgmr.msrb.gmra.mxu2 %vm390_vm7, %v13696_v38  ;;  %11215 = vmatmul.msk.f32.vlgmr.msrb.gmra.mxu3 %vm390_vm7, %v13696_v38 }
0x1a3e   :  { %5003 = vmatpush.msrb.mxu2 %v11183_v21  ;;  %5032 = vmatpush.msrb.mxu3 %v11184_v22 }
0x1a3f   :  { %4945 = vmatpush.msra.mxu0 %v11181_v43  ;;  %4974 = vmatpush.msra.mxu1 %v11182_v40 }
0x1a44   :  { %11204 = vmatmul.msk.f32.gmra.mxu0 %vm390_vm7, %v13708_v3  ;;  %11208 = vmatmul.msk.f32.gmra.mxu1 %vm390_vm7, %v13708_v3 }
0x1a45   :  { %11212 = vmatmul.msk.f32.gmra.mxu2 %vm390_vm7, %v13708_v3  ;;  %11216 = vmatmul.msk.f32.gmra.mxu3 %vm390_vm7, %v13708_v3 }
0x1a4c   :  { %11205 = vmatmul.msk.f32.gmra.mxu0 %vm390_vm7, %v13747_v44  ;;  %11209 = vmatmul.msk.f32.gmra.mxu1 %vm390_vm7, %v13747_v44 }
0x1a4d   :  { %11213 = vmatmul.msk.f32.gmra.mxu2 %vm390_vm7, %v13747_v44  ;;  %11217 = vmatmul.msk.f32.gmra.mxu3 %vm390_vm7, %v13747_v44 }
0x1a54   :  { %11206 = vmatmul.msk.f32.gmra.mxu0 %vm390_vm7, %v13760_v46  ;;  %11210 = vmatmul.msk.f32.gmra.mxu1 %vm390_vm7, %v13760_v46 }
0x1a55   :  { %11214 = vmatmul.msk.f32.gmra.mxu2 %vm390_vm7, %v13760_v46  ;;  %11218 = vmatmul.msk.f32.gmra.mxu3 %vm390_vm7, %v13760_v46 }
0x1a5c   :  { %11219 = vmatmul.msk.f32.vlgmr.msrb.gmra.mxu0 %vm390_vm7, %v13696_v38  ;;  %11223 = vmatmul.msk.f32.vlgmr.msrb.gmra.mxu1 %vm390_vm7, %v13696_v38 }
0x1a5d   :  { %11227 = vmatmul.msk.f32.vlgmr.msra.gmra.mxu2 %vm390_vm7, %v13696_v38  ;;  %11231 = vmatmul.msk.f32.vlgmr.msra.gmra.mxu3 %vm390_vm7, %v13696_v38 }
0x1a5e   :  { %5205 = vmatpush.xpose.msra.mxu2 %v11253_v30  ;;  %5147 = vmatpush.xpose.msrb.mxu0 %v11251_v1  ;;  %v13934_v30 = vperm.slane %v13897_v35, 4  ;;  %v13937_v1 = vperm.slane %v13897_v35, 5 }
0x1a5f   :  { %5234 = vmatpush.xpose.msra.mxu3 %v11254_v20  ;;  %5176 = vmatpush.xpose.msrb.mxu1 %v11252_v59 }
0x1a64   :  { %11220 = vmatmul.msk.f32.gmra.mxu0 %vm390_vm7, %v13708_v3  ;;  %11224 = vmatmul.msk.f32.gmra.mxu1 %vm390_vm7, %v13708_v3 }
0x1a65   :  { %11228 = vmatmul.msk.f32.gmra.mxu2 %vm390_vm7, %v13708_v3  ;;  %11232 = vmatmul.msk.f32.gmra.mxu3 %vm390_vm7, %v13708_v3 }
0x1a6c   :  { %11221 = vmatmul.msk.f32.gmra.mxu0 %vm390_vm7, %v13747_v44  ;;  %11225 = vmatmul.msk.f32.gmra.mxu1 %vm390_vm7, %v13747_v44 }
0x1a6d   :  { %11229 = vmatmul.msk.f32.gmra.mxu2 %vm390_vm7, %v13747_v44  ;;  %11233 = vmatmul.msk.f32.gmra.mxu3 %vm390_vm7, %v13747_v44 }
0x1a74   :  { %11222 = vmatmul.msk.f32.gmra.mxu0 %vm390_vm7, %v13760_v46  ;;  %11226 = vmatmul.msk.f32.gmra.mxu1 %vm390_vm7, %v13760_v46 }
0x1a75   :  { %11230 = vmatmul.msk.f32.gmra.mxu2 %vm390_vm7, %v13760_v46  ;;  %11234 = vmatmul.msk.f32.gmra.mxu3 %vm390_vm7, %v13760_v46 }
0x1a7c   :  { %11235 = vmatmul.msk.f32.vlgmr.msra.gmra.mxu0 %vm390_vm7, %v13696_v38  ;;  %11239 = vmatmul.msk.f32.vlgmr.msra.gmra.mxu1 %vm390_vm7, %v13696_v38 }
0x1a7d   :  { %11243 = vmatmul.msk.f32.vlgmr.msrb.gmra.mxu2 %vm390_vm7, %v13696_v38  ;;  %11247 = vmatmul.msk.f32.vlgmr.msrb.gmra.mxu3 %vm390_vm7, %v13696_v38 }
0x1a7e   :  { %5321 = vmatpush.xpose.msrb.mxu2 %v11257_v39  ;;  %5263 = vmatpush.xpose.msra.mxu0 %v11255_v18 }
0x1a7f   :  { %5350 = vmatpush.xpose.msrb.mxu3 %v11258_v56  ;;  %5292 = vmatpush.xpose.msra.mxu1 %v11256_v51 }
0x1a80   :  { %v4599_v31 = vpop.f32.mrf.mxu0  ;;  %v4628_v61 = vpop.f32.mrf.mxu1 }
0x1a81   :  { %v4600_v11 = vadd.f32 %v4599_v31, %v4538_v33  ;;  %v4629_v54 = vadd.f32 %v4628_v61, %v4539_v32 }
0x1a83   :  { %v5046_v12 = vmax.f32 %v4600_v11, 0.0  ;;  %v5047_v0 = vmax.f32 %v4629_v54, 0.0  ;;  %v13944_v11 = vperm.slane %v13897_v35, 6  ;;  %v13947_v54 = vperm.slane %v13897_v35, 7  ;;  %v11265_v35 = vld [vmem:[%s15646_s18 + $0x170] sm:$0xff] }
0x1a84   :  { %11236 = vmatmul.msk.f32.gmra.mxu0 %vm390_vm7, %v13708_v3  ;;  %11240 = vmatmul.msk.f32.gmra.mxu1 %vm390_vm7, %v13708_v3 }
0x1a85   :  { %11244 = vmatmul.msk.f32.gmra.mxu2 %vm390_vm7, %v13708_v3  ;;  %11248 = vmatmul.msk.f32.gmra.mxu3 %vm390_vm7, %v13708_v3 }
0x1a87   :  { %v4657_v62 = vpop.f32.mrf.mxu2  ;;  %v4686_v27 = vpop.f32.mrf.mxu3 }
0x1a88   :  { %v4658_v25 = vadd.f32 %v4657_v62, %v13902_v24  ;;  %v4687_v57 = vadd.f32 %v4686_v27, %v13905_v49  ;;  %v4602_v41 = vpop.f32.mrf.mxu0  ;;  %v4631_v9 = vpop.f32.mrf.mxu1 }
0x1a89   :  { %v4603_v14 = vadd.f32 %v4602_v41, %v4538_v33  ;;  %v4632_v36 = vadd.f32 %v4631_v9, %v4539_v32 }
0x1a8a   :  { %v5048_v48 = vmax.f32 %v4658_v25, 0.0  ;;  %v5049_v42 = vmax.f32 %v4687_v57, 0.0 }
0x1a8b   :  { %v5062_v19 = vmax.f32 %v4603_v14, 0.0  ;;  %v5063_v10 = vmax.f32 %v4632_v36, 0.0  ;;  %v11263_v14 = vld [vmem:[%s15646_s18 + $0x160] sm:$0xff]  ;;  %v11266_v36 = vld [vmem:[%s15646_s18 + $0x178] sm:$0xff] }
0x1a8c   :  { %11237 = vmatmul.msk.f32.gmra.mxu0 %vm390_vm7, %v13747_v44  ;;  %11241 = vmatmul.msk.f32.gmra.mxu1 %vm390_vm7, %v13747_v44 }
0x1a8d   :  { %11245 = vmatmul.msk.f32.gmra.mxu2 %vm390_vm7, %v13747_v44  ;;  %11249 = vmatmul.msk.f32.gmra.mxu3 %vm390_vm7, %v13747_v44 }
0x1a8f   :  { %v4660_v29 = vpop.f32.mrf.mxu2  ;;  %v4689_v60 = vpop.f32.mrf.mxu3 }
0x1a90   :  { %v4661_v34 = vadd.f32 %v4660_v29, %v13902_v24  ;;  %v4690_v17 = vadd.f32 %v4689_v60, %v13905_v49 }
0x1a92   :  { %v5064_v55 = vmax.f32 %v4661_v34, 0.0  ;;  %v5065_v58 = vmax.f32 %v4690_v17, 0.0 }
0x1a94   :  { %11238 = vmatmul.msk.f32.gmra.mxu0 %vm390_vm7, %v13760_v46  ;;  %11242 = vmatmul.msk.f32.gmra.mxu1 %vm390_vm7, %v13760_v46 }
0x1a95   :  { %11246 = vmatmul.msk.f32.gmra.mxu2 %vm390_vm7, %v13760_v46  ;;  %11250 = vmatmul.msk.f32.gmra.mxu3 %vm390_vm7, %v13760_v46 }
0x1a9c   :  { %5148 = vmatmul.f32.vlgmr.msrb.gmra.mxu0 %v5046_v12  ;;  %5177 = vmatmul.f32.vlgmr.msrb.gmra.mxu1 %v5047_v0 }
0x1a9d   :  { %5206 = vmatmul.f32.vlgmr.msra.gmra.mxu2 %v5048_v48  ;;  %5235 = vmatmul.f32.vlgmr.msra.gmra.mxu3 %v5049_v42 }
0x1a9e   :  { %5437 = vmatpush.xpose.msra.mxu2 %v11261_v2  ;;  %5379 = vmatpush.xpose.msrb.mxu0 %v11259_v8 }
0x1a9f   :  { %5466 = vmatpush.xpose.msra.mxu3 %v11262_v16  ;;  %5408 = vmatpush.xpose.msrb.mxu1 %v11260_v47 }
0x1aa4   :  { %5151 = vmatmul.f32.gmra.mxu0 %v5062_v19  ;;  %5180 = vmatmul.f32.gmra.mxu1 %v5063_v10 }
0x1aa5   :  { %5209 = vmatmul.f32.gmra.mxu2 %v5064_v55  ;;  %5238 = vmatmul.f32.gmra.mxu3 %v5065_v58 }
0x1aa8   :  { %v4605_v37 = vpop.f32.mrf.mxu0  ;;  %v4634_v7 = vpop.f32.mrf.mxu1 }
0x1aa9   :  { %v4606_v53 = vadd.f32 %v4605_v37, %v4538_v33  ;;  %v4635_v6 = vadd.f32 %v4634_v7, %v4539_v32  ;;  %v11264_v7 = vld [vmem:[%s15646_s18 + $0x168] sm:$0xff] }
0x1aab   :  { %v5078_v52 = vmax.f32 %v4606_v53, 0.0  ;;  %v5079_v63 = vmax.f32 %v4635_v6, 0.0 }
0x1aad   :  { %5154 = vmatmul.f32.gmra.mxu0 %v5078_v52  ;;  %5183 = vmatmul.f32.gmra.mxu1 %v5079_v63 }
0x1aaf   :  { %v4663_v26 = vpop.f32.mrf.mxu2  ;;  %v4692_v4 = vpop.f32.mrf.mxu3 }
0x1ab0   :  { %v4664_v23 = vadd.f32 %v4663_v26, %v13902_v24  ;;  %v4693_v28 = vadd.f32 %v4692_v4, %v13905_v49 }
0x1ab1   :  { %v4608_v13 = vpop.f32.mrf.mxu0  ;;  %v4637_v15 = vpop.f32.mrf.mxu1 }
0x1ab2   :  { %v5080_v5 = vmax.f32 %v4664_v23, 0.0  ;;  %v5081_v50 = vmax.f32 %v4693_v28, 0.0  ;;  %v4609_v21 = vadd.f32 %v4608_v13, %v4538_v33  ;;  %v4638_v22 = vadd.f32 %v4637_v15, %v4539_v32 }
0x1ab4   :  { %v5094_v43 = vmax.f32 %v4609_v21, 0.0  ;;  %v5095_v40 = vmax.f32 %v4638_v22, 0.0  ;;  %5212 = vmatmul.f32.gmra.mxu2 %v5080_v5  ;;  %5241 = vmatmul.f32.gmra.mxu3 %v5081_v50  ;;  %v13976_v50 = vld [vmem:[%s15645_s17 + $0x28] sm:$0xff] }
0x1ab6   :  { %5157 = vmatmul.f32.gmra.mxu0 %v5094_v43  ;;  %5186 = vmatmul.f32.gmra.mxu1 %v5095_v40  ;;  %v13979_v43 = vperm.slane %v13976_v50, 0  ;;  %v13982_v40 = vperm.slane %v13976_v50, 1 }
0x1ab8   :  { %v4666_v20 = vpop.f32.mrf.mxu2  ;;  %v4695_v59 = vpop.f32.mrf.mxu3 }
0x1ab9   :  { %v4667_v39 = vadd.f32 %v4666_v20, %v13902_v24  ;;  %v4696_v18 = vadd.f32 %v4695_v59, %v13905_v49  ;;  %v4715_v56 = vpop.f32.mrf.mxu0  ;;  %v4744_v51 = vpop.f32.mrf.mxu1 }
0x1aba   :  { %v4716_v31 = vadd.f32 %v4715_v56, %v13934_v30  ;;  %v4745_v61 = vadd.f32 %v4744_v51, %v13937_v1 }
0x1abb   :  { %v5096_v33 = vmax.f32 %v4667_v39, 0.0  ;;  %v5097_v32 = vmax.f32 %v4696_v18, 0.0 }
0x1abc   :  { %v5050_v62 = vmax.f32 %v4716_v31, 0.0  ;;  %v5051_v27 = vmax.f32 %v4745_v61, 0.0 }
0x1abd   :  { %5215 = vmatmul.f32.gmra.mxu2 %v5096_v33  ;;  %5244 = vmatmul.f32.gmra.mxu3 %v5097_v32 }
0x1abe   :  { %5264 = vmatmul.f32.vlgmr.msra.gmra.mxu0 %v5050_v62  ;;  %5293 = vmatmul.f32.vlgmr.msra.gmra.mxu1 %v5051_v27  ;;  %v4548_v62 = vperm.slane %v13976_v50, 2  ;;  %v4549_v27 = vperm.slane %v13976_v50, 3 }
0x1abf   :  { %5495 = vmatpush.xpose.msra.mxu0 %v11263_v14  ;;  %5524 = vmatpush.xpose.msra.mxu1 %v11264_v7 }
0x1ac0   :  { %v4773_v24 = vpop.f32.mrf.mxu2  ;;  %v4802_v49 = vpop.f32.mrf.mxu3 }
0x1ac1   :  { %v4774_v25 = vadd.f32 %v4773_v24, %v13944_v11  ;;  %v4803_v57 = vadd.f32 %v4802_v49, %v13947_v54  ;;  %v4718_v12 = vpop.f32.mrf.mxu0  ;;  %v4747_v0 = vpop.f32.mrf.mxu1 }
0x1ac2   :  { %v4719_v48 = vadd.f32 %v4718_v12, %v13934_v30  ;;  %v4748_v42 = vadd.f32 %v4747_v0, %v13937_v1  ;;  %v11901_v0 = vld [vmem:[#allocation5] sm:$0xff] }
0x1ac3   :  { %v5052_v41 = vmax.f32 %v4774_v25, 0.0  ;;  %v5053_v9 = vmax.f32 %v4803_v57, 0.0 }
0x1ac4   :  { %v5066_v29 = vmax.f32 %v4719_v48, 0.0  ;;  %v5067_v60 = vmax.f32 %v4748_v42, 0.0 }
0x1ac5   :  { %5322 = vmatmul.f32.vlgmr.msrb.gmra.mxu2 %v5052_v41  ;;  %5351 = vmatmul.f32.vlgmr.msrb.gmra.mxu3 %v5053_v9 }
0x1ac6   :  { %5267 = vmatmul.f32.gmra.mxu0 %v5066_v29  ;;  %5296 = vmatmul.f32.gmra.mxu1 %v5067_v60 }
0x1ac7   :  { %5553 = vmatpush.xpose.msrb.mxu2 %v11265_v35  ;;  %5582 = vmatpush.xpose.msrb.mxu3 %v11266_v36  ;;  %v11902_v35 = vld [vmem:[#allocation7] sm:$0xff] }
0x1ac8   :  { %v4776_v34 = vpop.f32.mrf.mxu2  ;;  %v4805_v17 = vpop.f32.mrf.mxu3 }
0x1ac9   :  { %v4777_v19 = vadd.f32 %v4776_v34, %v13944_v11  ;;  %v4806_v10 = vadd.f32 %v4805_v17, %v13947_v54  ;;  %v4721_v55 = vpop.f32.mrf.mxu0  ;;  %v4750_v58 = vpop.f32.mrf.mxu1 }
0x1aca   :  { %v4722_v2 = vadd.f32 %v4721_v55, %v13934_v30  ;;  %v4751_v8 = vadd.f32 %v4750_v58, %v13937_v1 }
0x1acb   :  { %v5068_v16 = vmax.f32 %v4777_v19, 0.0  ;;  %v5069_v37 = vmax.f32 %v4806_v10, 0.0 }
0x1acc   :  { %v5082_v53 = vmax.f32 %v4722_v2, 0.0  ;;  %v5083_v6 = vmax.f32 %v4751_v8, 0.0 }
0x1acd   :  { %5325 = vmatmul.f32.gmra.mxu2 %v5068_v16  ;;  %5354 = vmatmul.f32.gmra.mxu3 %v5069_v37 }
0x1ace   :  { %5270 = vmatmul.f32.gmra.mxu0 %v5082_v53  ;;  %5299 = vmatmul.f32.gmra.mxu1 %v5083_v6 }
0x1ad0   :  { %v4779_v52 = vpop.f32.mrf.mxu2  ;;  %v4808_v63 = vpop.f32.mrf.mxu3 }
0x1ad1   :  { %v4780_v47 = vadd.f32 %v4779_v52, %v13944_v11  ;;  %v4809_v26 = vadd.f32 %v4808_v63, %v13947_v54  ;;  %v4724_v4 = vpop.f32.mrf.mxu0  ;;  %v4753_v23 = vpop.f32.mrf.mxu1 }
0x1ad2   :  { %v4725_v28 = vadd.f32 %v4724_v4, %v13934_v30  ;;  %v4754_v13 = vadd.f32 %v4753_v23, %v13937_v1 }
0x1ad3   :  { %v5084_v15 = vmax.f32 %v4780_v47, 0.0  ;;  %v5085_v5 = vmax.f32 %v4809_v26, 0.0 }
0x1ad4   :  { %v5098_v21 = vmax.f32 %v4725_v28, 0.0  ;;  %v5099_v22 = vmax.f32 %v4754_v13, 0.0 }
0x1ad5   :  { %5328 = vmatmul.f32.gmra.mxu2 %v5084_v15  ;;  %5357 = vmatmul.f32.gmra.mxu3 %v5085_v5  ;;  %v4550_v5 = vperm.slane %v13976_v50, 4 }
0x1ad6   :  { %5273 = vmatmul.f32.gmra.mxu0 %v5098_v21  ;;  %5302 = vmatmul.f32.gmra.mxu1 %v5099_v22  ;;  %v4551_v21 = vperm.slane %v13976_v50, 5 }
0x1ad8   :  { %v4782_v30 = vpop.f32.mrf.mxu2  ;;  %v4811_v1 = vpop.f32.mrf.mxu3 }
0x1ad9   :  { %v4783_v20 = vadd.f32 %v4782_v30, %v13944_v11  ;;  %v4812_v59 = vadd.f32 %v4811_v1, %v13947_v54  ;;  %v4831_v39 = vpop.f32.mrf.mxu0  ;;  %v4860_v18 = vpop.f32.mrf.mxu1  ;;  %v11900_v11 = vld [vmem:[#allocation5 + $0x8] sm:$0xff] }
0x1ada   :  { %v4832_v56 = vadd.f32 %v4831_v39, %v13979_v43  ;;  %v4861_v51 = vadd.f32 %v4860_v18, %v13982_v40 }
0x1adb   :  { %v5100_v31 = vmax.f32 %v4783_v20, 0.0  ;;  %v5101_v61 = vmax.f32 %v4812_v59, 0.0 }
0x1adc   :  { %v5054_v33 = vmax.f32 %v4832_v56, 0.0  ;;  %v5055_v32 = vmax.f32 %v4861_v51, 0.0 }
0x1add   :  { %5331 = vmatmul.f32.gmra.mxu2 %v5100_v31  ;;  %5360 = vmatmul.f32.gmra.mxu3 %v5101_v61  ;;  %v4552_v61 = vperm.slane %v13976_v50, 6 }
0x1ade   :  { %5380 = vmatmul.f32.vlgmr.msrb.gmra.mxu0 %v5054_v33  ;;  %5409 = vmatmul.f32.vlgmr.msrb.gmra.mxu1 %v5055_v32  ;;  %v4553_v33 = vperm.slane %v13976_v50, 7 }
0x1adf   :  { %5852 = vmatpush.msrb.mxu1 %v11900_v11 }
0x1ae0   :  { %v4889_v54 = vpop.f32.mrf.mxu2  ;;  %v4918_v24 = vpop.f32.mrf.mxu3 }
0x1ae1   :  { %v4890_v49 = vadd.f32 %v4889_v54, %v4548_v62  ;;  %v4919_v25 = vadd.f32 %v4918_v24, %v4549_v27  ;;  %v4834_v57 = vpop.f32.mrf.mxu0  ;;  %v4863_v12 = vpop.f32.mrf.mxu1  ;;  %5853 = vmatpush.msrb.mxu1 %v11901_v0 }
0x1ae2   :  { %v4835_v48 = vadd.f32 %v4834_v57, %v13979_v43  ;;  %v4864_v42 = vadd.f32 %v4863_v12, %v13982_v40 }
0x1ae3   :  { %v5056_v41 = vmax.f32 %v4890_v49, 0.0  ;;  %v5057_v9 = vmax.f32 %v4919_v25, 0.0 }
0x1ae4   :  { %v5070_v29 = vmax.f32 %v4835_v48, 0.0  ;;  %v5071_v60 = vmax.f32 %v4864_v42, 0.0 }
0x1ae5   :  { %5438 = vmatmul.f32.vlgmr.msra.gmra.mxu2 %v5056_v41  ;;  %5467 = vmatmul.f32.vlgmr.msra.gmra.mxu3 %v5057_v9 }
0x1ae6   :  { %5383 = vmatmul.f32.gmra.mxu0 %v5070_v29  ;;  %5412 = vmatmul.f32.gmra.mxu1 %v5071_v60 }
0x1ae7   :  { %6054 = vmatpush.msra.mxu2 %v11902_v35 }
0x1ae8   :  { %v4892_v14 = vpop.f32.mrf.mxu2  ;;  %v4921_v36 = vpop.f32.mrf.mxu3 }
0x1ae9   :  { %v4893_v34 = vadd.f32 %v4892_v14, %v4548_v62  ;;  %v4922_v17 = vadd.f32 %v4921_v36, %v4549_v27  ;;  %v4837_v19 = vpop.f32.mrf.mxu0  ;;  %v4866_v10 = vpop.f32.mrf.mxu1 }
0x1aea   :  { %v4838_v55 = vadd.f32 %v4837_v19, %v13979_v43  ;;  %v4867_v58 = vadd.f32 %v4866_v10, %v13982_v40 }
0x1aeb   :  { %v5072_v2 = vmax.f32 %v4893_v34, 0.0  ;;  %v5073_v8 = vmax.f32 %v4922_v17, 0.0 }
0x1aec   :  { %v5086_v16 = vmax.f32 %v4838_v55, 0.0  ;;  %v5087_v37 = vmax.f32 %v4867_v58, 0.0 }
0x1aed   :  { %5441 = vmatmul.f32.gmra.mxu2 %v5072_v2  ;;  %5470 = vmatmul.f32.gmra.mxu3 %v5073_v8 }
0x1aee   :  { %5386 = vmatmul.f32.gmra.mxu0 %v5086_v16  ;;  %5415 = vmatmul.f32.gmra.mxu1 %v5087_v37 }
0x1af0   :  { %v4895_v7 = vpop.f32.mrf.mxu2  ;;  %v4924_v53 = vpop.f32.mrf.mxu3 }
0x1af1   :  { %v4896_v6 = vadd.f32 %v4895_v7, %v4548_v62  ;;  %v4925_v52 = vadd.f32 %v4924_v53, %v4549_v27  ;;  %v4840_v63 = vpop.f32.mrf.mxu0  ;;  %v4869_v47 = vpop.f32.mrf.mxu1 }
0x1af2   :  { %v4841_v26 = vadd.f32 %v4840_v63, %v13979_v43  ;;  %v4870_v4 = vadd.f32 %v4869_v47, %v13982_v40 }
0x1af3   :  { %v5088_v23 = vmax.f32 %v4896_v6, 0.0  ;;  %v5089_v28 = vmax.f32 %v4925_v52, 0.0 }
0x1af4   :  { %v5102_v13 = vmax.f32 %v4841_v26, 0.0  ;;  %v5103_v15 = vmax.f32 %v4870_v4, 0.0 }
0x1af5   :  { %5444 = vmatmul.f32.gmra.mxu2 %v5088_v23  ;;  %5473 = vmatmul.f32.gmra.mxu3 %v5089_v28 }
0x1af6   :  { %5389 = vmatmul.f32.gmra.mxu0 %v5102_v13  ;;  %5418 = vmatmul.f32.gmra.mxu1 %v5103_v15 }
0x1af8   :  { %v4898_v22 = vpop.f32.mrf.mxu2  ;;  %v4927_v30 = vpop.f32.mrf.mxu3 }
0x1af9   :  { %v4899_v1 = vadd.f32 %v4898_v22, %v4548_v62  ;;  %v4928_v20 = vadd.f32 %v4927_v30, %v4549_v27  ;;  %v4947_v59 = vpop.f32.mrf.mxu0  ;;  %v4976_v43 = vpop.f32.mrf.mxu1 }
0x1afa   :  { %v4948_v39 = vadd.f32 %v4947_v59, %v4550_v5  ;;  %v4977_v40 = vadd.f32 %v4976_v43, %v4551_v21 }
0x1afb   :  { %v5104_v18 = vmax.f32 %v4899_v1, 0.0  ;;  %v5105_v56 = vmax.f32 %v4928_v20, 0.0 }
0x1afc   :  { %v5058_v51 = vmax.f32 %v4948_v39, 0.0  ;;  %v5059_v31 = vmax.f32 %v4977_v40, 0.0 }
0x1afd   :  { %5447 = vmatmul.f32.gmra.mxu2 %v5104_v18  ;;  %5476 = vmatmul.f32.gmra.mxu3 %v5105_v56 }
0x1afe   :  { %5496 = vmatmul.f32.vlgmr.msra.gmra.mxu0 %v5058_v51  ;;  %5525 = vmatmul.f32.vlgmr.msra.gmra.mxu1 %v5059_v31 }
0x1b00   :  { %v5005_v32 = vpop.f32.mrf.mxu2  ;;  %v5034_v11 = vpop.f32.mrf.mxu3 }
0x1b01   :  { %v5006_v62 = vadd.f32 %v5005_v32, %v4552_v61  ;;  %v5035_v27 = vadd.f32 %v5034_v11, %v4553_v33  ;;  %v4950_v54 = vpop.f32.mrf.mxu0  ;;  %v4979_v24 = vpop.f32.mrf.mxu1 }
0x1b02   :  { %v4951_v49 = vadd.f32 %v4950_v54, %v4550_v5  ;;  %v4980_v25 = vadd.f32 %v4979_v24, %v4551_v21 }
0x1b03   :  { %v5060_v57 = vmax.f32 %v5006_v62, 0.0  ;;  %v5061_v12 = vmax.f32 %v5035_v27, 0.0 }
0x1b04   :  { %v5074_v0 = vmax.f32 %v4951_v49, 0.0  ;;  %v5075_v48 = vmax.f32 %v4980_v25, 0.0 }
0x1b05   :  { %5554 = vmatmul.f32.vlgmr.msrb.gmra.mxu2 %v5060_v57  ;;  %5583 = vmatmul.f32.vlgmr.msrb.gmra.mxu3 %v5061_v12 }
0x1b06   :  { %5499 = vmatmul.f32.gmra.mxu0 %v5074_v0  ;;  %5528 = vmatmul.f32.gmra.mxu1 %v5075_v48 }
0x1b08   :  { %v5008_v42 = vpop.f32.mrf.mxu2  ;;  %v5037_v50 = vpop.f32.mrf.mxu3 }
0x1b09   :  { %v5009_v41 = vadd.f32 %v5008_v42, %v4552_v61  ;;  %v5038_v9 = vadd.f32 %v5037_v50, %v4553_v33  ;;  %v4953_v29 = vpop.f32.mrf.mxu0  ;;  %v4982_v60 = vpop.f32.mrf.mxu1  ;;  %v11677_v50 = vld [vmem:[%s15647_s19 + $0x2] ss:$0 sm:$0xff] }
0x1b0a   :  { %v4954_v35 = vadd.f32 %v4953_v29, %v4550_v5  ;;  %v4983_v14 = vadd.f32 %v4982_v60, %v4551_v21 }
0x1b0b   :  { %v5076_v36 = vmax.f32 %v5009_v41, 0.0  ;;  %v5077_v34 = vmax.f32 %v5038_v9, 0.0 }
0x1b0c   :  { %v5090_v17 = vmax.f32 %v4954_v35, 0.0  ;;  %v5091_v19 = vmax.f32 %v4983_v14, 0.0 }
0x1b0d   :  { %5557 = vmatmul.f32.gmra.mxu2 %v5076_v36  ;;  %5586 = vmatmul.f32.gmra.mxu3 %v5077_v34 }
0x1b0e   :  { %5502 = vmatmul.f32.gmra.mxu0 %v5090_v17  ;;  %5531 = vmatmul.f32.gmra.mxu1 %v5091_v19 }
0x1b10   :  { %v5011_v10 = vpop.f32.mrf.mxu2  ;;  %v5040_v55 = vpop.f32.mrf.mxu3 }
0x1b11   :  { %v5012_v58 = vadd.f32 %v5011_v10, %v4552_v61  ;;  %v5041_v2 = vadd.f32 %v5040_v55, %v4553_v33  ;;  %v4956_v8 = vpop.f32.mrf.mxu0  ;;  %v4985_v16 = vpop.f32.mrf.mxu1 }
0x1b12   :  { %v4957_v37 = vadd.f32 %v4956_v8, %v4550_v5  ;;  %v4986_v7 = vadd.f32 %v4985_v16, %v4551_v21 }
0x1b13   :  { %v5092_v53 = vmax.f32 %v5012_v58, 0.0  ;;  %v5093_v6 = vmax.f32 %v5041_v2, 0.0 }
0x1b14   :  { %v5106_v52 = vmax.f32 %v4957_v37, 0.0  ;;  %v5107_v63 = vmax.f32 %v4986_v7, 0.0 }
0x1b15   :  { %5560 = vmatmul.f32.gmra.mxu2 %v5092_v53  ;;  %5589 = vmatmul.f32.gmra.mxu3 %v5093_v6 }
0x1b16   :  { %5505 = vmatmul.f32.gmra.mxu0 %v5106_v52  ;;  %5534 = vmatmul.f32.gmra.mxu1 %v5107_v63 }
0x1b18   :  { %v5014_v47 = vpop.f32.mrf.mxu2  ;;  %v5043_v26 = vpop.f32.mrf.mxu3 }
0x1b19   :  { %v5015_v4 = vadd.f32 %v5014_v47, %v4552_v61  ;;  %v5044_v23 = vadd.f32 %v5043_v26, %v4553_v33  ;;  %v5149_v28 = vpop.f32.mrf.mxu0  ;;  %v5178_v13 = vpop.f32.mrf.mxu1 }
0x1b1a   :  { %v5150_v29 = vadd.f32 %v11677_v50, %v5149_v28 }
0x1b1b   :  { %v5108_v15 = vmax.f32 %v5015_v4, 0.0  ;;  %v5109_v22 = vmax.f32 %v5044_v23, 0.0 }
0x1b1c   :  { %v5179_v14 = vadd.f32 %v5178_v13, %v5150_v29 }
0x1b1d   :  { %5563 = vmatmul.f32.gmra.mxu2 %v5108_v15  ;;  %5592 = vmatmul.f32.gmra.mxu3 %v5109_v22 }
0x1b20   :  { %v5207_v30 = vpop.f32.mrf.mxu2  ;;  %v5236_v1 = vpop.f32.mrf.mxu3 }
0x1b21   :  { %v5152_v5 = vpop.f32.mrf.mxu0  ;;  %v5181_v21 = vpop.f32.mrf.mxu1  ;;  %v5208_v17 = vadd.f32 %v5207_v30, %v5179_v14 }
0x1b22   :  { %v5153_v19 = vadd.f32 %v11677_v50, %v5152_v5 }
0x1b23   :  { %v5237_v58 = vadd.f32 %v5236_v1, %v5208_v17 }
0x1b24   :  { %v5182_v2 = vadd.f32 %v5181_v21, %v5153_v19 }
0x1b28   :  { %v5210_v43 = vpop.f32.mrf.mxu2  ;;  %v5239_v39 = vpop.f32.mrf.mxu3 }
0x1b29   :  { %v5211_v7 = vadd.f32 %v5210_v43, %v5182_v2 }
0x1b2a   :  { %v5155_v20 = vpop.f32.mrf.mxu0  ;;  %v5184_v59 = vpop.f32.mrf.mxu1 }
0x1b2b   :  { %v5156_v53 = vadd.f32 %v11677_v50, %v5155_v20  ;;  %v5240_v47 = vadd.f32 %v5239_v39, %v5211_v7 }
0x1b2d   :  { %v5185_v4 = vadd.f32 %v5184_v59, %v5156_v53 }
0x1b33   :  { %v5158_v40 = vpop.f32.mrf.mxu0  ;;  %v5187_v18 = vpop.f32.mrf.mxu1 }
0x1b34   :  { %v5159_v5 = vadd.f32 %v11677_v50, %v5158_v40 }
0x1b36   :  { %v5188_v43 = vadd.f32 %v5187_v18, %v5159_v5 }
0x1b37   :  { %v5213_v56 = vpop.f32.mrf.mxu2  ;;  %v5242_v51 = vpop.f32.mrf.mxu3 }
0x1b38   :  { %v5214_v13 = vadd.f32 %v5213_v56, %v5185_v4 }
0x1b3a   :  { %v5243_v29 = vadd.f32 %v5242_v51, %v5214_v13 }
0x1b3b   :  { %v5265_v31 = vpop.f32.mrf.mxu0  ;;  %v5294_v61 = vpop.f32.mrf.mxu1 }
0x1b3c   :  { %v5266_v8 = vadd.f32 %v5265_v31, %v5237_v58 }
0x1b3e   :  { %v5295_v6 = vadd.f32 %v5294_v61, %v5266_v8 }
0x1b40   :  { %v5216_v33 = vpop.f32.mrf.mxu2  ;;  %v14000_v32 = vpop.f32.mrf.mxu3 }
0x1b41   :  { %v5217_v19 = vadd.f32 %v5216_v33, %v5188_v43 }
0x1b43   :  { %v5268_v11 = vpop.f32.mrf.mxu0  ;;  %v5297_v62 = vpop.f32.mrf.mxu1  ;;  %v5246_v40 = vadd.f32 %v14000_v32, %v5217_v19 }
0x1b44   :  { %v5269_v23 = vadd.f32 %v5268_v11, %v5240_v47 }
0x1b46   :  { %v5298_v30 = vadd.f32 %v5297_v62, %v5269_v23 }
0x1b48   :  { %v5323_v27 = vpop.f32.mrf.mxu2  ;;  %v5352_v54 = vpop.f32.mrf.mxu3 }
0x1b49   :  { %v5324_v26 = vadd.f32 %v5323_v27, %v5295_v6 }
0x1b4b   :  { %v5271_v24 = vpop.f32.mrf.mxu0  ;;  %v5300_v49 = vpop.f32.mrf.mxu1  ;;  %v5353_v15 = vadd.f32 %v5352_v54, %v5324_v26 }
0x1b4c   :  { %v5272_v20 = vadd.f32 %v5271_v24, %v5243_v29 }
0x1b4e   :  { %v5301_v59 = vadd.f32 %v5300_v49, %v5272_v20 }
0x1b50   :  { %v5326_v25 = vpop.f32.mrf.mxu2  ;;  %v5355_v57 = vpop.f32.mrf.mxu3 }
0x1b51   :  { %v5327_v14 = vadd.f32 %v5326_v25, %v5298_v30 }
0x1b53   :  { %v5274_v12 = vpop.f32.mrf.mxu0  ;;  %v5303_v0 = vpop.f32.mrf.mxu1  ;;  %v5356_v39 = vadd.f32 %v5355_v57, %v5327_v14 }
0x1b58   :  { %v5329_v48 = vpop.f32.mrf.mxu2  ;;  %v5358_v42 = vpop.f32.mrf.mxu3 }
0x1b59   :  { %v5330_v62 = vadd.f32 %v5329_v48, %v5301_v59 }
0x1b5b   :  { %v5381_v41 = vpop.f32.mrf.mxu0  ;;  %v5410_v9 = vpop.f32.mrf.mxu1  ;;  %v5359_v18 = vadd.f32 %v5358_v42, %v5330_v62 }
0x1b5c   :  { %v5382_v1 = vadd.f32 %v5381_v41, %v5353_v15  ;;  %v5275_v41 = vadd.f32 %v5274_v12, %v5246_v40 }
0x1b5e   :  { %v5411_v61 = vadd.f32 %v5410_v9, %v5382_v1  ;;  %v5304_v9 = vadd.f32 %v5303_v0, %v5275_v41 }
0x1b60   :  { %v5332_v60 = vpop.f32.mrf.mxu2  ;;  %v14005_v35 = vpop.f32.mrf.mxu3 }
0x1b61   :  { %v5333_v49 = vadd.f32 %v5332_v60, %v5304_v9 }
0x1b63   :  { %v5384_v36 = vpop.f32.mrf.mxu0  ;;  %v5413_v34 = vpop.f32.mrf.mxu1  ;;  %v5362_v48 = vadd.f32 %v14005_v35, %v5333_v49 }
0x1b64   :  { %v5385_v11 = vadd.f32 %v5384_v36, %v5356_v39 }
0x1b66   :  { %v5414_v2 = vadd.f32 %v5413_v34, %v5385_v11 }
0x1b68   :  { %v5439_v10 = vpop.f32.mrf.mxu2  ;;  %v5468_v55 = vpop.f32.mrf.mxu3 }
0x1b69   :  { %v5440_v27 = vadd.f32 %v5439_v10, %v5411_v61 }
0x1b6b   :  { %v5387_v16 = vpop.f32.mrf.mxu0  ;;  %v5416_v37 = vpop.f32.mrf.mxu1  ;;  %v5469_v50 = vadd.f32 %v5468_v55, %v5440_v27 }
0x1b6c   :  { %v5388_v8 = vadd.f32 %v5387_v16, %v5359_v18 }
0x1b6e   :  { %v5417_v6 = vadd.f32 %v5416_v37, %v5388_v8 }
0x1b70   :  { %v5442_v52 = vpop.f32.mrf.mxu2  ;;  %v5471_v63 = vpop.f32.mrf.mxu3 }
0x1b71   :  { %v5443_v24 = vadd.f32 %v5442_v52, %v5414_v2 }
0x1b73   :  { %v5390_v28 = vpop.f32.mrf.mxu0  ;;  %v5419_v22 = vpop.f32.mrf.mxu1  ;;  %v5472_v36 = vadd.f32 %v5471_v63, %v5443_v24 }
0x1b74   :  { %v5391_v42 = vadd.f32 %v5390_v28, %v5362_v48 }
0x1b76   :  { %v5420_v4 = vadd.f32 %v5419_v22, %v5391_v42 }
0x1b78   :  { %v5445_v21 = vpop.f32.mrf.mxu2  ;;  %v5474_v31 = vpop.f32.mrf.mxu3 }
0x1b79   :  { %v5446_v12 = vadd.f32 %v5445_v21, %v5417_v6 }
0x1b7b   :  { %v5497_v17 = vpop.f32.mrf.mxu0  ;;  %v5526_v58 = vpop.f32.mrf.mxu1  ;;  %v5475_v60 = vadd.f32 %v5474_v31, %v5446_v12 }
0x1b7c   :  { %v5498_v51 = vadd.f32 %v5497_v17, %v5469_v50 }
0x1b7e   :  { %v5527_v33 = vadd.f32 %v5526_v58, %v5498_v51  ;;  %v11268_v58 = vld [vmem:[%s15638_s10 + $0x18] sm:$0xff] }
0x1b7f   :  { %5740 = vmatpush.msrb.mxu0 %v11268_v58 }
0x1b80   :  { %v5448_v56 = vpop.f32.mrf.mxu2  ;;  %v5477_v54 = vpop.f32.mrf.mxu3 }
0x1b81   :  { %v5449_v15 = vadd.f32 %v5448_v56, %v5420_v4  ;;  %v11678_v4 = vld [vmem:[#allocation8 + $0x2] ss:$0 sm:$0xff] }
0x1b83   :  { %v5500_v25 = vpop.f32.mrf.mxu0  ;;  %v5529_v53 = vpop.f32.mrf.mxu1  ;;  %v5478_v21 = vadd.f32 %v5477_v54, %v5449_v15 }
0x1b84   :  { %v5501_v47 = vadd.f32 %v5500_v25, %v5472_v36 }
0x1b86   :  { %v5530_v52 = vadd.f32 %v5529_v53, %v5501_v47 }
0x1b88   :  { %v5555_v57 = vpop.f32.mrf.mxu2  ;;  %v5584_v10 = vpop.f32.mrf.mxu3 }
0x1b89   :  { %v5556_v7 = vadd.f32 %v5555_v57, %v5527_v33 }
0x1b8b   :  { %v5585_v32 = vadd.f32 %v5584_v10, %v5556_v7  ;;  %v5503_v34 = vpop.f32.mrf.mxu0  ;;  %v5532_v13 = vpop.f32.mrf.mxu1 }
0x1b8c   :  { %v5504_v23 = vadd.f32 %v5503_v34, %v5475_v60 }
0x1b8d   :  { %v5596_v55 = vadd.f32 %v5585_v32, %v13696_v38 }
0x1b8e   :  { %v5533_v5 = vadd.f32 %v5532_v13, %v5504_v23  ;;  %v11679_v13 = vld [vmem:[#allocation10 + $0x2] ss:$0 sm:$0xff] }
0x1b8f   :  { %v5604_v0 = vsel %vm390_vm7, %v5596_v55, 0.0 }
0x1b90   :  { %v5558_v16 = vpop.f32.mrf.mxu2  ;;  %v5587_v26 = vpop.f32.mrf.mxu3  ;;  %5605 = vadd.xlane.f32.xlu1 %v5604_v0 }
0x1b91   :  { %v5559_v63 = vadd.f32 %v5558_v16, %v5530_v52 }
0x1b93   :  { %v5588_v37 = vadd.f32 %v5587_v26, %v5559_v63  ;;  %v5506_v30 = vpop.f32.mrf.mxu0  ;;  %v5535_v22 = vpop.f32.mrf.mxu1 }
0x1b94   :  { %v5507_v14 = vadd.f32 %v5506_v30, %v5478_v21 }
0x1b95   :  { %v5597_v35 = vadd.f32 %v5588_v37, %v13708_v3 }
0x1b96   :  { %v5536_v20 = vadd.f32 %v5535_v22, %v5507_v14 }
0x1b97   :  { %v5607_v38 = vsel %vm390_vm7, %v5597_v35, 0.0 }
0x1b98   :  { %v5561_v28 = vpop.f32.mrf.mxu2  ;;  %v5590_v1 = vpop.f32.mrf.mxu3  ;;  %5608 = vadd.xlane.f32.xlu2 %v5607_v38 }
0x1b99   :  { %v5562_v29 = vadd.f32 %v5561_v28, %v5533_v5 }
0x1b9b   :  { %v5591_v43 = vadd.f32 %v5590_v1, %v5562_v29 }
0x1b9d   :  { %v5598_v31 = vadd.f32 %v5591_v43, %v13747_v44 }
0x1b9f   :  { %v5610_v61 = vsel %vm390_vm7, %v5598_v31, 0.0 }
0x1ba0   :  { %v5564_v17 = vpop.f32.mrf.mxu2  ;;  %5611 = vadd.xlane.f32.xlu0 %v5610_v61  ;;  %v5593_v19 = vpop.f32.mrf.mxu3 }
0x1ba1   :  { %v5565_v3 = vadd.f32 %v5564_v17, %v5536_v20 }
0x1ba3   :  { %v5594_v39 = vadd.f32 %v5593_v19, %v5565_v3 }
0x1ba5   :  { %v5599_v27 = vadd.f32 %v5594_v39, %v13760_v46 }
0x1ba7   :  { %v5613_v59 = vsel %vm390_vm7, %v5599_v27, 0.0 }
0x1ba8   :  { %5614 = vadd.xlane.f32.xlu1 %v5613_v59 }
0x1c03   :  { %v5606_v11 = vpop.xlane.xlu1 %5605 }
0x1c04   :  { %v5616_v44 = vmul.f32 %v5606_v11, %v12588_v45 }
0x1c06   :  { %v5620_v56 = vsub.f32 %v5596_v55, %v5616_v44 }
0x1c08   :  { %v5624_v54 = vmul.f32 %v5620_v56, %v5620_v56 }
0x1c0a   :  { %v5628_v40 = vsel %vm390_vm7, %v5624_v54, 0.0 }
0x1c0b   :  { %v5609_v62 = vpop.xlane.xlu2 %5608  ;;  %5629 = vadd.xlane.f32.xlu2 %v5628_v40 }
0x1c0c   :  { %v5617_v50 = vmul.f32 %v5609_v62, %v12588_v45 }
0x1c0e   :  { %v5621_v46 = vsub.f32 %v5597_v35, %v5617_v50 }
0x1c10   :  { %v5625_v41 = vmul.f32 %v5621_v46, %v5621_v46 }
0x1c12   :  { %v5631_v2 = vsel %vm390_vm7, %v5625_v41, 0.0 }
0x1c13   :  { %v5612_v51 = vpop.xlane.xlu0 %5611  ;;  %5632 = vadd.xlane.f32.xlu0 %v5631_v2 }
0x1c14   :  { %v5618_v25 = vmul.f32 %v5612_v51, %v12588_v45 }
0x1c16   :  { %v14025_v18 = vsub.f32 %v5598_v31, %v5618_v25  ;;  %v11680_v25 = vld [vmem:[%s15639_s11 + $0x3] ss:$0 sm:$0xff] }
0x1c18   :  { %v5626_v24 = vmul.f32 %v14025_v18, %v14025_v18 }
0x1c1a   :  { %v5634_v9 = vsel %vm390_vm7, %v5626_v24, 0.0 }
0x1c1b   :  { %5635 = vadd.xlane.f32.xlu1 %v5634_v9  ;;  %v5615_v8 = vpop.xlane.xlu1 %5614 }
0x1c1c   :  { %v5619_v33 = vmul.f32 %v5615_v8, %v12588_v45 }
0x1c1e   :  { %v14031_v57 = vsub.f32 %v5599_v27, %v5619_v33 }
0x1c20   :  { %v5627_v10 = vmul.f32 %v14031_v57, %v14031_v57 }
0x1c22   :  { %v5637_v49 = vsel %vm390_vm7, %v5627_v10, 0.0 }
0x1c23   :  { %5638 = vadd.xlane.f32.xlu2 %v5637_v49 }
0x1c7e   :  { %v5630_v36 = vpop.xlane.xlu2 %5629 }
0x1c7f   :  { %v5640_v7 = vmul.f32 %v5630_v36, %v12588_v45 }
0x1c81   :  { %v5644_v53 = vadd.f32 1e-05, %v5640_v7 }
0x1c83   :  { %11791 = vrsqrt.f32 %v5644_v53  ;;  %vm5654_vm9 = vweird.f32 %v5644_v53 }
0x1c86   :  { %v5633_v6 = vpop.xlane.xlu0 %5632 }
0x1c87   :  { %v5641_v47 = vmul.f32 %v5633_v6, %v12588_v45 }
0x1c89   :  { %v11792_v32 = vpop.eup %11791  ;;  %v5645_v48 = vadd.f32 1e-05, %v5641_v47 }
0x1c8a   :  { %v5649_v12 = vmul.f32 %v11792_v32, %v5644_v53  ;;  %vm5655_vm6 = vweird.f32 %v11792_v32 }
0x1c8b   :  { %11793 = vrsqrt.f32 %v5645_v48  ;;  %vm5656_vm10 = vmor %vm5654_vm9, %vm5655_vm6  ;;  %vm5664_vm12 = vweird.f32 %v5645_v48 }
0x1c8c   :  { %v5650_v34 = vmul.f32 %v11792_v32, %v5649_v12 }
0x1c8e   :  { %v5651_v55 = vmul.f32 0.5, %v5650_v34  ;;  %v5636_v42 = vpop.xlane.xlu1 %5635 }
0x1c8f   :  { %v5642_v52 = vmul.f32 %v5636_v42, %v12588_v45 }
0x1c90   :  { %v5652_v0 = vsub.f32 1.5, %v5651_v55 }
0x1c91   :  { %v11794_v16 = vpop.eup %11793  ;;  %v5646_v26 = vadd.f32 1e-05, %v5642_v52 }
0x1c92   :  { %v5653_v60 = vmul.f32 %v11792_v32, %v5652_v0  ;;  %v5659_v63 = vmul.f32 %v11794_v16, %v5645_v48  ;;  %vm5665_vm11 = vweird.f32 %v11794_v16 }
0x1c93   :  { %11795 = vrsqrt.f32 %v5646_v26  ;;  %vm5666_vm13 = vmor %vm5664_vm12, %vm5665_vm11  ;;  %vm5674_vm15 = vweird.f32 %v5646_v26 }
0x1c94   :  { %v5657_v23 = vsel %vm5656_vm10, %v11792_v32, %v5653_v60  ;;  %v5660_v37 = vmul.f32 %v11794_v16, %v5659_v63 }
0x1c95   :  { %v5688_v15 = vmul.f32 %v5657_v23, %v5620_v56 }
0x1c96   :  { %v5661_v35 = vmul.f32 0.5, %v5660_v37  ;;  %v5639_v5 = vpop.xlane.xlu2 %5638 }
0x1c97   :  { %v5695_v30 = vmul.f32 %v11678_v4, %v5688_v15  ;;  %v5643_v38 = vmul.f32 %v5639_v5, %v12588_v45 }
0x1c98   :  { %v5662_v28 = vsub.f32 1.5, %v5661_v35 }
0x1c99   :  { %v11796_v1 = vpop.eup %11795  ;;  %v14040_v21 = vadd.f32 %v11679_v13, %v5695_v30  ;;  %v5647_v29 = vadd.f32 1e-05, %v5643_v38 }
0x1c9a   :  { %v5663_v14 = vmul.f32 %v11794_v16, %v5662_v28  ;;  %v5669_v43 = vmul.f32 %v11796_v1, %v5646_v26  ;;  %vm5675_vm14 = vweird.f32 %v11796_v1 }
0x1c9b   :  { %11797 = vrsqrt.f32 %v5647_v29  ;;  %11270 = vmatmul.msk.f32.vlgmr.msrb.gmra.mxu0 %vm390_vm7, %v14040_v21  ;;  %vm5676_vm1 = vmor %vm5674_vm15, %vm5675_vm14  ;;  %vm5684_vm3 = vweird.f32 %v5647_v29 }
0x1c9c   :  { %v5667_v31 = vsel %vm5666_vm13, %v11794_v16, %v5663_v14  ;;  %v5670_v22 = vmul.f32 %v11796_v1, %v5669_v43 }
0x1c9d   :  { %v5689_v20 = vmul.f32 %v5667_v31, %v5621_v46 }
0x1c9e   :  { %v5671_v61 = vmul.f32 0.5, %v5670_v22 }
0x1c9f   :  { %v5696_v17 = vmul.f32 %v11678_v4, %v5689_v20 }
0x1ca0   :  { %v5672_v3 = vsub.f32 1.5, %v5671_v61 }
0x1ca1   :  { %v11798_v19 = vpop.eup %11797  ;;  %v14044_v39 = vadd.f32 %v11679_v13, %v5696_v17 }
0x1ca2   :  { %v5673_v27 = vmul.f32 %v11796_v1, %v5672_v3  ;;  %v5679_v59 = vmul.f32 %v11798_v19, %v5647_v29  ;;  %vm5685_vm2 = vweird.f32 %v11798_v19 }
0x1ca3   :  { %11271 = vmatmul.msk.f32.gmra.mxu0 %vm390_vm7, %v14044_v39  ;;  %vm5686_vm4 = vmor %vm5684_vm3, %vm5685_vm2 }
0x1ca4   :  { %v5677_v11 = vsel %vm5676_vm1, %v11796_v1, %v5673_v27  ;;  %v5680_v58 = vmul.f32 %v11798_v19, %v5679_v59 }
0x1ca5   :  { %v5690_v44 = vmul.f32 %v5677_v11, %v14025_v18 }
0x1ca6   :  { %v5681_v56 = vmul.f32 0.5, %v5680_v58 }
0x1ca7   :  { %v5697_v54 = vmul.f32 %v11678_v4, %v5690_v44 }
0x1ca8   :  { %v5682_v40 = vsub.f32 1.5, %v5681_v56 }
0x1ca9   :  { %v14049_v62 = vadd.f32 %v11679_v13, %v5697_v54 }
0x1caa   :  { %v5683_v50 = vmul.f32 %v11798_v19, %v5682_v40 }
0x1cab   :  { %11272 = vmatmul.msk.f32.gmra.mxu0 %vm390_vm7, %v14049_v62 }
0x1cac   :  { %v5687_v46 = vsel %vm5686_vm4, %v11798_v19, %v5683_v50 }
0x1cad   :  { %v5691_v41 = vmul.f32 %v5687_v46, %v14031_v57 }
0x1caf   :  { %v5698_v2 = vmul.f32 %v11678_v4, %v5691_v41 }
0x1cb1   :  { %v14054_v51 = vadd.f32 %v11679_v13, %v5698_v2 }
0x1cb3   :  { %11273 = vmatmul.msk.f32.gmra.mxu0 %vm390_vm7, %v14054_v51 }
0x1d18   :  { %v5742_v18 = vpop.f32.mrf.mxu0 }
0x1d19   :  { %v14061_v24 = vadd.f32 %v11680_v25, %v5742_v18 }
0x1d1b   :  { %5758 = vrot.lane.b32.xlu2 %v14061_v24, %s12076_s4 }
0x1d20   :  { %v5745_v9 = vpop.f32.mrf.mxu0 }
0x1d21   :  { %v14069_v10 = vadd.f32 %v11680_v25, %v5745_v9 }
0x1d28   :  { %v5748_v8 = vpop.f32.mrf.mxu0 }
0x1d29   :  { %v14065_v33 = vadd.f32 %v11680_v25, %v5748_v8 }
0x1d2b   :  { %5762 = vrot.lane.b32.xlu0 %v14065_v33, %s12076_s4 }
0x1d30   :  { %v5751_v57 = vpop.f32.mrf.mxu0 }
0x1d31   :  { %v14071_v49 = vadd.f32 %v11680_v25, %v5751_v57 }
0x1d33   :  { %5764 = vrot.lane.b32.xlu1 %v14071_v49, %s12076_s4  ;;  %5760 = vrot.lane.b32.xlu0 %v14069_v10, %s12076_s4 }
0x1d75   :  { %v5759_v36 = vpop.permute.xlu2 %5758 }
0x1d76   :  { %v5776_v7 = vmul.f32 %v5759_v36, %v14065_v33  ;;  %v5770_v34 = vmul.f32 %v5759_v36, %v14061_v24 }
0x1d78   :  { %5794 = vrot.lane.b32.xlu2 %v5776_v7, %s12063_s24 }
0x1d9d   :  { %v5763_v53 = vpop.permute.xlu0 %5762 }
0x1d9e   :  { %v5774_v6 = vmul.f32 %v5763_v53, %v14061_v24  ;;  %v5772_v60 = vmul.f32 %v5763_v53, %v14065_v33 }
0x1da0   :  { %5790 = vrot.lane.b32.xlu1 %v5774_v6, %s12063_s24 }
0x1da5   :  { %v5765_v47 = vpop.permute.xlu1 %5764  ;;  %v5761_v32 = vpop.permute.xlu0 %5760 }
0x1da6   :  { %v5775_v48 = vmul.f32 %v5765_v47, %v14069_v10  ;;  %v5777_v12 = vmul.f32 %v5761_v32, %v14071_v49  ;;  %v5771_v52 = vmul.f32 %v5761_v32, %v14069_v10  ;;  %v5773_v23 = vmul.f32 %v5765_v47, %v14071_v49 }
0x1da8   :  { %5792 = vrot.lane.b32.xlu0 %v5775_v48, %s12063_s24  ;;  %5796 = vrot.lane.b32.xlu1 %v5777_v12, %s12063_s24 }
0x1dd2   :  { %v5795_v26 = vpop.permute.xlu2 %5794 }
0x1dd3   :  { %v5804_v63 = vsel %vm390_vm7, %v5772_v60, %v5795_v26 }
0x1e12   :  { %v5791_v55 = vpop.permute.xlu1 %5790 }
0x1e13   :  { %v5802_v42 = vsel %vm390_vm7, %v5770_v34, %v5791_v55 }
0x1e14   :  { %11274 = vmatmul.msk.f32.vlgmr.msrb.gmra.mxu1 %vm395_vm8, %v5802_v42 }
0x1e1a   :  { %v5793_v0 = vpop.permute.xlu0 %5792  ;;  %v5797_v4 = vpop.permute.xlu1 %5796 }
0x1e1b   :  { %v5803_v16 = vsel %vm390_vm7, %v5771_v52, %v5793_v0  ;;  %v5805_v37 = vsel %vm390_vm7, %v5773_v23, %v5797_v4 }
0x1e1c   :  { %11275 = vmatmul.msk.f32.gmra.mxu1 %vm395_vm8, %v5803_v16 }
0x1e24   :  { %11276 = vmatmul.msk.f32.gmra.mxu1 %vm395_vm8, %v5804_v63 }
0x1e2c   :  { %11277 = vmatmul.msk.f32.gmra.mxu1 %vm395_vm8, %v5805_v37 }
0x1e91   :  { %v5855_v13 = vpop.f32.mrf.mxu1 }
0x1e92   :  { %v5867_v15 = vmul.f32 0.70710677, %v5855_v13 }
0x1e94   :  { %5875 = vrot.lane.b32.xlu0 %v5867_v15, %s12077_s6 }
0x1e99   :  { %v5858_v35 = vpop.f32.mrf.mxu1 }
0x1e9a   :  { %v5868_v5 = vmul.f32 0.70710677, %v5858_v35 }
0x1e9c   :  { %5877 = vrot.lane.b32.xlu2 %v5868_v5, %s12077_s6 }
0x1ea1   :  { %v5861_v30 = vpop.f32.mrf.mxu1 }
0x1ea2   :  { %v5869_v38 = vmul.f32 0.70710677, %v5861_v30 }
0x1ea4   :  { %5879 = vrot.lane.b32.xlu1 %v5869_v38, %s12077_s6 }
0x1ea9   :  { %v5864_v28 = vpop.f32.mrf.mxu1 }
0x1eaa   :  { %v5870_v1 = vmul.f32 0.70710677, %v5864_v28 }
0x1eac   :  { %5881 = vrot.lane.b32.xlu0 %v5870_v1, %s12077_s6 }
0x1ef6   :  { %v5878_v29 = vpop.permute.xlu2 %5877 }
0x1ef7   :  { %v5888_v14 = vmax.f32 %v5868_v5, %v5878_v29 }
0x1ef9   :  { %5897 = vrot.lane.b32.xlu1 %v5888_v14, %s12078_s1 }
0x1f06   :  { %v5876_v43 = vpop.permute.xlu0 %5875 }
0x1f07   :  { %v5887_v31 = vmax.f32 %v5867_v15, %v5876_v43 }
0x1f09   :  { %5895 = vrot.lane.b32.xlu2 %v5887_v31, %s12078_s1 }
0x1f16   :  { %v5880_v22 = vpop.permute.xlu1 %5879 }
0x1f17   :  { %v5889_v20 = vmax.f32 %v5869_v38, %v5880_v22 }
0x1f19   :  { %5899 = vrot.lane.b32.xlu0 %v5889_v20, %s12078_s1 }
0x1f1e   :  { %v5882_v61 = vpop.permute.xlu0 %5881 }
0x1f1f   :  { %v5890_v17 = vmax.f32 %v5870_v1, %v5882_v61 }
0x1f21   :  { %5901 = vrot.lane.b32.xlu2 %v5890_v17, %s12078_s1 }
0x1f63   :  { %v5896_v3 = vpop.permute.xlu2 %5895 }
0x1f64   :  { %v5907_v19 = vsel %vm707_vm0, %v5887_v31, %v5896_v3 }
0x1f65   :  { %v5911_v27 = vsub.f32 %v5867_v15, %v5907_v19 }
0x1f67   :  { %v5915_v59 = vmul.f32 1.442695, %v5911_v27 }
0x1f69   :  { %11799 = vpow2.f32 %v5915_v59 }
0x1f6b   :  { %v5898_v11 = vpop.permute.xlu1 %5897 }
0x1f6c   :  { %v5908_v58 = vsel %vm707_vm0, %v5888_v14, %v5898_v11 }
0x1f6d   :  { %v5912_v44 = vsub.f32 %v5868_v5, %v5908_v58 }
0x1f6f   :  { %v14107_v56 = vpop.eup %11799  ;;  %v5917_v54 = vmul.f32 1.442695, %v5912_v44 }
0x1f70   :  { %5927 = vrot.lane.b32.xlu1 %v14107_v56, %s12077_s6 }
0x1f71   :  { %11801 = vpow2.f32 %v5917_v54 }
0x1f77   :  { %v14111_v40 = vpop.eup %11801 }
0x1f78   :  { %5929 = vrot.lane.b32.xlu0 %v14111_v40, %s12077_s6 }
0x1f7b   :  { %v5902_v50 = vpop.permute.xlu2 %5901 }
0x1f7c   :  { %v5910_v46 = vsel %vm707_vm0, %v5890_v17, %v5902_v50 }
0x1f7d   :  { %v5914_v41 = vsub.f32 %v5870_v1, %v5910_v46 }
0x1f7f   :  { %v5921_v2 = vmul.f32 1.442695, %v5914_v41 }
0x1f81   :  { %11803 = vpow2.f32 %v5921_v2 }
0x1f87   :  { %v14116_v25 = vpop.eup %11803 }
0x1f88   :  { %5933 = vrot.lane.b32.xlu1 %v14116_v25, %s12077_s6 }
0x1f8b   :  { %v5900_v18 = vpop.permute.xlu0 %5899 }
0x1f8c   :  { %v5909_v9 = vsel %vm707_vm0, %v5889_v20, %v5900_v18 }
0x1f8d   :  { %v5913_v8 = vsub.f32 %v5869_v38, %v5909_v9 }
0x1f8f   :  { %v5919_v57 = vmul.f32 1.442695, %v5913_v8 }
0x1f91   :  { %11805 = vpow2.f32 %v5919_v57 }
0x1f97   :  { %v14121_v36 = vpop.eup %11805 }
0x1f98   :  { %5931 = vrot.lane.b32.xlu2 %v14121_v36, %s12077_s6 }
0x1fe2   :  { %v5928_v7 = vpop.permute.xlu1 %5927 }
0x1fe3   :  { %v5939_v53 = vadd.f32 %v14107_v56, %v5928_v7 }
0x1fe5   :  { %11807 = vrcp.f32 %v5939_v53  ;;  %v5954_v34 = vand.u32 2147483648, %v5939_v53  ;;  %v5952_v42 = vand.u32 2147483647, %v5939_v53  ;;  %vm5948_vm6 = vweird.f32 %v5939_v53 }
0x1fe7   :  { %v5955_v60 = vor.u32 1.1754944e-38, %v5954_v34  ;;  %vm5953_vm10 = vcmp.eq.f32.partialorder %v5952_v42, 8.507059e+37  ;;  %v11282_v34 = vld [vmem:[%s15640_s12 + $0x18] sm:$0xff] }
0x1fe8   :  { %6126 = vmatpush.msra.mxu3 %v11282_v34 }
0x1fea   :  { %v5930_v6 = vpop.permute.xlu0 %5929 }
0x1feb   :  { %v11808_v47 = vpop.eup %11807  ;;  %v5940_v32 = vadd.f32 %v14111_v40, %v5930_v6 }
0x1fec   :  { %v5944_v48 = vmul.f32 %v11808_v47, %v5939_v53  ;;  %vm5949_vm5 = vweird.f32 %v11808_v47 }
0x1fed   :  { %11809 = vrcp.f32 %v5940_v32  ;;  %vm5950_vm9 = vmor %vm5948_vm6, %vm5949_vm5  ;;  %v5969_v13 = vand.u32 2147483648, %v5940_v32  ;;  %v5967_v35 = vand.u32 2147483647, %v5940_v32  ;;  %vm5963_vm12 = vweird.f32 %v5940_v32 }
0x1fee   :  { %v5945_v12 = vsub.f32 1.0, %v5944_v48 }
0x1fef   :  { %v5970_v1 = vor.u32 1.1754944e-38, %v5969_v13  ;;  %vm5968_vm14 = vcmp.eq.f32.partialorder %v5967_v35, 8.507059e+37 }
0x1ff0   :  { %v5946_v55 = vmul.f32 %v11808_v47, %v5945_v12 }
0x1ff2   :  { %v5932_v52 = vpop.permute.xlu2 %5931  ;;  %v5947_v0 = vadd.f32 %v11808_v47, %v5946_v55 }
0x1ff3   :  { %v11810_v16 = vpop.eup %11809  ;;  %v5941_v26 = vadd.f32 %v14121_v36, %v5932_v52 }
0x1ff4   :  { %v5959_v63 = vmul.f32 %v11810_v16, %v5940_v32  ;;  %v5951_v4 = vsel %vm5950_vm9, %v11808_v47, %v5947_v0  ;;  %vm5964_vm11 = vweird.f32 %v11810_v16 }
0x1ff5   :  { %11811 = vrcp.f32 %v5941_v26  ;;  %v5956_v23 = vsel %vm5953_vm10, %v5955_v60, %v5951_v4  ;;  %vm5965_vm13 = vmor %vm5963_vm12, %vm5964_vm11  ;;  %v5984_v22 = vand.u32 2147483648, %v5941_v26  ;;  %v5982_v61 = vand.u32 2147483647, %v5941_v26 }
0x1ff6   :  { %v5960_v37 = vsub.f32 1.0, %v5959_v63  ;;  %6007 = vrot.lane.b32.xlu0 %v5956_v23, %s12078_s1  ;;  %vm5978_vm1 = vweird.f32 %v5941_v26 }
0x1ff7   :  { %v5985_v19 = vor.u32 1.1754944e-38, %v5984_v22  ;;  %vm5983_vm3 = vcmp.eq.f32.partialorder %v5982_v61, 8.507059e+37 }
0x1ff8   :  { %v5961_v15 = vmul.f32 %v11810_v16, %v5960_v37 }
0x1ffa   :  { %v5934_v5 = vpop.permute.xlu1 %5933  ;;  %v5962_v30 = vadd.f32 %v11810_v16, %v5961_v15 }
0x1ffb   :  { %v11812_v38 = vpop.eup %11811  ;;  %v5942_v28 = vadd.f32 %v14116_v25, %v5934_v5 }
0x1ffc   :  { %v5974_v29 = vmul.f32 %v11812_v38, %v5941_v26  ;;  %v5966_v14 = vsel %vm5965_vm13, %v11810_v16, %v5962_v30  ;;  %vm5979_vm15 = vweird.f32 %v11812_v38 }
0x1ffd   :  { %11813 = vrcp.f32 %v5942_v28  ;;  %v5971_v43 = vsel %vm5968_vm14, %v5970_v1, %v5966_v14  ;;  %vm5980_vm2 = vmor %vm5978_vm1, %vm5979_vm15  ;;  %v5999_v44 = vand.u32 2147483648, %v5942_v28  ;;  %v5997_v50 = vand.u32 2147483647, %v5942_v28 }
0x1ffe   :  { %v5975_v31 = vsub.f32 1.0, %v5974_v29  ;;  %6009 = vrot.lane.b32.xlu2 %v5971_v43, %s12078_s1  ;;  %vm5993_vm5 = vweird.f32 %v5942_v28 }
0x1fff   :  { %v6000_v41 = vor.u32 1.1754944e-38, %v5999_v44  ;;  %vm5998_vm9 = vcmp.eq.f32.partialorder %v5997_v50, 8.507059e+37 }
0x2000   :  { %v5976_v20 = vmul.f32 %v11812_v38, %v5975_v31  ;;  %v11681_v31 = vld [vmem:[%s15641_s13 + $0x3] ss:$0 sm:$0xff] }
0x2002   :  { %v5977_v17 = vadd.f32 %v11812_v38, %v5976_v20 }
0x2003   :  { %v11814_v3 = vpop.eup %11813 }
0x2004   :  { %v5989_v27 = vmul.f32 %v11814_v3, %v5942_v28  ;;  %v5981_v59 = vsel %vm5980_vm2, %v11812_v38, %v5977_v17  ;;  %vm5994_vm4 = vweird.f32 %v11814_v3 }
0x2005   :  { %v5986_v11 = vsel %vm5983_vm3, %v5985_v19, %v5981_v59  ;;  %vm5995_vm6 = vmor %vm5993_vm5, %vm5994_vm4 }
0x2006   :  { %v5990_v58 = vsub.f32 1.0, %v5989_v27  ;;  %5782 = vrot.lane.b32.xlu2 %v14065_v33, %s12079_s25  ;;  %6011 = vrot.lane.b32.xlu1 %v5986_v11, %s12078_s1 }
0x2008   :  { %v5991_v54 = vmul.f32 %v11814_v3, %v5990_v58 }
0x200a   :  { %v5992_v46 = vadd.f32 %v11814_v3, %v5991_v54 }
0x200c   :  { %v5996_v2 = vsel %vm5995_vm6, %v11814_v3, %v5992_v46 }
0x200d   :  { %v6001_v18 = vsel %vm5998_vm9, %v6000_v41, %v5996_v2 }
0x200e   :  { %5780 = vrot.lane.b32.xlu2 %v14069_v10, %s12079_s25  ;;  %6013 = vrot.lane.b32.xlu0 %v6001_v18, %s12078_s1 }
0x200f   :  { %5784 = vrot.lane.b32.xlu1 %v14071_v49, %s12079_s25 }
0x2016   :  { %5778 = vrot.lane.b32.xlu0 %v14061_v24, %s12079_s25 }
0x2058   :  { %v6010_v33 = vpop.permute.xlu2 %6009 }
0x2059   :  { %v6020_v53 = vsel %vm707_vm0, %v5971_v43, %v6010_v33 }
0x205a   :  { %v6024_v49 = vmul.f32 %v14111_v40, %v6020_v53 }
0x2060   :  { %v5783_v9 = vpop.permute.xlu2 %5782 }
0x2061   :  { %5810 = vrot.lane.b32.xlu1 %v5783_v9, %s12063_s24 }
0x2068   :  { %v6008_v8 = vpop.permute.xlu0 %6007  ;;  %v5781_v57 = vpop.permute.xlu2 %5780 }
0x2069   :  { %v6019_v7 = vsel %vm707_vm0, %v5956_v23, %v6008_v8  ;;  %5816 = vrot.lane.b32.xlu1 %v5781_v57, %s12063_s24 }
0x206a   :  { %v6023_v10 = vmul.f32 %v14107_v56, %v6019_v7 }
0x206c   :  { %11278 = vmatmul.msk.f32.vlgmr.msra.gmra.mxu2 %vm390_vm7, %v6023_v10 }
0x2074   :  { %11279 = vmatmul.msk.f32.gmra.mxu2 %vm390_vm7, %v6024_v49 }
0x2078   :  { %v6012_v24 = vpop.permute.xlu1 %6011 }
0x2079   :  { %v6021_v6 = vsel %vm707_vm0, %v5986_v11, %v6012_v24 }
0x207a   :  { %v6025_v47 = vmul.f32 %v14121_v36, %v6021_v6 }
0x207c   :  { %11280 = vmatmul.msk.f32.gmra.mxu2 %vm390_vm7, %v6025_v47 }
0x2080   :  { %v6014_v32 = vpop.permute.xlu0 %6013 }
0x2081   :  { %v6022_v48 = vsel %vm707_vm0, %v6001_v18, %v6014_v32  ;;  %v5785_v12 = vpop.permute.xlu1 %5784  ;;  %v11293_v18 = vld [vmem:[%s15644_s16 + $0x198] sm:$0xff] }
0x2082   :  { %v6026_v56 = vmul.f32 %v14116_v25, %v6022_v48  ;;  %5812 = vrot.lane.b32.xlu0 %v5785_v12, %s12063_s24  ;;  %6418 = vmatpush.msrb.mxu3 %v11293_v18 }
0x2084   :  { %11281 = vmatmul.msk.f32.gmra.mxu2 %vm390_vm7, %v6026_v56 }
0x2088   :  { %v5779_v40 = vpop.permute.xlu0 %5778 }
0x2089   :  { %5814 = vrot.lane.b32.xlu2 %v5779_v40, %s12063_s24 }
0x20d3   :  { %v5811_v36 = vpop.permute.xlu1 %5810 }
0x20d4   :  { %v5822_v55 = vsel %vm390_vm7, %v5779_v40, %v5811_v36  ;;  %v11290_v36 = vld [vmem:[%s15644_s16 + $0x180] sm:$0xff] }
0x20d5   :  { %6331 = vmatpush.msra.mxu0 %v11290_v36 }
0x20db   :  { %v5817_v37 = vpop.permute.xlu1 %5816 }
0x20dc   :  { %v5825_v13 = vsel %vm390_vm7, %v5785_v12, %v5817_v37 }
0x20e3   :  { %v5815_v60 = vpop.permute.xlu2 %5814 }
0x20e4   :  { %v5824_v63 = vsel %vm390_vm7, %v5783_v9, %v5815_v60 }
0x20ef   :  { %v6056_v42 = vpop.f32.mrf.mxu2 }
0x20f0   :  { %v6068_v52 = vmul.f32 %v6056_v42, %v5822_v55  ;;  %v11291_v55 = vld [vmem:[%s15644_s16 + $0x188] sm:$0xff] }
0x20f1   :  { %6360 = vmatpush.msra.mxu1 %v11291_v55 }
0x20f2   :  { %6076 = vrot.lane.b32.xlu0 %v6068_v52, %s12076_s4 }
0x20f4   :  { %v5813_v25 = vpop.permute.xlu0 %5812 }
0x20f5   :  { %v5823_v0 = vsel %vm390_vm7, %v5781_v57, %v5813_v25 }
0x20f7   :  { %v6059_v16 = vpop.f32.mrf.mxu2 }
0x20f8   :  { %v6069_v26 = vmul.f32 %v6059_v16, %v5823_v0 }
0x20fa   :  { %6078 = vrot.lane.b32.xlu2 %v6069_v26, %s12076_s4 }
0x20ff   :  { %v6062_v4 = vpop.f32.mrf.mxu2 }
0x2100   :  { %v6070_v23 = vmul.f32 %v6062_v4, %v5824_v63 }
0x2102   :  { %6080 = vrot.lane.b32.xlu1 %v6070_v23, %s12076_s4 }
0x2107   :  { %v6065_v15 = vpop.f32.mrf.mxu2 }
0x2108   :  { %v6071_v35 = vmul.f32 %v6065_v15, %v5825_v13 }
0x210a   :  { %6082 = vrot.lane.b32.xlu0 %v6071_v35, %s12076_s4 }
0x2154   :  { %v6079_v38 = vpop.permute.xlu2 %6078 }
0x2155   :  { %v6089_v28 = vadd.f32 %v6079_v38, %v6069_v26  ;;  %v11297_v38 = vld [vmem:[%s15644_s16 + $0x1b8] sm:$0xff] }
0x2164   :  { %v6077_v5 = vpop.permute.xlu0 %6076 }
0x2165   :  { %v6088_v30 = vadd.f32 %v6077_v5, %v6068_v52 }
0x2167   :  { %11284 = vmatmul.msk.f32.vlgmr.msra.gmra.mxu3 %vm390_vm7, %v6088_v30  ;;  %v11296_v30 = vld [vmem:[%s15644_s16 + $0x1b0] sm:$0xff] }
0x2168   :  { %6534 = vmatpush.msra.mxu3 %v11297_v38 }
0x216f   :  { %11285 = vmatmul.msk.f32.gmra.mxu3 %vm390_vm7, %v6089_v28  ;;  %v11294_v28 = vld [vmem:[%s15644_s16 + $0x1a0] sm:$0xff] }
0x2170   :  { %6447 = vmatpush.msrb.mxu0 %v11294_v28 }
0x2174   :  { %v6081_v1 = vpop.permute.xlu1 %6080 }
0x2175   :  { %v6090_v29 = vadd.f32 %v6081_v1, %v6070_v23 }
0x2177   :  { %11286 = vmatmul.msk.f32.gmra.mxu3 %vm390_vm7, %v6090_v29 }
0x217c   :  { %v6083_v14 = vpop.permute.xlu0 %6082 }
0x217d   :  { %v6091_v43 = vadd.f32 %v6083_v14, %v6071_v35  ;;  %v11295_v14 = vld [vmem:[%s15644_s16 + $0x1a8] sm:$0xff] }
0x217e   :  { %6476 = vmatpush.msrb.mxu1 %v11295_v14 }
0x217f   :  { %11287 = vmatmul.msk.f32.gmra.mxu3 %vm390_vm7, %v6091_v43  ;;  %v14233_v43 = vld [vmem:[%s15642_s14 + $0x3] ss:$0 sm:$0xff] }
0x21ea   :  { %v6128_v22 = vpop.f32.mrf.mxu3 }
0x21eb   :  { %v6129_v20 = vadd.f32 %v11681_v31, %v6128_v22 }
0x21ed   :  { %v6140_v61 = vadd.f32 %v6129_v20, %v14040_v21  ;;  %v14238_v20 = vld [vmem:[%s15643_s15 + $0x3] ss:$0 sm:$0xff] }
0x21ef   :  { %v6148_v17 = vsel %vm390_vm7, %v6140_v61, 0.0 }
0x21f0   :  { %6149 = vadd.xlane.f32.xlu2 %v6148_v17 }
0x21f2   :  { %v6131_v3 = vpop.f32.mrf.mxu3 }
0x21f3   :  { %v6132_v19 = vadd.f32 %v11681_v31, %v6131_v3 }
0x21f5   :  { %v6141_v27 = vadd.f32 %v6132_v19, %v14044_v39  ;;  %v11292_v39 = vld [vmem:[%s15644_s16 + $0x190] sm:$0xff] }
0x21f6   :  { %6389 = vmatpush.msrb.mxu2 %v11292_v39 }
0x21f7   :  { %v6151_v59 = vsel %vm390_vm7, %v6141_v27, 0.0 }
0x21f8   :  { %6152 = vadd.xlane.f32.xlu1 %v6151_v59  ;;  %6505 = vmatpush.msra.mxu2 %v11296_v30 }
0x21fa   :  { %v6134_v11 = vpop.f32.mrf.mxu3 }
0x21fb   :  { %v6135_v58 = vadd.f32 %v11681_v31, %v6134_v11 }
0x21fd   :  { %v6142_v44 = vadd.f32 %v6135_v58, %v14049_v62 }
0x21ff   :  { %v6154_v54 = vsel %vm390_vm7, %v6142_v44, 0.0 }
0x2200   :  { %6155 = vadd.xlane.f32.xlu0 %v6154_v54 }
0x2202   :  { %v6137_v50 = vpop.f32.mrf.mxu3 }
0x2203   :  { %v6138_v46 = vadd.f32 %v11681_v31, %v6137_v50 }
0x2205   :  { %v6143_v21 = vadd.f32 %v6138_v46, %v14054_v51 }
0x2207   :  { %v6157_v41 = vsel %vm390_vm7, %v6143_v21, 0.0 }
0x2208   :  { %6158 = vadd.xlane.f32.xlu2 %v6157_v41  ;;  %v11300_v41 = vld [vmem:[%s15644_s16 + $0x1d0] sm:$0xff] }
0x2263   :  { %v6150_v2 = vpop.xlane.xlu2 %6149 }
0x2264   :  { %v6160_v62 = vmul.f32 %v6150_v2, %v12588_v45  ;;  %v11301_v2 = vld [vmem:[%s15644_s16 + $0x1d8] sm:$0xff] }
0x2266   :  { %v6164_v33 = vsub.f32 %v6140_v61, %v6160_v62 }
0x2268   :  { %v6168_v9 = vmul.f32 %v6164_v33, %v6164_v33 }
0x226a   :  { %v6172_v51 = vsel %vm390_vm7, %v6168_v9, 0.0 }
0x226b   :  { %v6153_v8 = vpop.xlane.xlu1 %6152  ;;  %6173 = vadd.xlane.f32.xlu1 %v6172_v51 }
0x226c   :  { %v6161_v57 = vmul.f32 %v6153_v8, %v12588_v45 }
0x226e   :  { %v14192_v7 = vsub.f32 %v6141_v27, %v6161_v57 }
0x2270   :  { %v6169_v10 = vmul.f32 %v14192_v7, %v14192_v7 }
0x2272   :  { %v6175_v53 = vsel %vm390_vm7, %v6169_v10, 0.0 }
0x2273   :  { %v6156_v49 = vpop.xlane.xlu0 %6155  ;;  %6176 = vadd.xlane.f32.xlu0 %v6175_v53  ;;  %v11298_v53 = vld [vmem:[%s15644_s16 + $0x1c0] sm:$0xff] }
0x2274   :  { %v6162_v24 = vmul.f32 %v6156_v49, %v12588_v45  ;;  %v11299_v49 = vld [vmem:[%s15644_s16 + $0x1c8] sm:$0xff] }
0x2276   :  { %v14198_v6 = vsub.f32 %v6142_v44, %v6162_v24 }
0x2278   :  { %v6170_v47 = vmul.f32 %v14198_v6, %v14198_v6 }
0x227a   :  { %v6178_v32 = vsel %vm390_vm7, %v6170_v47, 0.0 }
0x227b   :  { %6179 = vadd.xlane.f32.xlu2 %v6178_v32  ;;  %v6159_v48 = vpop.xlane.xlu2 %6158 }
0x227c   :  { %v6163_v12 = vmul.f32 %v6159_v48, %v12588_v45 }
0x227e   :  { %v14204_v56 = vsub.f32 %v6143_v21, %v6163_v12 }
0x2280   :  { %v6171_v40 = vmul.f32 %v14204_v56, %v14204_v56 }
0x2282   :  { %v6181_v34 = vsel %vm390_vm7, %v6171_v40, 0.0 }
0x2283   :  { %6182 = vadd.xlane.f32.xlu1 %v6181_v34 }
0x22de   :  { %v6174_v42 = vpop.xlane.xlu1 %6173 }
0x22df   :  { %v6184_v52 = vmul.f32 %v6174_v42, %v12588_v45  ;;  %v11305_v42 = vld [vmem:[%s15644_s16 + $0x1f8] sm:$0xff] }
0x22e1   :  { %v6188_v25 = vadd.f32 1e-05, %v6184_v52  ;;  %v11302_v52 = vld [vmem:[%s15644_s16 + $0x1e0] sm:$0xff] }
0x22e3   :  { %11815 = vrsqrt.f32 %v6188_v25  ;;  %vm6198_vm11 = vweird.f32 %v6188_v25 }
0x22e6   :  { %v6177_v0 = vpop.xlane.xlu0 %6176 }
0x22e7   :  { %v6185_v16 = vmul.f32 %v6177_v0, %v12588_v45  ;;  %v11374_v0 = vld [vmem:[%s15646_s18 + $0x190] sm:$0xff] }
0x22e9   :  { %v11816_v26 = vpop.eup %11815  ;;  %v6189_v60 = vadd.f32 1e-05, %v6185_v16  ;;  %v11372_v16 = vld [vmem:[%s15646_s18 + $0x180] sm:$0xff] }
0x22ea   :  { %v6193_v63 = vmul.f32 %v11816_v26, %v6188_v25  ;;  %vm6199_vm10 = vweird.f32 %v11816_v26  ;;  %v11303_v25 = vld [vmem:[%s15644_s16 + $0x1e8] sm:$0xff] }
0x22eb   :  { %11817 = vrsqrt.f32 %v6189_v60  ;;  %vm6200_vm12 = vmor %vm6198_vm11, %vm6199_vm10  ;;  %vm6208_vm14 = vweird.f32 %v6189_v60 }
0x22ec   :  { %v6194_v4 = vmul.f32 %v11816_v26, %v6193_v63  ;;  %v11378_v63 = vld [vmem:[%s15646_s18 + $0x1b0] sm:$0xff] }
0x22ee   :  { %v6195_v23 = vmul.f32 0.5, %v6194_v4  ;;  %v6180_v37 = vpop.xlane.xlu2 %6179  ;;  %v11376_v4 = vld [vmem:[%s15646_s18 + $0x1a0] sm:$0xff] }
0x22ef   :  { %v6186_v13 = vmul.f32 %v6180_v37, %v12588_v45  ;;  %v11377_v37 = vld [vmem:[%s15646_s18 + $0x1a8] sm:$0xff] }
0x22f0   :  { %v6196_v15 = vsub.f32 1.5, %v6195_v23  ;;  %v11379_v23 = vld [vmem:[%s15646_s18 + $0x1b8] sm:$0xff] }
0x22f1   :  { %v11818_v35 = vpop.eup %11817  ;;  %v6190_v5 = vadd.f32 1e-05, %v6186_v13  ;;  %v14431_v13 = vld [vmem:[%s15645_s17 + $0x30] sm:$0xff] }
0x22f2   :  { %v6197_v1 = vmul.f32 %v11816_v26, %v6196_v15  ;;  %v6203_v29 = vmul.f32 %v11818_v35, %v6189_v60  ;;  %vm6209_vm13 = vweird.f32 %v11818_v35  ;;  %v11373_v60 = vld [vmem:[%s15646_s18 + $0x188] sm:$0xff]  ;;  %v6272_v15 = vperm.slane %v14431_v13, 0 }
0x22f3   :  { %11819 = vrsqrt.f32 %v6190_v5  ;;  %vm6210_vm15 = vmor %vm6208_vm14, %vm6209_vm13  ;;  %vm6218_vm2 = vweird.f32 %v6190_v5  ;;  %v14444_v14 = vperm.slane %v14431_v13, 2 }
0x22f4   :  { %v6201_v31 = vsel %vm6200_vm12, %v11816_v26, %v6197_v1  ;;  %v6204_v22 = vmul.f32 %v11818_v35, %v6203_v29  ;;  %v11375_v26 = vld [vmem:[%s15646_s18 + $0x198] sm:$0xff] }
0x22f5   :  { %v6232_v61 = vmul.f32 %v6201_v31, %v6164_v33 }
0x22f6   :  { %v6205_v17 = vmul.f32 0.5, %v6204_v22  ;;  %v6183_v3 = vpop.xlane.xlu1 %6182 }
0x22f7   :  { %v6239_v19 = vmul.f32 %v14233_v43, %v6232_v61  ;;  %v6187_v27 = vmul.f32 %v6183_v3, %v12588_v45 }
0x22f8   :  { %v6206_v59 = vsub.f32 1.5, %v6205_v17 }
0x22f9   :  { %v11820_v11 = vpop.eup %11819  ;;  %v14243_v58 = vadd.f32 %v14238_v20, %v6239_v19  ;;  %v6191_v44 = vadd.f32 1e-05, %v6187_v27 }
0x22fa   :  { %v6207_v54 = vmul.f32 %v11818_v35, %v6206_v59  ;;  %v6213_v50 = vmul.f32 %v11820_v11, %v6190_v5  ;;  %vm6219_vm1 = vweird.f32 %v11820_v11 }
0x22fb   :  { %11821 = vrsqrt.f32 %v6191_v44  ;;  %11308 = vmatmul.msk.f32.vlgmr.msra.gmra.mxu0 %vm390_vm7, %v14243_v58  ;;  %11312 = vmatmul.msk.f32.vlgmr.msra.gmra.mxu1 %vm390_vm7, %v14243_v58  ;;  %vm6220_vm3 = vmor %vm6218_vm2, %vm6219_vm1  ;;  %vm6228_vm5 = vweird.f32 %v6191_v44 }
0x22fc   :  { %v6211_v46 = vsel %vm6210_vm15, %v11818_v35, %v6207_v54  ;;  %v6214_v21 = vmul.f32 %v11820_v11, %v6213_v50  ;;  %11316 = vmatmul.msk.f32.vlgmr.msrb.gmra.mxu2 %vm390_vm7, %v14243_v58  ;;  %11320 = vmatmul.msk.f32.vlgmr.msrb.gmra.mxu3 %vm390_vm7, %v14243_v58  ;;  %v6273_v35 = vperm.slane %v14431_v13, 1  ;;  %v11382_v50 = vld [vmem:[%s15646_s18 + $0x1d0] sm:$0xff] }
0x22fd   :  { %v6233_v39 = vmul.f32 %v6211_v46, %v14192_v7  ;;  %6621 = vmatpush.msrb.mxu2 %v11300_v41  ;;  %6650 = vmatpush.msrb.mxu3 %v11301_v2  ;;  %v11380_v46 = vld [vmem:[%s15646_s18 + $0x1c0] sm:$0xff] }
0x22fe   :  { %v6215_v18 = vmul.f32 0.5, %v6214_v21  ;;  %6563 = vmatpush.msra.mxu0 %v11298_v53  ;;  %6592 = vmatpush.msra.mxu1 %v11299_v49  ;;  %v11383_v21 = vld [vmem:[%s15646_s18 + $0x1d8] sm:$0xff] }
0x22ff   :  { %v6240_v62 = vmul.f32 %v14233_v43, %v6233_v39 }
0x2300   :  { %v6216_v33 = vsub.f32 1.5, %v6215_v18 }
0x2301   :  { %v11822_v9 = vpop.eup %11821  ;;  %v14262_v51 = vadd.f32 %v14238_v20, %v6240_v62 }
0x2302   :  { %v6217_v8 = vmul.f32 %v11820_v11, %v6216_v33  ;;  %v6223_v57 = vmul.f32 %v11822_v9, %v6191_v44  ;;  %vm6229_vm4 = vweird.f32 %v11822_v9 }
0x2303   :  { %11309 = vmatmul.msk.f32.gmra.mxu0 %vm390_vm7, %v14262_v51  ;;  %11313 = vmatmul.msk.f32.gmra.mxu1 %vm390_vm7, %v14262_v51  ;;  %vm6230_vm6 = vmor %vm6228_vm5, %vm6229_vm4 }
0x2304   :  { %v6221_v7 = vsel %vm6220_vm3, %v11820_v11, %v6217_v8  ;;  %v6224_v10 = vmul.f32 %v11822_v9, %v6223_v57  ;;  %11317 = vmatmul.msk.f32.gmra.mxu2 %vm390_vm7, %v14262_v51  ;;  %11321 = vmatmul.msk.f32.gmra.mxu3 %vm390_vm7, %v14262_v51 }
0x2305   :  { %v6234_v24 = vmul.f32 %v6221_v7, %v14198_v6 }
0x2306   :  { %v6225_v47 = vmul.f32 0.5, %v6224_v10  ;;  %v11381_v10 = vld [vmem:[%s15646_s18 + $0x1c8] sm:$0xff] }
0x2307   :  { %v6241_v32 = vmul.f32 %v14233_v43, %v6234_v24 }
0x2308   :  { %v6226_v48 = vsub.f32 1.5, %v6225_v47 }
0x2309   :  { %v14281_v12 = vadd.f32 %v14238_v20, %v6241_v32 }
0x230a   :  { %v6227_v40 = vmul.f32 %v11822_v9, %v6226_v48 }
0x230b   :  { %11310 = vmatmul.msk.f32.gmra.mxu0 %vm390_vm7, %v14281_v12  ;;  %11314 = vmatmul.msk.f32.gmra.mxu1 %vm390_vm7, %v14281_v12 }
0x230c   :  { %v6231_v6 = vsel %vm6230_vm6, %v11822_v9, %v6227_v40  ;;  %11318 = vmatmul.msk.f32.gmra.mxu2 %vm390_vm7, %v14281_v12  ;;  %11322 = vmatmul.msk.f32.gmra.mxu3 %vm390_vm7, %v14281_v12 }
0x230d   :  { %v6235_v34 = vmul.f32 %v6231_v6, %v14204_v56  ;;  %v11304_v56 = vld [vmem:[%s15644_s16 + $0x1f0] sm:$0xff] }
0x230f   :  { %v6242_v36 = vmul.f32 %v14233_v43, %v6235_v34  ;;  %v14447_v43 = vperm.slane %v14431_v13, 3 }
0x2311   :  { %v14294_v55 = vadd.f32 %v14238_v20, %v6242_v36 }
0x2313   :  { %11311 = vmatmul.msk.f32.gmra.mxu0 %vm390_vm7, %v14294_v55  ;;  %11315 = vmatmul.msk.f32.gmra.mxu1 %vm390_vm7, %v14294_v55 }
0x2314   :  { %11319 = vmatmul.msk.f32.gmra.mxu2 %vm390_vm7, %v14294_v55  ;;  %11323 = vmatmul.msk.f32.gmra.mxu3 %vm390_vm7, %v14294_v55 }
0x231b   :  { %11324 = vmatmul.msk.f32.vlgmr.msrb.gmra.mxu0 %vm390_vm7, %v14243_v58  ;;  %11328 = vmatmul.msk.f32.vlgmr.msrb.gmra.mxu1 %vm390_vm7, %v14243_v58 }
0x231c   :  { %11332 = vmatmul.msk.f32.vlgmr.msra.gmra.mxu2 %vm390_vm7, %v14243_v58  ;;  %11336 = vmatmul.msk.f32.vlgmr.msra.gmra.mxu3 %vm390_vm7, %v14243_v58 }
0x231d   :  { %6737 = vmatpush.msra.mxu2 %v11304_v56  ;;  %6766 = vmatpush.msra.mxu3 %v11305_v42 }
0x231e   :  { %6679 = vmatpush.msrb.mxu0 %v11302_v52  ;;  %6708 = vmatpush.msrb.mxu1 %v11303_v25 }
0x2323   :  { %11325 = vmatmul.msk.f32.gmra.mxu0 %vm390_vm7, %v14262_v51  ;;  %11329 = vmatmul.msk.f32.gmra.mxu1 %vm390_vm7, %v14262_v51 }
0x2324   :  { %11333 = vmatmul.msk.f32.gmra.mxu2 %vm390_vm7, %v14262_v51  ;;  %11337 = vmatmul.msk.f32.gmra.mxu3 %vm390_vm7, %v14262_v51 }
0x232b   :  { %11326 = vmatmul.msk.f32.gmra.mxu0 %vm390_vm7, %v14281_v12  ;;  %11330 = vmatmul.msk.f32.gmra.mxu1 %vm390_vm7, %v14281_v12 }
0x232c   :  { %11334 = vmatmul.msk.f32.gmra.mxu2 %vm390_vm7, %v14281_v12  ;;  %11338 = vmatmul.msk.f32.gmra.mxu3 %vm390_vm7, %v14281_v12 }
0x2333   :  { %11327 = vmatmul.msk.f32.gmra.mxu0 %vm390_vm7, %v14294_v55  ;;  %11331 = vmatmul.msk.f32.gmra.mxu1 %vm390_vm7, %v14294_v55 }
0x2334   :  { %11335 = vmatmul.msk.f32.gmra.mxu2 %vm390_vm7, %v14294_v55  ;;  %11339 = vmatmul.msk.f32.gmra.mxu3 %vm390_vm7, %v14294_v55 }
0x233b   :  { %11340 = vmatmul.msk.f32.vlgmr.msra.gmra.mxu0 %vm390_vm7, %v14243_v58  ;;  %11344 = vmatmul.msk.f32.vlgmr.msra.gmra.mxu1 %vm390_vm7, %v14243_v58 }
0x233c   :  { %11348 = vmatmul.msk.f32.vlgmr.msrb.gmra.mxu2 %vm390_vm7, %v14243_v58  ;;  %11352 = vmatmul.msk.f32.vlgmr.msrb.gmra.mxu3 %vm390_vm7, %v14243_v58 }
0x233d   :  { %6939 = vmatpush.xpose.msrb.mxu2 %v11374_v0  ;;  %6881 = vmatpush.xpose.msra.mxu0 %v11372_v16  ;;  %v14468_v0 = vperm.slane %v14431_v13, 4  ;;  %v14471_v16 = vperm.slane %v14431_v13, 5 }
0x233e   :  { %6968 = vmatpush.xpose.msrb.mxu3 %v11375_v26  ;;  %6910 = vmatpush.xpose.msra.mxu1 %v11373_v60 }
0x2343   :  { %11341 = vmatmul.msk.f32.gmra.mxu0 %vm390_vm7, %v14262_v51  ;;  %11345 = vmatmul.msk.f32.gmra.mxu1 %vm390_vm7, %v14262_v51 }
0x2344   :  { %11349 = vmatmul.msk.f32.gmra.mxu2 %vm390_vm7, %v14262_v51  ;;  %11353 = vmatmul.msk.f32.gmra.mxu3 %vm390_vm7, %v14262_v51 }
0x234b   :  { %11342 = vmatmul.msk.f32.gmra.mxu0 %vm390_vm7, %v14281_v12  ;;  %11346 = vmatmul.msk.f32.gmra.mxu1 %vm390_vm7, %v14281_v12 }
0x234c   :  { %11350 = vmatmul.msk.f32.gmra.mxu2 %vm390_vm7, %v14281_v12  ;;  %11354 = vmatmul.msk.f32.gmra.mxu3 %vm390_vm7, %v14281_v12 }
0x2353   :  { %11343 = vmatmul.msk.f32.gmra.mxu0 %vm390_vm7, %v14294_v55  ;;  %11347 = vmatmul.msk.f32.gmra.mxu1 %vm390_vm7, %v14294_v55 }
0x2354   :  { %11351 = vmatmul.msk.f32.gmra.mxu2 %vm390_vm7, %v14294_v55  ;;  %11355 = vmatmul.msk.f32.gmra.mxu3 %vm390_vm7, %v14294_v55 }
0x235b   :  { %11356 = vmatmul.msk.f32.vlgmr.msrb.gmra.mxu0 %vm390_vm7, %v14243_v58  ;;  %11360 = vmatmul.msk.f32.vlgmr.msrb.gmra.mxu1 %vm390_vm7, %v14243_v58 }
0x235c   :  { %11364 = vmatmul.msk.f32.vlgmr.msra.gmra.mxu2 %vm390_vm7, %v14243_v58  ;;  %11368 = vmatmul.msk.f32.vlgmr.msra.gmra.mxu3 %vm390_vm7, %v14243_v58 }
0x235d   :  { %7055 = vmatpush.xpose.msra.mxu2 %v11378_v63  ;;  %6997 = vmatpush.xpose.msrb.mxu0 %v11376_v4 }
0x235e   :  { %7084 = vmatpush.xpose.msra.mxu3 %v11379_v23  ;;  %7026 = vmatpush.xpose.msrb.mxu1 %v11377_v37 }
0x2363   :  { %11357 = vmatmul.msk.f32.gmra.mxu0 %vm390_vm7, %v14262_v51  ;;  %11361 = vmatmul.msk.f32.gmra.mxu1 %vm390_vm7, %v14262_v51 }
0x2364   :  { %11365 = vmatmul.msk.f32.gmra.mxu2 %vm390_vm7, %v14262_v51  ;;  %11369 = vmatmul.msk.f32.gmra.mxu3 %vm390_vm7, %v14262_v51 }
0x236b   :  { %11358 = vmatmul.msk.f32.gmra.mxu0 %vm390_vm7, %v14281_v12  ;;  %11362 = vmatmul.msk.f32.gmra.mxu1 %vm390_vm7, %v14281_v12 }
0x236c   :  { %11366 = vmatmul.msk.f32.gmra.mxu2 %vm390_vm7, %v14281_v12  ;;  %11370 = vmatmul.msk.f32.gmra.mxu3 %vm390_vm7, %v14281_v12 }
0x2373   :  { %11359 = vmatmul.msk.f32.gmra.mxu0 %vm390_vm7, %v14294_v55  ;;  %11363 = vmatmul.msk.f32.gmra.mxu1 %vm390_vm7, %v14294_v55 }
0x2374   :  { %11367 = vmatmul.msk.f32.gmra.mxu2 %vm390_vm7, %v14294_v55  ;;  %11371 = vmatmul.msk.f32.gmra.mxu3 %vm390_vm7, %v14294_v55 }
0x2378   :  { %v6333_v5 = vpop.f32.mrf.mxu0  ;;  %v6362_v30 = vpop.f32.mrf.mxu1 }
0x2379   :  { %v6334_v38 = vadd.f32 %v6333_v5, %v6272_v15  ;;  %v6363_v28 = vadd.f32 %v6362_v30, %v6273_v35 }
0x237b   :  { %v6780_v1 = vmax.f32 %v6334_v38, 0.0  ;;  %v6781_v29 = vmax.f32 %v6363_v28, 0.0 }
0x237d   :  { %6882 = vmatmul.f32.vlgmr.msra.gmra.mxu0 %v6780_v1  ;;  %6911 = vmatmul.f32.vlgmr.msra.gmra.mxu1 %v6781_v29  ;;  %v14478_v1 = vperm.slane %v14431_v13, 6  ;;  %v14481_v29 = vperm.slane %v14431_v13, 7  ;;  %v11386_v13 = vld [vmem:[%s15646_s18 + $0x1f0] sm:$0xff] }
0x237e   :  { %7113 = vmatpush.xpose.msra.mxu0 %v11380_v46  ;;  %7142 = vmatpush.xpose.msra.mxu1 %v11381_v10 }
0x237f   :  { %v6391_v31 = vpop.f32.mrf.mxu2  ;;  %v6420_v22 = vpop.f32.mrf.mxu3 }
0x2380   :  { %v6392_v20 = vadd.f32 %v6391_v31, %v14444_v14  ;;  %v6421_v61 = vadd.f32 %v6420_v22, %v14447_v43  ;;  %v6336_v17 = vpop.f32.mrf.mxu0  ;;  %v6365_v3 = vpop.f32.mrf.mxu1 }
0x2381   :  { %v6337_v19 = vadd.f32 %v6336_v17, %v6272_v15  ;;  %v6366_v27 = vadd.f32 %v6365_v3, %v6273_v35 }
0x2382   :  { %v6782_v59 = vmax.f32 %v6392_v20, 0.0  ;;  %v6783_v11 = vmax.f32 %v6421_v61, 0.0 }
0x2383   :  { %v6796_v44 = vmax.f32 %v6337_v19, 0.0  ;;  %v6797_v54 = vmax.f32 %v6366_v27, 0.0 }
0x2384   :  { %6940 = vmatmul.f32.vlgmr.msrb.gmra.mxu2 %v6782_v59  ;;  %6969 = vmatmul.f32.vlgmr.msrb.gmra.mxu3 %v6783_v11 }
0x2385   :  { %6885 = vmatmul.f32.gmra.mxu0 %v6796_v44  ;;  %6914 = vmatmul.f32.gmra.mxu1 %v6797_v54  ;;  %v11384_v44 = vld [vmem:[%s15646_s18 + $0x1e0] sm:$0xff]  ;;  %v11387_v54 = vld [vmem:[%s15646_s18 + $0x1f8] sm:$0xff] }
0x2386   :  { %7171 = vmatpush.xpose.msrb.mxu2 %v11382_v50  ;;  %7200 = vmatpush.xpose.msrb.mxu3 %v11383_v21 }
0x2387   :  { %v6394_v41 = vpop.f32.mrf.mxu2  ;;  %v6423_v2 = vpop.f32.mrf.mxu3 }
0x2388   :  { %v6395_v39 = vadd.f32 %v6394_v41, %v14444_v14  ;;  %v6424_v18 = vadd.f32 %v6423_v2, %v14447_v43  ;;  %v6339_v62 = vpop.f32.mrf.mxu0  ;;  %v6368_v33 = vpop.f32.mrf.mxu1 }
0x2389   :  { %v6340_v9 = vadd.f32 %v6339_v62, %v6272_v15  ;;  %v6369_v8 = vadd.f32 %v6368_v33, %v6273_v35 }
0x238a   :  { %v6798_v57 = vmax.f32 %v6395_v39, 0.0  ;;  %v6799_v7 = vmax.f32 %v6424_v18, 0.0 }
0x238b   :  { %v6812_v53 = vmax.f32 %v6340_v9, 0.0  ;;  %v6813_v49 = vmax.f32 %v6369_v8, 0.0  ;;  %v11385_v8 = vld [vmem:[%s15646_s18 + $0x1e8] sm:$0xff] }
0x238c   :  { %6943 = vmatmul.f32.gmra.mxu2 %v6798_v57  ;;  %6972 = vmatmul.f32.gmra.mxu3 %v6799_v7 }
0x238d   :  { %6888 = vmatmul.f32.gmra.mxu0 %v6812_v53  ;;  %6917 = vmatmul.f32.gmra.mxu1 %v6813_v49 }
0x238f   :  { %v6397_v24 = vpop.f32.mrf.mxu2  ;;  %v6426_v47 = vpop.f32.mrf.mxu3 }
0x2390   :  { %v6398_v32 = vadd.f32 %v6397_v24, %v14444_v14  ;;  %v6427_v48 = vadd.f32 %v6426_v47, %v14447_v43  ;;  %v6342_v40 = vpop.f32.mrf.mxu0  ;;  %v6371_v6 = vpop.f32.mrf.mxu1 }
0x2391   :  { %v6343_v34 = vadd.f32 %v6342_v40, %v6272_v15  ;;  %v6372_v36 = vadd.f32 %v6371_v6, %v6273_v35 }
0x2392   :  { %v6814_v56 = vmax.f32 %v6398_v32, 0.0  ;;  %v6815_v42 = vmax.f32 %v6427_v48, 0.0 }
0x2393   :  { %v6828_v52 = vmax.f32 %v6343_v34, 0.0  ;;  %v6829_v25 = vmax.f32 %v6372_v36, 0.0  ;;  %v14510_v36 = vld [vmem:[%s15645_s17 + $0x38] sm:$0xff] }
0x2394   :  { %6946 = vmatmul.f32.gmra.mxu2 %v6814_v56  ;;  %6975 = vmatmul.f32.gmra.mxu3 %v6815_v42 }
0x2395   :  { %6891 = vmatmul.f32.gmra.mxu0 %v6828_v52  ;;  %6920 = vmatmul.f32.gmra.mxu1 %v6829_v25  ;;  %v14513_v52 = vperm.slane %v14510_v36, 0  ;;  %v14516_v25 = vperm.slane %v14510_v36, 1 }
0x2397   :  { %v6400_v26 = vpop.f32.mrf.mxu2  ;;  %v6429_v60 = vpop.f32.mrf.mxu3 }
0x2398   :  { %v6401_v63 = vadd.f32 %v6400_v26, %v14444_v14  ;;  %v6430_v4 = vadd.f32 %v6429_v60, %v14447_v43  ;;  %v6449_v23 = vpop.f32.mrf.mxu0  ;;  %v6478_v37 = vpop.f32.mrf.mxu1 }
0x2399   :  { %v6450_v15 = vadd.f32 %v6449_v23, %v14468_v0  ;;  %v6479_v35 = vadd.f32 %v6478_v37, %v14471_v16 }
0x239a   :  { %v6830_v5 = vmax.f32 %v6401_v63, 0.0  ;;  %v6831_v30 = vmax.f32 %v6430_v4, 0.0 }
0x239b   :  { %v6784_v38 = vmax.f32 %v6450_v15, 0.0  ;;  %v6785_v28 = vmax.f32 %v6479_v35, 0.0 }
0x239c   :  { %6949 = vmatmul.f32.gmra.mxu2 %v6830_v5  ;;  %6978 = vmatmul.f32.gmra.mxu3 %v6831_v30 }
0x239d   :  { %6998 = vmatmul.f32.vlgmr.msrb.gmra.mxu0 %v6784_v38  ;;  %7027 = vmatmul.f32.vlgmr.msrb.gmra.mxu1 %v6785_v28  ;;  %v6282_v38 = vperm.slane %v14510_v36, 2  ;;  %v6283_v28 = vperm.slane %v14510_v36, 3 }
0x239e   :  { %7229 = vmatpush.xpose.msrb.mxu0 %v11384_v44  ;;  %7258 = vmatpush.xpose.msrb.mxu1 %v11385_v8 }
0x239f   :  { %v6507_v14 = vpop.f32.mrf.mxu2  ;;  %v6536_v43 = vpop.f32.mrf.mxu3 }
0x23a0   :  { %v6508_v31 = vadd.f32 %v6507_v14, %v14478_v1  ;;  %v6537_v22 = vadd.f32 %v6536_v43, %v14481_v29  ;;  %v6452_v20 = vpop.f32.mrf.mxu0  ;;  %v6481_v61 = vpop.f32.mrf.mxu1 }
0x23a1   :  { %v6453_v17 = vadd.f32 %v6452_v20, %v14468_v0  ;;  %v6482_v3 = vadd.f32 %v6481_v61, %v14471_v16  ;;  %v11904_v61 = vld [vmem:[#allocation5] sm:$0xff] }
0x23a2   :  { %v6786_v19 = vmax.f32 %v6508_v31, 0.0  ;;  %v6787_v27 = vmax.f32 %v6537_v22, 0.0 }
0x23a3   :  { %v6800_v59 = vmax.f32 %v6453_v17, 0.0  ;;  %v6801_v11 = vmax.f32 %v6482_v3, 0.0 }
0x23a4   :  { %7056 = vmatmul.f32.vlgmr.msra.gmra.mxu2 %v6786_v19  ;;  %7085 = vmatmul.f32.vlgmr.msra.gmra.mxu3 %v6787_v27 }
0x23a5   :  { %7001 = vmatmul.f32.gmra.mxu0 %v6800_v59  ;;  %7030 = vmatmul.f32.gmra.mxu1 %v6801_v11 }
0x23a6   :  { %7287 = vmatpush.xpose.msra.mxu2 %v11386_v13  ;;  %7316 = vmatpush.xpose.msra.mxu3 %v11387_v54  ;;  %v11905_v13 = vld [vmem:[#allocation7] sm:$0xff] }
0x23a7   :  { %v6510_v50 = vpop.f32.mrf.mxu2  ;;  %v6539_v46 = vpop.f32.mrf.mxu3 }
0x23a8   :  { %v6511_v21 = vadd.f32 %v6510_v50, %v14478_v1  ;;  %v6540_v41 = vadd.f32 %v6539_v46, %v14481_v29  ;;  %v6455_v2 = vpop.f32.mrf.mxu0  ;;  %v6484_v39 = vpop.f32.mrf.mxu1 }
0x23a9   :  { %v6456_v18 = vadd.f32 %v6455_v2, %v14468_v0  ;;  %v6485_v62 = vadd.f32 %v6484_v39, %v14471_v16 }
0x23aa   :  { %v6802_v33 = vmax.f32 %v6511_v21, 0.0  ;;  %v6803_v9 = vmax.f32 %v6540_v41, 0.0 }
0x23ab   :  { %v6816_v57 = vmax.f32 %v6456_v18, 0.0  ;;  %v6817_v7 = vmax.f32 %v6485_v62, 0.0 }
0x23ac   :  { %7059 = vmatmul.f32.gmra.mxu2 %v6802_v33  ;;  %7088 = vmatmul.f32.gmra.mxu3 %v6803_v9 }
0x23ad   :  { %7004 = vmatmul.f32.gmra.mxu0 %v6816_v57  ;;  %7033 = vmatmul.f32.gmra.mxu1 %v6817_v7 }
0x23af   :  { %v6513_v10 = vpop.f32.mrf.mxu2  ;;  %v6542_v53 = vpop.f32.mrf.mxu3 }
0x23b0   :  { %v6514_v49 = vadd.f32 %v6513_v10, %v14478_v1  ;;  %v6543_v24 = vadd.f32 %v6542_v53, %v14481_v29  ;;  %v6458_v47 = vpop.f32.mrf.mxu0  ;;  %v6487_v32 = vpop.f32.mrf.mxu1 }
0x23b1   :  { %v6459_v48 = vadd.f32 %v6458_v47, %v14468_v0  ;;  %v6488_v40 = vadd.f32 %v6487_v32, %v14471_v16 }
0x23b2   :  { %v6818_v6 = vmax.f32 %v6514_v49, 0.0  ;;  %v6819_v34 = vmax.f32 %v6543_v24, 0.0 }
0x23b3   :  { %v6832_v56 = vmax.f32 %v6459_v48, 0.0  ;;  %v6833_v42 = vmax.f32 %v6488_v40, 0.0 }
0x23b4   :  { %7062 = vmatmul.f32.gmra.mxu2 %v6818_v6  ;;  %7091 = vmatmul.f32.gmra.mxu3 %v6819_v34  ;;  %v6284_v34 = vperm.slane %v14510_v36, 4 }
0x23b5   :  { %7007 = vmatmul.f32.gmra.mxu0 %v6832_v56  ;;  %7036 = vmatmul.f32.gmra.mxu1 %v6833_v42  ;;  %v6285_v56 = vperm.slane %v14510_v36, 5 }
0x23b7   :  { %v6516_v0 = vpop.f32.mrf.mxu2  ;;  %v6545_v16 = vpop.f32.mrf.mxu3 }
0x23b8   :  { %v6517_v26 = vadd.f32 %v6516_v0, %v14478_v1  ;;  %v6546_v60 = vadd.f32 %v6545_v16, %v14481_v29  ;;  %v6565_v63 = vpop.f32.mrf.mxu0  ;;  %v6594_v4 = vpop.f32.mrf.mxu1  ;;  %v11903_v1 = vld [vmem:[#allocation5 + $0x8] sm:$0xff] }
0x23b9   :  { %v6566_v23 = vadd.f32 %v6565_v63, %v14513_v52  ;;  %v6595_v37 = vadd.f32 %v6594_v4, %v14516_v25 }
0x23ba   :  { %v6834_v15 = vmax.f32 %v6517_v26, 0.0  ;;  %v6835_v35 = vmax.f32 %v6546_v60, 0.0 }
0x23bb   :  { %v6788_v5 = vmax.f32 %v6566_v23, 0.0  ;;  %v6789_v30 = vmax.f32 %v6595_v37, 0.0 }
0x23bc   :  { %7065 = vmatmul.f32.gmra.mxu2 %v6834_v15  ;;  %7094 = vmatmul.f32.gmra.mxu3 %v6835_v35  ;;  %v6286_v35 = vperm.slane %v14510_v36, 6 }
0x23bd   :  { %7114 = vmatmul.f32.vlgmr.msra.gmra.mxu0 %v6788_v5  ;;  %7143 = vmatmul.f32.vlgmr.msra.gmra.mxu1 %v6789_v30  ;;  %v6287_v5 = vperm.slane %v14510_v36, 7 }
0x23be   :  { %7586 = vmatpush.msra.mxu1 %v11903_v1 }
0x23bf   :  { %v6623_v29 = vpop.f32.mrf.mxu2  ;;  %v6652_v14 = vpop.f32.mrf.mxu3 }
0x23c0   :  { %v6624_v43 = vadd.f32 %v6623_v29, %v6282_v38  ;;  %v6653_v31 = vadd.f32 %v6652_v14, %v6283_v28  ;;  %v6568_v22 = vpop.f32.mrf.mxu0  ;;  %v6597_v20 = vpop.f32.mrf.mxu1  ;;  %7587 = vmatpush.msra.mxu1 %v11904_v61 }
0x23c1   :  { %v6569_v17 = vadd.f32 %v6568_v22, %v14513_v52  ;;  %v6598_v3 = vadd.f32 %v6597_v20, %v14516_v25 }
0x23c2   :  { %v6790_v19 = vmax.f32 %v6624_v43, 0.0  ;;  %v6791_v27 = vmax.f32 %v6653_v31, 0.0 }
0x23c3   :  { %v6804_v59 = vmax.f32 %v6569_v17, 0.0  ;;  %v6805_v11 = vmax.f32 %v6598_v3, 0.0 }
0x23c4   :  { %7172 = vmatmul.f32.vlgmr.msrb.gmra.mxu2 %v6790_v19  ;;  %7201 = vmatmul.f32.vlgmr.msrb.gmra.mxu3 %v6791_v27 }
0x23c5   :  { %7117 = vmatmul.f32.gmra.mxu0 %v6804_v59  ;;  %7146 = vmatmul.f32.gmra.mxu1 %v6805_v11 }
0x23c6   :  { %7788 = vmatpush.msrb.mxu2 %v11905_v13 }
0x23c7   :  { %v6626_v44 = vpop.f32.mrf.mxu2  ;;  %v6655_v54 = vpop.f32.mrf.mxu3 }
0x23c8   :  { %v6627_v50 = vadd.f32 %v6626_v44, %v6282_v38  ;;  %v6656_v46 = vadd.f32 %v6655_v54, %v6283_v28  ;;  %v6571_v21 = vpop.f32.mrf.mxu0  ;;  %v6600_v41 = vpop.f32.mrf.mxu1 }
0x23c9   :  { %v6572_v2 = vadd.f32 %v6571_v21, %v14513_v52  ;;  %v6601_v39 = vadd.f32 %v6600_v41, %v14516_v25 }
0x23ca   :  { %v6806_v18 = vmax.f32 %v6627_v50, 0.0  ;;  %v6807_v62 = vmax.f32 %v6656_v46, 0.0 }
0x23cb   :  { %v6820_v33 = vmax.f32 %v6572_v2, 0.0  ;;  %v6821_v9 = vmax.f32 %v6601_v39, 0.0 }
0x23cc   :  { %7175 = vmatmul.f32.gmra.mxu2 %v6806_v18  ;;  %7204 = vmatmul.f32.gmra.mxu3 %v6807_v62 }
0x23cd   :  { %7120 = vmatmul.f32.gmra.mxu0 %v6820_v33  ;;  %7149 = vmatmul.f32.gmra.mxu1 %v6821_v9 }
0x23cf   :  { %v6629_v8 = vpop.f32.mrf.mxu2  ;;  %v6658_v57 = vpop.f32.mrf.mxu3 }
0x23d0   :  { %v6630_v7 = vadd.f32 %v6629_v8, %v6282_v38  ;;  %v6659_v10 = vadd.f32 %v6658_v57, %v6283_v28  ;;  %v6574_v53 = vpop.f32.mrf.mxu0  ;;  %v6603_v49 = vpop.f32.mrf.mxu1 }
0x23d1   :  { %v6575_v24 = vadd.f32 %v6574_v53, %v14513_v52  ;;  %v6604_v47 = vadd.f32 %v6603_v49, %v14516_v25 }
0x23d2   :  { %v6822_v32 = vmax.f32 %v6630_v7, 0.0  ;;  %v6823_v48 = vmax.f32 %v6659_v10, 0.0 }
0x23d3   :  { %v6836_v40 = vmax.f32 %v6575_v24, 0.0  ;;  %v6837_v6 = vmax.f32 %v6604_v47, 0.0 }
0x23d4   :  { %7178 = vmatmul.f32.gmra.mxu2 %v6822_v32  ;;  %7207 = vmatmul.f32.gmra.mxu3 %v6823_v48 }
0x23d5   :  { %7123 = vmatmul.f32.gmra.mxu0 %v6836_v40  ;;  %7152 = vmatmul.f32.gmra.mxu1 %v6837_v6 }
0x23d7   :  { %v6632_v42 = vpop.f32.mrf.mxu2  ;;  %v6661_v0 = vpop.f32.mrf.mxu3 }
0x23d8   :  { %v6633_v16 = vadd.f32 %v6632_v42, %v6282_v38  ;;  %v6662_v26 = vadd.f32 %v6661_v0, %v6283_v28  ;;  %v6681_v60 = vpop.f32.mrf.mxu0  ;;  %v6710_v52 = vpop.f32.mrf.mxu1 }
0x23d9   :  { %v6682_v63 = vadd.f32 %v6681_v60, %v6284_v34  ;;  %v6711_v25 = vadd.f32 %v6710_v52, %v6285_v56 }
0x23da   :  { %v6838_v4 = vmax.f32 %v6633_v16, 0.0  ;;  %v6839_v23 = vmax.f32 %v6662_v26, 0.0 }
0x23db   :  { %v6792_v37 = vmax.f32 %v6682_v63, 0.0  ;;  %v6793_v15 = vmax.f32 %v6711_v25, 0.0 }
0x23dc   :  { %7181 = vmatmul.f32.gmra.mxu2 %v6838_v4  ;;  %7210 = vmatmul.f32.gmra.mxu3 %v6839_v23 }
0x23dd   :  { %7230 = vmatmul.f32.vlgmr.msrb.gmra.mxu0 %v6792_v37  ;;  %7259 = vmatmul.f32.vlgmr.msrb.gmra.mxu1 %v6793_v15 }
0x23df   :  { %v6739_v30 = vpop.f32.mrf.mxu2  ;;  %v6768_v1 = vpop.f32.mrf.mxu3 }
0x23e0   :  { %v6740_v38 = vadd.f32 %v6739_v30, %v6286_v35  ;;  %v6769_v28 = vadd.f32 %v6768_v1, %v6287_v5  ;;  %v6684_v29 = vpop.f32.mrf.mxu0  ;;  %v6713_v14 = vpop.f32.mrf.mxu1 }
0x23e1   :  { %v6685_v43 = vadd.f32 %v6684_v29, %v6284_v34  ;;  %v6714_v31 = vadd.f32 %v6713_v14, %v6285_v56 }
0x23e2   :  { %v6794_v22 = vmax.f32 %v6740_v38, 0.0  ;;  %v6795_v20 = vmax.f32 %v6769_v28, 0.0 }
0x23e3   :  { %v6808_v61 = vmax.f32 %v6685_v43, 0.0  ;;  %v6809_v17 = vmax.f32 %v6714_v31, 0.0 }
0x23e4   :  { %7288 = vmatmul.f32.vlgmr.msra.gmra.mxu2 %v6794_v22  ;;  %7317 = vmatmul.f32.vlgmr.msra.gmra.mxu3 %v6795_v20 }
0x23e5   :  { %7233 = vmatmul.f32.gmra.mxu0 %v6808_v61  ;;  %7262 = vmatmul.f32.gmra.mxu1 %v6809_v17 }
0x23e7   :  { %v6742_v3 = vpop.f32.mrf.mxu2  ;;  %v6771_v36 = vpop.f32.mrf.mxu3 }
0x23e8   :  { %v6743_v19 = vadd.f32 %v6742_v3, %v6286_v35  ;;  %v6772_v27 = vadd.f32 %v6771_v36, %v6287_v5  ;;  %v6687_v59 = vpop.f32.mrf.mxu0  ;;  %v6716_v11 = vpop.f32.mrf.mxu1  ;;  %v11684_v36 = vld [vmem:[%s15647_s19 + $0x3] ss:$0 sm:$0xff] }
0x23e9   :  { %v6688_v13 = vadd.f32 %v6687_v59, %v6284_v34  ;;  %v6717_v44 = vadd.f32 %v6716_v11, %v6285_v56 }
0x23ea   :  { %v6810_v54 = vmax.f32 %v6743_v19, 0.0  ;;  %v6811_v50 = vmax.f32 %v6772_v27, 0.0 }
0x23eb   :  { %v6824_v46 = vmax.f32 %v6688_v13, 0.0  ;;  %v6825_v21 = vmax.f32 %v6717_v44, 0.0 }
0x23ec   :  { %7291 = vmatmul.f32.gmra.mxu2 %v6810_v54  ;;  %7320 = vmatmul.f32.gmra.mxu3 %v6811_v50 }
0x23ed   :  { %7236 = vmatmul.f32.gmra.mxu0 %v6824_v46  ;;  %7265 = vmatmul.f32.gmra.mxu1 %v6825_v21 }
0x23ef   :  { %v6745_v41 = vpop.f32.mrf.mxu2  ;;  %v6774_v2 = vpop.f32.mrf.mxu3 }
0x23f0   :  { %v6746_v39 = vadd.f32 %v6745_v41, %v6286_v35  ;;  %v6775_v18 = vadd.f32 %v6774_v2, %v6287_v5  ;;  %v6690_v62 = vpop.f32.mrf.mxu0  ;;  %v6719_v33 = vpop.f32.mrf.mxu1 }
0x23f1   :  { %v6691_v9 = vadd.f32 %v6690_v62, %v6284_v34  ;;  %v6720_v8 = vadd.f32 %v6719_v33, %v6285_v56 }
0x23f2   :  { %v6826_v57 = vmax.f32 %v6746_v39, 0.0  ;;  %v6827_v7 = vmax.f32 %v6775_v18, 0.0 }
0x23f3   :  { %v6840_v10 = vmax.f32 %v6691_v9, 0.0  ;;  %v6841_v53 = vmax.f32 %v6720_v8, 0.0 }
0x23f4   :  { %7294 = vmatmul.f32.gmra.mxu2 %v6826_v57  ;;  %7323 = vmatmul.f32.gmra.mxu3 %v6827_v7 }
0x23f5   :  { %7239 = vmatmul.f32.gmra.mxu0 %v6840_v10  ;;  %7268 = vmatmul.f32.gmra.mxu1 %v6841_v53 }
0x23f7   :  { %v6748_v49 = vpop.f32.mrf.mxu2  ;;  %v6777_v24 = vpop.f32.mrf.mxu3 }
0x23f8   :  { %v6749_v47 = vadd.f32 %v6748_v49, %v6286_v35  ;;  %v6778_v32 = vadd.f32 %v6777_v24, %v6287_v5 }
0x23fa   :  { %v6842_v48 = vmax.f32 %v6749_v47, 0.0  ;;  %v6843_v40 = vmax.f32 %v6778_v32, 0.0  ;;  %v6883_v6 = vpop.f32.mrf.mxu0  ;;  %v6912_v42 = vpop.f32.mrf.mxu1 }
0x23fb   :  { %v6884_v59 = vadd.f32 %v11684_v36, %v6883_v6 }
0x23fc   :  { %7297 = vmatmul.f32.gmra.mxu2 %v6842_v48  ;;  %7326 = vmatmul.f32.gmra.mxu3 %v6843_v40 }
0x23fd   :  { %v6913_v44 = vadd.f32 %v6912_v42, %v6884_v59 }
0x2402   :  { %v6886_v34 = vpop.f32.mrf.mxu0  ;;  %v6915_v56 = vpop.f32.mrf.mxu1 }
0x2403   :  { %v6887_v21 = vadd.f32 %v11684_v36, %v6886_v34 }
0x2405   :  { %v6916_v18 = vadd.f32 %v6915_v56, %v6887_v21 }
0x2407   :  { %v6941_v0 = vpop.f32.mrf.mxu2  ;;  %v6970_v16 = vpop.f32.mrf.mxu3 }
0x2408   :  { %v6942_v46 = vadd.f32 %v6941_v0, %v6913_v44 }
0x240a   :  { %v6889_v26 = vpop.f32.mrf.mxu0  ;;  %v6918_v60 = vpop.f32.mrf.mxu1  ;;  %v6971_v39 = vadd.f32 %v6970_v16, %v6942_v46 }
0x240b   :  { %v6890_v57 = vadd.f32 %v11684_v36, %v6889_v26 }
0x240d   :  { %v6919_v47 = vadd.f32 %v6918_v60, %v6890_v57 }
0x240f   :  { %v6944_v52 = vpop.f32.mrf.mxu2  ;;  %v6973_v63 = vpop.f32.mrf.mxu3 }
0x2410   :  { %v6945_v8 = vadd.f32 %v6944_v52, %v6916_v18 }
0x2412   :  { %v6892_v25 = vpop.f32.mrf.mxu0  ;;  %v6921_v4 = vpop.f32.mrf.mxu1  ;;  %v6974_v49 = vadd.f32 %v6973_v63, %v6945_v8 }
0x2413   :  { %v6893_v34 = vadd.f32 %v11684_v36, %v6892_v25 }
0x2415   :  { %v6922_v52 = vadd.f32 %v6921_v4, %v6893_v34 }
0x2417   :  { %v6947_v23 = vpop.f32.mrf.mxu2  ;;  %v6976_v37 = vpop.f32.mrf.mxu3 }
0x2418   :  { %v6948_v40 = vadd.f32 %v6947_v23, %v6919_v47 }
0x241a   :  { %v6999_v15 = vpop.f32.mrf.mxu0  ;;  %v7028_v35 = vpop.f32.mrf.mxu1  ;;  %v6977_v59 = vadd.f32 %v6976_v37, %v6948_v40 }
0x241b   :  { %v7000_v62 = vadd.f32 %v6999_v15, %v6971_v39 }
0x241d   :  { %v7029_v7 = vadd.f32 %v7028_v35, %v7000_v62 }
0x241f   :  { %v6950_v5 = vpop.f32.mrf.mxu2  ;;  %v14534_v30 = vpop.f32.mrf.mxu3 }
0x2420   :  { %v6951_v21 = vadd.f32 %v6950_v5, %v6922_v52 }
0x2422   :  { %v7002_v1 = vpop.f32.mrf.mxu0  ;;  %v7031_v38 = vpop.f32.mrf.mxu1  ;;  %v6980_v25 = vadd.f32 %v14534_v30, %v6951_v21 }
0x2423   :  { %v7003_v32 = vadd.f32 %v7002_v1, %v6974_v49 }
0x2425   :  { %v7032_v0 = vadd.f32 %v7031_v38, %v7003_v32 }
0x2427   :  { %v7057_v28 = vpop.f32.mrf.mxu2  ;;  %v7086_v29 = vpop.f32.mrf.mxu3 }
0x2428   :  { %v7058_v24 = vadd.f32 %v7057_v28, %v7029_v7 }
0x242a   :  { %v7005_v14 = vpop.f32.mrf.mxu0  ;;  %v7034_v43 = vpop.f32.mrf.mxu1  ;;  %v7087_v6 = vadd.f32 %v7086_v29, %v7058_v24 }
0x242b   :  { %v7006_v26 = vadd.f32 %v7005_v14, %v6977_v59 }
0x242d   :  { %v7035_v60 = vadd.f32 %v7034_v43, %v7006_v26 }
0x242f   :  { %v7060_v31 = vpop.f32.mrf.mxu2  ;;  %v7089_v22 = vpop.f32.mrf.mxu3 }
0x2430   :  { %v7061_v44 = vadd.f32 %v7060_v31, %v7032_v0 }
0x2432   :  { %v7008_v20 = vpop.f32.mrf.mxu0  ;;  %v7037_v61 = vpop.f32.mrf.mxu1  ;;  %v7090_v63 = vadd.f32 %v7089_v22, %v7061_v44 }
0x2437   :  { %v7063_v17 = vpop.f32.mrf.mxu2  ;;  %v7092_v3 = vpop.f32.mrf.mxu3 }
0x2438   :  { %v7064_v38 = vadd.f32 %v7063_v17, %v7035_v60 }
0x243a   :  { %v7115_v19 = vpop.f32.mrf.mxu0  ;;  %v7144_v27 = vpop.f32.mrf.mxu1  ;;  %v7093_v4 = vadd.f32 %v7092_v3, %v7064_v38 }
0x243b   :  { %v7116_v16 = vadd.f32 %v7115_v19, %v7087_v6  ;;  %v7009_v19 = vadd.f32 %v7008_v20, %v6980_v25 }
0x243d   :  { %v7145_v35 = vadd.f32 %v7144_v27, %v7116_v16  ;;  %v7038_v27 = vadd.f32 %v7037_v61, %v7009_v19 }
0x243f   :  { %v7066_v11 = vpop.f32.mrf.mxu2  ;;  %v14539_v13 = vpop.f32.mrf.mxu3 }
0x2440   :  { %v7067_v43 = vadd.f32 %v7066_v11, %v7038_v27 }
0x2442   :  { %v7118_v54 = vpop.f32.mrf.mxu0  ;;  %v7147_v50 = vpop.f32.mrf.mxu1  ;;  %v7096_v17 = vadd.f32 %v14539_v13, %v7067_v43 }
0x2443   :  { %v7119_v1 = vadd.f32 %v7118_v54, %v7090_v63 }
0x2445   :  { %v7148_v18 = vadd.f32 %v7147_v50, %v7119_v1 }
0x2447   :  { %v7173_v41 = vpop.f32.mrf.mxu2  ;;  %v7202_v2 = vpop.f32.mrf.mxu3 }
0x2448   :  { %v7174_v28 = vadd.f32 %v7173_v41, %v7145_v35 }
0x244a   :  { %v7121_v33 = vpop.f32.mrf.mxu0  ;;  %v7150_v9 = vpop.f32.mrf.mxu1  ;;  %v7203_v36 = vadd.f32 %v7202_v2, %v7174_v28 }
0x244b   :  { %v7122_v62 = vadd.f32 %v7121_v33, %v7093_v4 }
0x244d   :  { %v7151_v7 = vadd.f32 %v7150_v9, %v7122_v62 }
0x244f   :  { %v7176_v10 = vpop.f32.mrf.mxu2  ;;  %v7205_v53 = vpop.f32.mrf.mxu3 }
0x2450   :  { %v7177_v14 = vadd.f32 %v7176_v10, %v7148_v18 }
0x2452   :  { %v7124_v48 = vpop.f32.mrf.mxu0  ;;  %v7153_v42 = vpop.f32.mrf.mxu1  ;;  %v7206_v54 = vadd.f32 %v7205_v53, %v7177_v14 }
0x2453   :  { %v7125_v3 = vadd.f32 %v7124_v48, %v7096_v17 }
0x2455   :  { %v7154_v47 = vadd.f32 %v7153_v42, %v7125_v3 }
0x2457   :  { %v7179_v56 = vpop.f32.mrf.mxu2  ;;  %v7208_v15 = vpop.f32.mrf.mxu3 }
0x2458   :  { %v7180_v20 = vadd.f32 %v7179_v56, %v7151_v7 }
0x245a   :  { %v7231_v46 = vpop.f32.mrf.mxu0  ;;  %v7260_v39 = vpop.f32.mrf.mxu1  ;;  %v7209_v11 = vadd.f32 %v7208_v15, %v7180_v20 }
0x245b   :  { %v7232_v37 = vadd.f32 %v7231_v46, %v7203_v36 }
0x245d   :  { %v7261_v5 = vadd.f32 %v7260_v39, %v7232_v37  ;;  %v11389_v39 = vld [vmem:[%s15638_s10 + $0x20] sm:$0xff] }
0x245e   :  { %7474 = vmatpush.msra.mxu0 %v11389_v39 }
0x245f   :  { %v7182_v23 = vpop.f32.mrf.mxu2  ;;  %v7211_v29 = vpop.f32.mrf.mxu3 }
0x2460   :  { %v7183_v6 = vadd.f32 %v7182_v23, %v7154_v47  ;;  %v11685_v47 = vld [vmem:[#allocation8 + $0x3] ss:$0 sm:$0xff] }
0x2462   :  { %v7234_v31 = vpop.f32.mrf.mxu0  ;;  %v7263_v57 = vpop.f32.mrf.mxu1  ;;  %v7212_v56 = vadd.f32 %v7211_v29, %v7183_v6 }
0x2463   :  { %v7235_v49 = vadd.f32 %v7234_v31, %v7206_v54 }
0x2465   :  { %v7264_v10 = vadd.f32 %v7263_v57, %v7235_v49 }
0x2467   :  { %v7289_v22 = vpop.f32.mrf.mxu2  ;;  %v7318_v41 = vpop.f32.mrf.mxu3 }
0x2468   :  { %v7290_v8 = vadd.f32 %v7289_v22, %v7261_v5 }
0x246a   :  { %v7319_v30 = vadd.f32 %v7318_v41, %v7290_v8  ;;  %v7237_v50 = vpop.f32.mrf.mxu0  ;;  %v7266_v40 = vpop.f32.mrf.mxu1 }
0x246b   :  { %v7238_v32 = vadd.f32 %v7237_v50, %v7209_v11 }
0x246c   :  { %v7330_v2 = vadd.f32 %v7319_v30, %v14243_v58 }
0x246d   :  { %v7267_v34 = vadd.f32 %v7266_v40, %v7238_v32  ;;  %v11686_v40 = vld [vmem:[#allocation10 + $0x3] ss:$0 sm:$0xff] }
0x246e   :  { %v7338_v61 = vsel %vm390_vm7, %v7330_v2, 0.0 }
0x246f   :  { %v7292_v33 = vpop.f32.mrf.mxu2  ;;  %v7321_v24 = vpop.f32.mrf.mxu3  ;;  %7339 = vadd.xlane.f32.xlu0 %v7338_v61 }
0x2470   :  { %v7293_v53 = vadd.f32 %v7292_v33, %v7264_v10 }
0x2472   :  { %v7322_v9 = vadd.f32 %v7321_v24, %v7293_v53  ;;  %v7240_v0 = vpop.f32.mrf.mxu0  ;;  %v7269_v42 = vpop.f32.mrf.mxu1 }
0x2473   :  { %v7241_v44 = vadd.f32 %v7240_v0, %v7212_v56 }
0x2474   :  { %v7331_v13 = vadd.f32 %v7322_v9, %v14262_v51 }
0x2475   :  { %v7270_v26 = vadd.f32 %v7269_v42, %v7241_v44 }
0x2476   :  { %v7341_v58 = vsel %vm390_vm7, %v7331_v13, 0.0 }
0x2477   :  { %v7295_v48 = vpop.f32.mrf.mxu2  ;;  %v7324_v16 = vpop.f32.mrf.mxu3  ;;  %7342 = vadd.xlane.f32.xlu2 %v7341_v58 }
0x2478   :  { %v7296_v59 = vadd.f32 %v7295_v48, %v7267_v34 }
0x247a   :  { %v7325_v52 = vadd.f32 %v7324_v16, %v7296_v59 }
0x247c   :  { %v7332_v15 = vadd.f32 %v7325_v52, %v14281_v12 }
0x247e   :  { %v7344_v35 = vsel %vm390_vm7, %v7332_v15, 0.0 }
0x247f   :  { %v7298_v46 = vpop.f32.mrf.mxu2  ;;  %7345 = vadd.xlane.f32.xlu1 %v7344_v35  ;;  %v7327_v21 = vpop.f32.mrf.mxu3 }
0x2480   :  { %v7299_v51 = vadd.f32 %v7298_v46, %v7270_v26 }
0x2482   :  { %v7328_v63 = vadd.f32 %v7327_v21, %v7299_v51 }
0x2484   :  { %v7333_v28 = vadd.f32 %v7328_v63, %v14294_v55 }
0x2486   :  { %v7347_v60 = vsel %vm390_vm7, %v7333_v28, 0.0 }
0x2487   :  { %7348 = vadd.xlane.f32.xlu0 %v7347_v60 }
0x24e2   :  { %v7340_v1 = vpop.xlane.xlu0 %7339 }
0x24e3   :  { %v7350_v12 = vmul.f32 %v7340_v1, %v12588_v45 }
0x24e5   :  { %v7354_v23 = vsub.f32 %v7330_v2, %v7350_v12 }
0x24e7   :  { %v7358_v29 = vmul.f32 %v7354_v23, %v7354_v23 }
0x24e9   :  { %v7362_v25 = vsel %vm390_vm7, %v7358_v29, 0.0 }
0x24ea   :  { %v7343_v38 = vpop.xlane.xlu2 %7342  ;;  %7363 = vadd.xlane.f32.xlu2 %v7362_v25 }
0x24eb   :  { %v7351_v36 = vmul.f32 %v7343_v38, %v12588_v45 }
0x24ed   :  { %v7355_v55 = vsub.f32 %v7331_v13, %v7351_v36 }
0x24ef   :  { %v7359_v19 = vmul.f32 %v7355_v55, %v7355_v55 }
0x24f1   :  { %v7365_v18 = vsel %vm390_vm7, %v7359_v19, 0.0 }
0x24f2   :  { %7366 = vadd.xlane.f32.xlu1 %v7365_v18  ;;  %v7346_v37 = vpop.xlane.xlu1 %7345 }
0x24f3   :  { %v7352_v31 = vmul.f32 %v7346_v37, %v12588_v45 }
0x24f5   :  { %v14559_v4 = vsub.f32 %v7332_v15, %v7352_v31  ;;  %v11687_v31 = vld [vmem:[%s15639_s11 + $0x4] ss:$0 sm:$0xff] }
0x24f7   :  { %v7360_v14 = vmul.f32 %v14559_v4, %v14559_v4 }
0x24f9   :  { %v7368_v27 = vsel %vm390_vm7, %v7360_v14, 0.0 }
0x24fa   :  { %v7349_v62 = vpop.xlane.xlu0 %7348  ;;  %7369 = vadd.xlane.f32.xlu0 %v7368_v27 }
0x24fb   :  { %v7353_v5 = vmul.f32 %v7349_v62, %v12588_v45 }
0x24fd   :  { %v14565_v22 = vsub.f32 %v7333_v28, %v7353_v5 }
0x24ff   :  { %v7361_v41 = vmul.f32 %v14565_v22, %v14565_v22 }
0x2501   :  { %v7371_v43 = vsel %vm390_vm7, %v7361_v41, 0.0 }
0x2502   :  { %7372 = vadd.xlane.f32.xlu2 %v7371_v43 }
0x255d   :  { %v7364_v54 = vpop.xlane.xlu2 %7363 }
0x255e   :  { %v7374_v8 = vmul.f32 %v7364_v54, %v12588_v45 }
0x2560   :  { %v7378_v57 = vadd.f32 1e-05, %v7374_v8 }
0x2562   :  { %11823 = vrsqrt.f32 %v7378_v57  ;;  %vm7388_vm10 = vweird.f32 %v7378_v57 }
0x2565   :  { %v7367_v7 = vpop.xlane.xlu1 %7366 }
0x2566   :  { %v7375_v49 = vmul.f32 %v7367_v7, %v12588_v45 }
0x2568   :  { %v11824_v30 = vpop.eup %11823  ;;  %v7379_v17 = vadd.f32 1e-05, %v7375_v49 }
0x2569   :  { %v7383_v20 = vmul.f32 %v11824_v30, %v7378_v57  ;;  %vm7389_vm9 = vweird.f32 %v11824_v30 }
0x256a   :  { %11825 = vrsqrt.f32 %v7379_v17  ;;  %vm7390_vm11 = vmor %vm7388_vm10, %vm7389_vm9  ;;  %vm7398_vm13 = vweird.f32 %v7379_v17 }
0x256b   :  { %v7384_v50 = vmul.f32 %v11824_v30, %v7383_v20 }
0x256d   :  { %v7385_v2 = vmul.f32 0.5, %v7384_v50  ;;  %v7370_v3 = vpop.xlane.xlu0 %7369 }
0x256e   :  { %v7376_v10 = vmul.f32 %v7370_v3, %v12588_v45 }
0x256f   :  { %v7386_v61 = vsub.f32 1.5, %v7385_v2 }
0x2570   :  { %v11826_v33 = vpop.eup %11825  ;;  %v7380_v24 = vadd.f32 1e-05, %v7376_v10 }
0x2571   :  { %v7387_v11 = vmul.f32 %v11824_v30, %v7386_v61  ;;  %v7393_v53 = vmul.f32 %v11826_v33, %v7379_v17  ;;  %vm7399_vm12 = vweird.f32 %v11826_v33 }
0x2572   :  { %11827 = vrsqrt.f32 %v7380_v24  ;;  %vm7400_vm14 = vmor %vm7398_vm13, %vm7399_vm12  ;;  %vm7408_vm1 = vweird.f32 %v7380_v24 }
0x2573   :  { %v7391_v32 = vsel %vm7390_vm11, %v11824_v30, %v7387_v11  ;;  %v7394_v9 = vmul.f32 %v11826_v33, %v7393_v53 }
0x2574   :  { %v7422_v6 = vmul.f32 %v7391_v32, %v7354_v23 }
0x2575   :  { %v7395_v13 = vmul.f32 0.5, %v7394_v9  ;;  %v7373_v34 = vpop.xlane.xlu2 %7372 }
0x2576   :  { %v7429_v0 = vmul.f32 %v11685_v47, %v7422_v6  ;;  %v7377_v58 = vmul.f32 %v7373_v34, %v12588_v45 }
0x2577   :  { %v7396_v48 = vsub.f32 1.5, %v7395_v13 }
0x2578   :  { %v11828_v16 = vpop.eup %11827  ;;  %v14574_v56 = vadd.f32 %v11686_v40, %v7429_v0  ;;  %v7381_v59 = vadd.f32 1e-05, %v7377_v58 }
0x2579   :  { %v7397_v44 = vmul.f32 %v11826_v33, %v7396_v48  ;;  %v7403_v52 = vmul.f32 %v11828_v16, %v7380_v24  ;;  %vm7409_vm15 = vweird.f32 %v11828_v16 }
0x257a   :  { %11829 = vrsqrt.f32 %v7381_v59  ;;  %11391 = vmatmul.msk.f32.vlgmr.msra.gmra.mxu0 %vm390_vm7, %v14574_v56  ;;  %vm7410_vm2 = vmor %vm7408_vm1, %vm7409_vm15  ;;  %vm7418_vm4 = vweird.f32 %v7381_v59 }
0x257b   :  { %v7401_v15 = vsel %vm7400_vm14, %v11826_v33, %v7397_v44  ;;  %v7404_v42 = vmul.f32 %v11828_v16, %v7403_v52 }
0x257c   :  { %v7423_v26 = vmul.f32 %v7401_v15, %v7355_v55 }
0x257d   :  { %v7405_v35 = vmul.f32 0.5, %v7404_v42 }
0x257e   :  { %v7430_v46 = vmul.f32 %v11685_v47, %v7423_v26 }
0x257f   :  { %v7406_v51 = vsub.f32 1.5, %v7405_v35 }
0x2580   :  { %v11830_v21 = vpop.eup %11829  ;;  %v14578_v63 = vadd.f32 %v11686_v40, %v7430_v46 }
0x2581   :  { %v7407_v28 = vmul.f32 %v11828_v16, %v7406_v51  ;;  %v7413_v60 = vmul.f32 %v11830_v21, %v7381_v59  ;;  %vm7419_vm3 = vweird.f32 %v11830_v21 }
0x2582   :  { %11392 = vmatmul.msk.f32.gmra.mxu0 %vm390_vm7, %v14578_v63  ;;  %vm7420_vm5 = vmor %vm7418_vm4, %vm7419_vm3 }
0x2583   :  { %v7411_v1 = vsel %vm7410_vm2, %v11828_v16, %v7407_v28  ;;  %v7414_v39 = vmul.f32 %v11830_v21, %v7413_v60 }
0x2584   :  { %v7424_v12 = vmul.f32 %v7411_v1, %v14559_v4 }
0x2585   :  { %v7415_v23 = vmul.f32 0.5, %v7414_v39 }
0x2586   :  { %v7431_v29 = vmul.f32 %v11685_v47, %v7424_v12 }
0x2587   :  { %v7416_v25 = vsub.f32 1.5, %v7415_v23 }
0x2588   :  { %v14583_v38 = vadd.f32 %v11686_v40, %v7431_v29 }
0x2589   :  { %v7417_v36 = vmul.f32 %v11830_v21, %v7416_v25 }
0x258a   :  { %11393 = vmatmul.msk.f32.gmra.mxu0 %vm390_vm7, %v14583_v38 }
0x258b   :  { %v7421_v55 = vsel %vm7420_vm5, %v11830_v21, %v7417_v36 }
0x258c   :  { %v7425_v19 = vmul.f32 %v7421_v55, %v14565_v22 }
0x258e   :  { %v7432_v18 = vmul.f32 %v11685_v47, %v7425_v19 }
0x2590   :  { %v14588_v37 = vadd.f32 %v11686_v40, %v7432_v18 }
0x2592   :  { %11394 = vmatmul.msk.f32.gmra.mxu0 %vm390_vm7, %v14588_v37 }
0x25f7   :  { %v7476_v4 = vpop.f32.mrf.mxu0 }
0x25f8   :  { %v14595_v14 = vadd.f32 %v11687_v31, %v7476_v4 }
0x25fa   :  { %7492 = vrot.lane.b32.xlu2 %v14595_v14, %s12076_s4 }
0x25ff   :  { %v7479_v27 = vpop.f32.mrf.mxu0 }
0x2600   :  { %v14607_v43 = vadd.f32 %v11687_v31, %v7479_v27 }
0x2607   :  { %v7482_v62 = vpop.f32.mrf.mxu0 }
0x2608   :  { %v14599_v5 = vadd.f32 %v11687_v31, %v7482_v62 }
0x260a   :  { %7496 = vrot.lane.b32.xlu1 %v14599_v5, %s12076_s4 }
0x260f   :  { %v7485_v22 = vpop.f32.mrf.mxu0 }
0x2610   :  { %v14603_v41 = vadd.f32 %v11687_v31, %v7485_v22 }
0x2612   :  { %7498 = vrot.lane.b32.xlu0 %v14603_v41, %s12076_s4 }
0x261a   :  { %7494 = vrot.lane.b32.xlu0 %v14607_v43, %s12076_s4 }
0x2654   :  { %v7493_v54 = vpop.permute.xlu2 %7492 }
0x2655   :  { %v7510_v8 = vmul.f32 %v7493_v54, %v14599_v5  ;;  %v7504_v50 = vmul.f32 %v7493_v54, %v14595_v14 }
0x2657   :  { %7528 = vrot.lane.b32.xlu0 %v7510_v8, %s12063_s24 }
0x267c   :  { %v7497_v57 = vpop.permute.xlu1 %7496 }
0x267d   :  { %v7508_v7 = vmul.f32 %v7497_v57, %v14595_v14  ;;  %v7506_v11 = vmul.f32 %v7497_v57, %v14599_v5 }
0x267f   :  { %7524 = vrot.lane.b32.xlu1 %v7508_v7, %s12063_s24 }
0x2684   :  { %v7499_v49 = vpop.permute.xlu0 %7498 }
0x2685   :  { %v7509_v30 = vmul.f32 %v7499_v49, %v14607_v43  ;;  %v7507_v32 = vmul.f32 %v7499_v49, %v14603_v41 }
0x2687   :  { %7526 = vrot.lane.b32.xlu2 %v7509_v30, %s12063_s24 }
0x268c   :  { %v7495_v17 = vpop.permute.xlu0 %7494 }
0x268d   :  { %v7511_v20 = vmul.f32 %v7495_v17, %v14603_v41  ;;  %v7505_v61 = vmul.f32 %v7495_v17, %v14607_v43 }
0x268f   :  { %7530 = vrot.lane.b32.xlu1 %v7511_v20, %s12063_s24 }
0x26c9   :  { %v7529_v24 = vpop.permute.xlu0 %7528 }
0x26ca   :  { %v7538_v53 = vsel %vm390_vm7, %v7506_v11, %v7529_v24 }
0x26e1   :  { %v7527_v10 = vpop.permute.xlu2 %7526 }
0x26e2   :  { %v7537_v33 = vsel %vm390_vm7, %v7505_v61, %v7527_v10 }
0x26f1   :  { %v7525_v2 = vpop.permute.xlu1 %7524 }
0x26f2   :  { %v7536_v3 = vsel %vm390_vm7, %v7504_v50, %v7525_v2 }
0x26f3   :  { %11395 = vmatmul.msk.f32.vlgmr.msra.gmra.mxu1 %vm395_vm8, %v7536_v3 }
0x26fb   :  { %11396 = vmatmul.msk.f32.gmra.mxu1 %vm395_vm8, %v7537_v33 }
0x2701   :  { %v7531_v47 = vpop.permute.xlu1 %7530 }
0x2702   :  { %v7539_v9 = vsel %vm390_vm7, %v7507_v32, %v7531_v47 }
0x2703   :  { %11397 = vmatmul.msk.f32.gmra.mxu1 %vm395_vm8, %v7538_v53 }
0x270b   :  { %11398 = vmatmul.msk.f32.gmra.mxu1 %vm395_vm8, %v7539_v9 }
0x2770   :  { %v7589_v40 = vpop.f32.mrf.mxu1 }
0x2771   :  { %v7601_v6 = vmul.f32 0.70710677, %v7589_v40 }
0x2773   :  { %7609 = vrot.lane.b32.xlu2 %v7601_v6, %s12077_s6 }
0x2778   :  { %v7592_v13 = vpop.f32.mrf.mxu1 }
0x2779   :  { %v7602_v34 = vmul.f32 0.70710677, %v7592_v13 }
0x277b   :  { %7611 = vrot.lane.b32.xlu0 %v7602_v34, %s12077_s6 }
0x2780   :  { %v7595_v0 = vpop.f32.mrf.mxu1 }
0x2781   :  { %v7603_v58 = vmul.f32 0.70710677, %v7595_v0 }
0x2783   :  { %7613 = vrot.lane.b32.xlu1 %v7603_v58, %s12077_s6 }
0x2788   :  { %v7598_v48 = vpop.f32.mrf.mxu1 }
0x2789   :  { %v7604_v16 = vmul.f32 0.70710677, %v7598_v48 }
0x278b   :  { %7615 = vrot.lane.b32.xlu2 %v7604_v16, %s12077_s6 }
0x27cd   :  { %v7610_v59 = vpop.permute.xlu2 %7609 }
0x27ce   :  { %v7621_v44 = vmax.f32 %v7601_v6, %v7610_v59 }
0x27d0   :  { %7629 = vrot.lane.b32.xlu0 %v7621_v44, %s12078_s1 }
0x27e5   :  { %v7616_v52 = vpop.permute.xlu2 %7615 }
0x27e6   :  { %v7624_v15 = vmax.f32 %v7604_v16, %v7616_v52 }
0x27e8   :  { %7635 = vrot.lane.b32.xlu0 %v7624_v15, %s12078_s1 }
0x27ed   :  { %v7612_v42 = vpop.permute.xlu0 %7611 }
0x27ee   :  { %v7622_v26 = vmax.f32 %v7602_v34, %v7612_v42 }
0x27f0   :  { %7631 = vrot.lane.b32.xlu1 %v7622_v26, %s12078_s1 }
0x27f5   :  { %v7614_v35 = vpop.permute.xlu1 %7613 }
0x27f6   :  { %v7623_v46 = vmax.f32 %v7603_v58, %v7614_v35 }
0x27f8   :  { %7633 = vrot.lane.b32.xlu2 %v7623_v46, %s12078_s1 }
0x2842   :  { %v7630_v51 = vpop.permute.xlu0 %7629 }
0x2843   :  { %v7641_v21 = vsel %vm707_vm0, %v7621_v44, %v7630_v51 }
0x2844   :  { %v7645_v28 = vsub.f32 %v7601_v6, %v7641_v21 }
0x2846   :  { %v7649_v60 = vmul.f32 1.442695, %v7645_v28 }
0x2848   :  { %11831 = vpow2.f32 %v7649_v60 }
0x284e   :  { %v14640_v1 = vpop.eup %11831 }
0x284f   :  { %7661 = vrot.lane.b32.xlu1 %v14640_v1, %s12077_s6 }
0x2852   :  { %v7634_v39 = vpop.permute.xlu2 %7633 }
0x2853   :  { %v7643_v12 = vsel %vm707_vm0, %v7623_v46, %v7634_v39 }
0x2854   :  { %v7647_v23 = vsub.f32 %v7603_v58, %v7643_v12 }
0x2856   :  { %v7653_v29 = vmul.f32 1.442695, %v7647_v23 }
0x2858   :  { %11833 = vpow2.f32 %v7653_v29 }
0x285a   :  { %v7636_v25 = vpop.permute.xlu0 %7635 }
0x285b   :  { %v7644_v36 = vsel %vm707_vm0, %v7624_v15, %v7636_v25 }
0x285c   :  { %v7648_v55 = vsub.f32 %v7604_v16, %v7644_v36 }
0x285e   :  { %v14646_v19 = vpop.eup %11833  ;;  %v7655_v18 = vmul.f32 1.442695, %v7648_v55 }
0x285f   :  { %7665 = vrot.lane.b32.xlu0 %v14646_v19, %s12077_s6 }
0x2860   :  { %11835 = vpow2.f32 %v7655_v18 }
0x2862   :  { %v7632_v31 = vpop.permute.xlu1 %7631 }
0x2863   :  { %v7642_v4 = vsel %vm707_vm0, %v7622_v26, %v7632_v31 }
0x2864   :  { %v7646_v27 = vsub.f32 %v7602_v34, %v7642_v4 }
0x2866   :  { %v14651_v62 = vpop.eup %11835  ;;  %v7651_v22 = vmul.f32 1.442695, %v7646_v27 }
0x2867   :  { %7667 = vrot.lane.b32.xlu1 %v14651_v62, %s12077_s6 }
0x2868   :  { %11837 = vpow2.f32 %v7651_v22 }
0x286e   :  { %v14655_v54 = vpop.eup %11837 }
0x286f   :  { %7663 = vrot.lane.b32.xlu2 %v14655_v54, %s12077_s6 }
0x28c1   :  { %v7662_v8 = vpop.permute.xlu1 %7661 }
0x28c2   :  { %v7673_v57 = vadd.f32 %v14640_v1, %v7662_v8 }
0x28c4   :  { %11839 = vrcp.f32 %v7673_v57  ;;  %v7688_v50 = vand.u32 2147483648, %v7673_v57  ;;  %v7686_v3 = vand.u32 2147483647, %v7673_v57  ;;  %vm7682_vm9 = vweird.f32 %v7673_v57 }
0x28c6   :  { %v7689_v11 = vor.u32 1.1754944e-38, %v7688_v50  ;;  %vm7687_vm11 = vcmp.eq.f32.partialorder %v7686_v3, 8.507059e+37  ;;  %v11403_v50 = vld [vmem:[%s15640_s12 + $0x20] sm:$0xff] }
0x28c7   :  { %7860 = vmatpush.msrb.mxu3 %v11403_v50  ;;  %v11414_v50 = vld [vmem:[%s15644_s16 + $0x218] sm:$0xff] }
0x28c9   :  { %v7664_v7 = vpop.permute.xlu2 %7663  ;;  %8152 = vmatpush.msra.mxu3 %v11414_v50 }
0x28ca   :  { %v11840_v49 = vpop.eup %11839  ;;  %v7674_v30 = vadd.f32 %v14655_v54, %v7664_v7 }
0x28cb   :  { %v7678_v17 = vmul.f32 %v11840_v49, %v7673_v57  ;;  %vm7683_vm6 = vweird.f32 %v11840_v49 }
0x28cc   :  { %11841 = vrcp.f32 %v7674_v30  ;;  %vm7684_vm10 = vmor %vm7682_vm9, %vm7683_vm6  ;;  %v7703_v40 = vand.u32 2147483648, %v7674_v30  ;;  %v7701_v13 = vand.u32 2147483647, %v7674_v30  ;;  %vm7697_vm13 = vweird.f32 %v7674_v30 }
0x28cd   :  { %v7679_v20 = vsub.f32 1.0, %v7678_v17 }
0x28ce   :  { %v7704_v16 = vor.u32 1.1754944e-38, %v7703_v40  ;;  %vm7702_vm15 = vcmp.eq.f32.partialorder %v7701_v13, 8.507059e+37 }
0x28cf   :  { %v7680_v2 = vmul.f32 %v11840_v49, %v7679_v20 }
0x28d1   :  { %v7666_v10 = vpop.permute.xlu0 %7665  ;;  %v7681_v61 = vadd.f32 %v11840_v49, %v7680_v2 }
0x28d2   :  { %v11842_v33 = vpop.eup %11841  ;;  %v7675_v24 = vadd.f32 %v14646_v19, %v7666_v10 }
0x28d3   :  { %v7693_v53 = vmul.f32 %v11842_v33, %v7674_v30  ;;  %v7685_v47 = vsel %vm7684_vm10, %v11840_v49, %v7681_v61  ;;  %vm7698_vm12 = vweird.f32 %v11842_v33 }
0x28d4   :  { %11843 = vrcp.f32 %v7675_v24  ;;  %v7690_v32 = vsel %vm7687_vm11, %v7689_v11, %v7685_v47  ;;  %vm7699_vm14 = vmor %vm7697_vm13, %vm7698_vm12  ;;  %v7718_v42 = vand.u32 2147483648, %v7675_v24  ;;  %v7716_v35 = vand.u32 2147483647, %v7675_v24 }
0x28d5   :  { %v7694_v9 = vsub.f32 1.0, %v7693_v53  ;;  %7741 = vrot.lane.b32.xlu2 %v7690_v32, %s12078_s1  ;;  %vm7712_vm2 = vweird.f32 %v7675_v24 }
0x28d6   :  { %v7719_v21 = vor.u32 1.1754944e-38, %v7718_v42  ;;  %vm7717_vm4 = vcmp.eq.f32.partialorder %v7716_v35, 8.507059e+37 }
0x28d7   :  { %v7695_v6 = vmul.f32 %v11842_v33, %v7694_v9 }
0x28d9   :  { %v7668_v34 = vpop.permute.xlu1 %7667  ;;  %v7696_v0 = vadd.f32 %v11842_v33, %v7695_v6 }
0x28da   :  { %v11844_v58 = vpop.eup %11843  ;;  %v7676_v48 = vadd.f32 %v14651_v62, %v7668_v34 }
0x28db   :  { %v7708_v59 = vmul.f32 %v11844_v58, %v7675_v24  ;;  %v7700_v44 = vsel %vm7699_vm14, %v11842_v33, %v7696_v0  ;;  %vm7713_vm1 = vweird.f32 %v11844_v58 }
0x28dc   :  { %11845 = vrcp.f32 %v7676_v48  ;;  %v7705_v52 = vsel %vm7702_vm15, %v7704_v16, %v7700_v44  ;;  %vm7714_vm3 = vmor %vm7712_vm2, %vm7713_vm1  ;;  %v7733_v23 = vand.u32 2147483648, %v7676_v48  ;;  %v7731_v25 = vand.u32 2147483647, %v7676_v48 }
0x28dd   :  { %v7709_v15 = vsub.f32 1.0, %v7708_v59  ;;  %7743 = vrot.lane.b32.xlu0 %v7705_v52, %s12078_s1  ;;  %vm7727_vm6 = vweird.f32 %v7676_v48 }
0x28de   :  { %v7734_v55 = vor.u32 1.1754944e-38, %v7733_v23  ;;  %vm7732_vm10 = vcmp.eq.f32.partialorder %v7731_v25, 8.507059e+37 }
0x28df   :  { %v7710_v26 = vmul.f32 %v11844_v58, %v7709_v15  ;;  %v11688_v15 = vld [vmem:[%s15641_s13 + $0x4] ss:$0 sm:$0xff] }
0x28e1   :  { %v7711_v46 = vadd.f32 %v11844_v58, %v7710_v26 }
0x28e2   :  { %v11846_v51 = vpop.eup %11845 }
0x28e3   :  { %v7723_v28 = vmul.f32 %v11846_v51, %v7676_v48  ;;  %v7715_v60 = vsel %vm7714_vm3, %v11844_v58, %v7711_v46  ;;  %vm7728_vm5 = vweird.f32 %v11846_v51 }
0x28e4   :  { %v7720_v39 = vsel %vm7717_vm4, %v7719_v21, %v7715_v60  ;;  %vm7729_vm9 = vmor %vm7727_vm6, %vm7728_vm5 }
0x28e5   :  { %v7724_v12 = vsub.f32 1.0, %v7723_v28  ;;  %7745 = vrot.lane.b32.xlu1 %v7720_v39, %s12078_s1  ;;  %7516 = vrot.lane.b32.xlu0 %v14599_v5, %s12079_s25 }
0x28e7   :  { %v7725_v29 = vmul.f32 %v11846_v51, %v7724_v12 }
0x28e9   :  { %v7726_v36 = vadd.f32 %v11846_v51, %v7725_v29 }
0x28eb   :  { %v7730_v18 = vsel %vm7729_vm9, %v11846_v51, %v7726_v36 }
0x28ec   :  { %v7735_v31 = vsel %vm7732_vm10, %v7734_v55, %v7730_v18 }
0x28ed   :  { %7747 = vrot.lane.b32.xlu2 %v7735_v31, %s12078_s1  ;;  %7518 = vrot.lane.b32.xlu1 %v14603_v41, %s12079_s25 }
0x28ee   :  { %7514 = vrot.lane.b32.xlu0 %v14607_v43, %s12079_s25 }
0x28f5   :  { %7512 = vrot.lane.b32.xlu2 %v14595_v14, %s12079_s25 }
0x292f   :  { %v7742_v5 = vpop.permute.xlu2 %7741 }
0x2930   :  { %v7753_v4 = vsel %vm707_vm0, %v7690_v32, %v7742_v5 }
0x2931   :  { %v7757_v27 = vmul.f32 %v14640_v1, %v7753_v4 }
0x2933   :  { %11399 = vmatmul.msk.f32.vlgmr.msrb.gmra.mxu2 %vm390_vm7, %v7757_v27 }
0x2947   :  { %v7748_v22 = vpop.permute.xlu2 %7747 }
0x2948   :  { %v7756_v30 = vsel %vm707_vm0, %v7735_v31, %v7748_v22 }
0x294f   :  { %v7744_v8 = vpop.permute.xlu0 %7743  ;;  %v7513_v57 = vpop.permute.xlu2 %7512 }
0x2950   :  { %v7754_v7 = vsel %vm707_vm0, %v7705_v52, %v7744_v8  ;;  %7548 = vrot.lane.b32.xlu0 %v7513_v57, %s12063_s24 }
0x2951   :  { %v7758_v41 = vmul.f32 %v14655_v54, %v7754_v7  ;;  %v7760_v54 = vmul.f32 %v14651_v62, %v7756_v30 }
0x2953   :  { %11400 = vmatmul.msk.f32.gmra.mxu2 %vm390_vm7, %v7758_v41 }
0x2957   :  { %v7746_v43 = vpop.permute.xlu1 %7745  ;;  %v7517_v14 = vpop.permute.xlu0 %7516 }
0x2958   :  { %v7755_v49 = vsel %vm707_vm0, %v7720_v39, %v7746_v43  ;;  %7544 = vrot.lane.b32.xlu1 %v7517_v14, %s12063_s24 }
0x2959   :  { %v7759_v1 = vmul.f32 %v14646_v19, %v7755_v49 }
0x295b   :  { %11401 = vmatmul.msk.f32.gmra.mxu2 %vm390_vm7, %v7759_v1 }
0x295f   :  { %v7519_v17 = vpop.permute.xlu1 %7518 }
0x2960   :  { %v7515_v20 = vpop.permute.xlu0 %7514  ;;  %7546 = vrot.lane.b32.xlu2 %v7519_v17, %s12063_s24 }
0x2961   :  { %7550 = vrot.lane.b32.xlu1 %v7515_v20, %s12063_s24 }
0x2963   :  { %11402 = vmatmul.msk.f32.gmra.mxu2 %vm390_vm7, %v7760_v54  ;;  %v11413_v54 = vld [vmem:[%s15644_s16 + $0x210] sm:$0xff] }
0x2964   :  { %8123 = vmatpush.msra.mxu2 %v11413_v54 }
0x29b6   :  { %v7790_v19 = vpop.f32.mrf.mxu2 }
0x29ba   :  { %v7547_v61 = vpop.permute.xlu2 %7546 }
0x29bb   :  { %v7557_v33 = vsel %vm390_vm7, %v7515_v20, %v7547_v61 }
0x29c2   :  { %v7549_v11 = vpop.permute.xlu0 %7548 }
0x29c3   :  { %v7558_v53 = vsel %vm390_vm7, %v7517_v14, %v7549_v11 }
0x29ca   :  { %v7545_v2 = vpop.permute.xlu1 %7544 }
0x29cb   :  { %v7556_v3 = vsel %vm390_vm7, %v7513_v57, %v7545_v2  ;;  %v11411_v2 = vld [vmem:[%s15644_s16 + $0x200] sm:$0xff] }
0x29cc   :  { %v7802_v10 = vmul.f32 %v7790_v19, %v7556_v3  ;;  %v11412_v19 = vld [vmem:[%s15644_s16 + $0x208] sm:$0xff]  ;;  %8065 = vmatpush.msrb.mxu0 %v11411_v2 }
0x29cd   :  { %8094 = vmatpush.msrb.mxu1 %v11412_v19 }
0x29ce   :  { %7810 = vrot.lane.b32.xlu2 %v7802_v10, %s12076_s4 }
0x29d3   :  { %v7551_v9 = vpop.permute.xlu1 %7550 }
0x29d4   :  { %v7559_v40 = vsel %vm390_vm7, %v7519_v17, %v7551_v9 }
0x29d6   :  { %v7793_v62 = vpop.f32.mrf.mxu2 }
0x29d7   :  { %v7803_v24 = vmul.f32 %v7793_v62, %v7557_v33 }
0x29d9   :  { %7812 = vrot.lane.b32.xlu0 %v7803_v24, %s12076_s4 }
0x29de   :  { %v7796_v47 = vpop.f32.mrf.mxu2 }
0x29df   :  { %v7804_v32 = vmul.f32 %v7796_v47, %v7558_v53 }
0x29e1   :  { %7814 = vrot.lane.b32.xlu1 %v7804_v32, %s12076_s4 }
0x29e6   :  { %v7799_v6 = vpop.f32.mrf.mxu2 }
0x29e7   :  { %v7805_v13 = vmul.f32 %v7799_v6, %v7559_v40  ;;  %v14758_v40 = vld [vmem:[%s15643_s15 + $0x4] ss:$0 sm:$0xff] }
0x29e9   :  { %7816 = vrot.lane.b32.xlu2 %v7805_v13, %s12076_s4 }
0x2a28   :  { %v7811_v34 = vpop.permute.xlu2 %7810 }
0x2a29   :  { %v7822_v0 = vadd.f32 %v7811_v34, %v7802_v10 }
0x2a2b   :  { %11405 = vmatmul.msk.f32.vlgmr.msrb.gmra.mxu3 %vm390_vm7, %v7822_v0 }
0x2a43   :  { %v7817_v44 = vpop.permute.xlu2 %7816 }
0x2a44   :  { %v7825_v52 = vadd.f32 %v7817_v44, %v7805_v13 }
0x2a4b   :  { %v7813_v58 = vpop.permute.xlu0 %7812 }
0x2a4c   :  { %v7823_v48 = vadd.f32 %v7813_v58, %v7803_v24 }
0x2a4e   :  { %11406 = vmatmul.msk.f32.gmra.mxu3 %vm390_vm7, %v7823_v48 }
0x2a53   :  { %v7815_v16 = vpop.permute.xlu1 %7814 }
0x2a54   :  { %v7824_v59 = vadd.f32 %v7815_v16, %v7804_v32  ;;  %v14753_v32 = vld [vmem:[%s15642_s14 + $0x4] ss:$0 sm:$0xff] }
0x2a56   :  { %11407 = vmatmul.msk.f32.gmra.mxu3 %vm390_vm7, %v7824_v59 }
0x2a5e   :  { %11408 = vmatmul.msk.f32.gmra.mxu3 %vm390_vm7, %v7825_v52 }
0x2aae   :  { %v7862_v42 = vpop.f32.mrf.mxu3 }
0x2aaf   :  { %v7863_v26 = vadd.f32 %v11688_v15, %v7862_v42  ;;  %v11418_v42 = vld [vmem:[%s15644_s16 + $0x238] sm:$0xff] }
0x2ab0   :  { %8268 = vmatpush.msrb.mxu3 %v11418_v42 }
0x2ab1   :  { %v7874_v35 = vadd.f32 %v7863_v26, %v14574_v56  ;;  %v11415_v26 = vld [vmem:[%s15644_s16 + $0x220] sm:$0xff] }
0x2ab2   :  { %8181 = vmatpush.msra.mxu0 %v11415_v26 }
0x2ab3   :  { %v7882_v46 = vsel %vm390_vm7, %v7874_v35, 0.0 }
0x2ab4   :  { %7883 = vadd.xlane.f32.xlu0 %v7882_v46  ;;  %v11416_v46 = vld [vmem:[%s15644_s16 + $0x228] sm:$0xff] }
0x2ab5   :  { %8210 = vmatpush.msra.mxu1 %v11416_v46 }
0x2ad1   :  { %v7865_v51 = vpop.f32.mrf.mxu3 }
0x2ad2   :  { %v7866_v21 = vadd.f32 %v11688_v15, %v7865_v51 }
0x2ad4   :  { %v7875_v28 = vadd.f32 %v7866_v21, %v14578_v63 }
0x2ad6   :  { %v7885_v60 = vsel %vm390_vm7, %v7875_v28, 0.0 }
0x2ad7   :  { %7886 = vadd.xlane.f32.xlu1 %v7885_v60 }
0x2ad9   :  { %v7868_v39 = vpop.f32.mrf.mxu3 }
0x2ada   :  { %v7869_v12 = vadd.f32 %v11688_v15, %v7868_v39 }
0x2adc   :  { %v7876_v23 = vadd.f32 %v7869_v12, %v14583_v38 }
0x2ade   :  { %v7888_v29 = vsel %vm390_vm7, %v7876_v23, 0.0 }
0x2adf   :  { %7889 = vadd.xlane.f32.xlu2 %v7888_v29 }
0x2ae1   :  { %v7871_v25 = vpop.f32.mrf.mxu3 }
0x2ae2   :  { %v7872_v36 = vadd.f32 %v11688_v15, %v7871_v25  ;;  %v11417_v15 = vld [vmem:[%s15644_s16 + $0x230] sm:$0xff] }
0x2ae3   :  { %8239 = vmatpush.msrb.mxu2 %v11417_v15 }
0x2ae4   :  { %v7877_v56 = vadd.f32 %v7872_v36, %v14588_v37 }
0x2ae6   :  { %v7891_v55 = vsel %vm390_vm7, %v7877_v56, 0.0 }
0x2ae7   :  { %7892 = vadd.xlane.f32.xlu0 %v7891_v55  ;;  %v11421_v55 = vld [vmem:[%s15644_s16 + $0x250] sm:$0xff] }
0x2b27   :  { %v7884_v18 = vpop.xlane.xlu0 %7883 }
0x2b28   :  { %v7894_v63 = vmul.f32 %v7884_v18, %v12588_v45  ;;  %v11422_v18 = vld [vmem:[%s15644_s16 + $0x258] sm:$0xff] }
0x2b2a   :  { %v7898_v31 = vsub.f32 %v7874_v35, %v7894_v63 }
0x2b2c   :  { %v7902_v5 = vmul.f32 %v7898_v31, %v7898_v31 }
0x2b2e   :  { %v7906_v4 = vsel %vm390_vm7, %v7902_v5, 0.0 }
0x2b2f   :  { %7907 = vadd.xlane.f32.xlu2 %v7906_v4 }
0x2b4a   :  { %v7887_v27 = vpop.xlane.xlu1 %7886 }
0x2b4b   :  { %v7895_v38 = vmul.f32 %v7887_v27, %v12588_v45 }
0x2b4d   :  { %v14720_v22 = vsub.f32 %v7875_v28, %v7895_v38 }
0x2b4f   :  { %v7903_v8 = vmul.f32 %v14720_v22, %v14720_v22 }
0x2b51   :  { %v7909_v37 = vsel %vm390_vm7, %v7903_v8, 0.0 }
0x2b52   :  { %7910 = vadd.xlane.f32.xlu1 %v7909_v37  ;;  %v7890_v57 = vpop.xlane.xlu2 %7889 }
0x2b53   :  { %v7896_v7 = vmul.f32 %v7890_v57, %v12588_v45 }
0x2b55   :  { %v14726_v41 = vsub.f32 %v7876_v23, %v7896_v7  ;;  %v11419_v7 = vld [vmem:[%s15644_s16 + $0x240] sm:$0xff] }
0x2b57   :  { %v7904_v43 = vmul.f32 %v14726_v41, %v14726_v41 }
0x2b59   :  { %v7912_v14 = vsel %vm390_vm7, %v7904_v43, 0.0  ;;  %v11420_v43 = vld [vmem:[%s15644_s16 + $0x248] sm:$0xff] }
0x2b5a   :  { %v7893_v49 = vpop.xlane.xlu0 %7892  ;;  %7913 = vadd.xlane.f32.xlu0 %v7912_v14 }
0x2b5b   :  { %v7897_v1 = vmul.f32 %v7893_v49, %v12588_v45 }
0x2b5d   :  { %v14732_v30 = vsub.f32 %v7877_v56, %v7897_v1 }
0x2b5f   :  { %v7905_v17 = vmul.f32 %v14732_v30, %v14732_v30 }
0x2b61   :  { %v7915_v20 = vsel %vm390_vm7, %v7905_v17, 0.0 }
0x2b62   :  { %7916 = vadd.xlane.f32.xlu2 %v7915_v20 }
0x2ba2   :  { %v7908_v3 = vpop.xlane.xlu2 %7907 }
0x2ba3   :  { %v7918_v10 = vmul.f32 %v7908_v3, %v12588_v45  ;;  %v11426_v3 = vld [vmem:[%s15644_s16 + $0x278] sm:$0xff] }
0x2ba5   :  { %v7922_v61 = vadd.f32 1e-05, %v7918_v10  ;;  %v11423_v10 = vld [vmem:[%s15644_s16 + $0x260] sm:$0xff] }
0x2ba7   :  { %11847 = vrsqrt.f32 %v7922_v61  ;;  %vm7932_vm12 = vweird.f32 %v7922_v61 }
0x2bad   :  { %v11848_v33 = vpop.eup %11847 }
0x2bae   :  { %v7927_v62 = vmul.f32 %v11848_v33, %v7922_v61  ;;  %vm7933_vm11 = vweird.f32 %v11848_v33  ;;  %v11424_v61 = vld [vmem:[%s15644_s16 + $0x268] sm:$0xff] }
0x2baf   :  { %vm7934_vm13 = vmor %vm7932_vm12, %vm7933_vm11 }
0x2bb0   :  { %v7928_v24 = vmul.f32 %v11848_v33, %v7927_v62  ;;  %v11493_v62 = vld [vmem:[%s15646_s18 + $0x200] sm:$0xff] }
0x2bb2   :  { %v7929_v11 = vmul.f32 0.5, %v7928_v24  ;;  %v11496_v24 = vld [vmem:[%s15646_s18 + $0x218] sm:$0xff] }
0x2bb4   :  { %v7930_v53 = vsub.f32 1.5, %v7929_v11  ;;  %v11494_v11 = vld [vmem:[%s15646_s18 + $0x208] sm:$0xff] }
0x2bb6   :  { %v7931_v47 = vmul.f32 %v11848_v33, %v7930_v53  ;;  %v11499_v53 = vld [vmem:[%s15646_s18 + $0x230] sm:$0xff] }
0x2bb8   :  { %v7935_v9 = vsel %vm7934_vm13, %v11848_v33, %v7931_v47  ;;  %v11495_v33 = vld [vmem:[%s15646_s18 + $0x210] sm:$0xff]  ;;  %v11497_v47 = vld [vmem:[%s15646_s18 + $0x220] sm:$0xff] }
0x2bb9   :  { %v7966_v6 = vmul.f32 %v7935_v9, %v7898_v31  ;;  %v11498_v9 = vld [vmem:[%s15646_s18 + $0x228] sm:$0xff] }
0x2bbb   :  { %v7973_v13 = vmul.f32 %v14753_v32, %v7966_v6 }
0x2bbd   :  { %v14762_v34 = vadd.f32 %v14758_v40, %v7973_v13 }
0x2bbf   :  { %11429 = vmatmul.msk.f32.vlgmr.msrb.gmra.mxu0 %vm390_vm7, %v14762_v34  ;;  %11433 = vmatmul.msk.f32.vlgmr.msrb.gmra.mxu1 %vm390_vm7, %v14762_v34 }
0x2bc0   :  { %11437 = vmatmul.msk.f32.vlgmr.msra.gmra.mxu2 %vm390_vm7, %v14762_v34  ;;  %11441 = vmatmul.msk.f32.vlgmr.msra.gmra.mxu3 %vm390_vm7, %v14762_v34 }
0x2bc1   :  { %8355 = vmatpush.msra.mxu2 %v11421_v55  ;;  %8384 = vmatpush.msra.mxu3 %v11422_v18 }
0x2bc2   :  { %8297 = vmatpush.msrb.mxu0 %v11419_v7  ;;  %8326 = vmatpush.msrb.mxu1 %v11420_v43 }
0x2bc5   :  { %v7911_v0 = vpop.xlane.xlu1 %7910 }
0x2bc6   :  { %v7919_v58 = vmul.f32 %v7911_v0, %v12588_v45 }
0x2bc8   :  { %v7923_v48 = vadd.f32 1e-05, %v7919_v58 }
0x2bca   :  { %11849 = vrsqrt.f32 %v7923_v48  ;;  %vm7942_vm15 = vweird.f32 %v7923_v48 }
0x2bcd   :  { %v7914_v16 = vpop.xlane.xlu0 %7913 }
0x2bce   :  { %v7920_v59 = vmul.f32 %v7914_v16, %v12588_v45 }
0x2bd0   :  { %v11850_v44 = vpop.eup %11849  ;;  %v7924_v52 = vadd.f32 1e-05, %v7920_v59 }
0x2bd1   :  { %v7937_v35 = vmul.f32 %v11850_v44, %v7923_v48  ;;  %vm7943_vm14 = vweird.f32 %v11850_v44 }
0x2bd2   :  { %11851 = vrsqrt.f32 %v7924_v52  ;;  %vm7944_vm1 = vmor %vm7942_vm15, %vm7943_vm14  ;;  %vm7952_vm3 = vweird.f32 %v7924_v52 }
0x2bd3   :  { %v7938_v51 = vmul.f32 %v11850_v44, %v7937_v35 }
0x2bd5   :  { %v7939_v21 = vmul.f32 0.5, %v7938_v51  ;;  %v7917_v28 = vpop.xlane.xlu2 %7916 }
0x2bd6   :  { %v7921_v60 = vmul.f32 %v7917_v28, %v12588_v45 }
0x2bd7   :  { %v7940_v39 = vsub.f32 1.5, %v7939_v21 }
0x2bd8   :  { %v11852_v12 = vpop.eup %11851  ;;  %v7925_v23 = vadd.f32 1e-05, %v7921_v60 }
0x2bd9   :  { %v7941_v29 = vmul.f32 %v11850_v44, %v7940_v39  ;;  %v7947_v25 = vmul.f32 %v11852_v12, %v7924_v52  ;;  %vm7953_vm2 = vweird.f32 %v11852_v12 }
0x2bda   :  { %11853 = vrsqrt.f32 %v7925_v23  ;;  %vm7954_vm4 = vmor %vm7952_vm3, %vm7953_vm2  ;;  %vm7962_vm6 = vweird.f32 %v7925_v23 }
0x2bdb   :  { %v7945_v36 = vsel %vm7944_vm1, %v11850_v44, %v7941_v29  ;;  %v7948_v56 = vmul.f32 %v11852_v12, %v7947_v25  ;;  %v11503_v25 = vld [vmem:[%s15646_s18 + $0x250] sm:$0xff] }
0x2bdc   :  { %v7967_v63 = vmul.f32 %v7945_v36, %v14720_v22  ;;  %v11501_v36 = vld [vmem:[%s15646_s18 + $0x240] sm:$0xff] }
0x2bdd   :  { %v7949_v31 = vmul.f32 0.5, %v7948_v56  ;;  %v11504_v56 = vld [vmem:[%s15646_s18 + $0x258] sm:$0xff] }
0x2bde   :  { %v7974_v5 = vmul.f32 %v14753_v32, %v7967_v63 }
0x2bdf   :  { %v7950_v4 = vsub.f32 1.5, %v7949_v31 }
0x2be0   :  { %v11854_v27 = vpop.eup %11853  ;;  %v14796_v38 = vadd.f32 %v14758_v40, %v7974_v5 }
0x2be1   :  { %v7951_v8 = vmul.f32 %v11852_v12, %v7950_v4  ;;  %v7957_v37 = vmul.f32 %v11854_v27, %v7925_v23  ;;  %vm7963_vm5 = vweird.f32 %v11854_v27 }
0x2be2   :  { %11430 = vmatmul.msk.f32.gmra.mxu0 %vm390_vm7, %v14796_v38  ;;  %11434 = vmatmul.msk.f32.gmra.mxu1 %vm390_vm7, %v14796_v38  ;;  %vm7964_vm9 = vmor %vm7962_vm6, %vm7963_vm5 }
0x2be3   :  { %v7955_v22 = vsel %vm7954_vm4, %v11852_v12, %v7951_v8  ;;  %v7958_v57 = vmul.f32 %v11854_v27, %v7957_v37  ;;  %11438 = vmatmul.msk.f32.gmra.mxu2 %vm390_vm7, %v14796_v38  ;;  %11442 = vmatmul.msk.f32.gmra.mxu3 %vm390_vm7, %v14796_v38 }
0x2be4   :  { %v7968_v14 = vmul.f32 %v7955_v22, %v14726_v41 }
0x2be5   :  { %v7959_v49 = vmul.f32 0.5, %v7958_v57  ;;  %v11502_v57 = vld [vmem:[%s15646_s18 + $0x248] sm:$0xff] }
0x2be6   :  { %v7975_v1 = vmul.f32 %v14753_v32, %v7968_v14 }
0x2be7   :  { %v7960_v17 = vsub.f32 1.5, %v7959_v49 }
0x2be8   :  { %v14815_v20 = vadd.f32 %v14758_v40, %v7975_v1 }
0x2be9   :  { %v7961_v54 = vmul.f32 %v11854_v27, %v7960_v17 }
0x2bea   :  { %11431 = vmatmul.msk.f32.gmra.mxu0 %vm390_vm7, %v14815_v20  ;;  %11435 = vmatmul.msk.f32.gmra.mxu1 %vm390_vm7, %v14815_v20 }
0x2beb   :  { %v7965_v41 = vsel %vm7964_vm9, %v11854_v27, %v7961_v54  ;;  %11439 = vmatmul.msk.f32.gmra.mxu2 %vm390_vm7, %v14815_v20  ;;  %11443 = vmatmul.msk.f32.gmra.mxu3 %vm390_vm7, %v14815_v20 }
0x2bec   :  { %v7969_v50 = vmul.f32 %v7965_v41, %v14732_v30  ;;  %v11425_v30 = vld [vmem:[%s15644_s16 + $0x270] sm:$0xff] }
0x2bee   :  { %v7976_v2 = vmul.f32 %v14753_v32, %v7969_v50  ;;  %v11500_v32 = vld [vmem:[%s15646_s18 + $0x238] sm:$0xff] }
0x2bf0   :  { %v14828_v19 = vadd.f32 %v14758_v40, %v7976_v2  ;;  %v14965_v40 = vld [vmem:[%s15645_s17 + $0x40] sm:$0xff] }
0x2bf1   :  { %v8006_v6 = vperm.slane %v14965_v40, 0  ;;  %v8007_v13 = vperm.slane %v14965_v40, 1  ;;  %v14970_v48 = vperm.slane %v14965_v40, 2  ;;  %v14973_v16 = vperm.slane %v14965_v40, 3 }
0x2bf2   :  { %11432 = vmatmul.msk.f32.gmra.mxu0 %vm390_vm7, %v14828_v19  ;;  %11436 = vmatmul.msk.f32.gmra.mxu1 %vm390_vm7, %v14828_v19 }
0x2bf3   :  { %11440 = vmatmul.msk.f32.gmra.mxu2 %vm390_vm7, %v14828_v19  ;;  %11444 = vmatmul.msk.f32.gmra.mxu3 %vm390_vm7, %v14828_v19 }
0x2bfa   :  { %11445 = vmatmul.msk.f32.vlgmr.msra.gmra.mxu0 %vm390_vm7, %v14762_v34  ;;  %11449 = vmatmul.msk.f32.vlgmr.msra.gmra.mxu1 %vm390_vm7, %v14762_v34 }
0x2bfb   :  { %11453 = vmatmul.msk.f32.vlgmr.msrb.gmra.mxu2 %vm390_vm7, %v14762_v34  ;;  %11457 = vmatmul.msk.f32.vlgmr.msrb.gmra.mxu3 %vm390_vm7, %v14762_v34 }
0x2bfc   :  { %8471 = vmatpush.msrb.mxu2 %v11425_v30  ;;  %8500 = vmatpush.msrb.mxu3 %v11426_v3 }
0x2bfd   :  { %8413 = vmatpush.msra.mxu0 %v11423_v10  ;;  %8442 = vmatpush.msra.mxu1 %v11424_v61 }
0x2c02   :  { %11446 = vmatmul.msk.f32.gmra.mxu0 %vm390_vm7, %v14796_v38  ;;  %11450 = vmatmul.msk.f32.gmra.mxu1 %vm390_vm7, %v14796_v38 }
0x2c03   :  { %11454 = vmatmul.msk.f32.gmra.mxu2 %vm390_vm7, %v14796_v38  ;;  %11458 = vmatmul.msk.f32.gmra.mxu3 %vm390_vm7, %v14796_v38 }
0x2c0a   :  { %11447 = vmatmul.msk.f32.gmra.mxu0 %vm390_vm7, %v14815_v20  ;;  %11451 = vmatmul.msk.f32.gmra.mxu1 %vm390_vm7, %v14815_v20 }
0x2c0b   :  { %11455 = vmatmul.msk.f32.gmra.mxu2 %vm390_vm7, %v14815_v20  ;;  %11459 = vmatmul.msk.f32.gmra.mxu3 %vm390_vm7, %v14815_v20 }
0x2c12   :  { %11448 = vmatmul.msk.f32.gmra.mxu0 %vm390_vm7, %v14828_v19  ;;  %11452 = vmatmul.msk.f32.gmra.mxu1 %vm390_vm7, %v14828_v19 }
0x2c13   :  { %11456 = vmatmul.msk.f32.gmra.mxu2 %vm390_vm7, %v14828_v19  ;;  %11460 = vmatmul.msk.f32.gmra.mxu3 %vm390_vm7, %v14828_v19 }
0x2c1a   :  { %11461 = vmatmul.msk.f32.vlgmr.msrb.gmra.mxu0 %vm390_vm7, %v14762_v34  ;;  %11465 = vmatmul.msk.f32.vlgmr.msrb.gmra.mxu1 %vm390_vm7, %v14762_v34 }
0x2c1b   :  { %11469 = vmatmul.msk.f32.vlgmr.msra.gmra.mxu2 %vm390_vm7, %v14762_v34  ;;  %11473 = vmatmul.msk.f32.vlgmr.msra.gmra.mxu3 %vm390_vm7, %v14762_v34 }
0x2c1c   :  { %8673 = vmatpush.xpose.msra.mxu2 %v11495_v33  ;;  %8615 = vmatpush.xpose.msrb.mxu0 %v11493_v62  ;;  %v15002_v33 = vperm.slane %v14965_v40, 4  ;;  %v15005_v62 = vperm.slane %v14965_v40, 5 }
0x2c1d   :  { %8702 = vmatpush.xpose.msra.mxu3 %v11496_v24  ;;  %8644 = vmatpush.xpose.msrb.mxu1 %v11494_v11 }
0x2c22   :  { %11462 = vmatmul.msk.f32.gmra.mxu0 %vm390_vm7, %v14796_v38  ;;  %11466 = vmatmul.msk.f32.gmra.mxu1 %vm390_vm7, %v14796_v38 }
0x2c23   :  { %11470 = vmatmul.msk.f32.gmra.mxu2 %vm390_vm7, %v14796_v38  ;;  %11474 = vmatmul.msk.f32.gmra.mxu3 %vm390_vm7, %v14796_v38 }
0x2c2a   :  { %11463 = vmatmul.msk.f32.gmra.mxu0 %vm390_vm7, %v14815_v20  ;;  %11467 = vmatmul.msk.f32.gmra.mxu1 %vm390_vm7, %v14815_v20 }
0x2c2b   :  { %11471 = vmatmul.msk.f32.gmra.mxu2 %vm390_vm7, %v14815_v20  ;;  %11475 = vmatmul.msk.f32.gmra.mxu3 %vm390_vm7, %v14815_v20 }
0x2c32   :  { %11464 = vmatmul.msk.f32.gmra.mxu0 %vm390_vm7, %v14828_v19  ;;  %11468 = vmatmul.msk.f32.gmra.mxu1 %vm390_vm7, %v14828_v19 }
0x2c33   :  { %11472 = vmatmul.msk.f32.gmra.mxu2 %vm390_vm7, %v14828_v19  ;;  %11476 = vmatmul.msk.f32.gmra.mxu3 %vm390_vm7, %v14828_v19 }
0x2c3a   :  { %11477 = vmatmul.msk.f32.vlgmr.msra.gmra.mxu0 %vm390_vm7, %v14762_v34  ;;  %11481 = vmatmul.msk.f32.vlgmr.msra.gmra.mxu1 %vm390_vm7, %v14762_v34 }
0x2c3b   :  { %11485 = vmatmul.msk.f32.vlgmr.msrb.gmra.mxu2 %vm390_vm7, %v14762_v34  ;;  %11489 = vmatmul.msk.f32.vlgmr.msrb.gmra.mxu3 %vm390_vm7, %v14762_v34 }
0x2c3c   :  { %8789 = vmatpush.xpose.msrb.mxu2 %v11499_v53  ;;  %8731 = vmatpush.xpose.msra.mxu0 %v11497_v47  ;;  %v8067_v0 = vpop.f32.mrf.mxu0  ;;  %v8096_v58 = vpop.f32.mrf.mxu1 }
0x2c3d   :  { %8818 = vmatpush.xpose.msrb.mxu3 %v11500_v32  ;;  %8760 = vmatpush.xpose.msra.mxu1 %v11498_v9  ;;  %v8068_v52 = vadd.f32 %v8067_v0, %v8006_v6  ;;  %v8097_v15 = vadd.f32 %v8096_v58, %v8007_v13 }
0x2c3f   :  { %v8514_v35 = vmax.f32 %v8068_v52, 0.0  ;;  %v8515_v46 = vmax.f32 %v8097_v15, 0.0  ;;  %v15012_v52 = vperm.slane %v14965_v40, 6  ;;  %v15015_v15 = vperm.slane %v14965_v40, 7  ;;  %v11507_v40 = vld [vmem:[%s15646_s18 + $0x270] sm:$0xff] }
0x2c42   :  { %11478 = vmatmul.msk.f32.gmra.mxu0 %vm390_vm7, %v14796_v38  ;;  %11482 = vmatmul.msk.f32.gmra.mxu1 %vm390_vm7, %v14796_v38 }
0x2c43   :  { %11486 = vmatmul.msk.f32.gmra.mxu2 %vm390_vm7, %v14796_v38  ;;  %11490 = vmatmul.msk.f32.gmra.mxu3 %vm390_vm7, %v14796_v38  ;;  %v8125_v59 = vpop.f32.mrf.mxu2  ;;  %v8154_v44 = vpop.f32.mrf.mxu3 }
0x2c44   :  { %v8126_v42 = vadd.f32 %v8125_v59, %v14970_v48  ;;  %v8155_v26 = vadd.f32 %v8154_v44, %v14973_v16 }
0x2c46   :  { %v8516_v51 = vmax.f32 %v8126_v42, 0.0  ;;  %v8517_v21 = vmax.f32 %v8155_v26, 0.0 }
0x2c4a   :  { %11479 = vmatmul.msk.f32.gmra.mxu0 %vm390_vm7, %v14815_v20  ;;  %11483 = vmatmul.msk.f32.gmra.mxu1 %vm390_vm7, %v14815_v20 }
0x2c4b   :  { %11487 = vmatmul.msk.f32.gmra.mxu2 %vm390_vm7, %v14815_v20  ;;  %11491 = vmatmul.msk.f32.gmra.mxu3 %vm390_vm7, %v14815_v20 }
0x2c52   :  { %11480 = vmatmul.msk.f32.gmra.mxu0 %vm390_vm7, %v14828_v19  ;;  %11484 = vmatmul.msk.f32.gmra.mxu1 %vm390_vm7, %v14828_v19 }
0x2c53   :  { %11488 = vmatmul.msk.f32.gmra.mxu2 %vm390_vm7, %v14828_v19  ;;  %11492 = vmatmul.msk.f32.gmra.mxu3 %vm390_vm7, %v14828_v19 }
0x2c5a   :  { %8616 = vmatmul.f32.vlgmr.msrb.gmra.mxu0 %v8514_v35  ;;  %8645 = vmatmul.f32.vlgmr.msrb.gmra.mxu1 %v8515_v46 }
0x2c5b   :  { %8674 = vmatmul.f32.vlgmr.msra.gmra.mxu2 %v8516_v51  ;;  %8703 = vmatmul.f32.vlgmr.msra.gmra.mxu3 %v8517_v21 }
0x2c5c   :  { %8905 = vmatpush.xpose.msra.mxu2 %v11503_v25  ;;  %8847 = vmatpush.xpose.msrb.mxu0 %v11501_v36 }
0x2c5d   :  { %8934 = vmatpush.xpose.msra.mxu3 %v11504_v56  ;;  %8876 = vmatpush.xpose.msrb.mxu1 %v11502_v57 }
0x2c5f   :  { %v8070_v28 = vpop.f32.mrf.mxu0  ;;  %v8099_v60 = vpop.f32.mrf.mxu1 }
0x2c60   :  { %v8071_v39 = vadd.f32 %v8070_v28, %v8006_v6  ;;  %v8100_v12 = vadd.f32 %v8099_v60, %v8007_v13 }
0x2c62   :  { %v8530_v23 = vmax.f32 %v8071_v39, 0.0  ;;  %v8531_v29 = vmax.f32 %v8100_v12, 0.0 }
0x2c64   :  { %8619 = vmatmul.f32.gmra.mxu0 %v8530_v23  ;;  %8648 = vmatmul.f32.gmra.mxu1 %v8531_v29  ;;  %v11505_v23 = vld [vmem:[%s15646_s18 + $0x260] sm:$0xff]  ;;  %v11508_v29 = vld [vmem:[%s15646_s18 + $0x278] sm:$0xff] }
0x2c66   :  { %v8128_v55 = vpop.f32.mrf.mxu2  ;;  %v8157_v18 = vpop.f32.mrf.mxu3 }
0x2c67   :  { %v8129_v63 = vadd.f32 %v8128_v55, %v14970_v48  ;;  %v8158_v31 = vadd.f32 %v8157_v18, %v14973_v16  ;;  %v8073_v5 = vpop.f32.mrf.mxu0  ;;  %v8102_v4 = vpop.f32.mrf.mxu1 }
0x2c68   :  { %v8074_v27 = vadd.f32 %v8073_v5, %v8006_v6  ;;  %v8103_v8 = vadd.f32 %v8102_v4, %v8007_v13 }
0x2c69   :  { %v8532_v37 = vmax.f32 %v8129_v63, 0.0  ;;  %v8533_v22 = vmax.f32 %v8158_v31, 0.0 }
0x2c6a   :  { %v8546_v7 = vmax.f32 %v8074_v27, 0.0  ;;  %v8547_v43 = vmax.f32 %v8103_v8, 0.0  ;;  %v11506_v8 = vld [vmem:[%s15646_s18 + $0x268] sm:$0xff] }
0x2c6b   :  { %8677 = vmatmul.f32.gmra.mxu2 %v8532_v37  ;;  %8706 = vmatmul.f32.gmra.mxu3 %v8533_v22 }
0x2c6c   :  { %8622 = vmatmul.f32.gmra.mxu0 %v8546_v7  ;;  %8651 = vmatmul.f32.gmra.mxu1 %v8547_v43 }
0x2c6e   :  { %v8131_v14 = vpop.f32.mrf.mxu2  ;;  %v8160_v49 = vpop.f32.mrf.mxu3 }
0x2c6f   :  { %v8132_v1 = vadd.f32 %v8131_v14, %v14970_v48  ;;  %v8161_v17 = vadd.f32 %v8160_v49, %v14973_v16  ;;  %v8076_v54 = vpop.f32.mrf.mxu0  ;;  %v8105_v41 = vpop.f32.mrf.mxu1 }
0x2c70   :  { %v8077_v50 = vadd.f32 %v8076_v54, %v8006_v6  ;;  %v8106_v2 = vadd.f32 %v8105_v41, %v8007_v13 }
0x2c71   :  { %v8548_v30 = vmax.f32 %v8132_v1, 0.0  ;;  %v8549_v3 = vmax.f32 %v8161_v17, 0.0 }
0x2c72   :  { %v8562_v10 = vmax.f32 %v8077_v50, 0.0  ;;  %v8563_v61 = vmax.f32 %v8106_v2, 0.0  ;;  %v15044_v2 = vld [vmem:[%s15645_s17 + $0x48] sm:$0xff] }
0x2c73   :  { %8680 = vmatmul.f32.gmra.mxu2 %v8548_v30  ;;  %8709 = vmatmul.f32.gmra.mxu3 %v8549_v3 }
0x2c74   :  { %8625 = vmatmul.f32.gmra.mxu0 %v8562_v10  ;;  %8654 = vmatmul.f32.gmra.mxu1 %v8563_v61  ;;  %v15047_v10 = vperm.slane %v15044_v2, 0  ;;  %v15050_v61 = vperm.slane %v15044_v2, 1 }
0x2c76   :  { %v8134_v24 = vpop.f32.mrf.mxu2  ;;  %v8163_v11 = vpop.f32.mrf.mxu3 }
0x2c77   :  { %v8135_v53 = vadd.f32 %v8134_v24, %v14970_v48  ;;  %v8164_v47 = vadd.f32 %v8163_v11, %v14973_v16  ;;  %v8183_v32 = vpop.f32.mrf.mxu0  ;;  %v8212_v9 = vpop.f32.mrf.mxu1 }
0x2c78   :  { %v8184_v6 = vadd.f32 %v8183_v32, %v15002_v33  ;;  %v8213_v13 = vadd.f32 %v8212_v9, %v15005_v62 }
0x2c79   :  { %v8564_v0 = vmax.f32 %v8135_v53, 0.0  ;;  %v8565_v58 = vmax.f32 %v8164_v47, 0.0 }
0x2c7a   :  { %v8518_v59 = vmax.f32 %v8184_v6, 0.0  ;;  %v8519_v44 = vmax.f32 %v8213_v13, 0.0 }
0x2c7b   :  { %8683 = vmatmul.f32.gmra.mxu2 %v8564_v0  ;;  %8712 = vmatmul.f32.gmra.mxu3 %v8565_v58 }
0x2c7c   :  { %8732 = vmatmul.f32.vlgmr.msra.gmra.mxu0 %v8518_v59  ;;  %8761 = vmatmul.f32.vlgmr.msra.gmra.mxu1 %v8519_v44  ;;  %v8016_v59 = vperm.slane %v15044_v2, 2  ;;  %v8017_v44 = vperm.slane %v15044_v2, 3 }
0x2c7d   :  { %8963 = vmatpush.xpose.msra.mxu0 %v11505_v23  ;;  %8992 = vmatpush.xpose.msra.mxu1 %v11506_v8 }
0x2c7e   :  { %v8241_v48 = vpop.f32.mrf.mxu2  ;;  %v8270_v16 = vpop.f32.mrf.mxu3 }
0x2c7f   :  { %v8242_v42 = vadd.f32 %v8241_v48, %v15012_v52  ;;  %v8271_v26 = vadd.f32 %v8270_v16, %v15015_v15  ;;  %v8186_v35 = vpop.f32.mrf.mxu0  ;;  %v8215_v46 = vpop.f32.mrf.mxu1 }
0x2c80   :  { %v8187_v51 = vadd.f32 %v8186_v35, %v15002_v33  ;;  %v8216_v21 = vadd.f32 %v8215_v46, %v15005_v62  ;;  %v11907_v46 = vld [vmem:[#allocation5] sm:$0xff] }
0x2c81   :  { %v8520_v28 = vmax.f32 %v8242_v42, 0.0  ;;  %v8521_v60 = vmax.f32 %v8271_v26, 0.0 }
0x2c82   :  { %v8534_v39 = vmax.f32 %v8187_v51, 0.0  ;;  %v8535_v12 = vmax.f32 %v8216_v21, 0.0 }
0x2c83   :  { %8790 = vmatmul.f32.vlgmr.msrb.gmra.mxu2 %v8520_v28  ;;  %8819 = vmatmul.f32.vlgmr.msrb.gmra.mxu3 %v8521_v60 }
0x2c84   :  { %8735 = vmatmul.f32.gmra.mxu0 %v8534_v39  ;;  %8764 = vmatmul.f32.gmra.mxu1 %v8535_v12 }
0x2c85   :  { %9021 = vmatpush.xpose.msrb.mxu2 %v11507_v40  ;;  %9050 = vmatpush.xpose.msrb.mxu3 %v11508_v29  ;;  %v11908_v40 = vld [vmem:[#allocation7] sm:$0xff] }
0x2c86   :  { %v8244_v25 = vpop.f32.mrf.mxu2  ;;  %v8273_v36 = vpop.f32.mrf.mxu3 }
0x2c87   :  { %v8245_v56 = vadd.f32 %v8244_v25, %v15012_v52  ;;  %v8274_v55 = vadd.f32 %v8273_v36, %v15015_v15  ;;  %v8189_v18 = vpop.f32.mrf.mxu0  ;;  %v8218_v63 = vpop.f32.mrf.mxu1 }
0x2c88   :  { %v8190_v31 = vadd.f32 %v8189_v18, %v15002_v33  ;;  %v8219_v5 = vadd.f32 %v8218_v63, %v15005_v62 }
0x2c89   :  { %v8536_v4 = vmax.f32 %v8245_v56, 0.0  ;;  %v8537_v27 = vmax.f32 %v8274_v55, 0.0 }
0x2c8a   :  { %v8550_v37 = vmax.f32 %v8190_v31, 0.0  ;;  %v8551_v22 = vmax.f32 %v8219_v5, 0.0 }
0x2c8b   :  { %8793 = vmatmul.f32.gmra.mxu2 %v8536_v4  ;;  %8822 = vmatmul.f32.gmra.mxu3 %v8537_v27 }
0x2c8c   :  { %8738 = vmatmul.f32.gmra.mxu0 %v8550_v37  ;;  %8767 = vmatmul.f32.gmra.mxu1 %v8551_v22 }
0x2c8e   :  { %v8247_v57 = vpop.f32.mrf.mxu2  ;;  %v8276_v7 = vpop.f32.mrf.mxu3 }
0x2c8f   :  { %v8248_v43 = vadd.f32 %v8247_v57, %v15012_v52  ;;  %v8277_v14 = vadd.f32 %v8276_v7, %v15015_v15  ;;  %v8192_v49 = vpop.f32.mrf.mxu0  ;;  %v8221_v1 = vpop.f32.mrf.mxu1 }
0x2c90   :  { %v8193_v17 = vadd.f32 %v8192_v49, %v15002_v33  ;;  %v8222_v54 = vadd.f32 %v8221_v1, %v15005_v62 }
0x2c91   :  { %v8552_v41 = vmax.f32 %v8248_v43, 0.0  ;;  %v8553_v50 = vmax.f32 %v8277_v14, 0.0 }
0x2c92   :  { %v8566_v30 = vmax.f32 %v8193_v17, 0.0  ;;  %v8567_v3 = vmax.f32 %v8222_v54, 0.0 }
0x2c93   :  { %8796 = vmatmul.f32.gmra.mxu2 %v8552_v41  ;;  %8825 = vmatmul.f32.gmra.mxu3 %v8553_v50  ;;  %v8018_v50 = vperm.slane %v15044_v2, 4 }
0x2c94   :  { %8741 = vmatmul.f32.gmra.mxu0 %v8566_v30  ;;  %8770 = vmatmul.f32.gmra.mxu1 %v8567_v3  ;;  %v8019_v30 = vperm.slane %v15044_v2, 5 }
0x2c96   :  { %v8250_v33 = vpop.f32.mrf.mxu2  ;;  %v8279_v62 = vpop.f32.mrf.mxu3 }
0x2c97   :  { %v8251_v24 = vadd.f32 %v8250_v33, %v15012_v52  ;;  %v8280_v11 = vadd.f32 %v8279_v62, %v15015_v15  ;;  %v8299_v53 = vpop.f32.mrf.mxu0  ;;  %v8328_v47 = vpop.f32.mrf.mxu1  ;;  %v11906_v52 = vld [vmem:[#allocation5 + $0x8] sm:$0xff] }
0x2c98   :  { %v8300_v32 = vadd.f32 %v8299_v53, %v15047_v10  ;;  %v8329_v9 = vadd.f32 %v8328_v47, %v15050_v61 }
0x2c99   :  { %v8568_v6 = vmax.f32 %v8251_v24, 0.0  ;;  %v8569_v13 = vmax.f32 %v8280_v11, 0.0 }
0x2c9a   :  { %v8522_v0 = vmax.f32 %v8300_v32, 0.0  ;;  %v8523_v58 = vmax.f32 %v8329_v9, 0.0 }
0x2c9b   :  { %8799 = vmatmul.f32.gmra.mxu2 %v8568_v6  ;;  %8828 = vmatmul.f32.gmra.mxu3 %v8569_v13  ;;  %v8020_v13 = vperm.slane %v15044_v2, 6 }
0x2c9c   :  { %8848 = vmatmul.f32.vlgmr.msrb.gmra.mxu0 %v8522_v0  ;;  %8877 = vmatmul.f32.vlgmr.msrb.gmra.mxu1 %v8523_v58  ;;  %v8021_v0 = vperm.slane %v15044_v2, 7 }
0x2c9d   :  { %9320 = vmatpush.msrb.mxu1 %v11906_v52 }
0x2c9e   :  { %v8357_v15 = vpop.f32.mrf.mxu2  ;;  %v8386_v48 = vpop.f32.mrf.mxu3 }
0x2c9f   :  { %v8358_v16 = vadd.f32 %v8357_v15, %v8016_v59  ;;  %v8387_v42 = vadd.f32 %v8386_v48, %v8017_v44  ;;  %v8302_v26 = vpop.f32.mrf.mxu0  ;;  %v8331_v35 = vpop.f32.mrf.mxu1  ;;  %9321 = vmatpush.msrb.mxu1 %v11907_v46 }
0x2ca0   :  { %v8303_v51 = vadd.f32 %v8302_v26, %v15047_v10  ;;  %v8332_v21 = vadd.f32 %v8331_v35, %v15050_v61 }
0x2ca1   :  { %v8524_v28 = vmax.f32 %v8358_v16, 0.0  ;;  %v8525_v60 = vmax.f32 %v8387_v42, 0.0 }
0x2ca2   :  { %v8538_v39 = vmax.f32 %v8303_v51, 0.0  ;;  %v8539_v12 = vmax.f32 %v8332_v21, 0.0 }
0x2ca3   :  { %8906 = vmatmul.f32.vlgmr.msra.gmra.mxu2 %v8524_v28  ;;  %8935 = vmatmul.f32.vlgmr.msra.gmra.mxu3 %v8525_v60 }
0x2ca4   :  { %8851 = vmatmul.f32.gmra.mxu0 %v8538_v39  ;;  %8880 = vmatmul.f32.gmra.mxu1 %v8539_v12 }
0x2ca5   :  { %9522 = vmatpush.msra.mxu2 %v11908_v40 }
0x2ca6   :  { %v8360_v23 = vpop.f32.mrf.mxu2  ;;  %v8389_v29 = vpop.f32.mrf.mxu3 }
0x2ca7   :  { %v8361_v25 = vadd.f32 %v8360_v23, %v8016_v59  ;;  %v8390_v36 = vadd.f32 %v8389_v29, %v8017_v44  ;;  %v8305_v56 = vpop.f32.mrf.mxu0  ;;  %v8334_v55 = vpop.f32.mrf.mxu1 }
0x2ca8   :  { %v8306_v18 = vadd.f32 %v8305_v56, %v15047_v10  ;;  %v8335_v63 = vadd.f32 %v8334_v55, %v15050_v61 }
0x2ca9   :  { %v8540_v31 = vmax.f32 %v8361_v25, 0.0  ;;  %v8541_v5 = vmax.f32 %v8390_v36, 0.0 }
0x2caa   :  { %v8554_v4 = vmax.f32 %v8306_v18, 0.0  ;;  %v8555_v27 = vmax.f32 %v8335_v63, 0.0 }
0x2cab   :  { %8909 = vmatmul.f32.gmra.mxu2 %v8540_v31  ;;  %8938 = vmatmul.f32.gmra.mxu3 %v8541_v5 }
0x2cac   :  { %8854 = vmatmul.f32.gmra.mxu0 %v8554_v4  ;;  %8883 = vmatmul.f32.gmra.mxu1 %v8555_v27 }
0x2cae   :  { %v8363_v8 = vpop.f32.mrf.mxu2  ;;  %v8392_v37 = vpop.f32.mrf.mxu3 }
0x2caf   :  { %v8364_v22 = vadd.f32 %v8363_v8, %v8016_v59  ;;  %v8393_v57 = vadd.f32 %v8392_v37, %v8017_v44  ;;  %v8308_v7 = vpop.f32.mrf.mxu0  ;;  %v8337_v43 = vpop.f32.mrf.mxu1 }
0x2cb0   :  { %v8309_v14 = vadd.f32 %v8308_v7, %v15047_v10  ;;  %v8338_v49 = vadd.f32 %v8337_v43, %v15050_v61 }
0x2cb1   :  { %v8556_v1 = vmax.f32 %v8364_v22, 0.0  ;;  %v8557_v17 = vmax.f32 %v8393_v57, 0.0 }
0x2cb2   :  { %v8570_v54 = vmax.f32 %v8309_v14, 0.0  ;;  %v8571_v41 = vmax.f32 %v8338_v49, 0.0 }
0x2cb3   :  { %8912 = vmatmul.f32.gmra.mxu2 %v8556_v1  ;;  %8941 = vmatmul.f32.gmra.mxu3 %v8557_v17 }
0x2cb4   :  { %8857 = vmatmul.f32.gmra.mxu0 %v8570_v54  ;;  %8886 = vmatmul.f32.gmra.mxu1 %v8571_v41 }
0x2cb6   :  { %v8366_v3 = vpop.f32.mrf.mxu2  ;;  %v8395_v33 = vpop.f32.mrf.mxu3 }
0x2cb7   :  { %v8367_v62 = vadd.f32 %v8366_v3, %v8016_v59  ;;  %v8396_v24 = vadd.f32 %v8395_v33, %v8017_v44  ;;  %v8415_v11 = vpop.f32.mrf.mxu0  ;;  %v8444_v10 = vpop.f32.mrf.mxu1 }
0x2cb8   :  { %v8416_v53 = vadd.f32 %v8415_v11, %v8018_v50  ;;  %v8445_v61 = vadd.f32 %v8444_v10, %v8019_v30 }
0x2cb9   :  { %v8572_v47 = vmax.f32 %v8367_v62, 0.0  ;;  %v8573_v32 = vmax.f32 %v8396_v24, 0.0 }
0x2cba   :  { %v8526_v9 = vmax.f32 %v8416_v53, 0.0  ;;  %v8527_v6 = vmax.f32 %v8445_v61, 0.0 }
0x2cbb   :  { %8915 = vmatmul.f32.gmra.mxu2 %v8572_v47  ;;  %8944 = vmatmul.f32.gmra.mxu3 %v8573_v32 }
0x2cbc   :  { %8964 = vmatmul.f32.vlgmr.msra.gmra.mxu0 %v8526_v9  ;;  %8993 = vmatmul.f32.vlgmr.msra.gmra.mxu1 %v8527_v6 }
0x2cbe   :  { %v8473_v58 = vpop.f32.mrf.mxu2  ;;  %v8502_v52 = vpop.f32.mrf.mxu3 }
0x2cbf   :  { %v8474_v59 = vadd.f32 %v8473_v58, %v8020_v13  ;;  %v8503_v44 = vadd.f32 %v8502_v52, %v8021_v0  ;;  %v8418_v15 = vpop.f32.mrf.mxu0  ;;  %v8447_v48 = vpop.f32.mrf.mxu1 }
0x2cc0   :  { %v8419_v16 = vadd.f32 %v8418_v15, %v8018_v50  ;;  %v8448_v42 = vadd.f32 %v8447_v48, %v8019_v30 }
0x2cc1   :  { %v8528_v26 = vmax.f32 %v8474_v59, 0.0  ;;  %v8529_v35 = vmax.f32 %v8503_v44, 0.0 }
0x2cc2   :  { %v8542_v46 = vmax.f32 %v8419_v16, 0.0  ;;  %v8543_v51 = vmax.f32 %v8448_v42, 0.0 }
0x2cc3   :  { %9022 = vmatmul.f32.vlgmr.msrb.gmra.mxu2 %v8528_v26  ;;  %9051 = vmatmul.f32.vlgmr.msrb.gmra.mxu3 %v8529_v35 }
0x2cc4   :  { %8967 = vmatmul.f32.gmra.mxu0 %v8542_v46  ;;  %8996 = vmatmul.f32.gmra.mxu1 %v8543_v51 }
0x2cc6   :  { %v8476_v21 = vpop.f32.mrf.mxu2  ;;  %v8505_v2 = vpop.f32.mrf.mxu3 }
0x2cc7   :  { %v8477_v28 = vadd.f32 %v8476_v21, %v8020_v13  ;;  %v8506_v60 = vadd.f32 %v8505_v2, %v8021_v0  ;;  %v8421_v39 = vpop.f32.mrf.mxu0  ;;  %v8450_v12 = vpop.f32.mrf.mxu1  ;;  %v11691_v2 = vld [vmem:[%s15647_s19 + $0x4] ss:$0 sm:$0xff] }
0x2cc8   :  { %v8422_v40 = vadd.f32 %v8421_v39, %v8018_v50  ;;  %v8451_v23 = vadd.f32 %v8450_v12, %v8019_v30 }
0x2cc9   :  { %v8544_v29 = vmax.f32 %v8477_v28, 0.0  ;;  %v8545_v25 = vmax.f32 %v8506_v60, 0.0 }
0x2cca   :  { %v8558_v36 = vmax.f32 %v8422_v40, 0.0  ;;  %v8559_v56 = vmax.f32 %v8451_v23, 0.0 }
0x2ccb   :  { %9025 = vmatmul.f32.gmra.mxu2 %v8544_v29  ;;  %9054 = vmatmul.f32.gmra.mxu3 %v8545_v25 }
0x2ccc   :  { %8970 = vmatmul.f32.gmra.mxu0 %v8558_v36  ;;  %8999 = vmatmul.f32.gmra.mxu1 %v8559_v56 }
0x2cce   :  { %v8479_v55 = vpop.f32.mrf.mxu2  ;;  %v8508_v18 = vpop.f32.mrf.mxu3 }
0x2ccf   :  { %v8480_v63 = vadd.f32 %v8479_v55, %v8020_v13  ;;  %v8509_v31 = vadd.f32 %v8508_v18, %v8021_v0  ;;  %v8424_v5 = vpop.f32.mrf.mxu0  ;;  %v8453_v4 = vpop.f32.mrf.mxu1 }
0x2cd0   :  { %v8425_v27 = vadd.f32 %v8424_v5, %v8018_v50  ;;  %v8454_v8 = vadd.f32 %v8453_v4, %v8019_v30 }
0x2cd1   :  { %v8560_v37 = vmax.f32 %v8480_v63, 0.0  ;;  %v8561_v22 = vmax.f32 %v8509_v31, 0.0 }
0x2cd2   :  { %v8574_v57 = vmax.f32 %v8425_v27, 0.0  ;;  %v8575_v7 = vmax.f32 %v8454_v8, 0.0 }
0x2cd3   :  { %9028 = vmatmul.f32.gmra.mxu2 %v8560_v37  ;;  %9057 = vmatmul.f32.gmra.mxu3 %v8561_v22 }
0x2cd4   :  { %8973 = vmatmul.f32.gmra.mxu0 %v8574_v57  ;;  %9002 = vmatmul.f32.gmra.mxu1 %v8575_v7 }
0x2cd6   :  { %v8482_v43 = vpop.f32.mrf.mxu2  ;;  %v8511_v14 = vpop.f32.mrf.mxu3 }
0x2cd7   :  { %v8483_v49 = vadd.f32 %v8482_v43, %v8020_v13  ;;  %v8512_v1 = vadd.f32 %v8511_v14, %v8021_v0  ;;  %v8617_v41 = vpop.f32.mrf.mxu0  ;;  %v8646_v3 = vpop.f32.mrf.mxu1 }
0x2cd8   :  { %v8618_v39 = vadd.f32 %v11691_v2, %v8617_v41 }
0x2cd9   :  { %v8576_v17 = vmax.f32 %v8483_v49, 0.0  ;;  %v8577_v54 = vmax.f32 %v8512_v1, 0.0 }
0x2cda   :  { %v8647_v23 = vadd.f32 %v8646_v3, %v8618_v39 }
0x2cdb   :  { %9031 = vmatmul.f32.gmra.mxu2 %v8576_v17  ;;  %9060 = vmatmul.f32.gmra.mxu3 %v8577_v54 }
0x2cde   :  { %v8675_v33 = vpop.f32.mrf.mxu2  ;;  %v8704_v62 = vpop.f32.mrf.mxu3 }
0x2cdf   :  { %v8676_v36 = vadd.f32 %v8675_v33, %v8647_v23 }
0x2ce1   :  { %v8620_v50 = vpop.f32.mrf.mxu0  ;;  %v8649_v30 = vpop.f32.mrf.mxu1  ;;  %v8705_v63 = vadd.f32 %v8704_v62, %v8676_v36 }
0x2ce2   :  { %v8621_v56 = vadd.f32 %v11691_v2, %v8620_v50 }
0x2ce4   :  { %v8650_v31 = vadd.f32 %v8649_v30, %v8621_v56 }
0x2ce9   :  { %v8623_v24 = vpop.f32.mrf.mxu0  ;;  %v8652_v11 = vpop.f32.mrf.mxu1 }
0x2cea   :  { %v8624_v37 = vadd.f32 %v11691_v2, %v8623_v24 }
0x2cec   :  { %v8653_v49 = vadd.f32 %v8652_v11, %v8624_v37 }
0x2cee   :  { %v8678_v10 = vpop.f32.mrf.mxu2  ;;  %v8707_v53 = vpop.f32.mrf.mxu3 }
0x2cef   :  { %v8679_v8 = vadd.f32 %v8678_v10, %v8650_v31 }
0x2cf1   :  { %v8626_v61 = vpop.f32.mrf.mxu0  ;;  %v8655_v47 = vpop.f32.mrf.mxu1  ;;  %v8708_v43 = vadd.f32 %v8707_v53, %v8679_v8 }
0x2cf2   :  { %v8627_v50 = vadd.f32 %v11691_v2, %v8626_v61 }
0x2cf4   :  { %v8656_v10 = vadd.f32 %v8655_v47, %v8627_v50 }
0x2cf6   :  { %v8681_v32 = vpop.f32.mrf.mxu2  ;;  %v8710_v9 = vpop.f32.mrf.mxu3 }
0x2cf7   :  { %v8682_v54 = vadd.f32 %v8681_v32, %v8653_v49 }
0x2cf9   :  { %v8733_v6 = vpop.f32.mrf.mxu0  ;;  %v8762_v13 = vpop.f32.mrf.mxu1  ;;  %v8711_v39 = vadd.f32 %v8710_v9, %v8682_v54 }
0x2cfa   :  { %v8734_v5 = vadd.f32 %v8733_v6, %v8705_v63 }
0x2cfc   :  { %v8763_v22 = vadd.f32 %v8762_v13, %v8734_v5 }
0x2cfe   :  { %v8684_v0 = vpop.f32.mrf.mxu2  ;;  %v15068_v58 = vpop.f32.mrf.mxu3 }
0x2cff   :  { %v8685_v56 = vadd.f32 %v8684_v0, %v8656_v10 }
0x2d01   :  { %v8736_v52 = vpop.f32.mrf.mxu0  ;;  %v8765_v59 = vpop.f32.mrf.mxu1  ;;  %v8714_v61 = vadd.f32 %v15068_v58, %v8685_v56 }
0x2d02   :  { %v8737_v1 = vadd.f32 %v8736_v52, %v8708_v43 }
0x2d04   :  { %v8766_v33 = vadd.f32 %v8765_v59, %v8737_v1 }
0x2d06   :  { %v8791_v44 = vpop.f32.mrf.mxu2  ;;  %v8820_v15 = vpop.f32.mrf.mxu3 }
0x2d07   :  { %v8792_v14 = vadd.f32 %v8791_v44, %v8763_v22 }
0x2d09   :  { %v8739_v48 = vpop.f32.mrf.mxu0  ;;  %v8768_v16 = vpop.f32.mrf.mxu1  ;;  %v8821_v41 = vadd.f32 %v8820_v15, %v8792_v14 }
0x2d0a   :  { %v8740_v24 = vadd.f32 %v8739_v48, %v8711_v39 }
0x2d0c   :  { %v8769_v11 = vadd.f32 %v8768_v16, %v8740_v24 }
0x2d0e   :  { %v8794_v42 = vpop.f32.mrf.mxu2  ;;  %v8823_v26 = vpop.f32.mrf.mxu3 }
0x2d0f   :  { %v8795_v23 = vadd.f32 %v8794_v42, %v8766_v33 }
0x2d11   :  { %v8742_v35 = vpop.f32.mrf.mxu0  ;;  %v8771_v46 = vpop.f32.mrf.mxu1  ;;  %v8824_v53 = vadd.f32 %v8823_v26, %v8795_v23 }
0x2d16   :  { %v8797_v51 = vpop.f32.mrf.mxu2  ;;  %v8826_v21 = vpop.f32.mrf.mxu3 }
0x2d17   :  { %v8798_v59 = vadd.f32 %v8797_v51, %v8769_v11 }
0x2d19   :  { %v8849_v28 = vpop.f32.mrf.mxu0  ;;  %v8878_v60 = vpop.f32.mrf.mxu1  ;;  %v8827_v47 = vadd.f32 %v8826_v21, %v8798_v59 }
0x2d1a   :  { %v8850_v62 = vadd.f32 %v8849_v28, %v8821_v41  ;;  %v8743_v28 = vadd.f32 %v8742_v35, %v8714_v61 }
0x2d1c   :  { %v8879_v13 = vadd.f32 %v8878_v60, %v8850_v62  ;;  %v8772_v60 = vadd.f32 %v8771_v46, %v8743_v28 }
0x2d1e   :  { %v8800_v12 = vpop.f32.mrf.mxu2  ;;  %v15073_v40 = vpop.f32.mrf.mxu3 }
0x2d1f   :  { %v8801_v16 = vadd.f32 %v8800_v12, %v8772_v60 }
0x2d21   :  { %v8852_v29 = vpop.f32.mrf.mxu0  ;;  %v8881_v25 = vpop.f32.mrf.mxu1  ;;  %v8830_v51 = vadd.f32 %v15073_v40, %v8801_v16 }
0x2d22   :  { %v8853_v52 = vadd.f32 %v8852_v29, %v8824_v53 }
0x2d24   :  { %v8882_v31 = vadd.f32 %v8881_v25, %v8853_v52 }
0x2d26   :  { %v8907_v55 = vpop.f32.mrf.mxu2  ;;  %v8936_v18 = vpop.f32.mrf.mxu3 }
0x2d27   :  { %v8908_v44 = vadd.f32 %v8907_v55, %v8879_v13 }
0x2d29   :  { %v8855_v4 = vpop.f32.mrf.mxu0  ;;  %v8884_v27 = vpop.f32.mrf.mxu1  ;;  %v8937_v2 = vadd.f32 %v8936_v18, %v8908_v44 }
0x2d2a   :  { %v8856_v5 = vadd.f32 %v8855_v4, %v8827_v47 }
0x2d2c   :  { %v8885_v22 = vadd.f32 %v8884_v27, %v8856_v5 }
0x2d2e   :  { %v8910_v57 = vpop.f32.mrf.mxu2  ;;  %v8939_v7 = vpop.f32.mrf.mxu3 }
0x2d2f   :  { %v8911_v48 = vadd.f32 %v8910_v57, %v8882_v31 }
0x2d31   :  { %v8858_v17 = vpop.f32.mrf.mxu0  ;;  %v8887_v3 = vpop.f32.mrf.mxu1  ;;  %v8940_v29 = vadd.f32 %v8939_v7, %v8911_v48 }
0x2d32   :  { %v8859_v21 = vadd.f32 %v8858_v17, %v8830_v51 }
0x2d34   :  { %v8888_v49 = vadd.f32 %v8887_v3, %v8859_v21 }
0x2d36   :  { %v8913_v30 = vpop.f32.mrf.mxu2  ;;  %v8942_v6 = vpop.f32.mrf.mxu3 }
0x2d37   :  { %v8914_v35 = vadd.f32 %v8913_v30, %v8885_v22 }
0x2d39   :  { %v8965_v36 = vpop.f32.mrf.mxu0  ;;  %v8994_v63 = vpop.f32.mrf.mxu1  ;;  %v8943_v12 = vadd.f32 %v8942_v6, %v8914_v35 }
0x2d3a   :  { %v8966_v9 = vadd.f32 %v8965_v36, %v8937_v2 }
0x2d3c   :  { %v8995_v0 = vadd.f32 %v8994_v63, %v8966_v9  ;;  %v11510_v63 = vld [vmem:[%s15638_s10 + $0x28] sm:$0xff] }
0x2d3d   :  { %9208 = vmatpush.msrb.mxu0 %v11510_v63 }
0x2d3e   :  { %v8916_v32 = vpop.f32.mrf.mxu2  ;;  %v8945_v15 = vpop.f32.mrf.mxu3 }
0x2d3f   :  { %v8917_v41 = vadd.f32 %v8916_v32, %v8888_v49  ;;  %v11692_v49 = vld [vmem:[#allocation8 + $0x4] ss:$0 sm:$0xff] }
0x2d41   :  { %v8968_v42 = vpop.f32.mrf.mxu0  ;;  %v8997_v37 = vpop.f32.mrf.mxu1  ;;  %v8946_v30 = vadd.f32 %v8945_v15, %v8917_v41 }
0x2d42   :  { %v8969_v43 = vadd.f32 %v8968_v42, %v8940_v29 }
0x2d44   :  { %v8998_v57 = vadd.f32 %v8997_v37, %v8969_v43 }
0x2d46   :  { %v9023_v26 = vpop.f32.mrf.mxu2  ;;  %v9052_v55 = vpop.f32.mrf.mxu3 }
0x2d47   :  { %v9024_v8 = vadd.f32 %v9023_v26, %v8995_v0 }
0x2d49   :  { %v9053_v58 = vadd.f32 %v9052_v55, %v9024_v8  ;;  %v8971_v25 = vpop.f32.mrf.mxu0  ;;  %v9000_v54 = vpop.f32.mrf.mxu1 }
0x2d4a   :  { %v8972_v1 = vadd.f32 %v8971_v25, %v8943_v12 }
0x2d4b   :  { %v9064_v18 = vadd.f32 %v9053_v58, %v14762_v34 }
0x2d4c   :  { %v9001_v50 = vadd.f32 %v9000_v54, %v8972_v1  ;;  %v11693_v54 = vld [vmem:[#allocation10 + $0x4] ss:$0 sm:$0xff] }
0x2d4d   :  { %v9072_v46 = vsel %vm390_vm7, %v9064_v18, 0.0 }
0x2d4e   :  { %v9026_v4 = vpop.f32.mrf.mxu2  ;;  %v9055_v14 = vpop.f32.mrf.mxu3  ;;  %9073 = vadd.xlane.f32.xlu1 %v9072_v46 }
0x2d4f   :  { %v9027_v7 = vadd.f32 %v9026_v4, %v8998_v57 }
0x2d51   :  { %v9056_v27 = vadd.f32 %v9055_v14, %v9027_v7  ;;  %v8974_v33 = vpop.f32.mrf.mxu0  ;;  %v9003_v3 = vpop.f32.mrf.mxu1 }
0x2d52   :  { %v8975_v23 = vadd.f32 %v8974_v33, %v8946_v30 }
0x2d53   :  { %v9065_v40 = vadd.f32 %v9056_v27, %v14796_v38 }
0x2d54   :  { %v9004_v24 = vadd.f32 %v9003_v3, %v8975_v23 }
0x2d55   :  { %v9075_v34 = vsel %vm390_vm7, %v9065_v40, 0.0 }
0x2d56   :  { %v9029_v17 = vpop.f32.mrf.mxu2  ;;  %v9058_v62 = vpop.f32.mrf.mxu3  ;;  %9076 = vadd.xlane.f32.xlu0 %v9075_v34 }
0x2d57   :  { %v9030_v39 = vadd.f32 %v9029_v17, %v9001_v50 }
0x2d59   :  { %v9059_v10 = vadd.f32 %v9058_v62, %v9030_v39 }
0x2d5b   :  { %v9066_v6 = vadd.f32 %v9059_v10, %v14815_v20 }
0x2d5d   :  { %v9078_v13 = vsel %vm390_vm7, %v9066_v6, 0.0 }
0x2d5e   :  { %v9032_v36 = vpop.f32.mrf.mxu2  ;;  %9079 = vadd.xlane.f32.xlu2 %v9078_v13  ;;  %v9061_v56 = vpop.f32.mrf.mxu3 }
0x2d5f   :  { %v9033_v38 = vadd.f32 %v9032_v36, %v9004_v24 }
0x2d61   :  { %v9062_v53 = vadd.f32 %v9061_v56, %v9033_v38 }
0x2d63   :  { %v9067_v44 = vadd.f32 %v9062_v53, %v14828_v19 }
0x2d65   :  { %v9081_v11 = vsel %vm390_vm7, %v9067_v44, 0.0 }
0x2d66   :  { %9082 = vadd.xlane.f32.xlu1 %v9081_v11 }
0x2dc1   :  { %v9074_v52 = vpop.xlane.xlu1 %9073 }
0x2dc2   :  { %v9084_v20 = vmul.f32 %v9074_v52, %v12588_v45 }
0x2dc4   :  { %v9088_v32 = vsub.f32 %v9064_v18, %v9084_v20 }
0x2dc6   :  { %v9092_v15 = vmul.f32 %v9088_v32, %v9088_v32 }
0x2dc8   :  { %v9096_v61 = vsel %vm390_vm7, %v9092_v15, 0.0 }
0x2dc9   :  { %v9077_v59 = vpop.xlane.xlu0 %9076  ;;  %9097 = vadd.xlane.f32.xlu0 %v9096_v61 }
0x2dca   :  { %v9085_v2 = vmul.f32 %v9077_v59, %v12588_v45 }
0x2dcc   :  { %v9089_v19 = vsub.f32 %v9065_v40, %v9085_v2 }
0x2dce   :  { %v9093_v28 = vmul.f32 %v9089_v19, %v9089_v19 }
0x2dd0   :  { %v9099_v31 = vsel %vm390_vm7, %v9093_v28, 0.0 }
0x2dd1   :  { %v9080_v9 = vpop.xlane.xlu2 %9079  ;;  %9100 = vadd.xlane.f32.xlu2 %v9099_v31 }
0x2dd2   :  { %v9086_v42 = vmul.f32 %v9080_v9, %v12588_v45 }
0x2dd4   :  { %v15093_v47 = vsub.f32 %v9066_v6, %v9086_v42  ;;  %v11694_v42 = vld [vmem:[%s15639_s11 + $0x5] ss:$0 sm:$0xff] }
0x2dd6   :  { %v9094_v48 = vmul.f32 %v15093_v47, %v15093_v47 }
0x2dd8   :  { %v9102_v60 = vsel %vm390_vm7, %v9094_v48, 0.0 }
0x2dd9   :  { %9103 = vadd.xlane.f32.xlu1 %v9102_v60  ;;  %v9083_v5 = vpop.xlane.xlu1 %9082 }
0x2dda   :  { %v9087_v0 = vmul.f32 %v9083_v5, %v12588_v45 }
0x2ddc   :  { %v15099_v26 = vsub.f32 %v9067_v44, %v9087_v0 }
0x2dde   :  { %v9095_v55 = vmul.f32 %v15099_v26, %v15099_v26 }
0x2de0   :  { %v9105_v16 = vsel %vm390_vm7, %v9095_v55, 0.0 }
0x2de1   :  { %9106 = vadd.xlane.f32.xlu0 %v9105_v16 }
0x2e3c   :  { %v9098_v29 = vpop.xlane.xlu0 %9097 }
0x2e3d   :  { %v9108_v8 = vmul.f32 %v9098_v29, %v12588_v45 }
0x2e3f   :  { %v9112_v37 = vadd.f32 1e-05, %v9108_v8 }
0x2e41   :  { %11855 = vrsqrt.f32 %v9112_v37  ;;  %vm9122_vm11 = vweird.f32 %v9112_v37 }
0x2e44   :  { %v9101_v22 = vpop.xlane.xlu2 %9100 }
0x2e45   :  { %v9109_v43 = vmul.f32 %v9101_v22, %v12588_v45 }
0x2e47   :  { %v11856_v58 = vpop.eup %11855  ;;  %v9113_v51 = vadd.f32 1e-05, %v9109_v43 }
0x2e48   :  { %v9117_v35 = vmul.f32 %v11856_v58, %v9112_v37  ;;  %vm9123_vm10 = vweird.f32 %v11856_v58 }
0x2e49   :  { %11857 = vrsqrt.f32 %v9113_v51  ;;  %vm9124_vm12 = vmor %vm9122_vm11, %vm9123_vm10  ;;  %vm9132_vm14 = vweird.f32 %v9113_v51 }
0x2e4a   :  { %v9118_v25 = vmul.f32 %v11856_v58, %v9117_v35 }
0x2e4c   :  { %v9119_v18 = vmul.f32 0.5, %v9118_v25  ;;  %v9104_v21 = vpop.xlane.xlu1 %9103 }
0x2e4d   :  { %v9110_v57 = vmul.f32 %v9104_v21, %v12588_v45 }
0x2e4e   :  { %v9120_v46 = vsub.f32 1.5, %v9119_v18 }
0x2e4f   :  { %v11858_v4 = vpop.eup %11857  ;;  %v9114_v14 = vadd.f32 1e-05, %v9110_v57 }
0x2e50   :  { %v9121_v12 = vmul.f32 %v11856_v58, %v9120_v46  ;;  %v9127_v7 = vmul.f32 %v11858_v4, %v9113_v51  ;;  %vm9133_vm13 = vweird.f32 %v11858_v4 }
0x2e51   :  { %11859 = vrsqrt.f32 %v9114_v14  ;;  %vm9134_vm15 = vmor %vm9132_vm14, %vm9133_vm13  ;;  %vm9142_vm2 = vweird.f32 %v9114_v14 }
0x2e52   :  { %v9125_v1 = vsel %vm9124_vm12, %v11856_v58, %v9121_v12  ;;  %v9128_v27 = vmul.f32 %v11858_v4, %v9127_v7 }
0x2e53   :  { %v9156_v41 = vmul.f32 %v9125_v1, %v9088_v32 }
0x2e54   :  { %v9129_v40 = vmul.f32 0.5, %v9128_v27  ;;  %v9107_v50 = vpop.xlane.xlu0 %9106 }
0x2e55   :  { %v9163_v33 = vmul.f32 %v11692_v49, %v9156_v41  ;;  %v9111_v34 = vmul.f32 %v9107_v50, %v12588_v45 }
0x2e56   :  { %v9130_v17 = vsub.f32 1.5, %v9129_v40 }
0x2e57   :  { %v11860_v62 = vpop.eup %11859  ;;  %v15108_v30 = vadd.f32 %v11693_v54, %v9163_v33  ;;  %v9115_v39 = vadd.f32 1e-05, %v9111_v34 }
0x2e58   :  { %v9131_v23 = vmul.f32 %v11858_v4, %v9130_v17  ;;  %v9137_v10 = vmul.f32 %v11860_v62, %v9114_v14  ;;  %vm9143_vm1 = vweird.f32 %v11860_v62 }
0x2e59   :  { %11861 = vrsqrt.f32 %v9115_v39  ;;  %11512 = vmatmul.msk.f32.vlgmr.msrb.gmra.mxu0 %vm390_vm7, %v15108_v30  ;;  %vm9144_vm3 = vmor %vm9142_vm2, %vm9143_vm1  ;;  %vm9152_vm5 = vweird.f32 %v9115_v39 }
0x2e5a   :  { %v9135_v6 = vsel %vm9134_vm15, %v11858_v4, %v9131_v23  ;;  %v9138_v3 = vmul.f32 %v11860_v62, %v9137_v10 }
0x2e5b   :  { %v9157_v24 = vmul.f32 %v9135_v6, %v9089_v19 }
0x2e5c   :  { %v9139_v13 = vmul.f32 0.5, %v9138_v3 }
0x2e5d   :  { %v9164_v36 = vmul.f32 %v11692_v49, %v9157_v24 }
0x2e5e   :  { %v9140_v38 = vsub.f32 1.5, %v9139_v13 }
0x2e5f   :  { %v11862_v56 = vpop.eup %11861  ;;  %v15112_v53 = vadd.f32 %v11693_v54, %v9164_v36 }
0x2e60   :  { %v9141_v44 = vmul.f32 %v11860_v62, %v9140_v38  ;;  %v9147_v11 = vmul.f32 %v11862_v56, %v9115_v39  ;;  %vm9153_vm4 = vweird.f32 %v11862_v56 }
0x2e61   :  { %11513 = vmatmul.msk.f32.gmra.mxu0 %vm390_vm7, %v15112_v53  ;;  %vm9154_vm6 = vmor %vm9152_vm5, %vm9153_vm4 }
0x2e62   :  { %v9145_v52 = vsel %vm9144_vm3, %v11860_v62, %v9141_v44  ;;  %v9148_v63 = vmul.f32 %v11862_v56, %v9147_v11 }
0x2e63   :  { %v9158_v20 = vmul.f32 %v9145_v52, %v15093_v47 }
0x2e64   :  { %v9149_v32 = vmul.f32 0.5, %v9148_v63 }
0x2e65   :  { %v9165_v15 = vmul.f32 %v11692_v49, %v9158_v20 }
0x2e66   :  { %v9150_v61 = vsub.f32 1.5, %v9149_v32 }
0x2e67   :  { %v15117_v59 = vadd.f32 %v11693_v54, %v9165_v15 }
0x2e68   :  { %v9151_v2 = vmul.f32 %v11862_v56, %v9150_v61 }
0x2e69   :  { %11514 = vmatmul.msk.f32.gmra.mxu0 %vm390_vm7, %v15117_v59 }
0x2e6a   :  { %v9155_v19 = vsel %vm9154_vm6, %v11862_v56, %v9151_v2 }
0x2e6b   :  { %v9159_v28 = vmul.f32 %v9155_v19, %v15099_v26 }
0x2e6d   :  { %v9166_v31 = vmul.f32 %v11692_v49, %v9159_v28 }
0x2e6f   :  { %v15122_v9 = vadd.f32 %v11693_v54, %v9166_v31 }
0x2e71   :  { %11515 = vmatmul.msk.f32.gmra.mxu0 %vm390_vm7, %v15122_v9 }
0x2ed6   :  { %v9210_v47 = vpop.f32.mrf.mxu0 }
0x2ed7   :  { %v15129_v48 = vadd.f32 %v11694_v42, %v9210_v47 }
0x2ed9   :  { %9226 = vrot.lane.b32.xlu0 %v15129_v48, %s12076_s4 }
0x2ede   :  { %v9213_v60 = vpop.f32.mrf.mxu0 }
0x2edf   :  { %v15137_v55 = vadd.f32 %v11694_v42, %v9213_v60 }
0x2ee6   :  { %v9216_v5 = vpop.f32.mrf.mxu0 }
0x2ee7   :  { %v15133_v0 = vadd.f32 %v11694_v42, %v9216_v5 }
0x2ee9   :  { %9230 = vrot.lane.b32.xlu2 %v15133_v0, %s12076_s4 }
0x2eee   :  { %v9219_v26 = vpop.f32.mrf.mxu0 }
0x2eef   :  { %v15139_v16 = vadd.f32 %v11694_v42, %v9219_v26 }
0x2ef1   :  { %9232 = vrot.lane.b32.xlu1 %v15139_v16, %s12076_s4  ;;  %9228 = vrot.lane.b32.xlu2 %v15137_v55, %s12076_s4 }
0x2f43   :  { %v9231_v29 = vpop.permute.xlu2 %9230 }
0x2f44   :  { %v9242_v8 = vmul.f32 %v9231_v29, %v15129_v48  ;;  %v9240_v12 = vmul.f32 %v9231_v29, %v15133_v0 }
0x2f46   :  { %9258 = vrot.lane.b32.xlu0 %v9242_v8, %s12063_s24 }
0x2f4b   :  { %v9227_v37 = vpop.permute.xlu0 %9226  ;;  %v9229_v22 = vpop.permute.xlu2 %9228 }
0x2f4c   :  { %v9244_v43 = vmul.f32 %v9227_v37, %v15133_v0  ;;  %v9245_v58 = vmul.f32 %v9229_v22, %v15139_v16  ;;  %v9238_v25 = vmul.f32 %v9227_v37, %v15129_v48  ;;  %v9239_v57 = vmul.f32 %v9229_v22, %v15137_v55 }
0x2f4e   :  { %9264 = vrot.lane.b32.xlu0 %v9245_v58, %s12063_s24  ;;  %9262 = vrot.lane.b32.xlu2 %v9244_v43, %s12063_s24 }
0x2f63   :  { %v9233_v51 = vpop.permute.xlu1 %9232 }
0x2f64   :  { %v9243_v35 = vmul.f32 %v9233_v51, %v15137_v55  ;;  %v9241_v1 = vmul.f32 %v9233_v51, %v15139_v16 }
0x2f66   :  { %9260 = vrot.lane.b32.xlu1 %v9243_v35, %s12063_s24 }
0x2fa8   :  { %v9263_v14 = vpop.permute.xlu2 %9262 }
0x2fa9   :  { %v9272_v7 = vsel %vm390_vm7, %v9240_v12, %v9263_v14 }
0x2fb8   :  { %v9259_v18 = vpop.permute.xlu0 %9258 }
0x2fb9   :  { %v9270_v21 = vsel %vm390_vm7, %v9238_v25, %v9259_v18 }
0x2fba   :  { %11516 = vmatmul.msk.f32.vlgmr.msrb.gmra.mxu1 %vm395_vm8, %v9270_v21 }
0x2fc0   :  { %v9265_v49 = vpop.permute.xlu0 %9264 }
0x2fc1   :  { %v9273_v27 = vsel %vm390_vm7, %v9241_v1, %v9265_v49 }
0x2fd8   :  { %v9261_v46 = vpop.permute.xlu1 %9260 }
0x2fd9   :  { %v9271_v4 = vsel %vm390_vm7, %v9239_v57, %v9261_v46 }
0x2fda   :  { %11517 = vmatmul.msk.f32.gmra.mxu1 %vm395_vm8, %v9271_v4 }
0x2fe2   :  { %11518 = vmatmul.msk.f32.gmra.mxu1 %vm395_vm8, %v9272_v7 }
0x2fea   :  { %11519 = vmatmul.msk.f32.gmra.mxu1 %vm395_vm8, %v9273_v27 }
0x3037   :  { %v9323_v54 = vpop.f32.mrf.mxu1 }
0x3038   :  { %v9335_v41 = vmul.f32 0.70710677, %v9323_v54 }
0x303a   :  { %9343 = vrot.lane.b32.xlu1 %v9335_v41, %s12077_s6 }
0x3057   :  { %v9326_v40 = vpop.f32.mrf.mxu1 }
0x3058   :  { %v9336_v50 = vmul.f32 0.70710677, %v9326_v40 }
0x305a   :  { %9345 = vrot.lane.b32.xlu2 %v9336_v50, %s12077_s6 }
0x305f   :  { %v9329_v33 = vpop.f32.mrf.mxu1 }
0x3060   :  { %v9337_v34 = vmul.f32 0.70710677, %v9329_v33 }
0x3062   :  { %9347 = vrot.lane.b32.xlu0 %v9337_v34, %s12077_s6 }
0x3067   :  { %v9332_v17 = vpop.f32.mrf.mxu1 }
0x3068   :  { %v9338_v62 = vmul.f32 0.70710677, %v9332_v17 }
0x306a   :  { %9349 = vrot.lane.b32.xlu1 %v9338_v62, %s12077_s6 }
0x30ac   :  { %v9344_v39 = vpop.permute.xlu1 %9343 }
0x30ad   :  { %v9355_v23 = vmax.f32 %v9335_v41, %v9344_v39 }
0x30af   :  { %9363 = vrot.lane.b32.xlu2 %v9355_v23, %s12078_s1 }
0x30b4   :  { %v9346_v10 = vpop.permute.xlu2 %9345 }
0x30b5   :  { %v9356_v6 = vmax.f32 %v9336_v50, %v9346_v10 }
0x30b7   :  { %9365 = vrot.lane.b32.xlu0 %v9356_v6, %s12078_s1 }
0x30d4   :  { %v9348_v3 = vpop.permute.xlu0 %9347 }
0x30d5   :  { %v9357_v24 = vmax.f32 %v9337_v34, %v9348_v3 }
0x30d7   :  { %9367 = vrot.lane.b32.xlu1 %v9357_v24, %s12078_s1 }
0x30dc   :  { %v9350_v13 = vpop.permute.xlu1 %9349 }
0x30dd   :  { %v9358_v36 = vmax.f32 %v9338_v62, %v9350_v13 }
0x30df   :  { %9369 = vrot.lane.b32.xlu2 %v9358_v36, %s12078_s1 }
0x3109   :  { %v9364_v38 = vpop.permute.xlu2 %9363 }
0x310a   :  { %v9375_v56 = vsel %vm707_vm0, %v9355_v23, %v9364_v38 }
0x310b   :  { %v9379_v44 = vsub.f32 %v9335_v41, %v9375_v56 }
0x310d   :  { %v9383_v11 = vmul.f32 1.442695, %v9379_v44 }
0x310f   :  { %11863 = vpow2.f32 %v9383_v11 }
0x3115   :  { %v15174_v52 = vpop.eup %11863 }
0x3116   :  { %9395 = vrot.lane.b32.xlu0 %v15174_v52, %s12077_s6 }
0x3129   :  { %v9366_v63 = vpop.permute.xlu0 %9365 }
0x312a   :  { %v9376_v20 = vsel %vm707_vm0, %v9356_v6, %v9366_v63 }
0x312b   :  { %v9380_v32 = vsub.f32 %v9336_v50, %v9376_v20 }
0x312d   :  { %v9385_v15 = vmul.f32 1.442695, %v9380_v32 }
0x312f   :  { %11865 = vpow2.f32 %v9385_v15 }
0x3135   :  { %v15179_v61 = vpop.eup %11865 }
0x3136   :  { %9397 = vrot.lane.b32.xlu1 %v15179_v61, %s12077_s6 }
0x3139   :  { %v9370_v2 = vpop.permute.xlu2 %9369 }
0x313a   :  { %v9378_v19 = vsel %vm707_vm0, %v9358_v36, %v9370_v2 }
0x313b   :  { %v9382_v28 = vsub.f32 %v9338_v62, %v9378_v19 }
0x313d   :  { %v9389_v31 = vmul.f32 1.442695, %v9382_v28 }
0x313f   :  { %11867 = vpow2.f32 %v9389_v31 }
0x3145   :  { %v15184_v42 = vpop.eup %11867 }
0x3146   :  { %9401 = vrot.lane.b32.xlu0 %v15184_v42, %s12077_s6 }
0x3149   :  { %v9368_v47 = vpop.permute.xlu1 %9367 }
0x314a   :  { %v9377_v60 = vsel %vm707_vm0, %v9357_v24, %v9368_v47 }
0x314b   :  { %v9381_v5 = vsub.f32 %v9337_v34, %v9377_v60 }
0x314d   :  { %v9387_v26 = vmul.f32 1.442695, %v9381_v5 }
0x314f   :  { %11869 = vpow2.f32 %v9387_v26 }
0x3155   :  { %v15189_v29 = vpop.eup %11869 }
0x3156   :  { %9399 = vrot.lane.b32.xlu2 %v15189_v29, %s12077_s6 }
0x3188   :  { %v9396_v8 = vpop.permute.xlu0 %9395 }
0x3189   :  { %v9407_v37 = vadd.f32 %v15174_v52, %v9396_v8 }
0x318b   :  { %11871 = vrcp.f32 %v9407_v37  ;;  %v9422_v51 = vand.u32 2147483648, %v9407_v37  ;;  %v9420_v25 = vand.u32 2147483647, %v9407_v37  ;;  %vm9416_vm9 = vweird.f32 %v9407_v37 }
0x318d   :  { %v9423_v21 = vor.u32 1.1754944e-38, %v9422_v51  ;;  %vm9421_vm11 = vcmp.eq.f32.partialorder %v9420_v25, 8.507059e+37 }
0x3191   :  { %v11872_v22 = vpop.eup %11871 }
0x3192   :  { %v9412_v43 = vmul.f32 %v11872_v22, %v9407_v37  ;;  %vm9417_vm8 = vweird.f32 %v11872_v22 }
0x3193   :  { %vm9418_vm10 = vmor %vm9416_vm9, %vm9417_vm8 }
0x3194   :  { %v9413_v58 = vsub.f32 1.0, %v9412_v43 }
0x3196   :  { %v9414_v35 = vmul.f32 %v11872_v22, %v9413_v58 }
0x3198   :  { %v9415_v18 = vadd.f32 %v11872_v22, %v9414_v35 }
0x319a   :  { %v9419_v57 = vsel %vm9418_vm10, %v11872_v22, %v9415_v18 }
0x319b   :  { %v9424_v46 = vsel %vm9421_vm11, %v9423_v21, %v9419_v57  ;;  %v11524_v57 = vld [vmem:[%s15640_s12 + $0x28] sm:$0xff] }
0x319c   :  { %9475 = vrot.lane.b32.xlu1 %v9424_v46, %s12078_s1  ;;  %9594 = vmatpush.msra.mxu3 %v11524_v57 }
0x31a8   :  { %v9398_v4 = vpop.permute.xlu1 %9397 }
0x31a9   :  { %v9408_v14 = vadd.f32 %v15179_v61, %v9398_v4 }
0x31ab   :  { %11873 = vrcp.f32 %v9408_v14  ;;  %v9437_v54 = vand.u32 2147483648, %v9408_v14  ;;  %v9435_v40 = vand.u32 2147483647, %v9408_v14  ;;  %vm9431_vm13 = vweird.f32 %v9408_v14 }
0x31ad   :  { %v9438_v62 = vor.u32 1.1754944e-38, %v9437_v54  ;;  %vm9436_vm15 = vcmp.eq.f32.partialorder %v9435_v40, 8.507059e+37 }
0x31b0   :  { %v9400_v12 = vpop.permute.xlu2 %9399 }
0x31b1   :  { %v11874_v7 = vpop.eup %11873  ;;  %v9409_v49 = vadd.f32 %v15189_v29, %v9400_v12 }
0x31b2   :  { %v9427_v1 = vmul.f32 %v11874_v7, %v9408_v14  ;;  %vm9432_vm12 = vweird.f32 %v11874_v7 }
0x31b3   :  { %11875 = vrcp.f32 %v9409_v49  ;;  %vm9433_vm14 = vmor %vm9431_vm13, %vm9432_vm12  ;;  %v9452_v3 = vand.u32 2147483648, %v9409_v49  ;;  %v9450_v13 = vand.u32 2147483647, %v9409_v49  ;;  %vm9446_vm2 = vweird.f32 %v9409_v49 }
0x31b4   :  { %v9428_v27 = vsub.f32 1.0, %v9427_v1 }
0x31b5   :  { %v9453_v56 = vor.u32 1.1754944e-38, %v9452_v3  ;;  %vm9451_vm4 = vcmp.eq.f32.partialorder %v9450_v13, 8.507059e+37 }
0x31b6   :  { %v9429_v41 = vmul.f32 %v11874_v7, %v9428_v27 }
0x31b8   :  { %v9402_v50 = vpop.permute.xlu0 %9401  ;;  %v9430_v33 = vadd.f32 %v11874_v7, %v9429_v41 }
0x31b9   :  { %v11876_v34 = vpop.eup %11875  ;;  %v9410_v17 = vadd.f32 %v15184_v42, %v9402_v50 }
0x31ba   :  { %v9442_v39 = vmul.f32 %v11876_v34, %v9409_v49  ;;  %v9434_v23 = vsel %vm9433_vm14, %v11874_v7, %v9430_v33  ;;  %vm9447_vm1 = vweird.f32 %v11876_v34 }
0x31bb   :  { %11877 = vrcp.f32 %v9410_v17  ;;  %v9439_v10 = vsel %vm9436_vm15, %v9438_v62, %v9434_v23  ;;  %vm9448_vm3 = vmor %vm9446_vm2, %vm9447_vm1  ;;  %v9467_v32 = vand.u32 2147483648, %v9410_v17  ;;  %v9465_v2 = vand.u32 2147483647, %v9410_v17 }
0x31bc   :  { %v9443_v6 = vsub.f32 1.0, %v9442_v39  ;;  %9477 = vrot.lane.b32.xlu2 %v9439_v10, %s12078_s1  ;;  %vm9461_vm6 = vweird.f32 %v9410_v17 }
0x31bd   :  { %v9468_v28 = vor.u32 1.1754944e-38, %v9467_v32  ;;  %vm9466_vm9 = vcmp.eq.f32.partialorder %v9465_v2, 8.507059e+37 }
0x31be   :  { %v9444_v24 = vmul.f32 %v11876_v34, %v9443_v6  ;;  %v11695_v6 = vld [vmem:[%s15641_s13 + $0x5] ss:$0 sm:$0xff] }
0x31c0   :  { %v9445_v36 = vadd.f32 %v11876_v34, %v9444_v24 }
0x31c1   :  { %v11878_v38 = vpop.eup %11877 }
0x31c2   :  { %v9457_v44 = vmul.f32 %v11878_v38, %v9410_v17  ;;  %v9449_v11 = vsel %vm9448_vm3, %v11876_v34, %v9445_v36  ;;  %vm9462_vm5 = vweird.f32 %v11878_v38 }
0x31c3   :  { %v9454_v63 = vsel %vm9451_vm4, %v9453_v56, %v9449_v11  ;;  %vm9463_vm8 = vmor %vm9461_vm6, %vm9462_vm5 }
0x31c4   :  { %v9458_v20 = vsub.f32 1.0, %v9457_v44  ;;  %9250 = vrot.lane.b32.xlu2 %v15133_v0, %s12079_s25  ;;  %9479 = vrot.lane.b32.xlu0 %v9454_v63, %s12078_s1 }
0x31c6   :  { %v9459_v15 = vmul.f32 %v11878_v38, %v9458_v20 }
0x31c8   :  { %v9460_v19 = vadd.f32 %v11878_v38, %v9459_v15 }
0x31ca   :  { %v9464_v31 = vsel %vm9463_vm8, %v11878_v38, %v9460_v19 }
0x31cb   :  { %v9469_v47 = vsel %vm9466_vm9, %v9468_v28, %v9464_v31 }
0x31cc   :  { %9248 = vrot.lane.b32.xlu2 %v15137_v55, %s12079_s25  ;;  %9481 = vrot.lane.b32.xlu1 %v9469_v47, %s12078_s1 }
0x31cd   :  { %9252 = vrot.lane.b32.xlu0 %v15139_v16, %s12079_s25 }
0x31d4   :  { %9246 = vrot.lane.b32.xlu1 %v15129_v48, %s12079_s25 }
0x320e   :  { %v9476_v0 = vpop.permute.xlu1 %9475 }
0x320f   :  { %v9487_v60 = vsel %vm707_vm0, %v9424_v46, %v9476_v0 }
0x3210   :  { %v9491_v5 = vmul.f32 %v15174_v52, %v9487_v60 }
0x3212   :  { %11520 = vmatmul.msk.f32.vlgmr.msra.gmra.mxu2 %vm390_vm7, %v9491_v5 }
0x3216   :  { %v9478_v26 = vpop.permute.xlu2 %9477 }
0x3217   :  { %v9488_v8 = vsel %vm707_vm0, %v9439_v10, %v9478_v26 }
0x3218   :  { %v9492_v55 = vmul.f32 %v15179_v61, %v9488_v8 }
0x321a   :  { %11521 = vmatmul.msk.f32.gmra.mxu2 %vm390_vm7, %v9492_v55 }
0x321e   :  { %v9251_v37 = vpop.permute.xlu2 %9250 }
0x321f   :  { %9278 = vrot.lane.b32.xlu0 %v9251_v37, %s12063_s24 }
0x3226   :  { %v9249_v16 = vpop.permute.xlu2 %9248 }
0x3227   :  { %9284 = vrot.lane.b32.xlu0 %v9249_v16, %s12063_s24 }
0x3236   :  { %v9480_v48 = vpop.permute.xlu0 %9479 }
0x3237   :  { %v9489_v22 = vsel %vm707_vm0, %v9454_v63, %v9480_v48 }
0x3238   :  { %v9493_v52 = vmul.f32 %v15189_v29, %v9489_v22 }
0x323a   :  { %11522 = vmatmul.msk.f32.gmra.mxu2 %vm390_vm7, %v9493_v52 }
0x323e   :  { %v9482_v43 = vpop.permute.xlu1 %9481 }
0x323f   :  { %v9490_v58 = vsel %vm707_vm0, %v9469_v47, %v9482_v43  ;;  %v9253_v51 = vpop.permute.xlu0 %9252 }
0x3240   :  { %v9494_v61 = vmul.f32 %v15184_v42, %v9490_v58  ;;  %9280 = vrot.lane.b32.xlu1 %v9253_v51, %s12063_s24 }
0x3242   :  { %11523 = vmatmul.msk.f32.gmra.mxu2 %vm390_vm7, %v9494_v61 }
0x3246   :  { %v9247_v35 = vpop.permute.xlu1 %9246 }
0x3247   :  { %9282 = vrot.lane.b32.xlu2 %v9247_v35, %s12063_s24 }
0x3291   :  { %v9279_v25 = vpop.permute.xlu0 %9278 }
0x3292   :  { %v9290_v18 = vsel %vm390_vm7, %v9247_v35, %v9279_v25  ;;  %v11534_v35 = vld [vmem:[%s15644_s16 + $0x290] sm:$0xff]  ;;  %v11535_v25 = vld [vmem:[%s15644_s16 + $0x298] sm:$0xff] }
0x3293   :  { %9857 = vmatpush.msrb.mxu2 %v11534_v35  ;;  %9886 = vmatpush.msrb.mxu3 %v11535_v25 }
0x3295   :  { %v9524_v21 = vpop.f32.mrf.mxu2 }
0x3296   :  { %v9536_v29 = vmul.f32 %v9524_v21, %v9290_v18  ;;  %v11532_v18 = vld [vmem:[%s15644_s16 + $0x280] sm:$0xff]  ;;  %v11533_v21 = vld [vmem:[%s15644_s16 + $0x288] sm:$0xff] }
0x3297   :  { %9799 = vmatpush.msra.mxu0 %v11532_v18  ;;  %9828 = vmatpush.msra.mxu1 %v11533_v21 }
0x3298   :  { %9544 = vrot.lane.b32.xlu1 %v9536_v29, %s12076_s4 }
0x3299   :  { %v9285_v27 = vpop.permute.xlu0 %9284 }
0x329a   :  { %v9293_v54 = vsel %vm390_vm7, %v9253_v51, %v9285_v27 }
0x329d   :  { %v9527_v46 = vpop.f32.mrf.mxu2 }
0x32a1   :  { %v9283_v12 = vpop.permute.xlu2 %9282 }
0x32a2   :  { %v9292_v7 = vsel %vm390_vm7, %v9251_v37, %v9283_v12 }
0x32b2   :  { %v9281_v42 = vpop.permute.xlu1 %9280 }
0x32b3   :  { %v9291_v4 = vsel %vm390_vm7, %v9249_v16, %v9281_v42 }
0x32b4   :  { %v9537_v14 = vmul.f32 %v9527_v46, %v9291_v4 }
0x32b6   :  { %9546 = vrot.lane.b32.xlu2 %v9537_v14, %s12076_s4 }
0x32bd   :  { %v9530_v49 = vpop.f32.mrf.mxu2 }
0x32be   :  { %v9538_v1 = vmul.f32 %v9530_v49, %v9292_v7 }
0x32c0   :  { %9548 = vrot.lane.b32.xlu0 %v9538_v1, %s12076_s4 }
0x32c5   :  { %v9533_v41 = vpop.f32.mrf.mxu2 }
0x32c6   :  { %v9539_v40 = vmul.f32 %v9533_v41, %v9293_v54 }
0x32c8   :  { %9550 = vrot.lane.b32.xlu1 %v9539_v40, %s12076_s4  ;;  %s10922_s4 = sshll.u32 %s15650_s22, 4  ;;  %s10923_s4 = int_to_ptr.hbm [resolvable:$true] %s10922_s4 }
0x330a   :  { %v9545_v50 = vpop.permute.xlu1 %9544 }
0x330b   :  { %v9556_v33 = vadd.f32 %v9545_v50, %v9536_v29  ;;  %v15284_v50 = vld [vmem:[%s15642_s14 + $0x5] ss:$0 sm:$0xff] }
0x330d   :  { %11526 = vmatmul.msk.f32.vlgmr.msra.gmra.mxu3 %vm390_vm7, %v9556_v33 }
0x3310   :  { %v9547_v34 = vpop.permute.xlu2 %9546 }
0x3311   :  { %v9557_v17 = vadd.f32 %v9547_v34, %v9537_v14 }
0x3315   :  { %11527 = vmatmul.msk.f32.gmra.mxu3 %vm390_vm7, %v9557_v17  ;;  %v15289_v17 = vld [vmem:[%s15643_s15 + $0x5] ss:$0 sm:$0xff] }
0x3332   :  { %v9549_v62 = vpop.permute.xlu0 %9548 }
0x3333   :  { %v9558_v39 = vadd.f32 %v9549_v62, %v9538_v1 }
0x3335   :  { %11528 = vmatmul.msk.f32.gmra.mxu3 %vm390_vm7, %v9558_v39 }
0x333a   :  { %v9551_v23 = vpop.permute.xlu1 %9550 }
0x333b   :  { %v9559_v10 = vadd.f32 %v9551_v23, %v9539_v40 }
0x333d   :  { %11529 = vmatmul.msk.f32.gmra.mxu3 %vm390_vm7, %v9559_v10 }
0x3390   :  { %v9596_v3 = vpop.f32.mrf.mxu3 }
0x3391   :  { %v9597_v24 = vadd.f32 %v11695_v6, %v9596_v3 }
0x3393   :  { %v9608_v13 = vadd.f32 %v9597_v24, %v15108_v30 }
0x3395   :  { %v9616_v36 = vsel %vm390_vm7, %v9608_v13, 0.0 }
0x3396   :  { %9617 = vadd.xlane.f32.xlu2 %v9616_v36 }
0x3398   :  { %v9599_v38 = vpop.f32.mrf.mxu3 }
0x3399   :  { %v9600_v56 = vadd.f32 %v11695_v6, %v9599_v38 }
0x339b   :  { %v9609_v44 = vadd.f32 %v9600_v56, %v15112_v53 }
0x339d   :  { %v9619_v11 = vsel %vm390_vm7, %v9609_v44, 0.0 }
0x339e   :  { %9620 = vadd.xlane.f32.xlu0 %v9619_v11 }
0x33b8   :  { %v9602_v63 = vpop.f32.mrf.mxu3 }
0x33b9   :  { %v9603_v20 = vadd.f32 %v11695_v6, %v9602_v63  ;;  %v11538_v63 = vld [vmem:[%s15644_s16 + $0x2b0] sm:$0xff] }
0x33ba   :  { %9973 = vmatpush.msra.mxu2 %v11538_v63 }
0x33bb   :  { %v9610_v32 = vadd.f32 %v9603_v20, %v15117_v59  ;;  %v11539_v20 = vld [vmem:[%s15644_s16 + $0x2b8] sm:$0xff] }
0x33bc   :  { %10002 = vmatpush.msra.mxu3 %v11539_v20 }
0x33bd   :  { %v9622_v15 = vsel %vm390_vm7, %v9610_v32, 0.0 }
0x33be   :  { %9623 = vadd.xlane.f32.xlu1 %v9622_v15  ;;  %v11537_v15 = vld [vmem:[%s15644_s16 + $0x2a8] sm:$0xff] }
0x33bf   :  { %9944 = vmatpush.msrb.mxu1 %v11537_v15 }
0x33c0   :  { %v9605_v2 = vpop.f32.mrf.mxu3 }
0x33c1   :  { %v9606_v19 = vadd.f32 %v11695_v6, %v9605_v2 }
0x33c3   :  { %v9611_v30 = vadd.f32 %v9606_v19, %v15122_v9 }
0x33c5   :  { %v9625_v28 = vsel %vm390_vm7, %v9611_v30, 0.0 }
0x33c6   :  { %9626 = vadd.xlane.f32.xlu2 %v9625_v28 }
0x3409   :  { %v9618_v31 = vpop.xlane.xlu2 %9617 }
0x340a   :  { %v9628_v53 = vmul.f32 %v9618_v31, %v12588_v45 }
0x340c   :  { %v9632_v47 = vsub.f32 %v9608_v13, %v9628_v53 }
0x340e   :  { %v9636_v0 = vmul.f32 %v9632_v47, %v9632_v47 }
0x3410   :  { %v9640_v60 = vsel %vm390_vm7, %v9636_v0, 0.0  ;;  %v11543_v0 = vld [vmem:[%s15644_s16 + $0x2d8] sm:$0xff] }
0x3411   :  { %v9621_v5 = vpop.xlane.xlu0 %9620  ;;  %9641 = vadd.xlane.f32.xlu0 %v9640_v60 }
0x3412   :  { %v9629_v59 = vmul.f32 %v9621_v5, %v12588_v45 }
0x3414   :  { %v9633_v26 = vsub.f32 %v9609_v44, %v9629_v59 }
0x3416   :  { %v9637_v8 = vmul.f32 %v9633_v26, %v9633_v26 }
0x3418   :  { %v9643_v55 = vsel %vm390_vm7, %v9637_v8, 0.0 }
0x3419   :  { %9644 = vadd.xlane.f32.xlu1 %v9643_v55 }
0x3431   :  { %v9624_v9 = vpop.xlane.xlu1 %9623 }
0x3432   :  { %v9630_v37 = vmul.f32 %v9624_v9, %v12588_v45 }
0x3434   :  { %v15256_v16 = vsub.f32 %v9610_v32, %v9630_v37  ;;  %v11536_v32 = vld [vmem:[%s15644_s16 + $0x2a0] sm:$0xff] }
0x3435   :  { %9915 = vmatpush.msrb.mxu0 %v11536_v32  ;;  %v11540_v37 = vld [vmem:[%s15644_s16 + $0x2c0] sm:$0xff] }
0x3436   :  { %v9638_v48 = vmul.f32 %v15256_v16, %v15256_v16 }
0x3438   :  { %v9646_v22 = vsel %vm390_vm7, %v9638_v48, 0.0  ;;  %v11541_v48 = vld [vmem:[%s15644_s16 + $0x2c8] sm:$0xff] }
0x3439   :  { %9647 = vadd.xlane.f32.xlu2 %v9646_v22  ;;  %v9627_v52 = vpop.xlane.xlu2 %9626 }
0x343a   :  { %v9631_v43 = vmul.f32 %v9627_v52, %v12588_v45 }
0x343c   :  { %v15262_v58 = vsub.f32 %v9611_v30, %v9631_v43 }
0x343e   :  { %v9639_v51 = vmul.f32 %v15262_v58, %v15262_v58 }
0x3440   :  { %v9649_v61 = vsel %vm390_vm7, %v9639_v51, 0.0 }
0x3441   :  { %9650 = vadd.xlane.f32.xlu0 %v9649_v61 }
0x3484   :  { %v9642_v29 = vpop.xlane.xlu0 %9641 }
0x3485   :  { %v9652_v57 = vmul.f32 %v9642_v29, %v12588_v45  ;;  %v11547_v29 = vld [vmem:[%s15644_s16 + $0x2f8] sm:$0xff] }
0x3487   :  { %v9656_v42 = vadd.f32 1e-05, %v9652_v57  ;;  %v11544_v57 = vld [vmem:[%s15644_s16 + $0x2e0] sm:$0xff] }
0x3489   :  { %11879 = vrsqrt.f32 %v9656_v42  ;;  %vm9666_vm10 = vweird.f32 %v9656_v42 }
0x348c   :  { %v9645_v46 = vpop.xlane.xlu1 %9644 }
0x348d   :  { %v9653_v4 = vmul.f32 %v9645_v46, %v12588_v45  ;;  %v11616_v46 = vld [vmem:[%s15646_s18 + $0x290] sm:$0xff] }
0x348f   :  { %v11880_v14 = vpop.eup %11879  ;;  %v9657_v12 = vadd.f32 1e-05, %v9653_v4  ;;  %v11614_v4 = vld [vmem:[%s15646_s18 + $0x280] sm:$0xff] }
0x3490   :  { %v9661_v7 = vmul.f32 %v11880_v14, %v9656_v42  ;;  %vm9667_vm0 = vweird.f32 %v11880_v14  ;;  %v11545_v42 = vld [vmem:[%s15644_s16 + $0x2e8] sm:$0xff] }
0x3491   :  { %11881 = vrsqrt.f32 %v9657_v12  ;;  %vm9668_vm11 = vmor %vm9666_vm10, %vm9667_vm0  ;;  %vm9676_vm13 = vweird.f32 %v9657_v12 }
0x3492   :  { %v9662_v49 = vmul.f32 %v11880_v14, %v9661_v7  ;;  %v11620_v7 = vld [vmem:[%s15646_s18 + $0x2b0] sm:$0xff] }
0x3494   :  { %v9663_v1 = vmul.f32 0.5, %v9662_v49  ;;  %v11618_v49 = vld [vmem:[%s15646_s18 + $0x2a0] sm:$0xff] }
0x3496   :  { %v9664_v27 = vsub.f32 1.5, %v9663_v1  ;;  %v11621_v1 = vld [vmem:[%s15646_s18 + $0x2b8] sm:$0xff] }
0x3497   :  { %v11882_v54 = vpop.eup %11881 }
0x3498   :  { %v9665_v41 = vmul.f32 %v11880_v14, %v9664_v27  ;;  %v9671_v40 = vmul.f32 %v11882_v54, %v9657_v12  ;;  %vm9677_vm12 = vweird.f32 %v11882_v54  ;;  %v11615_v12 = vld [vmem:[%s15646_s18 + $0x288] sm:$0xff] }
0x3499   :  { %vm9678_vm14 = vmor %vm9676_vm13, %vm9677_vm12  ;;  %v11619_v27 = vld [vmem:[%s15646_s18 + $0x2a8] sm:$0xff] }
0x349a   :  { %v9669_v33 = vsel %vm9668_vm11, %v11880_v14, %v9665_v41  ;;  %v9672_v34 = vmul.f32 %v11882_v54, %v9671_v40  ;;  %v11617_v14 = vld [vmem:[%s15646_s18 + $0x298] sm:$0xff] }
0x349b   :  { %v9700_v62 = vmul.f32 %v9669_v33, %v9632_v47  ;;  %v11542_v47 = vld [vmem:[%s15644_s16 + $0x2d0] sm:$0xff] }
0x349c   :  { %v9673_v39 = vmul.f32 0.5, %v9672_v34 }
0x349d   :  { %v9707_v23 = vmul.f32 %v15284_v50, %v9700_v62 }
0x349e   :  { %v9674_v10 = vsub.f32 1.5, %v9673_v39 }
0x349f   :  { %v15293_v6 = vadd.f32 %v15289_v17, %v9707_v23 }
0x34a0   :  { %v9675_v3 = vmul.f32 %v11882_v54, %v9674_v10 }
0x34a1   :  { %11550 = vmatmul.msk.f32.vlgmr.msra.gmra.mxu0 %vm390_vm7, %v15293_v6  ;;  %11554 = vmatmul.msk.f32.vlgmr.msra.gmra.mxu1 %vm390_vm7, %v15293_v6 }
0x34a2   :  { %v9679_v24 = vsel %vm9678_vm14, %v11882_v54, %v9675_v3  ;;  %11558 = vmatmul.msk.f32.vlgmr.msrb.gmra.mxu2 %vm390_vm7, %v15293_v6  ;;  %11562 = vmatmul.msk.f32.vlgmr.msrb.gmra.mxu3 %vm390_vm7, %v15293_v6  ;;  %v15494_v54 = vld [vmem:[%s15645_s17 + $0x50] sm:$0xff] }
0x34a3   :  { %v9701_v13 = vmul.f32 %v9679_v24, %v9633_v26  ;;  %10089 = vmatpush.msrb.mxu2 %v11542_v47  ;;  %10118 = vmatpush.msrb.mxu3 %v11543_v0  ;;  %v9741_v33 = vperm.slane %v15494_v54, 1  ;;  %v15499_v62 = vperm.slane %v15494_v54, 2  ;;  %v15502_v39 = vperm.slane %v15494_v54, 3  ;;  %v11624_v0 = vld [vmem:[%s15646_s18 + $0x2d0] sm:$0xff] }
0x34a4   :  { %10031 = vmatpush.msra.mxu0 %v11540_v37  ;;  %10060 = vmatpush.msra.mxu1 %v11541_v48 }
0x34a5   :  { %v9708_v36 = vmul.f32 %v15284_v50, %v9701_v13 }
0x34a7   :  { %v15305_v38 = vadd.f32 %v15289_v17, %v9708_v36 }
0x34a9   :  { %11551 = vmatmul.msk.f32.gmra.mxu0 %vm390_vm7, %v15305_v38  ;;  %11555 = vmatmul.msk.f32.gmra.mxu1 %vm390_vm7, %v15305_v38 }
0x34aa   :  { %11559 = vmatmul.msk.f32.gmra.mxu2 %vm390_vm7, %v15305_v38  ;;  %11563 = vmatmul.msk.f32.gmra.mxu3 %vm390_vm7, %v15305_v38 }
0x34ac   :  { %v9648_v56 = vpop.xlane.xlu2 %9647 }
0x34ad   :  { %v9654_v44 = vmul.f32 %v9648_v56, %v12588_v45 }
0x34af   :  { %v9658_v11 = vadd.f32 1e-05, %v9654_v44 }
0x34b1   :  { %11883 = vrsqrt.f32 %v9658_v11  ;;  %vm9686_vm1 = vweird.f32 %v9658_v11 }
0x34b4   :  { %v9651_v2 = vpop.xlane.xlu0 %9650 }
0x34b5   :  { %v9655_v19 = vmul.f32 %v9651_v2, %v12588_v45 }
0x34b7   :  { %v11884_v30 = vpop.eup %11883  ;;  %v9659_v28 = vadd.f32 1e-05, %v9655_v19 }
0x34b8   :  { %v9681_v31 = vmul.f32 %v11884_v30, %v9658_v11  ;;  %vm9687_vm15 = vweird.f32 %v11884_v30 }
0x34b9   :  { %11885 = vrsqrt.f32 %v9659_v28  ;;  %vm9688_vm2 = vmor %vm9686_vm1, %vm9687_vm15  ;;  %vm9696_vm4 = vweird.f32 %v9659_v28 }
0x34ba   :  { %v9682_v53 = vmul.f32 %v11884_v30, %v9681_v31 }
0x34bc   :  { %v9683_v60 = vmul.f32 0.5, %v9682_v53 }
0x34be   :  { %v9684_v5 = vsub.f32 1.5, %v9683_v60  ;;  %v11622_v60 = vld [vmem:[%s15646_s18 + $0x2c0] sm:$0xff] }
0x34bf   :  { %v11886_v59 = vpop.eup %11885 }
0x34c0   :  { %v9685_v26 = vmul.f32 %v11884_v30, %v9684_v5  ;;  %v9691_v8 = vmul.f32 %v11886_v59, %v9659_v28  ;;  %vm9697_vm3 = vweird.f32 %v11886_v59  ;;  %v11625_v5 = vld [vmem:[%s15646_s18 + $0x2d8] sm:$0xff] }
0x34c1   :  { %vm9698_vm5 = vmor %vm9696_vm4, %vm9697_vm3 }
0x34c2   :  { %v9689_v55 = vsel %vm9688_vm2, %v11884_v30, %v9685_v26  ;;  %v9692_v9 = vmul.f32 %v11886_v59, %v9691_v8 }
0x34c3   :  { %v9702_v22 = vmul.f32 %v9689_v55, %v15256_v16 }
0x34c4   :  { %v9693_v52 = vmul.f32 0.5, %v9692_v9  ;;  %v11623_v9 = vld [vmem:[%s15646_s18 + $0x2c8] sm:$0xff] }
0x34c5   :  { %v9709_v43 = vmul.f32 %v15284_v50, %v9702_v22 }
0x34c6   :  { %v9694_v51 = vsub.f32 1.5, %v9693_v52 }
0x34c7   :  { %v15344_v61 = vadd.f32 %v15289_v17, %v9709_v43 }
0x34c8   :  { %v9695_v35 = vmul.f32 %v11886_v59, %v9694_v51 }
0x34c9   :  { %11552 = vmatmul.msk.f32.gmra.mxu0 %vm390_vm7, %v15344_v61  ;;  %11556 = vmatmul.msk.f32.gmra.mxu1 %vm390_vm7, %v15344_v61 }
0x34ca   :  { %v9699_v16 = vsel %vm9698_vm5, %v11886_v59, %v9695_v35  ;;  %11560 = vmatmul.msk.f32.gmra.mxu2 %vm390_vm7, %v15344_v61  ;;  %11564 = vmatmul.msk.f32.gmra.mxu3 %vm390_vm7, %v15344_v61 }
0x34cb   :  { %v9703_v25 = vmul.f32 %v9699_v16, %v15262_v58  ;;  %v11546_v58 = vld [vmem:[%s15644_s16 + $0x2f0] sm:$0xff] }
0x34cd   :  { %v9710_v18 = vmul.f32 %v15284_v50, %v9703_v25  ;;  %v9740_v50 = vperm.slane %v15494_v54, 0 }
0x34cf   :  { %v15357_v21 = vadd.f32 %v15289_v17, %v9710_v18 }
0x34d1   :  { %11553 = vmatmul.msk.f32.gmra.mxu0 %vm390_vm7, %v15357_v21  ;;  %11557 = vmatmul.msk.f32.gmra.mxu1 %vm390_vm7, %v15357_v21 }
0x34d2   :  { %11561 = vmatmul.msk.f32.gmra.mxu2 %vm390_vm7, %v15357_v21  ;;  %11565 = vmatmul.msk.f32.gmra.mxu3 %vm390_vm7, %v15357_v21 }
0x34d9   :  { %11566 = vmatmul.msk.f32.vlgmr.msrb.gmra.mxu0 %vm390_vm7, %v15293_v6  ;;  %11570 = vmatmul.msk.f32.vlgmr.msrb.gmra.mxu1 %vm390_vm7, %v15293_v6 }
0x34da   :  { %11574 = vmatmul.msk.f32.vlgmr.msra.gmra.mxu2 %vm390_vm7, %v15293_v6  ;;  %11578 = vmatmul.msk.f32.vlgmr.msra.gmra.mxu3 %vm390_vm7, %v15293_v6 }
0x34db   :  { %10205 = vmatpush.msra.mxu2 %v11546_v58  ;;  %10234 = vmatpush.msra.mxu3 %v11547_v29 }
0x34dc   :  { %10147 = vmatpush.msrb.mxu0 %v11544_v57  ;;  %10176 = vmatpush.msrb.mxu1 %v11545_v42 }
0x34e1   :  { %11567 = vmatmul.msk.f32.gmra.mxu0 %vm390_vm7, %v15305_v38  ;;  %11571 = vmatmul.msk.f32.gmra.mxu1 %vm390_vm7, %v15305_v38 }
0x34e2   :  { %11575 = vmatmul.msk.f32.gmra.mxu2 %vm390_vm7, %v15305_v38  ;;  %11579 = vmatmul.msk.f32.gmra.mxu3 %vm390_vm7, %v15305_v38 }
0x34e9   :  { %11568 = vmatmul.msk.f32.gmra.mxu0 %vm390_vm7, %v15344_v61  ;;  %11572 = vmatmul.msk.f32.gmra.mxu1 %vm390_vm7, %v15344_v61 }
0x34ea   :  { %11576 = vmatmul.msk.f32.gmra.mxu2 %vm390_vm7, %v15344_v61  ;;  %11580 = vmatmul.msk.f32.gmra.mxu3 %vm390_vm7, %v15344_v61 }
0x34f1   :  { %11569 = vmatmul.msk.f32.gmra.mxu0 %vm390_vm7, %v15357_v21  ;;  %11573 = vmatmul.msk.f32.gmra.mxu1 %vm390_vm7, %v15357_v21 }
0x34f2   :  { %11577 = vmatmul.msk.f32.gmra.mxu2 %vm390_vm7, %v15357_v21  ;;  %11581 = vmatmul.msk.f32.gmra.mxu3 %vm390_vm7, %v15357_v21 }
0x34f9   :  { %11582 = vmatmul.msk.f32.vlgmr.msra.gmra.mxu0 %vm390_vm7, %v15293_v6  ;;  %11586 = vmatmul.msk.f32.vlgmr.msra.gmra.mxu1 %vm390_vm7, %v15293_v6 }
0x34fa   :  { %11590 = vmatmul.msk.f32.vlgmr.msrb.gmra.mxu2 %vm390_vm7, %v15293_v6  ;;  %11594 = vmatmul.msk.f32.vlgmr.msrb.gmra.mxu3 %vm390_vm7, %v15293_v6 }
0x34fb   :  { %10407 = vmatpush.xpose.msrb.mxu2 %v11616_v46  ;;  %10349 = vmatpush.xpose.msra.mxu0 %v11614_v4  ;;  %v15531_v46 = vperm.slane %v15494_v54, 4  ;;  %v15534_v4 = vperm.slane %v15494_v54, 5 }
0x34fc   :  { %10436 = vmatpush.xpose.msrb.mxu3 %v11617_v14  ;;  %10378 = vmatpush.xpose.msra.mxu1 %v11615_v12 }
0x3501   :  { %11583 = vmatmul.msk.f32.gmra.mxu0 %vm390_vm7, %v15305_v38  ;;  %11587 = vmatmul.msk.f32.gmra.mxu1 %vm390_vm7, %v15305_v38 }
0x3502   :  { %11591 = vmatmul.msk.f32.gmra.mxu2 %vm390_vm7, %v15305_v38  ;;  %11595 = vmatmul.msk.f32.gmra.mxu3 %vm390_vm7, %v15305_v38 }
0x3509   :  { %11584 = vmatmul.msk.f32.gmra.mxu0 %vm390_vm7, %v15344_v61  ;;  %11588 = vmatmul.msk.f32.gmra.mxu1 %vm390_vm7, %v15344_v61 }
0x350a   :  { %11592 = vmatmul.msk.f32.gmra.mxu2 %vm390_vm7, %v15344_v61  ;;  %11596 = vmatmul.msk.f32.gmra.mxu3 %vm390_vm7, %v15344_v61 }
0x3511   :  { %11585 = vmatmul.msk.f32.gmra.mxu0 %vm390_vm7, %v15357_v21  ;;  %11589 = vmatmul.msk.f32.gmra.mxu1 %vm390_vm7, %v15357_v21 }
0x3512   :  { %11593 = vmatmul.msk.f32.gmra.mxu2 %vm390_vm7, %v15357_v21  ;;  %11597 = vmatmul.msk.f32.gmra.mxu3 %vm390_vm7, %v15357_v21 }
0x3519   :  { %11598 = vmatmul.msk.f32.vlgmr.msrb.gmra.mxu0 %vm390_vm7, %v15293_v6  ;;  %11602 = vmatmul.msk.f32.vlgmr.msrb.gmra.mxu1 %vm390_vm7, %v15293_v6 }
0x351a   :  { %11606 = vmatmul.msk.f32.vlgmr.msra.gmra.mxu2 %vm390_vm7, %v15293_v6  ;;  %11610 = vmatmul.msk.f32.vlgmr.msra.gmra.mxu3 %vm390_vm7, %v15293_v6 }
0x351b   :  { %10523 = vmatpush.xpose.msra.mxu2 %v11620_v7  ;;  %10465 = vmatpush.xpose.msrb.mxu0 %v11618_v49 }
0x351c   :  { %10552 = vmatpush.xpose.msra.mxu3 %v11621_v1  ;;  %10494 = vmatpush.xpose.msrb.mxu1 %v11619_v27 }
0x351e   :  { %v9801_v41 = vpop.f32.mrf.mxu0  ;;  %v9830_v40 = vpop.f32.mrf.mxu1 }
0x351f   :  { %v9802_v23 = vadd.f32 %v9801_v41, %v9740_v50  ;;  %v9831_v10 = vadd.f32 %v9830_v40, %v9741_v33 }
0x3521   :  { %11599 = vmatmul.msk.f32.gmra.mxu0 %vm390_vm7, %v15305_v38  ;;  %11603 = vmatmul.msk.f32.gmra.mxu1 %vm390_vm7, %v15305_v38  ;;  %v10248_v13 = vmax.f32 %v9802_v23, 0.0  ;;  %v10249_v36 = vmax.f32 %v9831_v10, 0.0  ;;  %v15541_v23 = vperm.slane %v15494_v54, 6  ;;  %v15544_v10 = vperm.slane %v15494_v54, 7  ;;  %v11628_v54 = vld [vmem:[%s15646_s18 + $0x2f0] sm:$0xff] }
0x3522   :  { %11607 = vmatmul.msk.f32.gmra.mxu2 %vm390_vm7, %v15305_v38  ;;  %11611 = vmatmul.msk.f32.gmra.mxu3 %vm390_vm7, %v15305_v38 }
0x3525   :  { %v9859_v34 = vpop.f32.mrf.mxu2  ;;  %v9888_v17 = vpop.f32.mrf.mxu3 }
0x3526   :  { %v9860_v3 = vadd.f32 %v9859_v34, %v15499_v62  ;;  %v9889_v24 = vadd.f32 %v9888_v17, %v15502_v39  ;;  %v9804_v11 = vpop.f32.mrf.mxu0  ;;  %v9833_v63 = vpop.f32.mrf.mxu1 }
0x3527   :  { %v9805_v15 = vadd.f32 %v9804_v11, %v9740_v50  ;;  %v9834_v2 = vadd.f32 %v9833_v63, %v9741_v33 }
0x3528   :  { %v10250_v56 = vmax.f32 %v9860_v3, 0.0  ;;  %v10251_v44 = vmax.f32 %v9889_v24, 0.0 }
0x3529   :  { %11600 = vmatmul.msk.f32.gmra.mxu0 %vm390_vm7, %v15344_v61  ;;  %11604 = vmatmul.msk.f32.gmra.mxu1 %vm390_vm7, %v15344_v61  ;;  %v10264_v28 = vmax.f32 %v9805_v15, 0.0  ;;  %v10265_v31 = vmax.f32 %v9834_v2, 0.0  ;;  %v11626_v15 = vld [vmem:[%s15646_s18 + $0x2e0] sm:$0xff]  ;;  %v11629_v2 = vld [vmem:[%s15646_s18 + $0x2f8] sm:$0xff] }
0x352a   :  { %11608 = vmatmul.msk.f32.gmra.mxu2 %vm390_vm7, %v15344_v61  ;;  %11612 = vmatmul.msk.f32.gmra.mxu3 %vm390_vm7, %v15344_v61 }
0x352d   :  { %v9862_v20 = vpop.f32.mrf.mxu2  ;;  %v9891_v32 = vpop.f32.mrf.mxu3 }
0x352e   :  { %v9863_v19 = vadd.f32 %v9862_v20, %v15499_v62  ;;  %v9892_v30 = vadd.f32 %v9891_v32, %v15502_v39 }
0x3530   :  { %v10266_v53 = vmax.f32 %v9863_v19, 0.0  ;;  %v10267_v47 = vmax.f32 %v9892_v30, 0.0 }
0x3531   :  { %11601 = vmatmul.msk.f32.gmra.mxu0 %vm390_vm7, %v15357_v21  ;;  %11605 = vmatmul.msk.f32.gmra.mxu1 %vm390_vm7, %v15357_v21 }
0x3532   :  { %11609 = vmatmul.msk.f32.gmra.mxu2 %vm390_vm7, %v15357_v21  ;;  %11613 = vmatmul.msk.f32.gmra.mxu3 %vm390_vm7, %v15357_v21 }
0x3539   :  { %10350 = vmatmul.f32.vlgmr.msra.gmra.mxu0 %v10248_v13  ;;  %10379 = vmatmul.f32.vlgmr.msra.gmra.mxu1 %v10249_v36 }
0x353a   :  { %10408 = vmatmul.f32.vlgmr.msrb.gmra.mxu2 %v10250_v56  ;;  %10437 = vmatmul.f32.vlgmr.msrb.gmra.mxu3 %v10251_v44 }
0x353b   :  { %10639 = vmatpush.xpose.msrb.mxu2 %v11624_v0  ;;  %10581 = vmatpush.xpose.msra.mxu0 %v11622_v60 }
0x353c   :  { %10668 = vmatpush.xpose.msrb.mxu3 %v11625_v5  ;;  %10610 = vmatpush.xpose.msra.mxu1 %v11623_v9 }
0x3541   :  { %10353 = vmatmul.f32.gmra.mxu0 %v10264_v28  ;;  %10382 = vmatmul.f32.gmra.mxu1 %v10265_v31 }
0x3542   :  { %10411 = vmatmul.f32.gmra.mxu2 %v10266_v53  ;;  %10440 = vmatmul.f32.gmra.mxu3 %v10267_v47 }
0x3546   :  { %v9807_v59 = vpop.f32.mrf.mxu0  ;;  %v9836_v26 = vpop.f32.mrf.mxu1 }
0x3547   :  { %v9808_v8 = vadd.f32 %v9807_v59, %v9740_v50  ;;  %v9837_v55 = vadd.f32 %v9836_v26, %v9741_v33  ;;  %v11627_v26 = vld [vmem:[%s15646_s18 + $0x2e8] sm:$0xff] }
0x3549   :  { %v10280_v37 = vmax.f32 %v9808_v8, 0.0  ;;  %v10281_v48 = vmax.f32 %v9837_v55, 0.0 }
0x354b   :  { %10356 = vmatmul.f32.gmra.mxu0 %v10280_v37  ;;  %10385 = vmatmul.f32.gmra.mxu1 %v10281_v48 }
0x354d   :  { %v9865_v22 = vpop.f32.mrf.mxu2  ;;  %v9894_v52 = vpop.f32.mrf.mxu3 }
0x354e   :  { %v9866_v43 = vadd.f32 %v9865_v22, %v15499_v62  ;;  %v9895_v51 = vadd.f32 %v9894_v52, %v15502_v39  ;;  %v9810_v35 = vpop.f32.mrf.mxu0  ;;  %v9839_v16 = vpop.f32.mrf.mxu1 }
0x354f   :  { %v9811_v25 = vadd.f32 %v9810_v35, %v9740_v50  ;;  %v9840_v18 = vadd.f32 %v9839_v16, %v9741_v33 }
0x3550   :  { %v10282_v58 = vmax.f32 %v9866_v43, 0.0  ;;  %v10283_v29 = vmax.f32 %v9895_v51, 0.0 }
0x3551   :  { %v10296_v57 = vmax.f32 %v9811_v25, 0.0  ;;  %v10297_v42 = vmax.f32 %v9840_v18, 0.0  ;;  %v15573_v18 = vld [vmem:[%s15645_s17 + $0x58] sm:$0xff] }
0x3552   :  { %10414 = vmatmul.f32.gmra.mxu2 %v10282_v58  ;;  %10443 = vmatmul.f32.gmra.mxu3 %v10283_v29 }
0x3553   :  { %10359 = vmatmul.f32.gmra.mxu0 %v10296_v57  ;;  %10388 = vmatmul.f32.gmra.mxu1 %v10297_v42  ;;  %v9748_v57 = vperm.slane %v15573_v18, 0  ;;  %v9749_v42 = vperm.slane %v15573_v18, 1 }
0x3555   :  { %v9868_v14 = vpop.f32.mrf.mxu2  ;;  %v9897_v12 = vpop.f32.mrf.mxu3 }
0x3556   :  { %v9869_v7 = vadd.f32 %v9868_v14, %v15499_v62  ;;  %v9898_v49 = vadd.f32 %v9897_v12, %v15502_v39  ;;  %v9917_v1 = vpop.f32.mrf.mxu0  ;;  %v9946_v27 = vpop.f32.mrf.mxu1 }
0x3557   :  { %v9918_v41 = vadd.f32 %v9917_v1, %v15531_v46  ;;  %v9947_v40 = vadd.f32 %v9946_v27, %v15534_v4 }
0x3558   :  { %v10298_v50 = vmax.f32 %v9869_v7, 0.0  ;;  %v10299_v33 = vmax.f32 %v9898_v49, 0.0 }
0x3559   :  { %v10252_v34 = vmax.f32 %v9918_v41, 0.0  ;;  %v10253_v17 = vmax.f32 %v9947_v40, 0.0 }
0x355a   :  { %10417 = vmatmul.f32.gmra.mxu2 %v10298_v50  ;;  %10446 = vmatmul.f32.gmra.mxu3 %v10299_v33 }
0x355b   :  { %10466 = vmatmul.f32.vlgmr.msrb.gmra.mxu0 %v10252_v34  ;;  %10495 = vmatmul.f32.vlgmr.msrb.gmra.mxu1 %v10253_v17  ;;  %v9750_v34 = vperm.slane %v15573_v18, 2  ;;  %v9751_v17 = vperm.slane %v15573_v18, 3 }
0x355c   :  { %10697 = vmatpush.xpose.msrb.mxu0 %v11626_v15  ;;  %10726 = vmatpush.xpose.msrb.mxu1 %v11627_v26 }
0x355d   :  { %v9975_v62 = vpop.f32.mrf.mxu2  ;;  %v10004_v39 = vpop.f32.mrf.mxu3 }
0x355e   :  { %v9976_v3 = vadd.f32 %v9975_v62, %v15541_v23  ;;  %v10005_v24 = vadd.f32 %v10004_v39, %v15544_v10  ;;  %v9920_v13 = vpop.f32.mrf.mxu0  ;;  %v9949_v36 = vpop.f32.mrf.mxu1 }
0x355f   :  { %v9921_v56 = vadd.f32 %v9920_v13, %v15531_v46  ;;  %v9950_v44 = vadd.f32 %v9949_v36, %v15534_v4 }
0x3560   :  { %v10254_v11 = vmax.f32 %v9976_v3, 0.0  ;;  %v10255_v63 = vmax.f32 %v10005_v24, 0.0 }
0x3561   :  { %v10268_v20 = vmax.f32 %v9921_v56, 0.0  ;;  %v10269_v32 = vmax.f32 %v9950_v44, 0.0 }
0x3562   :  { %10524 = vmatmul.f32.vlgmr.msra.gmra.mxu2 %v10254_v11  ;;  %10553 = vmatmul.f32.vlgmr.msra.gmra.mxu3 %v10255_v63 }
0x3563   :  { %10469 = vmatmul.f32.gmra.mxu0 %v10268_v20  ;;  %10498 = vmatmul.f32.gmra.mxu1 %v10269_v32 }
0x3564   :  { %10755 = vmatpush.xpose.msra.mxu2 %v11628_v54  ;;  %10784 = vmatpush.xpose.msra.mxu3 %v11629_v2 }
0x3565   :  { %v9978_v19 = vpop.f32.mrf.mxu2  ;;  %v10007_v30 = vpop.f32.mrf.mxu3 }
0x3566   :  { %v9979_v28 = vadd.f32 %v9978_v19, %v15541_v23  ;;  %v10008_v31 = vadd.f32 %v10007_v30, %v15544_v10  ;;  %v9923_v53 = vpop.f32.mrf.mxu0  ;;  %v9952_v47 = vpop.f32.mrf.mxu1 }
0x3567   :  { %v9924_v0 = vadd.f32 %v9923_v53, %v15531_v46  ;;  %v9953_v60 = vadd.f32 %v9952_v47, %v15534_v4 }
0x3568   :  { %v10270_v5 = vmax.f32 %v9979_v28, 0.0  ;;  %v10271_v59 = vmax.f32 %v10008_v31, 0.0 }
0x3569   :  { %v10284_v8 = vmax.f32 %v9924_v0, 0.0  ;;  %v10285_v55 = vmax.f32 %v9953_v60, 0.0 }
0x356a   :  { %10527 = vmatmul.f32.gmra.mxu2 %v10270_v5  ;;  %10556 = vmatmul.f32.gmra.mxu3 %v10271_v59 }
0x356b   :  { %10472 = vmatmul.f32.gmra.mxu0 %v10284_v8  ;;  %10501 = vmatmul.f32.gmra.mxu1 %v10285_v55 }
0x356d   :  { %v9981_v9 = vpop.f32.mrf.mxu2  ;;  %v10010_v37 = vpop.f32.mrf.mxu3 }
0x356e   :  { %v9982_v48 = vadd.f32 %v9981_v9, %v15541_v23  ;;  %v10011_v22 = vadd.f32 %v10010_v37, %v15544_v10  ;;  %v9926_v52 = vpop.f32.mrf.mxu0  ;;  %v9955_v43 = vpop.f32.mrf.mxu1 }
0x356f   :  { %v9927_v51 = vadd.f32 %v9926_v52, %v15531_v46  ;;  %v9956_v35 = vadd.f32 %v9955_v43, %v15534_v4 }
0x3570   :  { %v10286_v16 = vmax.f32 %v9982_v48, 0.0  ;;  %v10287_v25 = vmax.f32 %v10011_v22, 0.0 }
0x3571   :  { %v10300_v58 = vmax.f32 %v9927_v51, 0.0  ;;  %v10301_v29 = vmax.f32 %v9956_v35, 0.0  ;;  %v9752_v51 = vperm.slane %v15573_v18, 4  ;;  %v9753_v35 = vperm.slane %v15573_v18, 5 }
0x3572   :  { %10530 = vmatmul.f32.gmra.mxu2 %v10286_v16  ;;  %10559 = vmatmul.f32.gmra.mxu3 %v10287_v25 }
0x3573   :  { %10475 = vmatmul.f32.gmra.mxu0 %v10300_v58  ;;  %10504 = vmatmul.f32.gmra.mxu1 %v10301_v29 }
0x3575   :  { %v9984_v46 = vpop.f32.mrf.mxu2  ;;  %v10013_v14 = vpop.f32.mrf.mxu3 }
0x3576   :  { %v9985_v4 = vadd.f32 %v9984_v46, %v15541_v23  ;;  %v10014_v12 = vadd.f32 %v10013_v14, %v15544_v10  ;;  %v10033_v7 = vpop.f32.mrf.mxu0  ;;  %v10062_v49 = vpop.f32.mrf.mxu1 }
0x3577   :  { %v10034_v1 = vadd.f32 %v10033_v7, %v9748_v57  ;;  %v10063_v27 = vadd.f32 %v10062_v49, %v9749_v42 }
0x3578   :  { %v10302_v41 = vmax.f32 %v9985_v4, 0.0  ;;  %v10303_v40 = vmax.f32 %v10014_v12, 0.0 }
0x3579   :  { %v10256_v50 = vmax.f32 %v10034_v1, 0.0  ;;  %v10257_v33 = vmax.f32 %v10063_v27, 0.0  ;;  %v9754_v1 = vperm.slane %v15573_v18, 6  ;;  %v9755_v27 = vperm.slane %v15573_v18, 7 }
0x357a   :  { %10533 = vmatmul.f32.gmra.mxu2 %v10302_v41  ;;  %10562 = vmatmul.f32.gmra.mxu3 %v10303_v40 }
0x357b   :  { %10582 = vmatmul.f32.vlgmr.msra.gmra.mxu0 %v10256_v50  ;;  %10611 = vmatmul.f32.vlgmr.msra.gmra.mxu1 %v10257_v33 }
0x357d   :  { %v10091_v62 = vpop.f32.mrf.mxu2  ;;  %v10120_v23 = vpop.f32.mrf.mxu3 }
0x357e   :  { %v10092_v39 = vadd.f32 %v10091_v62, %v9750_v34  ;;  %v10121_v10 = vadd.f32 %v10120_v23, %v9751_v17  ;;  %v10036_v3 = vpop.f32.mrf.mxu0  ;;  %v10065_v24 = vpop.f32.mrf.mxu1 }
0x357f   :  { %v10037_v13 = vadd.f32 %v10036_v3, %v9748_v57  ;;  %v10066_v36 = vadd.f32 %v10065_v24, %v9749_v42 }
0x3580   :  { %v10258_v56 = vmax.f32 %v10092_v39, 0.0  ;;  %v10259_v44 = vmax.f32 %v10121_v10, 0.0 }
0x3581   :  { %v10272_v11 = vmax.f32 %v10037_v13, 0.0  ;;  %v10273_v63 = vmax.f32 %v10066_v36, 0.0 }
0x3582   :  { %10640 = vmatmul.f32.vlgmr.msrb.gmra.mxu2 %v10258_v56  ;;  %10669 = vmatmul.f32.vlgmr.msrb.gmra.mxu3 %v10259_v44 }
0x3583   :  { %10585 = vmatmul.f32.gmra.mxu0 %v10272_v11  ;;  %10614 = vmatmul.f32.gmra.mxu1 %v10273_v63 }
0x3585   :  { %v10094_v20 = vpop.f32.mrf.mxu2  ;;  %v10123_v32 = vpop.f32.mrf.mxu3 }
0x3586   :  { %v10095_v54 = vadd.f32 %v10094_v20, %v9750_v34  ;;  %v10124_v15 = vadd.f32 %v10123_v32, %v9751_v17  ;;  %v10039_v2 = vpop.f32.mrf.mxu0  ;;  %v10068_v19 = vpop.f32.mrf.mxu1 }
0x3587   :  { %v10040_v30 = vadd.f32 %v10039_v2, %v9748_v57  ;;  %v10069_v28 = vadd.f32 %v10068_v19, %v9749_v42 }
0x3588   :  { %v10274_v31 = vmax.f32 %v10095_v54, 0.0  ;;  %v10275_v53 = vmax.f32 %v10124_v15, 0.0 }
0x3589   :  { %v10288_v47 = vmax.f32 %v10040_v30, 0.0  ;;  %v10289_v0 = vmax.f32 %v10069_v28, 0.0 }
0x358a   :  { %10643 = vmatmul.f32.gmra.mxu2 %v10274_v31  ;;  %10672 = vmatmul.f32.gmra.mxu3 %v10275_v53 }
0x358b   :  { %10588 = vmatmul.f32.gmra.mxu0 %v10288_v47  ;;  %10617 = vmatmul.f32.gmra.mxu1 %v10289_v0 }
0x358d   :  { %v10097_v60 = vpop.f32.mrf.mxu2  ;;  %v10126_v5 = vpop.f32.mrf.mxu3 }
0x358e   :  { %v10098_v59 = vadd.f32 %v10097_v60, %v9750_v34  ;;  %v10127_v26 = vadd.f32 %v10126_v5, %v9751_v17  ;;  %v10042_v8 = vpop.f32.mrf.mxu0  ;;  %v10071_v55 = vpop.f32.mrf.mxu1 }
0x358f   :  { %v10043_v9 = vadd.f32 %v10042_v8, %v9748_v57  ;;  %v10072_v37 = vadd.f32 %v10071_v55, %v9749_v42  ;;  %v11698_v55 = vld [vmem:[%s15647_s19 + $0x5] ss:$0 sm:$0xff]  ;;  %s12081_s19 = smov [#allocation11]  }
0x3590   :  { %v10290_v48 = vmax.f32 %v10098_v59, 0.0  ;;  %v10291_v22 = vmax.f32 %v10127_v26, 0.0  ;;  %s10920_s12 = sshll.u32 %s12081_s19, 4  ;;  %s10921_s12 = int_to_ptr.vmem [resolvable:$true] %s10920_s12 }
0x3591   :  { %v10304_v52 = vmax.f32 %v10043_v9, 0.0  ;;  %v10305_v43 = vmax.f32 %v10072_v37, 0.0 }
0x3592   :  { %10646 = vmatmul.f32.gmra.mxu2 %v10290_v48  ;;  %10675 = vmatmul.f32.gmra.mxu3 %v10291_v22 }
0x3593   :  { %10591 = vmatmul.f32.gmra.mxu0 %v10304_v52  ;;  %10620 = vmatmul.f32.gmra.mxu1 %v10305_v43 }
0x3595   :  { %v10100_v16 = vpop.f32.mrf.mxu2  ;;  %v10129_v25 = vpop.f32.mrf.mxu3 }
0x3596   :  { %v10101_v58 = vadd.f32 %v10100_v16, %v9750_v34  ;;  %v10130_v29 = vadd.f32 %v10129_v25, %v9751_v17  ;;  %v10149_v46 = vpop.f32.mrf.mxu0  ;;  %v10178_v14 = vpop.f32.mrf.mxu1 }
0x3597   :  { %v10150_v57 = vadd.f32 %v10149_v46, %v9752_v51  ;;  %v10179_v42 = vadd.f32 %v10178_v14, %v9753_v35 }
0x3598   :  { %v10306_v4 = vmax.f32 %v10101_v58, 0.0  ;;  %v10307_v12 = vmax.f32 %v10130_v29, 0.0 }
0x3599   :  { %v10260_v7 = vmax.f32 %v10150_v57, 0.0  ;;  %v10261_v49 = vmax.f32 %v10179_v42, 0.0 }
0x359a   :  { %10649 = vmatmul.f32.gmra.mxu2 %v10306_v4  ;;  %10678 = vmatmul.f32.gmra.mxu3 %v10307_v12 }
0x359b   :  { %10698 = vmatmul.f32.vlgmr.msrb.gmra.mxu0 %v10260_v7  ;;  %10727 = vmatmul.f32.vlgmr.msrb.gmra.mxu1 %v10261_v49 }
0x359d   :  { %v10207_v41 = vpop.f32.mrf.mxu2  ;;  %v10236_v40 = vpop.f32.mrf.mxu3 }
0x359e   :  { %v10208_v50 = vadd.f32 %v10207_v41, %v9754_v1  ;;  %v10237_v33 = vadd.f32 %v10236_v40, %v9755_v27  ;;  %v10152_v34 = vpop.f32.mrf.mxu0  ;;  %v10181_v17 = vpop.f32.mrf.mxu1 }
0x359f   :  { %v10153_v62 = vadd.f32 %v10152_v34, %v9752_v51  ;;  %v10182_v23 = vadd.f32 %v10181_v17, %v9753_v35 }
0x35a0   :  { %v10262_v39 = vmax.f32 %v10208_v50, 0.0  ;;  %v10263_v10 = vmax.f32 %v10237_v33, 0.0 }
0x35a1   :  { %v10276_v3 = vmax.f32 %v10153_v62, 0.0  ;;  %v10277_v24 = vmax.f32 %v10182_v23, 0.0 }
0x35a2   :  { %10756 = vmatmul.f32.vlgmr.msra.gmra.mxu2 %v10262_v39  ;;  %10785 = vmatmul.f32.vlgmr.msra.gmra.mxu3 %v10263_v10 }
0x35a3   :  { %10701 = vmatmul.f32.gmra.mxu0 %v10276_v3  ;;  %10730 = vmatmul.f32.gmra.mxu1 %v10277_v24 }
0x35a5   :  { %v10210_v13 = vpop.f32.mrf.mxu2  ;;  %v10239_v18 = vpop.f32.mrf.mxu3 }
0x35a6   :  { %v10211_v36 = vadd.f32 %v10210_v13, %v9754_v1  ;;  %v10240_v56 = vadd.f32 %v10239_v18, %v9755_v27  ;;  %v10155_v44 = vpop.f32.mrf.mxu0  ;;  %v10184_v11 = vpop.f32.mrf.mxu1 }
0x35a7   :  { %v10156_v63 = vadd.f32 %v10155_v44, %v9752_v51  ;;  %v10185_v20 = vadd.f32 %v10184_v11, %v9753_v35 }
0x35a8   :  { %v10278_v32 = vmax.f32 %v10211_v36, 0.0  ;;  %v10279_v54 = vmax.f32 %v10240_v56, 0.0 }
0x35a9   :  { %v10292_v15 = vmax.f32 %v10156_v63, 0.0  ;;  %v10293_v2 = vmax.f32 %v10185_v20, 0.0 }
0x35aa   :  { %10759 = vmatmul.f32.gmra.mxu2 %v10278_v32  ;;  %10788 = vmatmul.f32.gmra.mxu3 %v10279_v54 }
0x35ab   :  { %10704 = vmatmul.f32.gmra.mxu0 %v10292_v15  ;;  %10733 = vmatmul.f32.gmra.mxu1 %v10293_v2 }
0x35ad   :  { %v10213_v19 = vpop.f32.mrf.mxu2  ;;  %v10242_v30 = vpop.f32.mrf.mxu3 }
0x35ae   :  { %v10214_v28 = vadd.f32 %v10213_v19, %v9754_v1  ;;  %v10243_v31 = vadd.f32 %v10242_v30, %v9755_v27  ;;  %v10158_v53 = vpop.f32.mrf.mxu0  ;;  %v10187_v47 = vpop.f32.mrf.mxu1 }
0x35af   :  { %v10159_v0 = vadd.f32 %v10158_v53, %v9752_v51  ;;  %v10188_v60 = vadd.f32 %v10187_v47, %v9753_v35 }
0x35b0   :  { %v10294_v5 = vmax.f32 %v10214_v28, 0.0  ;;  %v10295_v59 = vmax.f32 %v10243_v31, 0.0 }
0x35b1   :  { %v10308_v26 = vmax.f32 %v10159_v0, 0.0  ;;  %v10309_v8 = vmax.f32 %v10188_v60, 0.0 }
0x35b2   :  { %10762 = vmatmul.f32.gmra.mxu2 %v10294_v5  ;;  %10791 = vmatmul.f32.gmra.mxu3 %v10295_v59 }
0x35b3   :  { %10707 = vmatmul.f32.gmra.mxu0 %v10308_v26  ;;  %10736 = vmatmul.f32.gmra.mxu1 %v10309_v8 }
0x35b5   :  { %v10216_v9 = vpop.f32.mrf.mxu2  ;;  %v10245_v37 = vpop.f32.mrf.mxu3 }
0x35b6   :  { %v10217_v48 = vadd.f32 %v10216_v9, %v9754_v1  ;;  %v10246_v22 = vadd.f32 %v10245_v37, %v9755_v27  ;;  %v10351_v52 = vpop.f32.mrf.mxu0  ;;  %v10380_v43 = vpop.f32.mrf.mxu1 }
0x35b7   :  { %v10352_v51 = vadd.f32 %v11698_v55, %v10351_v52 }
0x35b8   :  { %v10310_v35 = vmax.f32 %v10217_v48, 0.0  ;;  %v10311_v16 = vmax.f32 %v10246_v22, 0.0 }
0x35b9   :  { %v10381_v25 = vadd.f32 %v10380_v43, %v10352_v51 }
0x35ba   :  { %10765 = vmatmul.f32.gmra.mxu2 %v10310_v35  ;;  %10794 = vmatmul.f32.gmra.mxu3 %v10311_v16 }
0x35bd   :  { %v10409_v58 = vpop.f32.mrf.mxu2  ;;  %v10438_v29 = vpop.f32.mrf.mxu3 }
0x35be   :  { %v10410_v46 = vadd.f32 %v10409_v58, %v10381_v25  ;;  %v10354_v14 = vpop.f32.mrf.mxu0  ;;  %v10383_v4 = vpop.f32.mrf.mxu1 }
0x35bf   :  { %v10355_v57 = vadd.f32 %v11698_v55, %v10354_v14 }
0x35c0   :  { %v10439_v42 = vadd.f32 %v10438_v29, %v10410_v46 }
0x35c1   :  { %v10384_v12 = vadd.f32 %v10383_v4, %v10355_v57 }
0x35c5   :  { %v10412_v7 = vpop.f32.mrf.mxu2  ;;  %v10441_v1 = vpop.f32.mrf.mxu3 }
0x35c6   :  { %v10413_v49 = vadd.f32 %v10412_v7, %v10384_v12 }
0x35c8   :  { %v10442_v27 = vadd.f32 %v10441_v1, %v10413_v49  ;;  %v10357_v41 = vpop.f32.mrf.mxu0  ;;  %v10386_v40 = vpop.f32.mrf.mxu1 }
0x35c9   :  { %v10358_v50 = vadd.f32 %v11698_v55, %v10357_v41 }
0x35cb   :  { %v10387_v33 = vadd.f32 %v10386_v40, %v10358_v50 }
0x35d0   :  { %v10360_v34 = vpop.f32.mrf.mxu0  ;;  %v10389_v17 = vpop.f32.mrf.mxu1 }
0x35d1   :  { %v10361_v62 = vadd.f32 %v11698_v55, %v10360_v34 }
0x35d3   :  { %v10390_v23 = vadd.f32 %v10389_v17, %v10361_v62 }
0x35d5   :  { %v10415_v39 = vpop.f32.mrf.mxu2  ;;  %v10444_v10 = vpop.f32.mrf.mxu3 }
0x35d6   :  { %v10416_v3 = vadd.f32 %v10415_v39, %v10387_v33 }
0x35d8   :  { %v10445_v24 = vadd.f32 %v10444_v10, %v10416_v3  ;;  %v10467_v13 = vpop.f32.mrf.mxu0  ;;  %v10496_v18 = vpop.f32.mrf.mxu1 }
0x35d9   :  { %v10468_v37 = vadd.f32 %v10467_v13, %v10439_v42 }
0x35db   :  { %v10497_v52 = vadd.f32 %v10496_v18, %v10468_v37 }
0x35dd   :  { %v10418_v36 = vpop.f32.mrf.mxu2  ;;  %v10447_v56 = vpop.f32.mrf.mxu3 }
0x35de   :  { %v10419_v44 = vadd.f32 %v10418_v36, %v10390_v23 }
0x35e0   :  { %v10448_v11 = vadd.f32 %v10447_v56, %v10419_v44  ;;  %v10470_v63 = vpop.f32.mrf.mxu0  ;;  %v10499_v20 = vpop.f32.mrf.mxu1 }
0x35e1   :  { %v10471_v16 = vadd.f32 %v10470_v63, %v10442_v27 }
0x35e3   :  { %v10500_v46 = vadd.f32 %v10499_v20, %v10471_v16 }
0x35e5   :  { %v10525_v32 = vpop.f32.mrf.mxu2  ;;  %v10554_v54 = vpop.f32.mrf.mxu3 }
0x35e6   :  { %v10526_v35 = vadd.f32 %v10525_v32, %v10497_v52 }
0x35e8   :  { %v10473_v15 = vpop.f32.mrf.mxu0  ;;  %v10502_v2 = vpop.f32.mrf.mxu1  ;;  %v10555_v58 = vadd.f32 %v10554_v54, %v10526_v35 }
0x35e9   :  { %v10474_v7 = vadd.f32 %v10473_v15, %v10445_v24 }
0x35eb   :  { %v10503_v40 = vadd.f32 %v10502_v2, %v10474_v7 }
0x35ed   :  { %v10528_v19 = vpop.f32.mrf.mxu2  ;;  %v10557_v30 = vpop.f32.mrf.mxu3 }
0x35ee   :  { %v10529_v12 = vadd.f32 %v10528_v19, %v10500_v46 }
0x35f0   :  { %v10476_v28 = vpop.f32.mrf.mxu0  ;;  %v10505_v31 = vpop.f32.mrf.mxu1  ;;  %v10558_v41 = vadd.f32 %v10557_v30, %v10529_v12 }
0x35f1   :  { %v10477_v23 = vadd.f32 %v10476_v28, %v10448_v11 }
0x35f3   :  { %v10506_v36 = vadd.f32 %v10505_v31, %v10477_v23 }
0x35f5   :  { %v10531_v53 = vpop.f32.mrf.mxu2  ;;  %v10560_v47 = vpop.f32.mrf.mxu3 }
0x35f6   :  { %v10532_v62 = vadd.f32 %v10531_v53, %v10503_v40 }
0x35f8   :  { %v10583_v0 = vpop.f32.mrf.mxu0  ;;  %v10612_v60 = vpop.f32.mrf.mxu1  ;;  %v10561_v13 = vadd.f32 %v10560_v47, %v10532_v62 }
0x35f9   :  { %v10584_v14 = vadd.f32 %v10583_v0, %v10555_v58 }
0x35fb   :  { %v10613_v49 = vadd.f32 %v10612_v60, %v10584_v14 }
0x35fd   :  { %v10534_v5 = vpop.f32.mrf.mxu2  ;;  %v10563_v59 = vpop.f32.mrf.mxu3 }
0x35fe   :  { %v10535_v20 = vadd.f32 %v10534_v5, %v10506_v36 }
0x3600   :  { %v10586_v26 = vpop.f32.mrf.mxu0  ;;  %v10615_v8 = vpop.f32.mrf.mxu1  ;;  %v10564_v53 = vadd.f32 %v10563_v59, %v10535_v20 }
0x3601   :  { %v10587_v50 = vadd.f32 %v10586_v26, %v10558_v41 }
0x3603   :  { %v10616_v39 = vadd.f32 %v10615_v8, %v10587_v50 }
0x3605   :  { %v10641_v55 = vpop.f32.mrf.mxu2  ;;  %v10670_v9 = vpop.f32.mrf.mxu3 }
0x3606   :  { %v10642_v42 = vadd.f32 %v10641_v55, %v10613_v49 }
0x3608   :  { %v10589_v48 = vpop.f32.mrf.mxu0  ;;  %v10618_v22 = vpop.f32.mrf.mxu1  ;;  %v10671_v27 = vadd.f32 %v10670_v9, %v10642_v42 }
0x3609   :  { %v10590_v56 = vadd.f32 %v10589_v48, %v10561_v13 }
0x360b   :  { %v10619_v2 = vadd.f32 %v10618_v22, %v10590_v56 }
0x360d   :  { %v10644_v43 = vpop.f32.mrf.mxu2  ;;  %v10673_v51 = vpop.f32.mrf.mxu3 }
0x360e   :  { %v10645_v18 = vadd.f32 %v10644_v43, %v10616_v39 }
0x3610   :  { %v10592_v25 = vpop.f32.mrf.mxu0  ;;  %v10621_v29 = vpop.f32.mrf.mxu1  ;;  %v10674_v32 = vadd.f32 %v10673_v51, %v10645_v18 }
0x3611   :  { %v10593_v60 = vadd.f32 %v10592_v25, %v10564_v53 }
0x3613   :  { %v10622_v9 = vadd.f32 %v10621_v29, %v10593_v60 }
0x3615   :  { %v10647_v57 = vpop.f32.mrf.mxu2  ;;  %v10676_v4 = vpop.f32.mrf.mxu3 }
0x3616   :  { %v10648_v0 = vadd.f32 %v10647_v57, %v10619_v2 }
0x3618   :  { %v10699_v1 = vpop.f32.mrf.mxu0  ;;  %v10728_v33 = vpop.f32.mrf.mxu1  ;;  %v10677_v55 = vadd.f32 %v10676_v4, %v10648_v0 }
0x3619   :  { %v10700_v10 = vadd.f32 %v10699_v1, %v10671_v27 }
0x361b   :  { %v10729_v24 = vadd.f32 %v10728_v33, %v10700_v10 }
0x361d   :  { %v10650_v34 = vpop.f32.mrf.mxu2  ;;  %v10679_v17 = vpop.f32.mrf.mxu3 }
0x361e   :  { %v10651_v52 = vadd.f32 %v10650_v34, %v10622_v9 }
0x3620   :  { %v10702_v3 = vpop.f32.mrf.mxu0  ;;  %v10731_v15 = vpop.f32.mrf.mxu1  ;;  %v10680_v25 = vadd.f32 %v10679_v17, %v10651_v52 }
0x3621   :  { %v10703_v19 = vadd.f32 %v10702_v3, %v10674_v32 }
0x3623   :  { %v10732_v47 = vadd.f32 %v10731_v15, %v10703_v19 }
0x3625   :  { %v10757_v44 = vpop.f32.mrf.mxu2  ;;  %v10786_v63 = vpop.f32.mrf.mxu3 }
0x3626   :  { %v10758_v54 = vadd.f32 %v10757_v44, %v10729_v24 }
0x3628   :  { %v10787_v30 = vadd.f32 %v10786_v63, %v10758_v54  ;;  %v10705_v28 = vpop.f32.mrf.mxu0  ;;  %v10734_v22 = vpop.f32.mrf.mxu1 }
0x3629   :  { %v10706_v37 = vadd.f32 %v10705_v28, %v10677_v55 }
0x362a   :  { %v10798_v11 = vadd.f32 %v10787_v30, %v15293_v6 }
0x362b   :  { %v10735_v43 = vadd.f32 %v10734_v22, %v10706_v37 }
0x362c   :  { %v10806_v31 = vsel %vm390_vm7, %v10798_v11, 0.0 }
0x362d   :  { %v10760_v26 = vpop.f32.mrf.mxu2  ;;  %v10789_v8 = vpop.f32.mrf.mxu3  ;;  %10807 = vadd.xlane.f32.xlu1 %v10806_v31 }
0x362e   :  { %v10761_v5 = vadd.f32 %v10760_v26, %v10732_v47 }
0x3630   :  { %v10790_v48 = vadd.f32 %v10789_v8, %v10761_v5  ;;  %v10708_v51 = vpop.f32.mrf.mxu0  ;;  %v10737_v29 = vpop.f32.mrf.mxu1  ;;  %v11699_v5 = vld [vmem:[#allocation8 + $0x5] ss:$0 sm:$0xff] }
0x3631   :  { %v10709_v46 = vadd.f32 %v10708_v51, %v10680_v25 }
0x3632   :  { %v10799_v59 = vadd.f32 %v10790_v48, %v15305_v38  ;;  %v11700_v48 = vld [vmem:[#allocation10 + $0x5] ss:$0 sm:$0xff] }
0x3633   :  { %v10738_v4 = vadd.f32 %v10737_v29, %v10709_v46 }
0x3634   :  { %v10809_v6 = vsel %vm390_vm7, %v10799_v59, 0.0 }
0x3635   :  { %v10763_v35 = vpop.f32.mrf.mxu2  ;;  %v10792_v16 = vpop.f32.mrf.mxu3  ;;  %10810 = vadd.xlane.f32.xlu2 %v10809_v6 }
0x3636   :  { %v10764_v58 = vadd.f32 %v10763_v35, %v10735_v43 }
0x3638   :  { %v10793_v14 = vadd.f32 %v10792_v16, %v10764_v58 }
0x363a   :  { %v10800_v57 = vadd.f32 %v10793_v14, %v15344_v61 }
0x363c   :  { %v10812_v12 = vsel %vm390_vm7, %v10800_v57, 0.0 }
0x363d   :  { %v10766_v7 = vpop.f32.mrf.mxu2  ;;  %10813 = vadd.xlane.f32.xlu0 %v10812_v12  ;;  %v10795_v49 = vpop.f32.mrf.mxu3 }
0x363e   :  { %v10767_v38 = vadd.f32 %v10766_v7, %v10738_v4 }
0x3640   :  { %v10796_v1 = vadd.f32 %v10795_v49, %v10767_v38 }
0x3642   :  { %v10801_v41 = vadd.f32 %v10796_v1, %v15357_v21 }
0x3644   :  { %v10815_v42 = vsel %vm390_vm7, %v10801_v41, 0.0 }
0x3645   :  { %10816 = vadd.xlane.f32.xlu1 %v10815_v42 }
0x36a0   :  { %v10808_v40 = vpop.xlane.xlu1 %10807 }
0x36a1   :  { %v10818_v50 = vmul.f32 %v10808_v40, %v12588_v45 }
0x36a3   :  { %v10822_v33 = vsub.f32 %v10798_v11, %v10818_v50 }
0x36a5   :  { %v10826_v34 = vmul.f32 %v10822_v33, %v10822_v33 }
0x36a7   :  { %v10830_v61 = vsel %vm390_vm7, %v10826_v34, 0.0 }
0x36a8   :  { %v10811_v17 = vpop.xlane.xlu2 %10810  ;;  %10831 = vadd.xlane.f32.xlu2 %v10830_v61 }
0x36a9   :  { %v10819_v62 = vmul.f32 %v10811_v17, %v12588_v45 }
0x36ab   :  { %v10823_v27 = vsub.f32 %v10799_v59, %v10819_v62 }
0x36ad   :  { %v10827_v23 = vmul.f32 %v10823_v27, %v10823_v27 }
0x36af   :  { %v10833_v39 = vsel %vm390_vm7, %v10827_v23, 0.0 }
0x36b0   :  { %10834 = vadd.xlane.f32.xlu0 %v10833_v39  ;;  %v10814_v21 = vpop.xlane.xlu0 %10813 }
0x36b1   :  { %v10820_v10 = vmul.f32 %v10814_v21, %v12588_v45 }
0x36b3   :  { %v15601_v3 = vsub.f32 %v10800_v57, %v10820_v10 }
0x36b5   :  { %v10828_v13 = vmul.f32 %v15601_v3, %v15601_v3 }
0x36b7   :  { %v10836_v18 = vsel %vm390_vm7, %v10828_v13, 0.0 }
0x36b8   :  { %v10817_v36 = vpop.xlane.xlu1 %10816  ;;  %10837 = vadd.xlane.f32.xlu1 %v10836_v18 }
0x36b9   :  { %v10821_v56 = vmul.f32 %v10817_v36, %v12588_v45 }
0x36bb   :  { %v15607_v24 = vsub.f32 %v10801_v41, %v10821_v56 }
0x36bd   :  { %v10829_v44 = vmul.f32 %v15607_v24, %v15607_v24 }
0x36bf   :  { %v10839_v63 = vsel %vm390_vm7, %v10829_v44, 0.0 }
0x36c0   :  { %10840 = vadd.xlane.f32.xlu2 %v10839_v63 }
0x371b   :  { %v10832_v20 = vpop.xlane.xlu2 %10831 }
0x371c   :  { %v10842_v32 = vmul.f32 %v10832_v20, %v12588_v45 }
0x371e   :  { %v10846_v54 = vadd.f32 1e-05, %v10842_v32 }
0x3720   :  { %11887 = vrsqrt.f32 %v10846_v54  ;;  %vm10856_vm8 = vweird.f32 %v10846_v54 }
0x3723   :  { %v10835_v15 = vpop.xlane.xlu0 %10834 }
0x3724   :  { %v10843_v2 = vmul.f32 %v10835_v15, %v12588_v45 }
0x3726   :  { %v11888_v19 = vpop.eup %11887  ;;  %v10847_v30 = vadd.f32 1e-05, %v10843_v2 }
0x3727   :  { %v10851_v53 = vmul.f32 %v11888_v19, %v10846_v54  ;;  %vm10857_vm6 = vweird.f32 %v11888_v19 }
0x3728   :  { %11889 = vrsqrt.f32 %v10847_v30  ;;  %vm10858_vm9 = vmor %vm10856_vm8, %vm10857_vm6  ;;  %vm10866_vm10 = vweird.f32 %v10847_v30 }
0x3729   :  { %v10852_v0 = vmul.f32 %v11888_v19, %v10851_v53 }
0x372b   :  { %v10853_v11 = vmul.f32 0.5, %v10852_v0  ;;  %v10838_v28 = vpop.xlane.xlu1 %10837 }
0x372c   :  { %v10844_v60 = vmul.f32 %v10838_v28, %v12588_v45 }
0x372d   :  { %v10854_v47 = vsub.f32 1.5, %v10853_v11 }
0x372e   :  { %v11890_v31 = vpop.eup %11889  ;;  %v10848_v26 = vadd.f32 1e-05, %v10844_v60 }
0x372f   :  { %v10855_v8 = vmul.f32 %v11888_v19, %v10854_v47  ;;  %v10861_v55 = vmul.f32 %v11890_v31, %v10847_v30  ;;  %vm10867_vm0 = vweird.f32 %v11890_v31 }
0x3730   :  { %11891 = vrsqrt.f32 %v10848_v26  ;;  %vm10868_vm11 = vmor %vm10866_vm10, %vm10867_vm0  ;;  %vm10876_vm13 = vweird.f32 %v10848_v26 }
0x3731   :  { %v10859_v9 = vsel %vm10858_vm9, %v11888_v19, %v10855_v8  ;;  %v10862_v37 = vmul.f32 %v11890_v31, %v10861_v55 }
0x3732   :  { %v10890_v22 = vmul.f32 %v10859_v9, %v10822_v33 }
0x3733   :  { %v10863_v52 = vmul.f32 0.5, %v10862_v37  ;;  %v10841_v59 = vpop.xlane.xlu2 %10840 }
0x3734   :  { %v10897_v43 = vmul.f32 %v11699_v5, %v10890_v22  ;;  %v10845_v51 = vmul.f32 %v10841_v59, %v12588_v45 }
0x3735   :  { %v10864_v6 = vsub.f32 1.5, %v10863_v52 }
0x3736   :  { %v11892_v35 = vpop.eup %11891  ;;  %v10904_v16 = vadd.f32 %v11700_v48, %v10897_v43  ;;  %v10849_v25 = vadd.f32 1e-05, %v10845_v51 }
0x3737   :  { %v10865_v58 = vmul.f32 %v11890_v31, %v10864_v6  ;;  %v10871_v46 = vmul.f32 %v11892_v35, %v10848_v26  ;;  %vm10877_vm12 = vweird.f32 %v11892_v35 }
0x3738   :  { %v10908_v14 = vmax.f32 %v10904_v16, 0.0  ;;  %11893 = vrsqrt.f32 %v10849_v25  ;;  %vm10878_vm14 = vmor %vm10876_vm13, %vm10877_vm12  ;;  %vm10886_vm1 = vweird.f32 %v10849_v25 }
0x3739   :  { %v10869_v57 = vsel %vm10868_vm11, %v11890_v31, %v10865_v58  ;;  %v10872_v29 = vmul.f32 %v11892_v35, %v10871_v46 }
0x373a   :  { %10912 = vst.msk [vmem:[#allocation11] sm:$0xff] %vm390_vm7, %v10908_v14  ;;  %v10891_v4 = vmul.f32 %v10869_v57, %v10823_v27 }
0x373b   :  { %v10873_v12 = vmul.f32 0.5, %v10872_v29 }
0x373c   :  { %v10898_v7 = vmul.f32 %v11699_v5, %v10891_v4 }
0x373d   :  { %v10874_v38 = vsub.f32 1.5, %v10873_v12 }
0x373e   :  { %v11894_v45 = vpop.eup %11893  ;;  %v10905_v49 = vadd.f32 %v11700_v48, %v10898_v7 }
0x373f   :  { %v10875_v1 = vmul.f32 %v11892_v35, %v10874_v38  ;;  %v10881_v41 = vmul.f32 %v11894_v45, %v10849_v25  ;;  %vm10887_vm15 = vweird.f32 %v11894_v45 }
0x3740   :  { %v10909_v42 = vmax.f32 %v10905_v49, 0.0  ;;  %vm10888_vm2 = vmor %vm10886_vm1, %vm10887_vm15 }
0x3741   :  { %v10879_v40 = vsel %vm10878_vm14, %v11892_v35, %v10875_v1  ;;  %v10882_v50 = vmul.f32 %v11894_v45, %v10881_v41 }
0x3742   :  { %10913 = vst.msk [vmem:[#allocation11 + $0x8] sm:$0xff] %vm390_vm7, %v10909_v42  ;;  %v10892_v33 = vmul.f32 %v10879_v40, %v15601_v3 }
0x3743   :  { %v10883_v34 = vmul.f32 0.5, %v10882_v50 }
0x3744   :  { %v10899_v61 = vmul.f32 %v11699_v5, %v10892_v33 }
0x3745   :  { %v10884_v17 = vsub.f32 1.5, %v10883_v34 }
0x3746   :  { %v10906_v62 = vadd.f32 %v11700_v48, %v10899_v61 }
0x3747   :  { %v10885_v27 = vmul.f32 %v11894_v45, %v10884_v17 }
0x3748   :  { %v10910_v23 = vmax.f32 %v10906_v62, 0.0 }
0x3749   :  { %v10889_v39 = vsel %vm10888_vm2, %v11894_v45, %v10885_v27 }
0x374a   :  { %10914 = vst.msk [vmem:[#allocation11 + $0x10] sm:$0xff] %vm390_vm7, %v10910_v23  ;;  %v10893_v21 = vmul.f32 %v10889_v39, %v15607_v24 }
0x374c   :  { %v10900_v10 = vmul.f32 %v11699_v5, %v10893_v21 }
0x374e   :  { %v10907_v3 = vadd.f32 %v11700_v48, %v10900_v10 }
0x3750   :  { %v10911_v13 = vmax.f32 %v10907_v3, 0.0 }
0x3752   :  { %10915 = vst.msk [vmem:[#allocation11 + $0x18] sm:$0xff] %vm390_vm7, %v10911_v13 }
0x3753   :  { %10928 = dma.vmem_to_hbm [thread:$0]  %s10921_s12, 512, %s10923_s4, [#allocation4], %s12062_s5, %s12062_s5, %s12063_s24  }
0x3754   :  { %12059 = dma.done.wait [#allocation4], 512  }
0x3755   :  { %12060 = vsyncadd [#allocation4], 4294966784 }
0x3756   :  { %10933 = vsyncpa [#allocation3], 1 }
0x3757   :  { %10934 = vsyncpa [#allocation6], 1 }
0x3758   :  { %10935 = vsyncpa [#allocation9], 1 }
0x3759   :  { %10936 = vsyncpa [#allocation4], 1 }

</bundles_post_ra>
